<compile_context>
chip_gen: v5e
topology: v5e:2x2
jax: 0.10.0
libtpu: 0.0.40
codegen_flags: <defaults>
</compile_context>

<pallas_src>
import numpy as np
import jax
import jax.numpy as jnp
from jax.experimental import pallas as pl
from jax.experimental.pallas import tpu as pltpu


# ------------------------------ parameters ---------------------------------

def init_generator_params(key, input_dim=10, im_chan=1, hidden_dim=32):
    specs = [
        # (cin,            cout,           k, stride, final)
        (input_dim,        hidden_dim * 4, 3, 2, False),
        (hidden_dim * 4,   hidden_dim * 2, 4, 1, False),
        (hidden_dim * 2,   hidden_dim,     3, 2, False),
        (hidden_dim,       im_chan,        4, 2, True),
    ]
    params = []
    for i, (cin, cout, k, s, final) in enumerate(specs):
        kw_, kb = jax.random.split(jax.random.fold_in(key, i))
        layer = {
            "w": 0.05 * jax.random.normal(kw_, (cin, cout, k, k), jnp.float32),
            "b": 0.05 * jax.random.normal(kb, (cout,), jnp.float32),
            "stride": s,
            "final": final,
        }
        if not final:
            layer["gamma"] = jnp.ones((cout,), jnp.float32)   # BN default init
            layer["beta"] = jnp.zeros((cout,), jnp.float32)
        params.append(layer)
    return params


# ----------------- host-side weight -> placement-matrix prep ----------------

def prepare_generator(params, batch, input_dim):
    """Turn PyTorch-layout ConvTranspose2d weights into matmul-ready placement
    matrices for the fused kernel.  Pure numpy, done once per weight set."""
    N = batch
    operands = []
    plan = []
    Hin = Win = 1
    cin = input_dim
    for layer in params:
        w = np.asarray(layer["w"], np.float32)          # (Cin, Cout, k, k)
        cin_, cout, k, _ = w.shape
        assert cin_ == cin
        s = layer["stride"]
        Hout = (Hin - 1) * s + k
        Wout = (Win - 1) * s + k

        # M_kh : channel contraction + width placement for kernel row kh.
        # rows = (iw, ci), cols = (ow, co)
        for kh in range(k):
            M = np.zeros((Win * cin, Wout * cout), np.float32)
            for iw in range(Win):
                for kw in range(k):
                    ow = iw * s + kw
                    M[iw * cin:(iw + 1) * cin,
                      ow * cout:(ow + 1) * cout] = w[:, :, kh, kw]
            operands.append(M)

        # L_kh : strided height placement (0/1).  rows = (n, oh), cols = (n, ih)
        for kh in range(k):
            L = np.zeros((N * Hout, N * Hin), np.float32)
            for n in range(N):
                for ih in range(Hin):
                    L[n * Hout + ih * s + kh, n * Hin + ih] = 1.0
            operands.append(L)

        entry = {"k": k, "final": layer["final"]}
        if layer["final"]:
            # bias broadcast over the (ow, co) lane layout
            bias_row = np.tile(np.asarray(layer["b"], np.float32), Wout)[None, :]
            operands.append(bias_row)
        else:
            # T pools the Wout width-groups of the lane axis per channel,
            # pre-scaled by 1/(N*Hout*Wout) so the kernel gets means directly.
            # T^T broadcasts per-channel values back onto the lane layout.
            count = float(N * Hout * Wout)
            eye = np.eye(cout, dtype=np.float32)
            T = np.tile(eye, (Wout, 1)) / count              # (Wout*cout, cout)
            Tt = np.ascontiguousarray(np.tile(eye, (Wout, 1)).T)   # (cout, Wout*cout)
            operands += [T, Tt,
                         np.asarray(layer["gamma"], np.float32)[None, :],
                         np.asarray(layer["beta"], np.float32)[None, :]]
        plan.append(entry)
        Hin, Win, cin = Hout, Wout, cout

    operands = [jnp.asarray(o) for o in operands]
    return plan, operands, (N * Hin, Win * cin)


# ------------------------------ fused kernel --------------------------------

def _make_fused_kernel(plan):
    def kernel(*refs):
        noise_ref = refs[0]
        out_ref = refs[-1]
        args = refs[1:-1]

        x = noise_ref[...]                        # (N, input_dim) == layer-1 A2
        idx = 0
        for entry in plan:
            k = entry["k"]
            Ms = args[idx:idx + k]; idx += k
            Ls = args[idx:idx + k]; idx += k

            # ConvTranspose2d: sum_kh  L_kh @ (A2 @ M_kh)   (all MXU matmuls)
            y = None
            for kh in range(k):
                r = jnp.dot(x, Ms[kh][...], preferred_element_type=jnp.float32)
                t = jnp.dot(Ls[kh][...], r, preferred_element_type=jnp.float32)
                y = t if y is None else y + t

            if entry["final"]:
                bias_row = args[idx][...]; idx += 1
                x = jnp.tanh(y + bias_row)
            else:
                # ConvT bias omitted: exactly cancelled by BN mean subtraction.
                T = args[idx][...]          # (WoutCout, cout), pre-scaled by 1/count
                Tt = args[idx + 1][...]     # (cout, WoutCout) 0/1 broadcast
                gamma = args[idx + 2][...]  # (1, cout)
                beta = args[idx + 3][...]   # (1, cout)
                idx += 4

                # Single-pass batch stats (biased var), pooled per channel.
                row_sum = jnp.sum(y, axis=0, keepdims=True)          # (1, WoutCout)
                row_sumsq = jnp.sum(y * y, axis=0, keepdims=True)    # (1, WoutCout)
                mean_ch = jnp.dot(row_sum, T,
                                  preferred_element_type=jnp.float32)    # (1, cout)
                msq_ch = jnp.dot(row_sumsq, T,
                                 preferred_element_type=jnp.float32)     # (1, cout)
                var_ch = msq_ch - mean_ch * mean_ch
                scale_ch = gamma * jax.lax.rsqrt(var_ch + 1e-5)
                shift_ch = beta - mean_ch * scale_ch
                scale_cols = jnp.dot(scale_ch, Tt,
                                     preferred_element_type=jnp.float32)
                shift_cols = jnp.dot(shift_ch, Tt,
                                     preferred_element_type=jnp.float32)
                x = jnp.maximum(y * scale_cols + shift_cols, 0.0)

        out_ref[...] = x
    return kernel


def generator_forward(noise, plan, operands, out_rows_cols, im_chan=1):
    """noise: (N, input_dim) -> images (N, im_chan, 28, 28) NCHW."""
    N = noise.shape[0]
    rows, cols = out_rows_cols
    inputs = (noise.astype(jnp.float32),) + tuple(operands)
    out2d = pl.pallas_call(
        _make_fused_kernel(plan),
        out_shape=jax.ShapeDtypeStruct((rows, cols), jnp.float32),
        in_specs=[pl.BlockSpec(memory_space=pltpu.MemorySpace.VMEM)]
                 * len(inputs),
        out_specs=pl.BlockSpec(memory_space=pltpu.MemorySpace.VMEM),
        compiler_params=pltpu.CompilerParams(
            vmem_limit_bytes=32 * 1024 * 1024),
    )(*inputs)
    H = rows // N
    W = cols // im_chan
    if im_chan == 1:
        # rows = (n, oh), cols = (ow): already NCHW order -> pure reshape.
        return out2d.reshape(N, 1, H, W)
    return jnp.transpose(out2d.reshape(N, H, W, im_chan), (0, 3, 1, 2))


# ------------------- plain-JAX reference (for validation) -------------------

def reference_forward(noise, params, input_dim):
    N = noise.shape[0]
    x = noise.reshape(N, 1, 1, input_dim).astype(jnp.float32)     # NHWC
    for p in params:
        w, b, s = p["w"], p["b"], p["stride"]
        cin, cout, k, _ = w.shape
        n, H, W, _ = x.shape
        Hout, Wout = (H - 1) * s + k, (W - 1) * s + k
        y = jnp.einsum("nhwi,iokl->nhwokl", x, w)
        out = jnp.zeros((n, Hout, Wout, cout), jnp.float32)
        for kh in range(k):
            for kw in range(k):
                out = out.at[:,
                             kh:kh + s * (H - 1) + 1:s,
                             kw:kw + s * (W - 1) + 1:s,
                             :].add(y[:, :, :, :, kh, kw])
        out = out + b.reshape(1, 1, 1, cout)
        if p["final"]:
            x = jnp.tanh(out)
        else:
            mean = out.mean(axis=(0, 1, 2), keepdims=True)
            var = ((out - mean) ** 2).mean(axis=(0, 1, 2), keepdims=True)
            xn = (out - mean) * jax.lax.rsqrt(var + 1e-5)
            x = jnp.maximum(xn * p["gamma"].reshape(1, 1, 1, -1)
                            + p["beta"].reshape(1, 1, 1, -1), 0.0)
    return jnp.transpose(x, (0, 3, 1, 2))                         # NCHW


# --------------------------------- main --------------------------------------

if __name__ == "__main__":
    batch, input_dim, im_chan, hidden_dim = 2, 10, 1, 32

    key = jax.random.PRNGKey(0)
    k_noise, k_params = jax.random.split(key)
    noise = jax.random.normal(k_noise, (batch, input_dim), jnp.float32)
    params = init_generator_params(k_params, input_dim, im_chan, hidden_dim)

    plan, operands, out_rc = prepare_generator(params, batch, input_dim)
    out = generator_forward(noise, plan, operands, out_rc, im_chan)
    out = jax.block_until_ready(out)

    assert out.shape == (batch, im_chan, 28, 28), out.shape
    assert bool(jnp.all(jnp.isfinite(out)))
    assert bool(jnp.all(jnp.abs(out) <= 1.0))      # tanh output range

    # cross-check fused Pallas kernel against a plain-JAX reference
    ref = jax.block_until_ready(reference_forward(noise, params, input_dim))
    max_err = float(jnp.max(jnp.abs(out - ref)))
    assert max_err < 3e-3, max_err

    print("KERNEL_OK")
</pallas_src>

<mosaic_0001>
module attributes {stable_mosaic.version = 11 : i64} {
  func.func @kernel(%arg0: memref<2x10xf32, #tpu.memory_space<vmem>>, %arg1: memref<10x384xf32, #tpu.memory_space<vmem>>, %arg2: memref<10x384xf32, #tpu.memory_space<vmem>>, %arg3: memref<10x384xf32, #tpu.memory_space<vmem>>, %arg4: memref<6x2xf32, #tpu.memory_space<vmem>>, %arg5: memref<6x2xf32, #tpu.memory_space<vmem>>, %arg6: memref<6x2xf32, #tpu.memory_space<vmem>>, %arg7: memref<384x128xf32, #tpu.memory_space<vmem>>, %arg8: memref<128x384xf32, #tpu.memory_space<vmem>>, %arg9: memref<1x128xf32, #tpu.memory_space<vmem>>, %arg10: memref<1x128xf32, #tpu.memory_space<vmem>>, %arg11: memref<384x384xf32, #tpu.memory_space<vmem>>, %arg12: memref<384x384xf32, #tpu.memory_space<vmem>>, %arg13: memref<384x384xf32, #tpu.memory_space<vmem>>, %arg14: memref<384x384xf32, #tpu.memory_space<vmem>>, %arg15: memref<12x6xf32, #tpu.memory_space<vmem>>, %arg16: memref<12x6xf32, #tpu.memory_space<vmem>>, %arg17: memref<12x6xf32, #tpu.memory_space<vmem>>, %arg18: memref<12x6xf32, #tpu.memory_space<vmem>>, %arg19: memref<384x64xf32, #tpu.memory_space<vmem>>, %arg20: memref<64x384xf32, #tpu.memory_space<vmem>>, %arg21: memref<1x64xf32, #tpu.memory_space<vmem>>, %arg22: memref<1x64xf32, #tpu.memory_space<vmem>>, %arg23: memref<384x416xf32, #tpu.memory_space<vmem>>, %arg24: memref<384x416xf32, #tpu.memory_space<vmem>>, %arg25: memref<384x416xf32, #tpu.memory_space<vmem>>, %arg26: memref<26x12xf32, #tpu.memory_space<vmem>>, %arg27: memref<26x12xf32, #tpu.memory_space<vmem>>, %arg28: memref<26x12xf32, #tpu.memory_space<vmem>>, %arg29: memref<416x32xf32, #tpu.memory_space<vmem>>, %arg30: memref<32x416xf32, #tpu.memory_space<vmem>>, %arg31: memref<1x32xf32, #tpu.memory_space<vmem>>, %arg32: memref<1x32xf32, #tpu.memory_space<vmem>>, %arg33: memref<416x28xf32, #tpu.memory_space<vmem>>, %arg34: memref<416x28xf32, #tpu.memory_space<vmem>>, %arg35: memref<416x28xf32, #tpu.memory_space<vmem>>, %arg36: memref<416x28xf32, #tpu.memory_space<vmem>>, %arg37: memref<56x26xf32, #tpu.memory_space<vmem>>, %arg38: memref<56x26xf32, #tpu.memory_space<vmem>>, %arg39: memref<56x26xf32, #tpu.memory_space<vmem>>, %arg40: memref<56x26xf32, #tpu.memory_space<vmem>>, %arg41: memref<1x28xf32, #tpu.memory_space<vmem>>, %arg42: memref<56x28xf32, #tpu.memory_space<vmem>>) attributes {dimension_semantics = [], scalar_prefetch = 0 : i64, scratch_operands = 0 : i64, tpu.core_type = #tpu.core_type<tc>} {
    %c0 = arith.constant 0 : index
    %c0_0 = arith.constant 0 : index
    %0 = vector.load %arg0[%c0, %c0_0] : memref<2x10xf32, #tpu.memory_space<vmem>>, vector<2x10xf32>
    %c0_1 = arith.constant 0 : index
    %c0_2 = arith.constant 0 : index
    %1 = vector.load %arg1[%c0_1, %c0_2] : memref<10x384xf32, #tpu.memory_space<vmem>>, vector<10x384xf32>
    %cst = arith.constant dense<0.000000e+00> : vector<2x384xf32>
    %2 = tpu.matmul %0, %1, %cst {dimension_numbers = #tpu.dot_dimension_numbers<[1], [0], [0], [1], [0, 0, 1, 1], [], []>} : vector<2x10xf32>, vector<10x384xf32>, vector<2x384xf32> -> vector<2x384xf32>
    %c0_3 = arith.constant 0 : index
    %c0_4 = arith.constant 0 : index
    %3 = vector.load %arg4[%c0_3, %c0_4] : memref<6x2xf32, #tpu.memory_space<vmem>>, vector<6x2xf32>
    %cst_5 = arith.constant dense<0.000000e+00> : vector<6x384xf32>
    %4 = tpu.matmul %3, %2, %cst_5 {dimension_numbers = #tpu.dot_dimension_numbers<[1], [0], [0], [1], [0, 0, 1, 1], [], []>} : vector<6x2xf32>, vector<2x384xf32>, vector<6x384xf32> -> vector<6x384xf32>
    %c0_6 = arith.constant 0 : index
    %c0_7 = arith.constant 0 : index
    %5 = vector.load %arg2[%c0_6, %c0_7] : memref<10x384xf32, #tpu.memory_space<vmem>>, vector<10x384xf32>
    %cst_8 = arith.constant dense<0.000000e+00> : vector<2x384xf32>
    %6 = tpu.matmul %0, %5, %cst_8 {dimension_numbers = #tpu.dot_dimension_numbers<[1], [0], [0], [1], [0, 0, 1, 1], [], []>} : vector<2x10xf32>, vector<10x384xf32>, vector<2x384xf32> -> vector<2x384xf32>
    %c0_9 = arith.constant 0 : index
    %c0_10 = arith.constant 0 : index
    %7 = vector.load %arg5[%c0_9, %c0_10] : memref<6x2xf32, #tpu.memory_space<vmem>>, vector<6x2xf32>
    %cst_11 = arith.constant dense<0.000000e+00> : vector<6x384xf32>
    %8 = tpu.matmul %7, %6, %cst_11 {dimension_numbers = #tpu.dot_dimension_numbers<[1], [0], [0], [1], [0, 0, 1, 1], [], []>} : vector<6x2xf32>, vector<2x384xf32>, vector<6x384xf32> -> vector<6x384xf32>
    %9 = arith.addf %4, %8 : vector<6x384xf32>
    %c0_12 = arith.constant 0 : index
    %c0_13 = arith.constant 0 : index
    %10 = vector.load %arg3[%c0_12, %c0_13] : memref<10x384xf32, #tpu.memory_space<vmem>>, vector<10x384xf32>
    %cst_14 = arith.constant dense<0.000000e+00> : vector<2x384xf32>
    %11 = tpu.matmul %0, %10, %cst_14 {dimension_numbers = #tpu.dot_dimension_numbers<[1], [0], [0], [1], [0, 0, 1, 1], [], []>} : vector<2x10xf32>, vector<10x384xf32>, vector<2x384xf32> -> vector<2x384xf32>
    %c0_15 = arith.constant 0 : index
    %c0_16 = arith.constant 0 : index
    %12 = vector.load %arg6[%c0_15, %c0_16] : memref<6x2xf32, #tpu.memory_space<vmem>>, vector<6x2xf32>
    %cst_17 = arith.constant dense<0.000000e+00> : vector<6x384xf32>
    %13 = tpu.matmul %12, %11, %cst_17 {dimension_numbers = #tpu.dot_dimension_numbers<[1], [0], [0], [1], [0, 0, 1, 1], [], []>} : vector<6x2xf32>, vector<2x384xf32>, vector<6x384xf32> -> vector<6x384xf32>
    %14 = arith.addf %9, %13 : vector<6x384xf32>
    %c0_18 = arith.constant 0 : index
    %c0_19 = arith.constant 0 : index
    %15 = vector.load %arg7[%c0_18, %c0_19] : memref<384x128xf32, #tpu.memory_space<vmem>>, vector<384x128xf32>
    %c0_20 = arith.constant 0 : index
    %c0_21 = arith.constant 0 : index
    %16 = vector.load %arg8[%c0_20, %c0_21] : memref<128x384xf32, #tpu.memory_space<vmem>>, vector<128x384xf32>
    %c0_22 = arith.constant 0 : index
    %c0_23 = arith.constant 0 : index
    %17 = vector.load %arg9[%c0_22, %c0_23] : memref<1x128xf32, #tpu.memory_space<vmem>>, vector<1x128xf32>
    %c0_24 = arith.constant 0 : index
    %c0_25 = arith.constant 0 : index
    %18 = vector.load %arg10[%c0_24, %c0_25] : memref<1x128xf32, #tpu.memory_space<vmem>>, vector<1x128xf32>
    %cst_26 = arith.constant dense<0.000000e+00> : vector<384xf32>
    %19 = vector.multi_reduction <add>, %14, %cst_26 [0] : vector<6x384xf32> to vector<384xf32>
    %20 = vector.shape_cast %19 : vector<384xf32> to vector<1x384xf32>
    %21 = arith.mulf %14, %14 : vector<6x384xf32>
    %cst_27 = arith.constant dense<0.000000e+00> : vector<384xf32>
    %22 = vector.multi_reduction <add>, %21, %cst_27 [0] : vector<6x384xf32> to vector<384xf32>
    %23 = vector.shape_cast %22 : vector<384xf32> to vector<1x384xf32>
    %cst_28 = arith.constant dense<0.000000e+00> : vector<1x128xf32>
    %24 = tpu.matmul %20, %15, %cst_28 {dimension_numbers = #tpu.dot_dimension_numbers<[1], [0], [0], [1], [0, 0, 1, 1], [], []>} : vector<1x384xf32>, vector<384x128xf32>, vector<1x128xf32> -> vector<1x128xf32>
    %cst_29 = arith.constant dense<0.000000e+00> : vector<1x128xf32>
    %25 = tpu.matmul %23, %15, %cst_29 {dimension_numbers = #tpu.dot_dimension_numbers<[1], [0], [0], [1], [0, 0, 1, 1], [], []>} : vector<1x384xf32>, vector<384x128xf32>, vector<1x128xf32> -> vector<1x128xf32>
    %26 = arith.mulf %24, %24 : vector<1x128xf32>
    %27 = arith.subf %25, %26 : vector<1x128xf32>
    %cst_30 = arith.constant 9.99999974E-6 : f32
    %28 = vector.broadcast %cst_30 : f32 to vector<1x128xf32>
    %29 = arith.addf %27, %28 : vector<1x128xf32>
    %30 = math.rsqrt %29 : vector<1x128xf32>
    %31 = arith.mulf %17, %30 : vector<1x128xf32>
    %32 = arith.mulf %24, %31 : vector<1x128xf32>
    %33 = arith.subf %18, %32 : vector<1x128xf32>
    %cst_31 = arith.constant dense<0.000000e+00> : vector<1x384xf32>
    %34 = tpu.matmul %31, %16, %cst_31 {dimension_numbers = #tpu.dot_dimension_numbers<[1], [0], [0], [1], [0, 0, 1, 1], [], []>} : vector<1x128xf32>, vector<128x384xf32>, vector<1x384xf32> -> vector<1x384xf32>
    %cst_32 = arith.constant dense<0.000000e+00> : vector<1x384xf32>
    %35 = tpu.matmul %33, %16, %cst_32 {dimension_numbers = #tpu.dot_dimension_numbers<[1], [0], [0], [1], [0, 0, 1, 1], [], []>} : vector<1x128xf32>, vector<128x384xf32>, vector<1x384xf32> -> vector<1x384xf32>
    %36 = vector.broadcast %34 : vector<1x384xf32> to vector<6x384xf32>
    %37 = arith.mulf %14, %36 : vector<6x384xf32>
    %38 = vector.broadcast %35 : vector<1x384xf32> to vector<6x384xf32>
    %39 = arith.addf %37, %38 : vector<6x384xf32>
    %cst_33 = arith.constant 0.000000e+00 : f32
    %40 = vector.broadcast %cst_33 : f32 to vector<6x384xf32>
    %41 = arith.maximumf %39, %40 : vector<6x384xf32>
    %c0_34 = arith.constant 0 : index
    %c0_35 = arith.constant 0 : index
    %42 = vector.load %arg11[%c0_34, %c0_35] : memref<384x384xf32, #tpu.memory_space<vmem>>, vector<384x384xf32>
    %cst_36 = arith.constant dense<0.000000e+00> : vector<6x384xf32>
    %43 = tpu.matmul %41, %42, %cst_36 {dimension_numbers = #tpu.dot_dimension_numbers<[1], [0], [0], [1], [0, 0, 1, 1], [], []>} : vector<6x384xf32>, vector<384x384xf32>, vector<6x384xf32> -> vector<6x384xf32>
    %c0_37 = arith.constant 0 : index
    %c0_38 = arith.constant 0 : index
    %44 = vector.load %arg15[%c0_37, %c0_38] : memref<12x6xf32, #tpu.memory_space<vmem>>, vector<12x6xf32>
    %cst_39 = arith.constant dense<0.000000e+00> : vector<12x384xf32>
    %45 = tpu.matmul %44, %43, %cst_39 {dimension_numbers = #tpu.dot_dimension_numbers<[1], [0], [0], [1], [0, 0, 1, 1], [], []>} : vector<12x6xf32>, vector<6x384xf32>, vector<12x384xf32> -> vector<12x384xf32>
    %c0_40 = arith.constant 0 : index
    %c0_41 = arith.constant 0 : index
    %46 = vector.load %arg12[%c0_40, %c0_41] : memref<384x384xf32, #tpu.memory_space<vmem>>, vector<384x384xf32>
    %cst_42 = arith.constant dense<0.000000e+00> : vector<6x384xf32>
    %47 = tpu.matmul %41, %46, %cst_42 {dimension_numbers = #tpu.dot_dimension_numbers<[1], [0], [0], [1], [0, 0, 1, 1], [], []>} : vector<6x384xf32>, vector<384x384xf32>, vector<6x384xf32> -> vector<6x384xf32>
    %c0_43 = arith.constant 0 : index
    %c0_44 = arith.constant 0 : index
    %48 = vector.load %arg16[%c0_43, %c0_44] : memref<12x6xf32, #tpu.memory_space<vmem>>, vector<12x6xf32>
    %cst_45 = arith.constant dense<0.000000e+00> : vector<12x384xf32>
    %49 = tpu.matmul %48, %47, %cst_45 {dimension_numbers = #tpu.dot_dimension_numbers<[1], [0], [0], [1], [0, 0, 1, 1], [], []>} : vector<12x6xf32>, vector<6x384xf32>, vector<12x384xf32> -> vector<12x384xf32>
    %50 = arith.addf %45, %49 : vector<12x384xf32>
    %c0_46 = arith.constant 0 : index
    %c0_47 = arith.constant 0 : index
    %51 = vector.load %arg13[%c0_46, %c0_47] : memref<384x384xf32, #tpu.memory_space<vmem>>, vector<384x384xf32>
    %cst_48 = arith.constant dense<0.000000e+00> : vector<6x384xf32>
    %52 = tpu.matmul %41, %51, %cst_48 {dimension_numbers = #tpu.dot_dimension_numbers<[1], [0], [0], [1], [0, 0, 1, 1], [], []>} : vector<6x384xf32>, vector<384x384xf32>, vector<6x384xf32> -> vector<6x384xf32>
    %c0_49 = arith.constant 0 : index
    %c0_50 = arith.constant 0 : index
    %53 = vector.load %arg17[%c0_49, %c0_50] : memref<12x6xf32, #tpu.memory_space<vmem>>, vector<12x6xf32>
    %cst_51 = arith.constant dense<0.000000e+00> : vector<12x384xf32>
    %54 = tpu.matmul %53, %52, %cst_51 {dimension_numbers = #tpu.dot_dimension_numbers<[1], [0], [0], [1], [0, 0, 1, 1], [], []>} : vector<12x6xf32>, vector<6x384xf32>, vector<12x384xf32> -> vector<12x384xf32>
    %55 = arith.addf %50, %54 : vector<12x384xf32>
    %c0_52 = arith.constant 0 : index
    %c0_53 = arith.constant 0 : index
    %56 = vector.load %arg14[%c0_52, %c0_53] : memref<384x384xf32, #tpu.memory_space<vmem>>, vector<384x384xf32>
    %cst_54 = arith.constant dense<0.000000e+00> : vector<6x384xf32>
    %57 = tpu.matmul %41, %56, %cst_54 {dimension_numbers = #tpu.dot_dimension_numbers<[1], [0], [0], [1], [0, 0, 1, 1], [], []>} : vector<6x384xf32>, vector<384x384xf32>, vector<6x384xf32> -> vector<6x384xf32>
    %c0_55 = arith.constant 0 : index
    %c0_56 = arith.constant 0 : index
    %58 = vector.load %arg18[%c0_55, %c0_56] : memref<12x6xf32, #tpu.memory_space<vmem>>, vector<12x6xf32>
    %cst_57 = arith.constant dense<0.000000e+00> : vector<12x384xf32>
    %59 = tpu.matmul %58, %57, %cst_57 {dimension_numbers = #tpu.dot_dimension_numbers<[1], [0], [0], [1], [0, 0, 1, 1], [], []>} : vector<12x6xf32>, vector<6x384xf32>, vector<12x384xf32> -> vector<12x384xf32>
    %60 = arith.addf %55, %59 : vector<12x384xf32>
    %c0_58 = arith.constant 0 : index
    %c0_59 = arith.constant 0 : index
    %61 = vector.load %arg19[%c0_58, %c0_59] : memref<384x64xf32, #tpu.memory_space<vmem>>, vector<384x64xf32>
    %c0_60 = arith.constant 0 : index
    %c0_61 = arith.constant 0 : index
    %62 = vector.load %arg20[%c0_60, %c0_61] : memref<64x384xf32, #tpu.memory_space<vmem>>, vector<64x384xf32>
    %c0_62 = arith.constant 0 : index
    %c0_63 = arith.constant 0 : index
    %63 = vector.load %arg21[%c0_62, %c0_63] : memref<1x64xf32, #tpu.memory_space<vmem>>, vector<1x64xf32>
    %c0_64 = arith.constant 0 : index
    %c0_65 = arith.constant 0 : index
    %64 = vector.load %arg22[%c0_64, %c0_65] : memref<1x64xf32, #tpu.memory_space<vmem>>, vector<1x64xf32>
    %cst_66 = arith.constant dense<0.000000e+00> : vector<384xf32>
    %65 = vector.multi_reduction <add>, %60, %cst_66 [0] : vector<12x384xf32> to vector<384xf32>
    %66 = vector.shape_cast %65 : vector<384xf32> to vector<1x384xf32>
    %67 = arith.mulf %60, %60 : vector<12x384xf32>
    %cst_67 = arith.constant dense<0.000000e+00> : vector<384xf32>
    %68 = vector.multi_reduction <add>, %67, %cst_67 [0] : vector<12x384xf32> to vector<384xf32>
    %69 = vector.shape_cast %68 : vector<384xf32> to vector<1x384xf32>
    %cst_68 = arith.constant dense<0.000000e+00> : vector<1x64xf32>
    %70 = tpu.matmul %66, %61, %cst_68 {dimension_numbers = #tpu.dot_dimension_numbers<[1], [0], [0], [1], [0, 0, 1, 1], [], []>} : vector<1x384xf32>, vector<384x64xf32>, vector<1x64xf32> -> vector<1x64xf32>
    %cst_69 = arith.constant dense<0.000000e+00> : vector<1x64xf32>
    %71 = tpu.matmul %69, %61, %cst_69 {dimension_numbers = #tpu.dot_dimension_numbers<[1], [0], [0], [1], [0, 0, 1, 1], [], []>} : vector<1x384xf32>, vector<384x64xf32>, vector<1x64xf32> -> vector<1x64xf32>
    %72 = arith.mulf %70, %70 : vector<1x64xf32>
    %73 = arith.subf %71, %72 : vector<1x64xf32>
    %cst_70 = arith.constant 9.99999974E-6 : f32
    %74 = vector.broadcast %cst_70 : f32 to vector<1x64xf32>
    %75 = arith.addf %73, %74 : vector<1x64xf32>
    %76 = math.rsqrt %75 : vector<1x64xf32>
    %77 = arith.mulf %63, %76 : vector<1x64xf32>
    %78 = arith.mulf %70, %77 : vector<1x64xf32>
    %79 = arith.subf %64, %78 : vector<1x64xf32>
    %cst_71 = arith.constant dense<0.000000e+00> : vector<1x384xf32>
    %80 = tpu.matmul %77, %62, %cst_71 {dimension_numbers = #tpu.dot_dimension_numbers<[1], [0], [0], [1], [0, 0, 1, 1], [], []>} : vector<1x64xf32>, vector<64x384xf32>, vector<1x384xf32> -> vector<1x384xf32>
    %cst_72 = arith.constant dense<0.000000e+00> : vector<1x384xf32>
    %81 = tpu.matmul %79, %62, %cst_72 {dimension_numbers = #tpu.dot_dimension_numbers<[1], [0], [0], [1], [0, 0, 1, 1], [], []>} : vector<1x64xf32>, vector<64x384xf32>, vector<1x384xf32> -> vector<1x384xf32>
    %82 = vector.broadcast %80 : vector<1x384xf32> to vector<12x384xf32>
    %83 = arith.mulf %60, %82 : vector<12x384xf32>
    %84 = vector.broadcast %81 : vector<1x384xf32> to vector<12x384xf32>
    %85 = arith.addf %83, %84 : vector<12x384xf32>
    %cst_73 = arith.constant 0.000000e+00 : f32
    %86 = vector.broadcast %cst_73 : f32 to vector<12x384xf32>
    %87 = arith.maximumf %85, %86 : vector<12x384xf32>
    %c0_74 = arith.constant 0 : index
    %c0_75 = arith.constant 0 : index
    %88 = vector.load %arg23[%c0_74, %c0_75] : memref<384x416xf32, #tpu.memory_space<vmem>>, vector<384x416xf32>
    %cst_76 = arith.constant dense<0.000000e+00> : vector<12x416xf32>
    %89 = tpu.matmul %87, %88, %cst_76 {dimension_numbers = #tpu.dot_dimension_numbers<[1], [0], [0], [1], [0, 0, 1, 1], [], []>} : vector<12x384xf32>, vector<384x416xf32>, vector<12x416xf32> -> vector<12x416xf32>
    %c0_77 = arith.constant 0 : index
    %c0_78 = arith.constant 0 : index
    %90 = vector.load %arg26[%c0_77, %c0_78] : memref<26x12xf32, #tpu.memory_space<vmem>>, vector<26x12xf32>
    %cst_79 = arith.constant dense<0.000000e+00> : vector<26x416xf32>
    %91 = tpu.matmul %90, %89, %cst_79 {dimension_numbers = #tpu.dot_dimension_numbers<[1], [0], [0], [1], [0, 0, 1, 1], [], []>} : vector<26x12xf32>, vector<12x416xf32>, vector<26x416xf32> -> vector<26x416xf32>
    %c0_80 = arith.constant 0 : index
    %c0_81 = arith.constant 0 : index
    %92 = vector.load %arg24[%c0_80, %c0_81] : memref<384x416xf32, #tpu.memory_space<vmem>>, vector<384x416xf32>
    %cst_82 = arith.constant dense<0.000000e+00> : vector<12x416xf32>
    %93 = tpu.matmul %87, %92, %cst_82 {dimension_numbers = #tpu.dot_dimension_numbers<[1], [0], [0], [1], [0, 0, 1, 1], [], []>} : vector<12x384xf32>, vector<384x416xf32>, vector<12x416xf32> -> vector<12x416xf32>
    %c0_83 = arith.constant 0 : index
    %c0_84 = arith.constant 0 : index
    %94 = vector.load %arg27[%c0_83, %c0_84] : memref<26x12xf32, #tpu.memory_space<vmem>>, vector<26x12xf32>
    %cst_85 = arith.constant dense<0.000000e+00> : vector<26x416xf32>
    %95 = tpu.matmul %94, %93, %cst_85 {dimension_numbers = #tpu.dot_dimension_numbers<[1], [0], [0], [1], [0, 0, 1, 1], [], []>} : vector<26x12xf32>, vector<12x416xf32>, vector<26x416xf32> -> vector<26x416xf32>
    %96 = arith.addf %91, %95 : vector<26x416xf32>
    %c0_86 = arith.constant 0 : index
    %c0_87 = arith.constant 0 : index
    %97 = vector.load %arg25[%c0_86, %c0_87] : memref<384x416xf32, #tpu.memory_space<vmem>>, vector<384x416xf32>
    %cst_88 = arith.constant dense<0.000000e+00> : vector<12x416xf32>
    %98 = tpu.matmul %87, %97, %cst_88 {dimension_numbers = #tpu.dot_dimension_numbers<[1], [0], [0], [1], [0, 0, 1, 1], [], []>} : vector<12x384xf32>, vector<384x416xf32>, vector<12x416xf32> -> vector<12x416xf32>
    %c0_89 = arith.constant 0 : index
    %c0_90 = arith.constant 0 : index
    %99 = vector.load %arg28[%c0_89, %c0_90] : memref<26x12xf32, #tpu.memory_space<vmem>>, vector<26x12xf32>
    %cst_91 = arith.constant dense<0.000000e+00> : vector<26x416xf32>
    %100 = tpu.matmul %99, %98, %cst_91 {dimension_numbers = #tpu.dot_dimension_numbers<[1], [0], [0], [1], [0, 0, 1, 1], [], []>} : vector<26x12xf32>, vector<12x416xf32>, vector<26x416xf32> -> vector<26x416xf32>
    %101 = arith.addf %96, %100 : vector<26x416xf32>
    %c0_92 = arith.constant 0 : index
    %c0_93 = arith.constant 0 : index
    %102 = vector.load %arg29[%c0_92, %c0_93] : memref<416x32xf32, #tpu.memory_space<vmem>>, vector<416x32xf32>
    %c0_94 = arith.constant 0 : index
    %c0_95 = arith.constant 0 : index
    %103 = vector.load %arg30[%c0_94, %c0_95] : memref<32x416xf32, #tpu.memory_space<vmem>>, vector<32x416xf32>
    %c0_96 = arith.constant 0 : index
    %c0_97 = arith.constant 0 : index
    %104 = vector.load %arg31[%c0_96, %c0_97] : memref<1x32xf32, #tpu.memory_space<vmem>>, vector<1x32xf32>
    %c0_98 = arith.constant 0 : index
    %c0_99 = arith.constant 0 : index
    %105 = vector.load %arg32[%c0_98, %c0_99] : memref<1x32xf32, #tpu.memory_space<vmem>>, vector<1x32xf32>
    %cst_100 = arith.constant dense<0.000000e+00> : vector<416xf32>
    %106 = vector.multi_reduction <add>, %101, %cst_100 [0] : vector<26x416xf32> to vector<416xf32>
    %107 = vector.shape_cast %106 : vector<416xf32> to vector<1x416xf32>
    %108 = arith.mulf %101, %101 : vector<26x416xf32>
    %cst_101 = arith.constant dense<0.000000e+00> : vector<416xf32>
    %109 = vector.multi_reduction <add>, %108, %cst_101 [0] : vector<26x416xf32> to vector<416xf32>
    %110 = vector.shape_cast %109 : vector<416xf32> to vector<1x416xf32>
    %cst_102 = arith.constant dense<0.000000e+00> : vector<1x32xf32>
    %111 = tpu.matmul %107, %102, %cst_102 {dimension_numbers = #tpu.dot_dimension_numbers<[1], [0], [0], [1], [0, 0, 1, 1], [], []>} : vector<1x416xf32>, vector<416x32xf32>, vector<1x32xf32> -> vector<1x32xf32>
    %cst_103 = arith.constant dense<0.000000e+00> : vector<1x32xf32>
    %112 = tpu.matmul %110, %102, %cst_103 {dimension_numbers = #tpu.dot_dimension_numbers<[1], [0], [0], [1], [0, 0, 1, 1], [], []>} : vector<1x416xf32>, vector<416x32xf32>, vector<1x32xf32> -> vector<1x32xf32>
    %113 = arith.mulf %111, %111 : vector<1x32xf32>
    %114 = arith.subf %112, %113 : vector<1x32xf32>
    %cst_104 = arith.constant 9.99999974E-6 : f32
    %115 = vector.broadcast %cst_104 : f32 to vector<1x32xf32>
    %116 = arith.addf %114, %115 : vector<1x32xf32>
    %117 = math.rsqrt %116 : vector<1x32xf32>
    %118 = arith.mulf %104, %117 : vector<1x32xf32>
    %119 = arith.mulf %111, %118 : vector<1x32xf32>
    %120 = arith.subf %105, %119 : vector<1x32xf32>
    %cst_105 = arith.constant dense<0.000000e+00> : vector<1x416xf32>
    %121 = tpu.matmul %118, %103, %cst_105 {dimension_numbers = #tpu.dot_dimension_numbers<[1], [0], [0], [1], [0, 0, 1, 1], [], []>} : vector<1x32xf32>, vector<32x416xf32>, vector<1x416xf32> -> vector<1x416xf32>
    %cst_106 = arith.constant dense<0.000000e+00> : vector<1x416xf32>
    %122 = tpu.matmul %120, %103, %cst_106 {dimension_numbers = #tpu.dot_dimension_numbers<[1], [0], [0], [1], [0, 0, 1, 1], [], []>} : vector<1x32xf32>, vector<32x416xf32>, vector<1x416xf32> -> vector<1x416xf32>
    %123 = vector.broadcast %121 : vector<1x416xf32> to vector<26x416xf32>
    %124 = arith.mulf %101, %123 : vector<26x416xf32>
    %125 = vector.broadcast %122 : vector<1x416xf32> to vector<26x416xf32>
    %126 = arith.addf %124, %125 : vector<26x416xf32>
    %cst_107 = arith.constant 0.000000e+00 : f32
    %127 = vector.broadcast %cst_107 : f32 to vector<26x416xf32>
    %128 = arith.maximumf %126, %127 : vector<26x416xf32>
    %c0_108 = arith.constant 0 : index
    %c0_109 = arith.constant 0 : index
    %129 = vector.load %arg33[%c0_108, %c0_109] : memref<416x28xf32, #tpu.memory_space<vmem>>, vector<416x28xf32>
    %cst_110 = arith.constant dense<0.000000e+00> : vector<26x28xf32>
    %130 = tpu.matmul %128, %129, %cst_110 {dimension_numbers = #tpu.dot_dimension_numbers<[1], [0], [0], [1], [0, 0, 1, 1], [], []>} : vector<26x416xf32>, vector<416x28xf32>, vector<26x28xf32> -> vector<26x28xf32>
    %c0_111 = arith.constant 0 : index
    %c0_112 = arith.constant 0 : index
    %131 = vector.load %arg37[%c0_111, %c0_112] : memref<56x26xf32, #tpu.memory_space<vmem>>, vector<56x26xf32>
    %cst_113 = arith.constant dense<0.000000e+00> : vector<56x28xf32>
    %132 = tpu.matmul %131, %130, %cst_113 {dimension_numbers = #tpu.dot_dimension_numbers<[1], [0], [0], [1], [0, 0, 1, 1], [], []>} : vector<56x26xf32>, vector<26x28xf32>, vector<56x28xf32> -> vector<56x28xf32>
    %c0_114 = arith.constant 0 : index
    %c0_115 = arith.constant 0 : index
    %133 = vector.load %arg34[%c0_114, %c0_115] : memref<416x28xf32, #tpu.memory_space<vmem>>, vector<416x28xf32>
    %cst_116 = arith.constant dense<0.000000e+00> : vector<26x28xf32>
    %134 = tpu.matmul %128, %133, %cst_116 {dimension_numbers = #tpu.dot_dimension_numbers<[1], [0], [0], [1], [0, 0, 1, 1], [], []>} : vector<26x416xf32>, vector<416x28xf32>, vector<26x28xf32> -> vector<26x28xf32>
    %c0_117 = arith.constant 0 : index
    %c0_118 = arith.constant 0 : index
    %135 = vector.load %arg38[%c0_117, %c0_118] : memref<56x26xf32, #tpu.memory_space<vmem>>, vector<56x26xf32>
    %cst_119 = arith.constant dense<0.000000e+00> : vector<56x28xf32>
    %136 = tpu.matmul %135, %134, %cst_119 {dimension_numbers = #tpu.dot_dimension_numbers<[1], [0], [0], [1], [0, 0, 1, 1], [], []>} : vector<56x26xf32>, vector<26x28xf32>, vector<56x28xf32> -> vector<56x28xf32>
    %137 = arith.addf %132, %136 : vector<56x28xf32>
    %c0_120 = arith.constant 0 : index
    %c0_121 = arith.constant 0 : index
    %138 = vector.load %arg35[%c0_120, %c0_121] : memref<416x28xf32, #tpu.memory_space<vmem>>, vector<416x28xf32>
    %cst_122 = arith.constant dense<0.000000e+00> : vector<26x28xf32>
    %139 = tpu.matmul %128, %138, %cst_122 {dimension_numbers = #tpu.dot_dimension_numbers<[1], [0], [0], [1], [0, 0, 1, 1], [], []>} : vector<26x416xf32>, vector<416x28xf32>, vector<26x28xf32> -> vector<26x28xf32>
    %c0_123 = arith.constant 0 : index
    %c0_124 = arith.constant 0 : index
    %140 = vector.load %arg39[%c0_123, %c0_124] : memref<56x26xf32, #tpu.memory_space<vmem>>, vector<56x26xf32>
    %cst_125 = arith.constant dense<0.000000e+00> : vector<56x28xf32>
    %141 = tpu.matmul %140, %139, %cst_125 {dimension_numbers = #tpu.dot_dimension_numbers<[1], [0], [0], [1], [0, 0, 1, 1], [], []>} : vector<56x26xf32>, vector<26x28xf32>, vector<56x28xf32> -> vector<56x28xf32>
    %142 = arith.addf %137, %141 : vector<56x28xf32>
    %c0_126 = arith.constant 0 : index
    %c0_127 = arith.constant 0 : index
    %143 = vector.load %arg36[%c0_126, %c0_127] : memref<416x28xf32, #tpu.memory_space<vmem>>, vector<416x28xf32>
    %cst_128 = arith.constant dense<0.000000e+00> : vector<26x28xf32>
    %144 = tpu.matmul %128, %143, %cst_128 {dimension_numbers = #tpu.dot_dimension_numbers<[1], [0], [0], [1], [0, 0, 1, 1], [], []>} : vector<26x416xf32>, vector<416x28xf32>, vector<26x28xf32> -> vector<26x28xf32>
    %c0_129 = arith.constant 0 : index
    %c0_130 = arith.constant 0 : index
    %145 = vector.load %arg40[%c0_129, %c0_130] : memref<56x26xf32, #tpu.memory_space<vmem>>, vector<56x26xf32>
    %cst_131 = arith.constant dense<0.000000e+00> : vector<56x28xf32>
    %146 = tpu.matmul %145, %144, %cst_131 {dimension_numbers = #tpu.dot_dimension_numbers<[1], [0], [0], [1], [0, 0, 1, 1], [], []>} : vector<56x26xf32>, vector<26x28xf32>, vector<56x28xf32> -> vector<56x28xf32>
    %147 = arith.addf %142, %146 : vector<56x28xf32>
    %c0_132 = arith.constant 0 : index
    %c0_133 = arith.constant 0 : index
    %148 = vector.load %arg41[%c0_132, %c0_133] : memref<1x28xf32, #tpu.memory_space<vmem>>, vector<1x28xf32>
    %149 = vector.broadcast %148 : vector<1x28xf32> to vector<56x28xf32>
    %150 = arith.addf %147, %149 : vector<56x28xf32>
    %151 = math.tanh %150 : vector<56x28xf32>
    %c0_134 = arith.constant 0 : index
    %c0_135 = arith.constant 0 : index
    %152 = vector.load %arg42[%c0_134, %c0_135] : memref<56x28xf32, #tpu.memory_space<vmem>>, vector<56x28xf32>
    tpu.vector_store %arg42[%c0_134, %c0_135], %151 {strides = array<i32>} : memref<56x28xf32, #tpu.memory_space<vmem>>, vector<56x28xf32>,
    return
  }
}

</mosaic_0001>

<bundles_post_ra>
// kernel: tpu_custom_call.1
= control target key start
LH: loop header
LB: loop body
LE: loop exit
PB: predicated region body
PF: predicated region fallthrough
CT: control target
= control target key end

     0   :  { %s6849_s3 = smov 1   ;;  %s6850_s7 = smov 2   ;;  %vm185_vm0 = vcmask 1041408   ;;  %vm181_vm1 = vcmask 80896   ;;  %vm332_vm2 = vcmask 15360   ;;  %vm726_vm3 = vcmask 1045504   ;;  %s9970_s0 = inlined_call_operand.smem [shape: u32[43], index: -1, kind: input, shape index: {}] }
   0x1   :  { %s6548_s6 = sld [smem:[%s9970_s0 + %s6849_s3]]   ;;  %s6851_s14 = smov 5   ;;  %vm1695_vm7 = vcmask 48128   ;;  %vm2770_vm8 = vcmask 1043456   ;;  %vm2961_vm12 = vcmask 523264   ;;  %vm4056_vm13 = vcmask 97280  }
   0x2   :  { %s6549_s10 = sld [smem:[%s9970_s0 + %s6850_s7]]   ;;  %s6852_s18 = smov 3   ;;  %vm5065_vm14 = vcmask 261120   ;;  %vm5071_vm15 = vcmask 254976  }
   0x3   :  { %s1_s13 = sld [smem:[%s9970_s0]]   ;;  %s6853_s22 = smov 4  }
   0x4   :  { %s6552_s17 = sld [smem:[%s9970_s0 + %s6851_s14]]   ;;  %s6854_s26 = smov 7  }
   0x5   :  { %s6931_s21 = sld [smem:[%s9970_s0 + %s6852_s18]]   ;;  %s6855_s30 = smov 6  }
   0x6   :  { %s6551_s25 = sld [smem:[%s9970_s0 + %s6853_s22]]   ;;  %s6856_s4 = smov 8  }
   0x7   :  { %v178_v0 = vld [vmem:[%s6548_s6 + $0x18] sm:$0x3]  ;;  %v175_v1 = vld [vmem:[%s6548_s6] sm:$0xff]  ;;  %v176_v9 = vld [vmem:[%s6548_s6 + $0x8] sm:$0xff]  ;;  %s6966_s29 = sld [smem:[%s9970_s0 + %s6854_s26]]   ;;  %s6857_s8 = smov 11  }
   0x8   :  { %6590 = vmatpush.msk.msra.mxu2 %vm185_vm0, %v178_v0  ;;  %v259_v2 = vld [vmem:[%s6549_s10 + $0x18] sm:$0x3]  ;;  %v261_v3 = vld [vmem:[%s6549_s10 + $0x28] sm:$0x3]  ;;  %v256_v4 = vld [vmem:[%s6549_s10] sm:$0xff]  ;;  %s6553_s3 = sld [smem:[%s9970_s0 + %s6855_s30]]   ;;  %s6858_s12 = smov 9  }
   0x9   :  { %6596 = vmatpush.msk.msra.mxu3 %vm185_vm0, %v259_v2  ;;  %6600 = vmatpush.msk.msra.mxu1 %vm185_vm0, %v261_v3  ;;  %v258_v5 = vld [vmem:[%s6549_s10 + $0x10] sm:$0xff]  ;;  %v6908_v6 = vld [vmem:[%s1_s13] sm:$0x3]  ;;  %v180_v10 = vld [vmem:[%s6548_s6 + $0x28] sm:$0x3]  ;;  %s7173_s7 = sld [smem:[%s9970_s0 + %s6856_s4]]   ;;  %s6859_s16 = smov 10  }
   0xa   :  { %210 = vmatpush.msra.mxu2 %v175_v1  ;;  %v179_v7 = vld [vmem:[%s6548_s6 + $0x20] sm:$0x3]  ;;  %v257_v11 = vld [vmem:[%s6549_s10 + $0x8] sm:$0xff]  ;;  %v177_v12 = vld [vmem:[%s6548_s6 + $0x10] sm:$0xff]  ;;  %s7286_s11 = sld [smem:[%s9970_s0 + %s6857_s8]]   ;;  %s6860_s20 = smov 12  }
   0xb   :  { %286 = vmatpush.msra.mxu3 %v256_v4  ;;  %326 = vmatpush.msra.mxu1 %v258_v5  ;;  %v260_v8 = vld [vmem:[%s6549_s10 + $0x20] sm:$0x3]  ;;  %v480_v15 = vld [vmem:[%s6931_s21 + $0x18] sm:$0x3]  ;;  %v478_v22 = vld [vmem:[%s6931_s21 + $0x8] sm:$0xff]  ;;  %s6556_s15 = sld [smem:[%s9970_s0 + %s6858_s12]]   ;;  %s6861_s24 = smov 13  }
   0xc   :  { %6591 = vmatmul.msk.f32.vlgmr.msra.gmra.mxu2 %vm181_vm1, %v6908_v6  ;;  %6597 = vmatmul.msk.f32.vlgmr.msra.gmra.mxu3 %vm181_vm1, %v6908_v6  ;;  %v331_v13 = vld [vmem:[%s6552_s17] sm:$0x3f]  ;;  %v482_v24 = vld [vmem:[%s6931_s21 + $0x28] sm:$0x3]  ;;  %v479_v25 = vld [vmem:[%s6931_s21 + $0x10] sm:$0xff]  ;;  %s6557_s19 = sld [smem:[%s9970_s0 + %s6859_s16]]   ;;  %s6862_s28 = smov 15  }
   0xd   :  { %6601 = vmatmul.msk.f32.vlgmr.msra.gmra.mxu1 %vm181_vm1, %v6908_v6  ;;  %6592 = vmatpush.msk.msrb.mxu2 %vm185_vm0, %v179_v7  ;;  %v477_v16 = vld [vmem:[%s6931_s21] sm:$0xff]  ;;  %v6969_v27 = vld [vmem:[%s6966_s29 + $0x78] sm:$0xff]  ;;  %v6972_v28 = vld [vmem:[%s6966_s29 + $0x70] sm:$0xff]  ;;  %s7434_s23 = sld [smem:[%s9970_s0 + %s6860_s20]]   ;;  %s6863_s2 = smov 16  }
   0xe   :  { %6598 = vmatpush.msk.msra.mxu0 %vm185_vm0, %v260_v8  ;;  %v255_v17 = vld [vmem:[%s6551_s25] sm:$0x3f]  ;;  %v6979_v29 = vld [vmem:[%s6966_s29 + $0x68] sm:$0xff]  ;;  %v6989_v32 = vld [vmem:[%s6966_s29 + $0x58] sm:$0xff]  ;;  %s7630_s27 = sld [smem:[%s9970_s0 + %s6861_s24]]   ;;  %s6864_s6 = smov 14  }
   0xf   :  { %230 = vmatpush.msrb.mxu2 %v176_v9  ;;  %v481_v21 = vld [vmem:[%s6931_s21 + $0x20] sm:$0x3]  ;;  %v6995_v34 = vld [vmem:[%s6966_s29 + $0x50] sm:$0xff]  ;;  %v6999_v36 = vld [vmem:[%s6966_s29 + $0x48] sm:$0xff]  ;;  %s6562_s1 = sld [smem:[%s9970_s0 + %s6862_s28]]   ;;  %s6865_s10 = smov 17  }
  0x10   :  { %306 = vmatpush.msra.mxu0 %v257_v11  ;;  %v6985_v31 = vld [vmem:[%s6966_s29 + $0x60] sm:$0xff]  ;;  %v7003_v38 = vld [vmem:[%s6966_s29 + $0xf8] sm:$0xff]  ;;  %v7012_v40 = vld [vmem:[%s6966_s29 + $0xf0] sm:$0xff]  ;;  %s7661_s5 = sld [smem:[%s9970_s0 + %s6863_s2]]   ;;  %s6866_s14 = smov 18  }
  0x11   :  { %6594 = vmatpush.msk.msra.mxu2 %vm185_vm0, %v180_v10  ;;  %6599 = vmatmul.msk.f32.vlgmr.msra.gmra.mxu0 %vm181_vm1, %v6908_v6  ;;  %v552_v35 = vld [vmem:[%s6553_s3] sm:$0x3f]  ;;  %v7017_v42 = vld [vmem:[%s6966_s29 + $0x38] sm:$0xff]  ;;  %v7022_v43 = vld [vmem:[%s6966_s29 + $0xe8] sm:$0xff]  ;;  %s7837_s9 = sld [smem:[%s9970_s0 + %s6864_s6]]   ;;  %s6867_s18 = smov 19  }
  0x12   :  { %v7007_v39 = vld [vmem:[%s6966_s29 + $0x40] sm:$0xff]  ;;  %v7025_v45 = vld [vmem:[%s6966_s29 + $0x30] sm:$0xff]  ;;  %v7035_v47 = vld [vmem:[%s6966_s29 + $0x28] sm:$0xff]  ;;  %s6564_s13 = sld [smem:[%s9970_s0 + %s6865_s10]]   ;;  %s6868_s22 = smov 20  }
  0x13   :  { %250 = vmatpush.msra.mxu2 %v177_v12  ;;  %v7031_v46 = vld [vmem:[%s6966_s29 + $0xe0] sm:$0xff]  ;;  %v7040_v48 = vld [vmem:[%s6966_s29 + $0xd8] sm:$0xff]  ;;  %v7048_v50 = vld [vmem:[%s6966_s29 + $0xd0] sm:$0xff]  ;;  %s6565_s17 = sld [smem:[%s9970_s0 + %s6866_s14]]   ;;  %s6869_s26 = smov 23  }
  0x14   :  { %6593 = vmatmul.msk.f32.vlgmr.msrb.gmra.mxu2 %vm181_vm1, %v6908_v6  ;;  %v7043_v49 = vld [vmem:[%s6966_s29 + $0x20] sm:$0xff]  ;;  %v631_v52 = vld [vmem:[%s6966_s29 + $0x18] sm:$0xff]  ;;  %v7056_v53 = vld [vmem:[%s6966_s29 + $0xc8] sm:$0xff]  ;;  %s8064_s21 = sld [smem:[%s9970_s0 + %s6867_s18]]   ;;  %s6870_s30 = smov 21  }
  0x15   :  { %v630_v54 = vld [vmem:[%s6966_s29 + $0x10] sm:$0xff]  ;;  %v7061_v55 = vld [vmem:[%s6966_s29 + $0xc0] sm:$0xff]  ;;  %v629_v56 = vld [vmem:[%s6966_s29 + $0x8] sm:$0xff]  ;;  %s8176_s25 = sld [smem:[%s9970_s0 + %s6868_s22]]   ;;  %s6871_s4 = smov 22  }
  0x16   :  { %v7066_v57 = vld [vmem:[%s6966_s29 + $0xb8] sm:$0xff]  ;;  %v628_v58 = vld [vmem:[%s6966_s29] sm:$0xff]  ;;  %v7073_v61 = vld [vmem:[%s6966_s29 + $0xb0] sm:$0xff]  ;;  %s6568_s3 = sld [smem:[%s9970_s0 + %s6870_s30]]   ;;  %s6872_s8 = smov 24  }
  0x17   :  { %v675_v59 = vld [vmem:[%s6966_s29 + $0x178] sm:$0xff]  ;;  %v674_v62 = vld [vmem:[%s6966_s29 + $0x170] sm:$0xff]  ;;  %v7079_v63 = vld [vmem:[%s6966_s29 + $0xa8] sm:$0xff]  ;;  %s6873_s12 = smov 27   ;;  %s6874_s16 = smov 25  }
  0x18   :  { %v673_v0 = vld [vmem:[%s6966_s29 + $0x168] sm:$0xff]  ;;  %v7085_v1 = vld [vmem:[%s6966_s29 + $0xa0] sm:$0xff]  ;;  %v7091_v3 = vld [vmem:[%s6966_s29 + $0x98] sm:$0xff]  ;;  %s6875_s20 = smov 26   ;;  %s6876_s24 = smov 28  }
  0x19   :  { %v672_v2 = vld [vmem:[%s6966_s29 + $0x160] sm:$0xff]  ;;  %v671_v4 = vld [vmem:[%s6966_s29 + $0x158] sm:$0xff]  ;;  %v7097_v5 = vld [vmem:[%s6966_s29 + $0x90] sm:$0xff]  ;;  %s6877_s28 = smov 29   ;;  %s6878_s2 = smov 30  }
  0x1a   :  { %v7103_v7 = vld [vmem:[%s6966_s29 + $0x88] sm:$0xff]  ;;  %v668_v9 = vld [vmem:[%s6966_s29 + $0x140] sm:$0xff]  ;;  %v667_v11 = vld [vmem:[%s6966_s29 + $0x138] sm:$0xff]  ;;  %s6879_s6 = smov 33   ;;  %s6880_s10 = smov 31  }
  0x1b   :  { %v669_v8 = vld [vmem:[%s6966_s29 + $0x148] sm:$0xff]  ;;  %v7118_v10 = vld [vmem:[%s6966_s29 + $0x80] sm:$0xff]  ;;  %v666_v12 = vld [vmem:[%s6966_s29 + $0x130] sm:$0xff]  ;;  %s6881_s14 = smov 32   ;;  %s6882_s18 = smov 34  }
  0x1c   :  { %6595 = vmatmul.msk.f32.vlgmr.msra.gmra.mxu2 %vm181_vm1, %v6908_v6  ;;  %s6883_s22 = smov 35   ;;  %s6885_s30 = smov 37  }
  0x8a   :  { %v328_v14 = vpop.f32.mrf.mxu1 }
  0x8b   :  { %6606 = vmatpush.msk.msrb.mxu0 %vm185_vm0, %v328_v14  ;;  %v664_v14 = vld [vmem:[%s6966_s29 + $0x120] sm:$0xff] }
  0x8c   :  { %6607 = vmatmul.msk.f32.vlgmr.msrb.gmra.mxu0 %vm332_vm2, %v331_v13 }
  0x8d   :  { %6614 = vmatpush.msk.msra.mxu0 %vm185_vm0, %v480_v15  ;;  %v663_v15 = vld [vmem:[%s6966_s29 + $0x118] sm:$0xff] }
  0x8e   :  { %v308_v18 = vpop.f32.mrf.mxu0 }
  0x8f   :  { %v212_v19 = vpop.f32.mrf.mxu2  ;;  %v288_v20 = vpop.f32.mrf.mxu3  ;;  %507 = vmatpush.msra.mxu0 %v477_v16  ;;  %6604 = vmatpush.msk.msrb.mxu3 %vm185_vm0, %v308_v18  ;;  %v662_v16 = vld [vmem:[%s6966_s29 + $0x110] sm:$0xff] }
  0x90   :  { %6602 = vmatpush.msk.msrb.mxu2 %vm185_vm0, %v288_v20  ;;  %6608 = vmatpush.msk.msrb.mxu1 %vm185_vm0, %v212_v19  ;;  %v660_v19 = vld [vmem:[%s6966_s29 + $0x100] sm:$0xff] }
  0x91   :  { %6603 = vmatmul.msk.f32.vlgmr.msrb.gmra.mxu2 %vm332_vm2, %v331_v13  ;;  %6609 = vmatmul.msk.f32.vlgmr.msrb.gmra.mxu1 %vm332_vm2, %v255_v17 }
  0x92   :  { %6616 = vmatpush.msk.msra.mxu1 %vm185_vm0, %v481_v21  ;;  %6605 = vmatmul.msk.f32.vlgmr.msrb.gmra.mxu3 %vm332_vm2, %v331_v13  ;;  %v665_v13 = vld [vmem:[%s6966_s29 + $0x128] sm:$0xff] }
  0x94   :  { %6615 = vmatmul.msk.f32.vlgmr.msra.gmra.mxu0 %vm181_vm1, %v6908_v6  ;;  %527 = vmatpush.msra.mxu1 %v478_v22 }
  0x97   :  { %v232_v23 = vpop.f32.mrf.mxu2 }
  0x98   :  { %6610 = vmatpush.msk.msra.mxu2 %vm185_vm0, %v232_v23 }
  0x99   :  { %6611 = vmatmul.msk.f32.vlgmr.msra.gmra.mxu2 %vm332_vm2, %v255_v17  ;;  %6617 = vmatmul.msk.f32.vlgmr.msra.gmra.mxu1 %vm181_vm1, %v6908_v6 }
  0x9a   :  { %6618 = vmatpush.msk.msrb.mxu2 %vm185_vm0, %v482_v24 }
  0x9c   :  { %547 = vmatpush.msrb.mxu2 %v479_v25 }
  0x9e   :  { %772 = vmatpush.msra.mxu2 %v6969_v27 }
  0x9f   :  { %v252_v26 = vpop.f32.mrf.mxu2 }
  0xa0   :  { %6612 = vmatpush.msk.msra.mxu3 %vm185_vm0, %v252_v26  ;;  %773 = vmatpush.msra.mxu2 %v6972_v28 }
  0xa1   :  { %6613 = vmatmul.msk.f32.vlgmr.msra.gmra.mxu3 %vm332_vm2, %v255_v17  ;;  %6619 = vmatmul.msk.f32.vlgmr.msrb.gmra.mxu2 %vm181_vm1, %v6908_v6  ;;  %v670_v6 = vld [vmem:[%s6966_s29 + $0x150] sm:$0xff]  ;;  %v661_v17 = vld [vmem:[%s6966_s29 + $0x108] sm:$0xff]  ;;  %s8204_s29 = sld [smem:[%s9970_s0 + %s6869_s26]]   ;;  %s6884_s26 = smov 36  }
  0xa2   :  { %774 = vmatpush.msra.mxu2 %v6979_v29 }
  0xa4   :  { %775 = vmatpush.msra.mxu2 %v6985_v31 }
  0xa6   :  { %776 = vmatpush.msra.mxu2 %v6989_v32 }
  0xa8   :  { %777 = vmatpush.msra.mxu2 %v6995_v34 }
  0xaa   :  { %778 = vmatpush.msra.mxu2 %v6999_v36 }
  0xac   :  { %779 = vmatpush.msra.mxu2 %v7007_v39 }
  0xae   :  { %780 = vmatpush.msra.mxu2 %v7017_v42 }
  0xb0   :  { %781 = vmatpush.msra.mxu2 %v7025_v45 }
  0xb2   :  { %782 = vmatpush.msra.mxu2 %v7035_v47 }
  0xb4   :  { %783 = vmatpush.msra.mxu2 %v7043_v49 }
  0xb6   :  { %784 = vmatpush.msra.mxu2 %v631_v52 }
  0xb8   :  { %785 = vmatpush.msra.mxu2 %v630_v54 }
  0xba   :  { %786 = vmatpush.msra.mxu2 %v629_v56 }
  0xbc   :  { %787 = vmatpush.msra.mxu2 %v628_v58 }
  0xbe   :  { %812 = vmatpush.msrb.mxu2 %v675_v59 }
  0xc0   :  { %813 = vmatpush.msrb.mxu2 %v674_v62 }
  0xc2   :  { %814 = vmatpush.msrb.mxu2 %v673_v0 }
  0xc4   :  { %815 = vmatpush.msrb.mxu2 %v672_v2 }
  0xc6   :  { %816 = vmatpush.msrb.mxu2 %v671_v4 }
  0xc8   :  { %817 = vmatpush.msrb.mxu2 %v670_v6 }
  0xca   :  { %818 = vmatpush.msrb.mxu2 %v669_v8 }
  0xcc   :  { %819 = vmatpush.msrb.mxu2 %v668_v9 }
  0xce   :  { %820 = vmatpush.msrb.mxu2 %v667_v11 }
  0xd0   :  { %821 = vmatpush.msrb.mxu2 %v666_v12 }
  0xd2   :  { %822 = vmatpush.msrb.mxu2 %v665_v13 }
  0xd4   :  { %823 = vmatpush.msrb.mxu2 %v664_v14 }
  0xd6   :  { %824 = vmatpush.msrb.mxu2 %v663_v15 }
  0xd8   :  { %825 = vmatpush.msrb.mxu2 %v662_v16 }
  0xda   :  { %826 = vmatpush.msrb.mxu2 %v661_v17 }
  0xdc   :  { %827 = vmatpush.msrb.mxu2 %v660_v19 }
 0x109   :  { %v6981_v30 = vpop.f32.mrf.mxu0 }
 0x10e   :  { %v6992_v33 = vpop.f32.mrf.mxu1 }
 0x111   :  { %v509_v37 = vpop.f32.mrf.mxu0 }
 0x112   :  { %6620 = vmatpush.msk.msrb.mxu3 %vm185_vm0, %v509_v37 }
 0x113   :  { %6621 = vmatmul.msk.f32.vlgmr.msrb.gmra.mxu3 %vm332_vm2, %v552_v35 }
 0x114   :  { %v7014_v41 = vpop.f32.mrf.mxu2  ;;  %792 = vmatpush.msra.mxu3 %v7003_v38 }
 0x115   :  { %v382_v18 = vpop.f32.mrf.mxu3  ;;  %v435_v22 = vadd.f32 %v6992_v33, %v7014_v41 }
 0x116   :  { %v529_v44 = vpop.f32.mrf.mxu1  ;;  %793 = vmatpush.msra.mxu3 %v7012_v40 }
 0x117   :  { %6622 = vmatpush.msk.msrb.mxu0 %vm185_vm0, %v529_v44 }
 0x118   :  { %6623 = vmatmul.msk.f32.vlgmr.msrb.gmra.mxu0 %vm332_vm2, %v552_v35  ;;  %794 = vmatpush.msra.mxu3 %v7022_v43 }
 0x11a   :  { %795 = vmatpush.msra.mxu3 %v7031_v46 }
 0x11c   :  { %v7050_v51 = vpop.f32.mrf.mxu2  ;;  %796 = vmatpush.msra.mxu3 %v7040_v48 }
 0x11d   :  { %v455_v21 = vadd.f32 %v7050_v51, %v382_v18 }
 0x11e   :  { %797 = vmatpush.msra.mxu3 %v7048_v50 }
 0x120   :  { %798 = vmatpush.msra.mxu3 %v7056_v53 }
 0x122   :  { %799 = vmatpush.msra.mxu3 %v7061_v55 }
 0x124   :  { %v549_v60 = vpop.f32.mrf.mxu2  ;;  %800 = vmatpush.msra.mxu3 %v7066_v57  ;;  %v474_v20 = vpop.f32.mrf.mxu3 }
 0x125   :  { %6624 = vmatpush.msk.msrb.mxu1 %vm185_vm0, %v549_v60 }
 0x126   :  { %6625 = vmatmul.msk.f32.vlgmr.msrb.gmra.mxu1 %vm332_vm2, %v552_v35  ;;  %801 = vmatpush.msra.mxu3 %v7073_v61 }
 0x127   :  { %832 = vmatpush.msra.mxu1 %v6969_v27 }
 0x128   :  { %802 = vmatpush.msra.mxu3 %v7079_v63 }
 0x129   :  { %833 = vmatpush.msra.mxu1 %v6972_v28 }
 0x12a   :  { %803 = vmatpush.msra.mxu3 %v7085_v1 }
 0x12b   :  { %834 = vmatpush.msra.mxu1 %v6979_v29 }
 0x12c   :  { %804 = vmatpush.msra.mxu3 %v7091_v3 }
 0x12d   :  { %835 = vmatpush.msra.mxu1 %v6985_v31 }
 0x12e   :  { %805 = vmatpush.msra.mxu3 %v7097_v5 }
 0x12f   :  { %836 = vmatpush.msra.mxu1 %v6989_v32 }
 0x130   :  { %806 = vmatpush.msra.mxu3 %v7103_v7 }
 0x131   :  { %837 = vmatpush.msra.mxu1 %v6995_v34 }
 0x132   :  { %807 = vmatpush.msra.mxu3 %v7118_v10 }
 0x133   :  { %838 = vmatpush.msra.mxu1 %v6999_v36 }
 0x134   :  { %872 = vmatpush.msrb.mxu3 %v675_v59 }
 0x135   :  { %839 = vmatpush.msra.mxu1 %v7007_v39 }
 0x136   :  { %873 = vmatpush.msrb.mxu3 %v674_v62 }
 0x137   :  { %840 = vmatpush.msra.mxu1 %v7017_v42 }
 0x138   :  { %874 = vmatpush.msrb.mxu3 %v673_v0 }
 0x139   :  { %841 = vmatpush.msra.mxu1 %v7025_v45 }
 0x13a   :  { %875 = vmatpush.msrb.mxu3 %v672_v2 }
 0x13b   :  { %842 = vmatpush.msra.mxu1 %v7035_v47 }
 0x13c   :  { %876 = vmatpush.msrb.mxu3 %v671_v4 }
 0x13d   :  { %843 = vmatpush.msra.mxu1 %v7043_v49  ;;  %v475_v49 = vadd.f32 %v474_v20, %v6981_v30 }
 0x13e   :  { %877 = vmatpush.msrb.mxu3 %v670_v6 }
 0x13f   :  { %844 = vmatpush.msra.mxu1 %v631_v52 }
 0x140   :  { %878 = vmatpush.msrb.mxu3 %v669_v8 }
 0x141   :  { %845 = vmatpush.msra.mxu1 %v630_v54 }
 0x142   :  { %879 = vmatpush.msrb.mxu3 %v668_v9 }
 0x143   :  { %846 = vmatpush.msra.mxu1 %v629_v56 }
 0x144   :  { %880 = vmatpush.msrb.mxu3 %v667_v11 }
 0x145   :  { %847 = vmatpush.msra.mxu1 %v628_v58 }
 0x146   :  { %881 = vmatpush.msrb.mxu3 %v666_v12 }
 0x148   :  { %882 = vmatpush.msrb.mxu3 %v665_v13 }
 0x14a   :  { %883 = vmatpush.msrb.mxu3 %v664_v14 }
 0x14c   :  { %884 = vmatpush.msrb.mxu3 %v663_v15 }
 0x14e   :  { %885 = vmatpush.msrb.mxu3 %v662_v16 }
 0x150   :  { %886 = vmatpush.msrb.mxu3 %v661_v17 }
 0x152   :  { %887 = vmatpush.msrb.mxu3 %v660_v19 }
 0x195   :  { %v602_v23 = vpop.f32.mrf.mxu0 }
 0x196   :  { %v582_v24 = vpop.f32.mrf.mxu3  ;;  %v7132_v25 = vadd.f32 %v602_v23, %v455_v21  ;;  %v706_v21 = vld [vmem:[%s7173_s7 + $0xf0] sm:$0xff]  ;;  %v703_v23 = vld [vmem:[%s7173_s7 + $0xd8] sm:$0xff] }
 0x197   :  { %v7134_v26 = vadd.f32 %v582_v24, %v435_v22  ;;  %v7202_v22 = vld [vmem:[%s7173_s7 + $0xf8] sm:$0xff]  ;;  %v7207_v24 = vld [vmem:[%s7173_s7 + $0xe0] sm:$0xff] }
 0x198   :  { %v734_v27 = vsel %vm726_vm3, %v7132_v25, 0.0  ;;  %v749_v6 = vmul.f32 %v7132_v25, %v7132_v25 }
 0x199   :  { %v727_v28 = vsel %vm726_vm3, %v7134_v26, 0.0  ;;  %v748_v29 = vmul.f32 %v7134_v26, %v7134_v26  ;;  %v735_v31 = vrot.slane %v734_v27, 4 }
 0x19a   :  { %v728_v32 = vrot.slane %v727_v28, 4  ;;  %v758_v13 = vsel %vm726_vm3, %v749_v6, 0.0 }
 0x19b   :  { %v751_v33 = vsel %vm726_vm3, %v748_v29, 0.0  ;;  %v736_v34 = vadd.f32 %v735_v31, %v734_v27  ;;  %v759_v17 = vrot.slane %v758_v13, 4  ;;  %v700_v27 = vld [vmem:[%s7173_s7 + $0xc0] sm:$0xff]  ;;  %v697_v29 = vld [vmem:[%s7173_s7 + $0xa8] sm:$0xff]  ;;  %v7216_v31 = vld [vmem:[%s7173_s7 + $0xb0] sm:$0xff] }
 0x19c   :  { %v729_v35 = vadd.f32 %v728_v32, %v727_v28  ;;  %v752_v36 = vrot.slane %v751_v33, 4  ;;  %v7211_v28 = vld [vmem:[%s7173_s7 + $0xc8] sm:$0xff]  ;;  %v723_v32 = vld [vmem:[%s7173_s7 + $0x178] sm:$0xff] }
 0x19d   :  { %v737_v37 = vrot.slane %v736_v34, 2  ;;  %v760_v20 = vadd.f32 %v759_v17, %v758_v13  ;;  %v681_v13 = vld [vmem:[%s7173_s7 + $0x28] sm:$0xff] }
 0x19e   :  { %v730_v39 = vrot.slane %v729_v35, 2  ;;  %v753_v41 = vadd.f32 %v752_v36, %v751_v33  ;;  %v694_v33 = vld [vmem:[%s7173_s7 + $0x90] sm:$0xff]  ;;  %v7227_v36 = vld [vmem:[%s7173_s7 + $0x80] sm:$0xff] }
 0x19f   :  { %v738_v42 = vadd.f32 %v737_v37, %v736_v34  ;;  %v7222_v34 = vld [vmem:[%s7173_s7 + $0x98] sm:$0xff]  ;;  %v688_v37 = vld [vmem:[%s7173_s7 + $0x60] sm:$0xff] }
 0x1a0   :  { %v731_v44 = vadd.f32 %v730_v39, %v729_v35  ;;  %v754_v45 = vrot.slane %v753_v41, 2  ;;  %v691_v35 = vld [vmem:[%s7173_s7 + $0x78] sm:$0xff]  ;;  %v7232_v39 = vld [vmem:[%s7173_s7 + $0x68] sm:$0xff] }
 0x1a1   :  { %v739_v47 = vrot.slane %v738_v42, 1 }
 0x1a2   :  { %v732_v51 = vrot.slane %v731_v44, 1  ;;  %v755_v52 = vadd.f32 %v754_v45, %v753_v41  ;;  %v685_v41 = vld [vmem:[%s7173_s7 + $0x48] sm:$0xff]  ;;  %v682_v45 = vld [vmem:[%s7173_s7 + $0x30] sm:$0xff] }
 0x1a3   :  { %v622_v54 = vpop.f32.mrf.mxu1  ;;  %v740_v56 = vadd.f32 %v739_v47, %v738_v42  ;;  %v7237_v42 = vld [vmem:[%s7173_s7 + $0x50] sm:$0xff]  ;;  %v7244_v47 = vld [vmem:[%s7173_s7 + $0x38] sm:$0xff] }
 0x1a4   :  { %v7144_v58 = vadd.f32 %v622_v54, %v475_v49  ;;  %v733_v59 = vadd.f32 %v732_v51, %v731_v44  ;;  %v756_v60 = vrot.slane %v755_v52, 1  ;;  %v720_v44 = vld [vmem:[%s7173_s7 + $0x160] sm:$0xff]  ;;  %v717_v49 = vld [vmem:[%s7173_s7 + $0x148] sm:$0xff]  ;;  %v679_v51 = vld [vmem:[%s7173_s7 + $0x18] sm:$0xff] }
 0x1a5   :  { %808 = vmatmul.f32.vlgmr.msra.gmra.mxu3 %v740_v56  ;;  %v714_v54 = vld [vmem:[%s7173_s7 + $0x130] sm:$0xff]  ;;  %v676_v56 = vld [vmem:[%s7173_s7] sm:$0xff] }
 0x1a6   :  { %v741_v62 = vsel %vm726_vm3, %v7144_v58, 0.0  ;;  %v750_v0 = vmul.f32 %v7144_v58, %v7144_v58  ;;  %788 = vmatmul.f32.vlgmr.msra.gmra.mxu2 %v733_v59  ;;  %v757_v2 = vadd.f32 %v756_v60, %v755_v52  ;;  %v7250_v52 = vld [vmem:[%s7173_s7 + $0x20] sm:$0xff]  ;;  %v7256_v59 = vld [vmem:[%s7173_s7 + $0x8] sm:$0xff]  ;;  %v711_v60 = vld [vmem:[%s7173_s7 + $0x118] sm:$0xff] }
 0x1a7   :  { %v742_v4 = vrot.slane %v741_v62, 4  ;;  %852 = vmatpush.msra.mxu2 %v7003_v38 }
 0x1a8   :  { %v765_v30 = vsel %vm726_vm3, %v750_v0, 0.0  ;;  %848 = vmatmul.f32.vlgmr.msra.gmra.mxu1 %v757_v2  ;;  %v705_v0 = vld [vmem:[%s7173_s7 + $0xe8] sm:$0xff]  ;;  %v702_v2 = vld [vmem:[%s7173_s7 + $0xd0] sm:$0xff] }
 0x1a9   :  { %v743_v8 = vadd.f32 %v742_v4, %v741_v62  ;;  %v766_v9 = vrot.slane %v765_v30, 4  ;;  %853 = vmatpush.msra.mxu2 %v7012_v40  ;;  %v708_v62 = vld [vmem:[%s7173_s7 + $0x100] sm:$0xff]  ;;  %v699_v4 = vld [vmem:[%s7173_s7 + $0xb8] sm:$0xff] }
 0x1ab   :  { %v744_v11 = vrot.slane %v743_v8, 2  ;;  %v767_v12 = vadd.f32 %v766_v9, %v765_v30  ;;  %854 = vmatpush.msra.mxu2 %v7022_v43  ;;  %v761_v43 = vrot.slane %v760_v20, 2  ;;  %v696_v30 = vld [vmem:[%s7173_s7 + $0xa0] sm:$0xff]  ;;  %v690_v9 = vld [vmem:[%s7173_s7 + $0x70] sm:$0xff] }
 0x1ad   :  { %v745_v14 = vadd.f32 %v744_v11, %v743_v8  ;;  %v768_v15 = vrot.slane %v767_v12, 2  ;;  %855 = vmatpush.msra.mxu2 %v7031_v46  ;;  %v762_v46 = vadd.f32 %v761_v43, %v760_v20  ;;  %v693_v8 = vld [vmem:[%s7173_s7 + $0x88] sm:$0xff]  ;;  %v687_v11 = vld [vmem:[%s7173_s7 + $0x58] sm:$0xff] }
 0x1af   :  { %856 = vmatpush.msra.mxu2 %v7040_v48  ;;  %v746_v38 = vrot.slane %v745_v14, 1  ;;  %v769_v16 = vadd.f32 %v768_v15, %v767_v12  ;;  %v763_v48 = vrot.slane %v762_v46, 1  ;;  %v684_v12 = vld [vmem:[%s7173_s7 + $0x40] sm:$0xff]  ;;  %v678_v15 = vld [vmem:[%s7173_s7 + $0x10] sm:$0xff] }
 0x1b1   :  { %857 = vmatpush.msra.mxu2 %v7048_v50  ;;  %v747_v18 = vadd.f32 %v746_v38, %v745_v14  ;;  %v770_v19 = vrot.slane %v769_v16, 1  ;;  %v764_v50 = vadd.f32 %v763_v48, %v762_v46 }
 0x1b3   :  { %858 = vmatpush.msra.mxu2 %v7056_v53  ;;  %v771_v40 = vadd.f32 %v770_v19, %v769_v16  ;;  %v721_v53 = vld [vmem:[%s7173_s7 + $0x168] sm:$0xff] }
 0x1b4   :  { %828 = vmatmul.f32.vlgmr.msrb.gmra.mxu2 %v747_v18  ;;  %908 = vmatpush.msra.mxu0 %v721_v53 }
 0x1b5   :  { %859 = vmatpush.msra.mxu2 %v7061_v55  ;;  %888 = vmatmul.f32.vlgmr.msrb.gmra.mxu3 %v771_v40  ;;  %v7177_v55 = vld [vmem:[%s7173_s7 + $0x170] sm:$0xff] }
 0x1b6   :  { %928 = vmatpush.msrb.mxu1 %v7177_v55  ;;  %968 = vmatpush.msra.mxu3 %v721_v53  ;;  %v1088_v53 = vld [vmem:[%s7286_s11 + $0x168] sm:$0xff] }
 0x1b7   :  { %860 = vmatpush.msra.mxu2 %v7066_v57  ;;  %v718_v57 = vld [vmem:[%s7173_s7 + $0x150] sm:$0xff] }
 0x1b8   :  { %909 = vmatpush.msra.mxu0 %v718_v57  ;;  %969 = vmatpush.msra.mxu3 %v718_v57 }
 0x1b9   :  { %861 = vmatpush.msra.mxu2 %v7073_v61  ;;  %v7182_v61 = vld [vmem:[%s7173_s7 + $0x158] sm:$0xff] }
 0x1ba   :  { %929 = vmatpush.msrb.mxu1 %v7182_v61 }
 0x1bb   :  { %862 = vmatpush.msra.mxu2 %v7079_v63  ;;  %v715_v63 = vld [vmem:[%s7173_s7 + $0x138] sm:$0xff] }
 0x1bc   :  { %910 = vmatpush.msra.mxu0 %v715_v63  ;;  %970 = vmatpush.msra.mxu3 %v715_v63  ;;  %v1130_v63 = vld [vmem:[%s7286_s11 + $0x2b8] sm:$0xff] }
 0x1bd   :  { %863 = vmatpush.msra.mxu2 %v7085_v1  ;;  %v7186_v1 = vld [vmem:[%s7173_s7 + $0x140] sm:$0xff] }
 0x1be   :  { %930 = vmatpush.msrb.mxu1 %v7186_v1 }
 0x1bf   :  { %864 = vmatpush.msra.mxu2 %v7091_v3  ;;  %v712_v3 = vld [vmem:[%s7173_s7 + $0x120] sm:$0xff] }
 0x1c0   :  { %911 = vmatpush.msra.mxu0 %v712_v3  ;;  %971 = vmatpush.msra.mxu3 %v712_v3  ;;  %v1127_v3 = vld [vmem:[%s7286_s11 + $0x2a0] sm:$0xff] }
 0x1c1   :  { %865 = vmatpush.msra.mxu2 %v7097_v5  ;;  %v7191_v5 = vld [vmem:[%s7173_s7 + $0x128] sm:$0xff] }
 0x1c2   :  { %931 = vmatpush.msrb.mxu1 %v7191_v5 }
 0x1c3   :  { %866 = vmatpush.msra.mxu2 %v7103_v7  ;;  %v709_v7 = vld [vmem:[%s7173_s7 + $0x108] sm:$0xff] }
 0x1c4   :  { %912 = vmatpush.msra.mxu0 %v709_v7  ;;  %972 = vmatpush.msra.mxu3 %v709_v7  ;;  %v1124_v7 = vld [vmem:[%s7286_s11 + $0x288] sm:$0xff] }
 0x1c5   :  { %867 = vmatpush.msra.mxu2 %v7118_v10  ;;  %v7197_v10 = vld [vmem:[%s7173_s7 + $0x110] sm:$0xff]  ;;  %s6569_s7 = sld [smem:[%s9970_s0 + %s6871_s4]]   ;;  %s6886_s4 = smov 38  }
 0x1c6   :  { %868 = vmatmul.f32.vlgmr.msra.gmra.mxu2 %v764_v50  ;;  %932 = vmatpush.msrb.mxu1 %v7197_v10  ;;  %v1136_v50 = vld [vmem:[%s7286_s11 + $0x2e8] sm:$0xff] }
 0x1c7   :  { %913 = vmatpush.msra.mxu0 %v706_v21  ;;  %973 = vmatpush.msra.mxu3 %v706_v21  ;;  %v1121_v21 = vld [vmem:[%s7286_s11 + $0x270] sm:$0xff] }
 0x1c8   :  { %933 = vmatpush.msrb.mxu1 %v7202_v22  ;;  %948 = vmatpush.msrb.mxu2 %v723_v32 }
 0x1c9   :  { %914 = vmatpush.msra.mxu0 %v703_v23  ;;  %974 = vmatpush.msra.mxu3 %v703_v23 }
 0x1ca   :  { %934 = vmatpush.msrb.mxu1 %v7207_v24  ;;  %949 = vmatpush.msrb.mxu2 %v720_v44 }
 0x1cb   :  { %915 = vmatpush.msra.mxu0 %v700_v27  ;;  %975 = vmatpush.msra.mxu3 %v700_v27  ;;  %v1070_v27 = vld [vmem:[%s7286_s11 + $0xd8] sm:$0xff] }
 0x1cc   :  { %935 = vmatpush.msrb.mxu1 %v7211_v28  ;;  %950 = vmatpush.msrb.mxu2 %v717_v49 }
 0x1cd   :  { %916 = vmatpush.msra.mxu0 %v697_v29  ;;  %976 = vmatpush.msra.mxu3 %v697_v29  ;;  %v1115_v29 = vld [vmem:[%s7286_s11 + $0x240] sm:$0xff] }
 0x1ce   :  { %936 = vmatpush.msrb.mxu1 %v7216_v31  ;;  %951 = vmatpush.msrb.mxu2 %v714_v54 }
 0x1cf   :  { %917 = vmatpush.msra.mxu0 %v694_v33  ;;  %977 = vmatpush.msra.mxu3 %v694_v33  ;;  %v1112_v33 = vld [vmem:[%s7286_s11 + $0x228] sm:$0xff] }
 0x1d0   :  { %937 = vmatpush.msrb.mxu1 %v7222_v34  ;;  %952 = vmatpush.msrb.mxu2 %v711_v60 }
 0x1d1   :  { %918 = vmatpush.msra.mxu0 %v691_v35  ;;  %978 = vmatpush.msra.mxu3 %v691_v35 }
 0x1d2   :  { %938 = vmatpush.msrb.mxu1 %v7227_v36  ;;  %953 = vmatpush.msrb.mxu2 %v708_v62 }
 0x1d3   :  { %919 = vmatpush.msra.mxu0 %v688_v37  ;;  %979 = vmatpush.msra.mxu3 %v688_v37  ;;  %v1061_v37 = vld [vmem:[%s7286_s11 + $0x90] sm:$0xff] }
 0x1d4   :  { %939 = vmatpush.msrb.mxu1 %v7232_v39  ;;  %954 = vmatpush.msrb.mxu2 %v705_v0 }
 0x1d5   :  { %920 = vmatpush.msra.mxu0 %v685_v41  ;;  %980 = vmatpush.msra.mxu3 %v685_v41  ;;  %v1106_v41 = vld [vmem:[%s7286_s11 + $0x1f8] sm:$0xff] }
 0x1d6   :  { %940 = vmatpush.msrb.mxu1 %v7237_v42  ;;  %955 = vmatpush.msrb.mxu2 %v702_v2 }
 0x1d7   :  { %921 = vmatpush.msra.mxu0 %v682_v45  ;;  %981 = vmatpush.msra.mxu3 %v682_v45 }
 0x1d8   :  { %941 = vmatpush.msrb.mxu1 %v7244_v47  ;;  %956 = vmatpush.msrb.mxu2 %v699_v4 }
 0x1d9   :  { %922 = vmatpush.msra.mxu0 %v679_v51  ;;  %982 = vmatpush.msra.mxu3 %v679_v51 }
 0x1da   :  { %942 = vmatpush.msrb.mxu1 %v7250_v52  ;;  %957 = vmatpush.msrb.mxu2 %v696_v30 }
 0x1db   :  { %923 = vmatpush.msra.mxu0 %v676_v56  ;;  %983 = vmatpush.msra.mxu3 %v676_v56  ;;  %v725_v56 = vld [vmem:[%s6557_s19] sm:$0x1]  ;;  %s8721_s19 = sld [smem:[%s9970_s0 + %s6874_s16]]   ;;  %s6889_s16 = smov 40  }
 0x1dc   :  { %943 = vmatpush.msrb.mxu1 %v7256_v59  ;;  %958 = vmatpush.msrb.mxu2 %v693_v8 }
 0x1dd   :  { %988 = vmatpush.msrb.mxu0 %v7177_v55  ;;  %1207 = vmatpush.msrb.mxu3 %v1136_v50  ;;  %v1133_v55 = vld [vmem:[%s7286_s11 + $0x2d0] sm:$0xff]  ;;  %v1163_v50 = vld [vmem:[%s7286_s11 + $0x3c0] sm:$0xff] }
 0x1de   :  { %1008 = vmatpush.msra.mxu1 %v723_v32  ;;  %959 = vmatpush.msrb.mxu2 %v690_v9 }
 0x1df   :  { %989 = vmatpush.msrb.mxu0 %v7182_v61  ;;  %v1085_v61 = vld [vmem:[%s7286_s11 + $0x150] sm:$0xff]  ;;  %1208 = vmatpush.msrb.mxu3 %v1133_v55  ;;  %v1134_v55 = vld [vmem:[%s7286_s11 + $0x2d8] sm:$0xff] }
 0x1e0   :  { %1009 = vmatpush.msra.mxu1 %v720_v44  ;;  %960 = vmatpush.msrb.mxu2 %v687_v11  ;;  %v724_v44 = vld [vmem:[%s6556_s15] sm:$0x1]  ;;  %s8714_s15 = sld [smem:[%s9970_s0 + %s6873_s12]]   ;;  %s6888_s12 = smov 41  }
 0x1e1   :  { %990 = vmatpush.msrb.mxu0 %v7186_v1  ;;  %v1082_v1 = vld [vmem:[%s7286_s11 + $0x138] sm:$0xff]  ;;  %1209 = vmatpush.msrb.mxu3 %v1130_v63  ;;  %v1068_v63 = vld [vmem:[%s7286_s11 + $0xc8] sm:$0xff] }
 0x1e2   :  { %1010 = vmatpush.msra.mxu1 %v717_v49  ;;  %961 = vmatpush.msrb.mxu2 %v684_v12  ;;  %v1055_v49 = vld [vmem:[%s7286_s11 + $0x60] sm:$0xff] }
 0x1e3   :  { %991 = vmatpush.msrb.mxu0 %v7191_v5  ;;  %v1079_v5 = vld [vmem:[%s7286_s11 + $0x120] sm:$0xff]  ;;  %1210 = vmatpush.msrb.mxu3 %v1127_v3  ;;  %v1176_v3 = vld [vmem:[%s7286_s11 + $0x428] sm:$0xff] }
 0x1e4   :  { %1011 = vmatpush.msra.mxu1 %v714_v54  ;;  %962 = vmatpush.msrb.mxu2 %v681_v13  ;;  %v1184_v54 = vld [vmem:[%s7286_s11 + $0x468] sm:$0xff] }
 0x1e5   :  { %992 = vmatpush.msrb.mxu0 %v7197_v10  ;;  %v1076_v10 = vld [vmem:[%s7286_s11 + $0x108] sm:$0xff]  ;;  %1211 = vmatpush.msrb.mxu3 %v1124_v7  ;;  %v1065_v7 = vld [vmem:[%s7286_s11 + $0xb0] sm:$0xff] }
 0x1e6   :  { %1012 = vmatpush.msra.mxu1 %v711_v60  ;;  %963 = vmatpush.msrb.mxu2 %v678_v15  ;;  %v1100_v60 = vld [vmem:[%s7286_s11 + $0x1c8] sm:$0xff] }
 0x1e7   :  { %993 = vmatpush.msrb.mxu0 %v7202_v22  ;;  %v1073_v22 = vld [vmem:[%s7286_s11 + $0xf0] sm:$0xff]  ;;  %1212 = vmatpush.msrb.mxu3 %v1121_v21 }
 0x1e8   :  { %1013 = vmatpush.msra.mxu1 %v708_v62  ;;  %1187 = vmatpush.msra.mxu2 %v1088_v53  ;;  %v1071_v53 = vld [vmem:[%s7286_s11 + $0xe0] sm:$0xff]  ;;  %v1173_v21 = vld [vmem:[%s7286_s11 + $0x410] sm:$0xff] }
 0x1e9   :  { %994 = vmatpush.msrb.mxu0 %v7207_v24  ;;  %v1118_v24 = vld [vmem:[%s7286_s11 + $0x258] sm:$0xff] }
 0x1ea   :  { %1014 = vmatpush.msra.mxu1 %v705_v0  ;;  %1188 = vmatpush.msra.mxu2 %v1085_v61  ;;  %v1181_v0 = vld [vmem:[%s7286_s11 + $0x450] sm:$0xff]  ;;  %v1160_v61 = vld [vmem:[%s7286_s11 + $0x3a8] sm:$0xff] }
 0x1eb   :  { %995 = vmatpush.msrb.mxu0 %v7211_v28  ;;  %1213 = vmatpush.msrb.mxu3 %v1118_v24  ;;  %v1125_v24 = vld [vmem:[%s7286_s11 + $0x290] sm:$0xff] }
 0x1ec   :  { %1015 = vmatpush.msra.mxu1 %v702_v2  ;;  %1189 = vmatpush.msra.mxu2 %v1082_v1  ;;  %v1052_v2 = vld [vmem:[%s7286_s11 + $0x48] sm:$0xff]  ;;  %v1131_v1 = vld [vmem:[%s7286_s11 + $0x2c0] sm:$0xff] }
 0x1ed   :  { %996 = vmatpush.msrb.mxu0 %v7216_v31  ;;  %v1067_v31 = vld [vmem:[%s7286_s11 + $0xc0] sm:$0xff]  ;;  %1214 = vmatpush.msrb.mxu3 %v1115_v29 }
 0x1ee   :  { %1016 = vmatpush.msra.mxu1 %v699_v4  ;;  %1190 = vmatpush.msra.mxu2 %v1079_v5  ;;  %v1086_v4 = vld [vmem:[%s7286_s11 + $0x158] sm:$0xff]  ;;  %v1157_v5 = vld [vmem:[%s7286_s11 + $0x390] sm:$0xff]  ;;  %v1059_v29 = vld [vmem:[%s7286_s11 + $0x80] sm:$0xff] }
 0x1ef   :  { %997 = vmatpush.msrb.mxu0 %v7222_v34  ;;  %v1064_v34 = vld [vmem:[%s7286_s11 + $0xa8] sm:$0xff]  ;;  %1215 = vmatpush.msrb.mxu3 %v1112_v33 }
 0x1f0   :  { %1017 = vmatpush.msra.mxu1 %v696_v30  ;;  %1191 = vmatpush.msra.mxu2 %v1076_v10  ;;  %v1128_v10 = vld [vmem:[%s7286_s11 + $0x2a8] sm:$0xff] }
 0x1f1   :  { %998 = vmatpush.msrb.mxu0 %v7227_v36  ;;  %v1109_v36 = vld [vmem:[%s7286_s11 + $0x210] sm:$0xff]  ;;  %v1148_v33 = vld [vmem:[%s7286_s11 + $0x348] sm:$0xff] }
 0x1f2   :  { %1018 = vmatpush.msra.mxu1 %v693_v8  ;;  %1192 = vmatpush.msra.mxu2 %v1073_v22  ;;  %v1097_v8 = vld [vmem:[%s7286_s11 + $0x1b0] sm:$0xff]  ;;  %v1154_v22 = vld [vmem:[%s7286_s11 + $0x378] sm:$0xff] }
 0x1f3   :  { %999 = vmatpush.msrb.mxu0 %v7232_v39  ;;  %1216 = vmatpush.msrb.mxu3 %v1109_v36  ;;  %v1164_v36 = vld [vmem:[%s7286_s11 + $0x3c8] sm:$0xff] }
 0x1f4   :  { %1019 = vmatpush.msra.mxu1 %v690_v9  ;;  %1193 = vmatpush.msra.mxu2 %v1070_v27  ;;  %v1083_v9 = vld [vmem:[%s7286_s11 + $0x140] sm:$0xff]  ;;  %v1170_v27 = vld [vmem:[%s7286_s11 + $0x3f8] sm:$0xff] }
 0x1f5   :  { %1000 = vmatpush.msrb.mxu0 %v7237_v42  ;;  %v1058_v42 = vld [vmem:[%s7286_s11 + $0x78] sm:$0xff]  ;;  %1217 = vmatpush.msrb.mxu3 %v1106_v41 }
 0x1f6   :  { %1020 = vmatpush.msra.mxu1 %v687_v11  ;;  %1194 = vmatpush.msra.mxu2 %v1067_v31  ;;  %v1049_v11 = vld [vmem:[%s7286_s11 + $0x30] sm:$0xff]  ;;  %v1122_v31 = vld [vmem:[%s7286_s11 + $0x278] sm:$0xff] }
 0x1f7   :  { %1001 = vmatpush.msrb.mxu0 %v7244_v47  ;;  %v1103_v47 = vld [vmem:[%s7286_s11 + $0x1e0] sm:$0xff]  ;;  %v1142_v41 = vld [vmem:[%s7286_s11 + $0x318] sm:$0xff] }
 0x1f8   :  { %1021 = vmatpush.msra.mxu1 %v684_v12  ;;  %1195 = vmatpush.msra.mxu2 %v1064_v34  ;;  %v1175_v12 = vld [vmem:[%s7286_s11 + $0x420] sm:$0xff]  ;;  %v1056_v34 = vld [vmem:[%s7286_s11 + $0x68] sm:$0xff] }
 0x1f9   :  { %1002 = vmatpush.msrb.mxu0 %v7250_v52  ;;  %1218 = vmatpush.msrb.mxu3 %v1103_v47  ;;  %v1090_v47 = vld [vmem:[%s7286_s11 + $0x178] sm:$0xff] }
 0x1fa   :  { %1022 = vmatpush.msra.mxu1 %v681_v13  ;;  %1196 = vmatpush.msra.mxu2 %v1061_v37  ;;  %v1094_v13 = vld [vmem:[%s7286_s11 + $0x198] sm:$0xff]  ;;  %v1145_v37 = vld [vmem:[%s7286_s11 + $0x330] sm:$0xff] }
 0x1fb   :  { %1003 = vmatpush.msrb.mxu0 %v7256_v59  ;;  %v1089_v59 = vld [vmem:[%s7286_s11 + $0x170] sm:$0xff]  ;;  %1219 = vmatpush.msrb.mxu3 %v1100_v60  ;;  %v1132_v60 = vld [vmem:[%s7286_s11 + $0x2c8] sm:$0xff] }
 0x1fc   :  { %1023 = vmatpush.msra.mxu1 %v678_v15  ;;  %1197 = vmatpush.msra.mxu2 %v1058_v42  ;;  %v1080_v15 = vld [vmem:[%s7286_s11 + $0x128] sm:$0xff]  ;;  %v1050_v42 = vld [vmem:[%s7286_s11 + $0x38] sm:$0xff] }
 0x1fd   :  { %1220 = vmatpush.msrb.mxu3 %v1097_v8  ;;  %v1069_v8 = vld [vmem:[%s7286_s11 + $0xd0] sm:$0xff] }
 0x1fe   :  { %1198 = vmatpush.msra.mxu2 %v1055_v49  ;;  %v1044_v49 = vld [vmem:[%s7286_s11 + $0x8] sm:$0xff] }
 0x1ff   :  { %1221 = vmatpush.msrb.mxu3 %v1094_v13  ;;  %v1066_v13 = vld [vmem:[%s7286_s11 + $0xb8] sm:$0xff] }
 0x200   :  { %1199 = vmatpush.msra.mxu2 %v1052_v2  ;;  %v1075_v2 = vld [vmem:[%s7286_s11 + $0x100] sm:$0xff] }
 0x202   :  { %1200 = vmatpush.msra.mxu2 %v1049_v11  ;;  %v1116_v11 = vld [vmem:[%s7286_s11 + $0x248] sm:$0xff] }
 0x225   :  { %v849_v18 = vpop.f32.mrf.mxu1 }
 0x228   :  { %v809_v38 = vpop.f32.mrf.mxu3 }
 0x229   :  { %v789_v6 = vpop.f32.mrf.mxu2 }
 0x22a   :  { %v810_v16 = vadd.f32 %v809_v38, %v789_v6  ;;  %v1178_v6 = vld [vmem:[%s7286_s11 + $0x438] sm:$0xff] }
 0x22b   :  { %v1046_v38 = vld [vmem:[%s7286_s11 + $0x18] sm:$0xff] }
 0x22c   :  { %1201 = vmatpush.msra.mxu2 %v1046_v38  ;;  %v1158_v38 = vld [vmem:[%s7286_s11 + $0x398] sm:$0xff] }
 0x237   :  { %v829_v14 = vpop.f32.mrf.mxu2 }
 0x238   :  { %v7289_v17 = vadd.f32 %v829_v14, %v810_v16  ;;  %v889_v20 = vpop.f32.mrf.mxu3  ;;  %v1172_v14 = vld [vmem:[%s7286_s11 + $0x408] sm:$0xff]  ;;  %v1091_v16 = vld [vmem:[%s7286_s11 + $0x180] sm:$0xff] }
 0x239   :  { %1222 = vmatpush.msrb.mxu3 %v1091_v16  ;;  %v1063_v16 = vld [vmem:[%s7286_s11 + $0xa0] sm:$0xff] }
 0x23a   :  { %v892_v43 = vmul.f32 %v7289_v17, %v7289_v17 }
 0x249   :  { %v869_v19 = vpop.f32.mrf.mxu2 }
 0x24a   :  { %v870_v40 = vadd.f32 %v869_v19, %v849_v18  ;;  %v1077_v18 = vld [vmem:[%s7286_s11 + $0x110] sm:$0xff] }
 0x24b   :  { %v1185_v19 = vld [vmem:[%s7286_s11 + $0x470] sm:$0xff] }
 0x24c   :  { %v890_v46 = vadd.f32 %v889_v20, %v870_v40  ;;  %v1043_v40 = vld [vmem:[%s7286_s11] sm:$0xff]  ;;  %v1166_v20 = vld [vmem:[%s7286_s11 + $0x3d8] sm:$0xff] }
 0x24d   :  { %1202 = vmatpush.msra.mxu2 %v1043_v40  ;;  %v1060_v40 = vld [vmem:[%s7286_s11 + $0x88] sm:$0xff] }
 0x24e   :  { %v893_v48 = vsub.f32 %v890_v46, %v892_v43  ;;  %v1074_v43 = vld [vmem:[%s7286_s11 + $0xf8] sm:$0xff]  ;;  %v1137_v46 = vld [vmem:[%s7286_s11 + $0x2f0] sm:$0xff] }
 0x250   :  { %v894_v57 = vadd.f32 1e-05, %v893_v48  ;;  %v1182_v48 = vld [vmem:[%s7286_s11 + $0x458] sm:$0xff] }
 0x252   :  { %6829 = vrsqrt.f32 %v894_v57  ;;  %vm901_vm5 = vweird.f32 %v894_v57 }
 0x258   :  { %v6830_v23 = vpop.eup %6829 }
 0x259   :  { %v896_v28 = vmul.f32 %v6830_v23, %v894_v57  ;;  %vm902_vm4 = vweird.f32 %v6830_v23  ;;  %v1179_v57 = vld [vmem:[%s7286_s11 + $0x440] sm:$0xff] }
 0x25a   :  { %vm903_vm6 = vmor %vm901_vm5, %vm902_vm4  ;;  %vm5905_vm4 = vcmask 211968  }
 0x25b   :  { %v897_v32 = vmul.f32 %v6830_v23, %v896_v28  ;;  %v1151_v28 = vld [vmem:[%s7286_s11 + $0x360] sm:$0xff] }
 0x25d   :  { %v898_v35 = vmul.f32 0.5, %v897_v32  ;;  %v1167_v32 = vld [vmem:[%s7286_s11 + $0x3e0] sm:$0xff] }
 0x25f   :  { %v899_v39 = vsub.f32 1.5, %v898_v35  ;;  %v1119_v35 = vld [vmem:[%s7286_s11 + $0x260] sm:$0xff] }
 0x261   :  { %v900_v45 = vmul.f32 %v6830_v23, %v899_v39  ;;  %v1053_v39 = vld [vmem:[%s7286_s11 + $0x50] sm:$0xff] }
 0x263   :  { %v904_v51 = vsel %vm903_vm6, %v6830_v23, %v900_v45  ;;  %v1062_v23 = vld [vmem:[%s7286_s11 + $0x98] sm:$0xff]  ;;  %v1047_v45 = vld [vmem:[%s7286_s11 + $0x20] sm:$0xff] }
 0x264   :  { %v905_v52 = vmul.f32 %v904_v51, %v724_v44  ;;  %v1139_v44 = vld [vmem:[%s7286_s11 + $0x300] sm:$0xff] }
 0x265   :  { %v1087_v51 = vld [vmem:[%s7286_s11 + $0x160] sm:$0xff] }
 0x266   :  { %924 = vmatmul.f32.vlgmr.msra.gmra.mxu0 %v905_v52  ;;  %944 = vmatmul.f32.vlgmr.msrb.gmra.mxu1 %v905_v52  ;;  %v906_v62 = vmul.f32 %v905_v52, %v7289_v17  ;;  %v1169_v17 = vld [vmem:[%s7286_s11 + $0x3f0] sm:$0xff] }
 0x267   :  { %964 = vmatmul.f32.vlgmr.msrb.gmra.mxu2 %v905_v52  ;;  %1227 = vmatpush.msra.mxu0 %v1184_v54  ;;  %v1138_v52 = vld [vmem:[%s7286_s11 + $0x2f8] sm:$0xff]  ;;  %v1084_v54 = vld [vmem:[%s7286_s11 + $0x148] sm:$0xff] }
 0x268   :  { %v907_v30 = vsub.f32 %v725_v56, %v906_v62  ;;  %1247 = vmatpush.msrb.mxu1 %v1089_v59  ;;  %1267 = vmatpush.msrb.mxu2 %v1137_v46  ;;  %v1135_v56 = vld [vmem:[%s7286_s11 + $0x2e0] sm:$0xff]  ;;  %v1081_v59 = vld [vmem:[%s7286_s11 + $0x130] sm:$0xff]  ;;  %v1078_v62 = vld [vmem:[%s7286_s11 + $0x118] sm:$0xff] }
 0x269   :  { %1228 = vmatpush.msra.mxu0 %v1181_v0  ;;  %v1129_v0 = vld [vmem:[%s7286_s11 + $0x2b0] sm:$0xff]  ;;  %v1152_v46 = vld [vmem:[%s7286_s11 + $0x368] sm:$0xff] }
 0x26a   :  { %984 = vmatmul.f32.vlgmr.msra.gmra.mxu3 %v907_v30  ;;  %1248 = vmatpush.msrb.mxu1 %v1086_v4  ;;  %v1126_v4 = vld [vmem:[%s7286_s11 + $0x298] sm:$0xff] }
 0x26b   :  { %1229 = vmatpush.msra.mxu0 %v1178_v6  ;;  %1287 = vmatpush.msra.mxu3 %v1185_v19  ;;  %v1123_v6 = vld [vmem:[%s7286_s11 + $0x280] sm:$0xff] }
 0x26c   :  { %1249 = vmatpush.msrb.mxu1 %v1083_v9  ;;  %1268 = vmatpush.msrb.mxu2 %v1134_v55  ;;  %v1120_v9 = vld [vmem:[%s7286_s11 + $0x268] sm:$0xff]  ;;  %v1155_v19 = vld [vmem:[%s7286_s11 + $0x380] sm:$0xff]  ;;  %v1149_v55 = vld [vmem:[%s7286_s11 + $0x350] sm:$0xff] }
 0x26d   :  { %1230 = vmatpush.msra.mxu0 %v1175_v12  ;;  %1288 = vmatpush.msra.mxu3 %v1182_v48  ;;  %v1161_v12 = vld [vmem:[%s7286_s11 + $0x3b0] sm:$0xff] }
 0x26e   :  { %1004 = vmatmul.f32.vlgmr.msrb.gmra.mxu0 %v907_v30  ;;  %1024 = vmatmul.f32.vlgmr.msra.gmra.mxu1 %v907_v30  ;;  %v1072_v30 = vld [vmem:[%s7286_s11 + $0xe8] sm:$0xff]  ;;  %v1057_v48 = vld [vmem:[%s7286_s11 + $0x70] sm:$0xff] }
 0x26f   :  { %1231 = vmatpush.msra.mxu0 %v1172_v14  ;;  %1250 = vmatpush.msrb.mxu1 %v1080_v15  ;;  %v1117_v14 = vld [vmem:[%s7286_s11 + $0x250] sm:$0xff] }
 0x270   :  { %1289 = vmatpush.msra.mxu3 %v1179_v57  ;;  %1269 = vmatpush.msrb.mxu2 %v1131_v1  ;;  %v1113_v15 = vld [vmem:[%s7286_s11 + $0x230] sm:$0xff]  ;;  %v1054_v57 = vld [vmem:[%s7286_s11 + $0x58] sm:$0xff] }
 0x271   :  { %1232 = vmatpush.msra.mxu0 %v1169_v17  ;;  %1251 = vmatpush.msrb.mxu1 %v1077_v18  ;;  %v1114_v17 = vld [vmem:[%s7286_s11 + $0x238] sm:$0xff] }
 0x272   :  { %1290 = vmatpush.msra.mxu3 %v1176_v3  ;;  %1270 = vmatpush.msrb.mxu2 %v1128_v10  ;;  %v1110_v18 = vld [vmem:[%s7286_s11 + $0x218] sm:$0xff]  ;;  %v1051_v3 = vld [vmem:[%s7286_s11 + $0x40] sm:$0xff] }
 0x273   :  { %1233 = vmatpush.msra.mxu0 %v1166_v20  ;;  %1252 = vmatpush.msrb.mxu1 %v1074_v43  ;;  %v1111_v20 = vld [vmem:[%s7286_s11 + $0x220] sm:$0xff]  ;;  %v1146_v1 = vld [vmem:[%s7286_s11 + $0x338] sm:$0xff] }
 0x274   :  { %1291 = vmatpush.msra.mxu3 %v1173_v21  ;;  %1271 = vmatpush.msrb.mxu2 %v1125_v24  ;;  %v1107_v43 = vld [vmem:[%s7286_s11 + $0x200] sm:$0xff]  ;;  %v1048_v21 = vld [vmem:[%s7286_s11 + $0x28] sm:$0xff] }
 0x275   :  { %1234 = vmatpush.msra.mxu0 %v1163_v50  ;;  %1253 = vmatpush.msrb.mxu1 %v1071_v53  ;;  %v1108_v50 = vld [vmem:[%s7286_s11 + $0x208] sm:$0xff]  ;;  %v1143_v10 = vld [vmem:[%s7286_s11 + $0x320] sm:$0xff] }
 0x276   :  { %1292 = vmatpush.msra.mxu3 %v1170_v27  ;;  %1272 = vmatpush.msrb.mxu2 %v1122_v31  ;;  %v1104_v53 = vld [vmem:[%s7286_s11 + $0x1e8] sm:$0xff]  ;;  %v1045_v27 = vld [vmem:[%s7286_s11 + $0x10] sm:$0xff] }
 0x277   :  { %1235 = vmatpush.msra.mxu0 %v1160_v61  ;;  %1254 = vmatpush.msrb.mxu1 %v1068_v63  ;;  %v1105_v61 = vld [vmem:[%s7286_s11 + $0x1f0] sm:$0xff]  ;;  %v1140_v24 = vld [vmem:[%s7286_s11 + $0x308] sm:$0xff] }
 0x278   :  { %1293 = vmatpush.msra.mxu3 %v1167_v32  ;;  %1273 = vmatpush.msrb.mxu2 %v1119_v35  ;;  %v1101_v63 = vld [vmem:[%s7286_s11 + $0x1d0] sm:$0xff] }
 0x279   :  { %1236 = vmatpush.msra.mxu0 %v1157_v5  ;;  %1255 = vmatpush.msrb.mxu1 %v1065_v7  ;;  %v1102_v5 = vld [vmem:[%s7286_s11 + $0x1d8] sm:$0xff]  ;;  %v1093_v31 = vld [vmem:[%s7286_s11 + $0x190] sm:$0xff] }
 0x27a   :  { %1294 = vmatpush.msra.mxu3 %v1164_v36  ;;  %1274 = vmatpush.msrb.mxu2 %v1116_v11  ;;  %v1098_v7 = vld [vmem:[%s7286_s11 + $0x1b8] sm:$0xff]  ;;  %v1507_v11 = vld [vmem:[%s7434_s23 + $0x450] sm:$0xff] }
 0x27b   :  { %1237 = vmatpush.msra.mxu0 %v1154_v22  ;;  %1256 = vmatpush.msrb.mxu1 %v1062_v23  ;;  %v1099_v22 = vld [vmem:[%s7286_s11 + $0x1c0] sm:$0xff] }
 0x27c   :  { %1295 = vmatpush.msra.mxu3 %v1161_v12  ;;  %1275 = vmatpush.msrb.mxu2 %v1113_v15  ;;  %v1095_v23 = vld [vmem:[%s7286_s11 + $0x1a0] sm:$0xff]  ;;  %v1180_v12 = vld [vmem:[%s7286_s11 + $0x448] sm:$0xff]  ;;  %v1504_v15 = vld [vmem:[%s7434_s23 + $0x438] sm:$0xff] }
 0x27d   :  { %1238 = vmatpush.msra.mxu0 %v1151_v28  ;;  %1257 = vmatpush.msrb.mxu1 %v1059_v29  ;;  %v1096_v28 = vld [vmem:[%s7286_s11 + $0x1a8] sm:$0xff] }
 0x27e   :  { %1296 = vmatpush.msra.mxu3 %v1158_v38  ;;  %1276 = vmatpush.msrb.mxu2 %v1110_v18  ;;  %v1092_v29 = vld [vmem:[%s7286_s11 + $0x188] sm:$0xff]  ;;  %v1177_v38 = vld [vmem:[%s7286_s11 + $0x430] sm:$0xff]  ;;  %v1501_v18 = vld [vmem:[%s7434_s23 + $0x420] sm:$0xff] }
 0x27f   :  { %1239 = vmatpush.msra.mxu0 %v1148_v33  ;;  %1258 = vmatpush.msrb.mxu1 %v1056_v34 }
 0x280   :  { %1297 = vmatpush.msra.mxu3 %v1155_v19  ;;  %1277 = vmatpush.msrb.mxu2 %v1107_v43  ;;  %v1174_v19 = vld [vmem:[%s7286_s11 + $0x418] sm:$0xff]  ;;  %v1498_v43 = vld [vmem:[%s7434_s23 + $0x408] sm:$0xff] }
 0x281   :  { %1240 = vmatpush.msra.mxu0 %v1145_v37  ;;  %1259 = vmatpush.msrb.mxu1 %v1053_v39 }
 0x282   :  { %1298 = vmatpush.msra.mxu3 %v1152_v46  ;;  %1278 = vmatpush.msrb.mxu2 %v1104_v53  ;;  %v1171_v46 = vld [vmem:[%s7286_s11 + $0x400] sm:$0xff]  ;;  %v1495_v53 = vld [vmem:[%s7434_s23 + $0x3f0] sm:$0xff] }
 0x283   :  { %1241 = vmatpush.msra.mxu0 %v1142_v41  ;;  %1260 = vmatpush.msrb.mxu1 %v1050_v42 }
 0x284   :  { %1299 = vmatpush.msra.mxu3 %v1149_v55  ;;  %1279 = vmatpush.msrb.mxu2 %v1101_v63  ;;  %v1168_v55 = vld [vmem:[%s7286_s11 + $0x3e8] sm:$0xff]  ;;  %v1492_v63 = vld [vmem:[%s7434_s23 + $0x3d8] sm:$0xff] }
 0x285   :  { %1242 = vmatpush.msra.mxu0 %v1139_v44  ;;  %1261 = vmatpush.msrb.mxu1 %v1047_v45 }
 0x286   :  { %1300 = vmatpush.msra.mxu3 %v1146_v1  ;;  %1280 = vmatpush.msrb.mxu2 %v1098_v7  ;;  %v1165_v1 = vld [vmem:[%s7286_s11 + $0x3d0] sm:$0xff]  ;;  %v1489_v7 = vld [vmem:[%s7434_s23 + $0x3c0] sm:$0xff] }
 0x287   :  { %1307 = vmatpush.msrb.mxu0 %v1090_v47  ;;  %1262 = vmatpush.msrb.mxu1 %v1044_v49 }
 0x288   :  { %1301 = vmatpush.msra.mxu3 %v1143_v10  ;;  %1281 = vmatpush.msrb.mxu2 %v1095_v23  ;;  %v1162_v10 = vld [vmem:[%s7286_s11 + $0x3b8] sm:$0xff]  ;;  %v1486_v23 = vld [vmem:[%s7434_s23 + $0x3a8] sm:$0xff] }
 0x289   :  { %1308 = vmatpush.msrb.mxu0 %v1087_v51  ;;  %1327 = vmatpush.msra.mxu1 %v1138_v52 }
 0x28a   :  { %1302 = vmatpush.msra.mxu3 %v1140_v24  ;;  %1282 = vmatpush.msrb.mxu2 %v1092_v29  ;;  %v1159_v24 = vld [vmem:[%s7286_s11 + $0x3a0] sm:$0xff]  ;;  %v1483_v29 = vld [vmem:[%s7434_s23 + $0x390] sm:$0xff] }
 0x28b   :  { %1309 = vmatpush.msrb.mxu0 %v1084_v54  ;;  %1328 = vmatpush.msra.mxu1 %v1135_v56 }
 0x28d   :  { %1310 = vmatpush.msrb.mxu0 %v1081_v59  ;;  %1329 = vmatpush.msra.mxu1 %v1132_v60 }
 0x28f   :  { %1311 = vmatpush.msrb.mxu0 %v1078_v62  ;;  %1330 = vmatpush.msra.mxu1 %v1129_v0  ;;  %v1414_v62 = vld [vmem:[%s7434_s23 + $0x168] sm:$0xff] }
 0x290   :  { %v1462_v0 = vld [vmem:[%s7434_s23 + $0x2e8] sm:$0xff] }
 0x291   :  { %1312 = vmatpush.msrb.mxu0 %v1075_v2  ;;  %1331 = vmatpush.msra.mxu1 %v1126_v4  ;;  %v1411_v2 = vld [vmem:[%s7434_s23 + $0x150] sm:$0xff] }
 0x292   :  { %v1459_v4 = vld [vmem:[%s7434_s23 + $0x2d0] sm:$0xff] }
 0x293   :  { %1313 = vmatpush.msrb.mxu0 %v1072_v30  ;;  %1332 = vmatpush.msra.mxu1 %v1123_v6  ;;  %v1510_v30 = vld [vmem:[%s7434_s23 + $0x468] sm:$0xff]  ;;  %v1183_v6 = vld [vmem:[%s7286_s11 + $0x460] sm:$0xff] }
 0x295   :  { %1314 = vmatpush.msrb.mxu0 %v1069_v8  ;;  %1333 = vmatpush.msra.mxu1 %v1120_v9  ;;  %v1408_v8 = vld [vmem:[%s7434_s23 + $0x138] sm:$0xff] }
 0x296   :  { %v1456_v9 = vld [vmem:[%s7434_s23 + $0x2b8] sm:$0xff] }
 0x297   :  { %1315 = vmatpush.msrb.mxu0 %v1066_v13  ;;  %1334 = vmatpush.msra.mxu1 %v1117_v14  ;;  %v1405_v13 = vld [vmem:[%s7434_s23 + $0x120] sm:$0xff] }
 0x298   :  { %v1453_v14 = vld [vmem:[%s7434_s23 + $0x2a0] sm:$0xff] }
 0x299   :  { %1316 = vmatpush.msrb.mxu0 %v1063_v16  ;;  %1335 = vmatpush.msra.mxu1 %v1114_v17  ;;  %v1402_v16 = vld [vmem:[%s7434_s23 + $0x108] sm:$0xff] }
 0x29a   :  { %v1450_v17 = vld [vmem:[%s7434_s23 + $0x288] sm:$0xff] }
 0x29b   :  { %1317 = vmatpush.msrb.mxu0 %v1060_v40  ;;  %1336 = vmatpush.msra.mxu1 %v1111_v20  ;;  %v1399_v40 = vld [vmem:[%s7434_s23 + $0xf0] sm:$0xff] }
 0x29c   :  { %v1447_v20 = vld [vmem:[%s7434_s23 + $0x270] sm:$0xff] }
 0x29d   :  { %1318 = vmatpush.msrb.mxu0 %v1057_v48  ;;  %1337 = vmatpush.msra.mxu1 %v1108_v50  ;;  %v1396_v48 = vld [vmem:[%s7434_s23 + $0xd8] sm:$0xff] }
 0x29e   :  { %v1444_v50 = vld [vmem:[%s7434_s23 + $0x258] sm:$0xff] }
 0x29f   :  { %1319 = vmatpush.msrb.mxu0 %v1054_v57  ;;  %1338 = vmatpush.msra.mxu1 %v1105_v61  ;;  %v1393_v57 = vld [vmem:[%s7434_s23 + $0xc0] sm:$0xff] }
 0x2a0   :  { %v1441_v61 = vld [vmem:[%s7434_s23 + $0x240] sm:$0xff] }
 0x2a1   :  { %1320 = vmatpush.msrb.mxu0 %v1051_v3  ;;  %1339 = vmatpush.msra.mxu1 %v1102_v5  ;;  %v1390_v3 = vld [vmem:[%s7434_s23 + $0xa8] sm:$0xff] }
 0x2a2   :  { %v1438_v5 = vld [vmem:[%s7434_s23 + $0x228] sm:$0xff] }
 0x2a3   :  { %1321 = vmatpush.msrb.mxu0 %v1048_v21  ;;  %1340 = vmatpush.msra.mxu1 %v1099_v22  ;;  %v1387_v21 = vld [vmem:[%s7434_s23 + $0x90] sm:$0xff] }
 0x2a4   :  { %v1435_v22 = vld [vmem:[%s7434_s23 + $0x210] sm:$0xff] }
 0x2a5   :  { %1322 = vmatpush.msrb.mxu0 %v1045_v27  ;;  %1341 = vmatpush.msra.mxu1 %v1096_v28  ;;  %v1384_v27 = vld [vmem:[%s7434_s23 + $0x78] sm:$0xff] }
 0x2a6   :  { %v1432_v28 = vld [vmem:[%s7434_s23 + $0x1f8] sm:$0xff] }
 0x2a7   :  { %1342 = vmatpush.msra.mxu1 %v1093_v31  ;;  %v1156_v31 = vld [vmem:[%s7286_s11 + $0x388] sm:$0xff] }
 0x2e3   :  { %v925_v32 = vpop.f32.mrf.mxu0  ;;  %v945_v33 = vpop.f32.mrf.mxu1 }
 0x2e4   :  { %v1029_v34 = vperm.slane %v945_v33, 0  ;;  %v1028_v35 = vperm.slane %v925_v32, 0  ;;  %v1381_v32 = vld [vmem:[%s7434_s23 + $0x60] sm:$0xff] }
 0x2e5   :  { %v1429_v33 = vld [vmem:[%s7434_s23 + $0x1e0] sm:$0xff] }
 0x2e6   :  { %v1032_v42 = vmul.f32 %v1029_v34, %v7132_v25  ;;  %v1031_v51 = vmul.f32 %v1028_v35, %v7134_v26  ;;  %v1186_v26 = vld [vmem:[%s7286_s11 + $0x478] sm:$0xff]  ;;  %v1153_v35 = vld [vmem:[%s7286_s11 + $0x370] sm:$0xff] }
 0x2e7   :  { %v1480_v34 = vld [vmem:[%s7434_s23 + $0x378] sm:$0xff] }
 0x2ea   :  { %v965_v36 = vpop.f32.mrf.mxu2 }
 0x2eb   :  { %v1030_v37 = vperm.slane %v965_v36, 0  ;;  %v1005_v39 = vpop.f32.mrf.mxu0  ;;  %v1025_v41 = vpop.f32.mrf.mxu1  ;;  %v1378_v36 = vld [vmem:[%s7434_s23 + $0x48] sm:$0xff] }
 0x2ec   :  { %v1035_v44 = vperm.slane %v1005_v39, 0  ;;  %v1036_v45 = vperm.slane %v1025_v41, 0  ;;  %v1477_v39 = vld [vmem:[%s7434_s23 + $0x360] sm:$0xff]  ;;  %v1150_v41 = vld [vmem:[%s7286_s11 + $0x358] sm:$0xff] }
 0x2ed   :  { %v1033_v47 = vmul.f32 %v1030_v37, %v7144_v58  ;;  %v985_v49 = vpop.f32.mrf.mxu3  ;;  %v1426_v37 = vld [vmem:[%s7434_s23 + $0x1c8] sm:$0xff] }
 0x2ee   :  { %v1038_v52 = vadd.f32 %v1035_v44, %v1032_v42  ;;  %v1034_v54 = vperm.slane %v985_v49, 0  ;;  %v1375_v42 = vld [vmem:[%s7434_s23 + $0x30] sm:$0xff]  ;;  %v1372_v49 = vld [vmem:[%s7434_s23 + $0x18] sm:$0xff] }
 0x2ef   :  { %v1039_v56 = vadd.f32 %v1036_v45, %v1033_v47  ;;  %v1423_v44 = vld [vmem:[%s7434_s23 + $0x1b0] sm:$0xff]  ;;  %v1474_v45 = vld [vmem:[%s7434_s23 + $0x348] sm:$0xff]  ;;  %v1147_v47 = vld [vmem:[%s7286_s11 + $0x340] sm:$0xff] }
 0x2f0   :  { %v7439_v59 = vmax.f32 %v1038_v52, 0.0  ;;  %v1037_v60 = vadd.f32 %v1034_v54, %v1031_v51  ;;  %v1420_v51 = vld [vmem:[%s7434_s23 + $0x198] sm:$0xff]  ;;  %v1471_v52 = vld [vmem:[%s7434_s23 + $0x330] sm:$0xff]  ;;  %v1144_v54 = vld [vmem:[%s7286_s11 + $0x328] sm:$0xff] }
 0x2f1   :  { %v7442_v25 = vmax.f32 %v1039_v56, 0.0  ;;  %v1369_v56 = vld [vmem:[%s7434_s23] sm:$0xff] }
 0x2f2   :  { %v7445_v58 = vmax.f32 %v1037_v60, 0.0  ;;  %1223 = vmatmul.f32.vlgmr.msrb.gmra.mxu3 %v7439_v59  ;;  %v1417_v60 = vld [vmem:[%s7434_s23 + $0x180] sm:$0xff] }
 0x2f3   :  { %1243 = vmatmul.f32.vlgmr.msra.gmra.mxu0 %v7442_v25  ;;  %1513 = vmatpush.msrb.mxu3 %v1414_v62  ;;  %v1468_v62 = vld [vmem:[%s7434_s23 + $0x318] sm:$0xff] }
 0x2f4   :  { %1533 = vmatpush.msra.mxu0 %v1462_v0  ;;  %1203 = vmatmul.f32.vlgmr.msra.gmra.mxu2 %v7445_v58  ;;  %v1463_v0 = vld [vmem:[%s7434_s23 + $0x2f0] sm:$0xff] }
 0x2f5   :  { %1263 = vmatmul.f32.vlgmr.msrb.gmra.mxu1 %v7445_v58  ;;  %1347 = vmatpush.msra.mxu2 %v1186_v26  ;;  %v1511_v26 = vld [vmem:[%s7434_s23 + $0x470] sm:$0xff] }
 0x2f6   :  { %1514 = vmatpush.msrb.mxu3 %v1411_v2  ;;  %1534 = vmatpush.msra.mxu0 %v1459_v4  ;;  %v1141_v2 = vld [vmem:[%s7286_s11 + $0x310] sm:$0xff]  ;;  %v1465_v4 = vld [vmem:[%s7434_s23 + $0x300] sm:$0xff]  ;;  %s8435_s11 = sld [smem:[%s9970_s0 + %s6872_s8]]   ;;  %s6887_s8 = smov 39  }
 0x2f7   :  { %1553 = vmatpush.msrb.mxu1 %v1510_v30  ;;  %1348 = vmatpush.msra.mxu2 %v1183_v6  ;;  %v1415_v30 = vld [vmem:[%s7434_s23 + $0x170] sm:$0xff]  ;;  %v1460_v6 = vld [vmem:[%s7434_s23 + $0x2d8] sm:$0xff] }
 0x2f8   :  { %1515 = vmatpush.msrb.mxu3 %v1408_v8  ;;  %1535 = vmatpush.msra.mxu0 %v1456_v9  ;;  %v1508_v8 = vld [vmem:[%s7434_s23 + $0x458] sm:$0xff] }
 0x2f9   :  { %1554 = vmatpush.msrb.mxu1 %v1507_v11  ;;  %1349 = vmatpush.msra.mxu2 %v1180_v12  ;;  %v1416_v9 = vld [vmem:[%s7434_s23 + $0x178] sm:$0xff]  ;;  %v1457_v12 = vld [vmem:[%s7434_s23 + $0x2c0] sm:$0xff] }
 0x2fa   :  { %1516 = vmatpush.msrb.mxu3 %v1405_v13  ;;  %1536 = vmatpush.msra.mxu0 %v1453_v14  ;;  %v1412_v11 = vld [vmem:[%s7434_s23 + $0x158] sm:$0xff]  ;;  %v1505_v13 = vld [vmem:[%s7434_s23 + $0x440] sm:$0xff] }
 0x2fb   :  { %1555 = vmatpush.msrb.mxu1 %v1504_v15  ;;  %1303 = vmatmul.f32.vlgmr.msra.gmra.mxu3 %v7442_v25  ;;  %v1413_v14 = vld [vmem:[%s7434_s23 + $0x160] sm:$0xff] }
 0x2fc   :  { %1323 = vmatmul.f32.vlgmr.msrb.gmra.mxu0 %v7445_v58  ;;  %1350 = vmatpush.msra.mxu2 %v1177_v38  ;;  %v1409_v15 = vld [vmem:[%s7434_s23 + $0x140] sm:$0xff]  ;;  %v1454_v38 = vld [vmem:[%s7434_s23 + $0x2a8] sm:$0xff] }
 0x2fd   :  { %1517 = vmatpush.msrb.mxu3 %v1402_v16  ;;  %1537 = vmatpush.msra.mxu0 %v1450_v17  ;;  %v1502_v16 = vld [vmem:[%s7434_s23 + $0x428] sm:$0xff] }
 0x2fe   :  { %1556 = vmatpush.msrb.mxu1 %v1501_v18  ;;  %1283 = vmatmul.f32.vlgmr.msrb.gmra.mxu2 %v7439_v59  ;;  %v1410_v17 = vld [vmem:[%s7434_s23 + $0x148] sm:$0xff] }
 0x2ff   :  { %1343 = vmatmul.f32.vlgmr.msra.gmra.mxu1 %v7439_v59  ;;  %1351 = vmatpush.msra.mxu2 %v1174_v19  ;;  %v1406_v18 = vld [vmem:[%s7434_s23 + $0x128] sm:$0xff]  ;;  %v1451_v19 = vld [vmem:[%s7434_s23 + $0x290] sm:$0xff] }
 0x300   :  { %1518 = vmatpush.msrb.mxu3 %v1399_v40  ;;  %1538 = vmatpush.msra.mxu0 %v1447_v20  ;;  %v1499_v40 = vld [vmem:[%s7434_s23 + $0x410] sm:$0xff] }
 0x301   :  { %1557 = vmatpush.msrb.mxu1 %v1498_v43  ;;  %1352 = vmatpush.msra.mxu2 %v1171_v46  ;;  %v1407_v20 = vld [vmem:[%s7434_s23 + $0x130] sm:$0xff]  ;;  %v1448_v46 = vld [vmem:[%s7434_s23 + $0x278] sm:$0xff] }
 0x302   :  { %1519 = vmatpush.msrb.mxu3 %v1396_v48  ;;  %1539 = vmatpush.msra.mxu0 %v1444_v50  ;;  %v1403_v43 = vld [vmem:[%s7434_s23 + $0x110] sm:$0xff]  ;;  %v1496_v48 = vld [vmem:[%s7434_s23 + $0x3f8] sm:$0xff] }
 0x303   :  { %1558 = vmatpush.msrb.mxu1 %v1495_v53  ;;  %1353 = vmatpush.msra.mxu2 %v1168_v55  ;;  %v1404_v50 = vld [vmem:[%s7434_s23 + $0x118] sm:$0xff]  ;;  %v1445_v55 = vld [vmem:[%s7434_s23 + $0x260] sm:$0xff] }
 0x304   :  { %1520 = vmatpush.msrb.mxu3 %v1393_v57  ;;  %1540 = vmatpush.msra.mxu0 %v1441_v61  ;;  %v1400_v53 = vld [vmem:[%s7434_s23 + $0xf8] sm:$0xff]  ;;  %v1493_v57 = vld [vmem:[%s7434_s23 + $0x3e0] sm:$0xff] }
 0x305   :  { %1559 = vmatpush.msrb.mxu1 %v1492_v63  ;;  %1354 = vmatpush.msra.mxu2 %v1165_v1  ;;  %v1401_v61 = vld [vmem:[%s7434_s23 + $0x100] sm:$0xff]  ;;  %v1442_v1 = vld [vmem:[%s7434_s23 + $0x248] sm:$0xff] }
 0x306   :  { %1521 = vmatpush.msrb.mxu3 %v1390_v3  ;;  %1541 = vmatpush.msra.mxu0 %v1438_v5  ;;  %v1397_v63 = vld [vmem:[%s7434_s23 + $0xe0] sm:$0xff]  ;;  %v1490_v3 = vld [vmem:[%s7434_s23 + $0x3c8] sm:$0xff] }
 0x307   :  { %1560 = vmatpush.msrb.mxu1 %v1489_v7  ;;  %1355 = vmatpush.msra.mxu2 %v1162_v10  ;;  %v1398_v5 = vld [vmem:[%s7434_s23 + $0xe8] sm:$0xff]  ;;  %v1439_v10 = vld [vmem:[%s7434_s23 + $0x230] sm:$0xff] }
 0x308   :  { %1522 = vmatpush.msrb.mxu3 %v1387_v21  ;;  %1542 = vmatpush.msra.mxu0 %v1435_v22  ;;  %v1394_v7 = vld [vmem:[%s7434_s23 + $0xc8] sm:$0xff]  ;;  %v1487_v21 = vld [vmem:[%s7434_s23 + $0x3b0] sm:$0xff] }
 0x309   :  { %1561 = vmatpush.msrb.mxu1 %v1486_v23  ;;  %1356 = vmatpush.msra.mxu2 %v1159_v24  ;;  %v1395_v22 = vld [vmem:[%s7434_s23 + $0xd0] sm:$0xff]  ;;  %v1436_v24 = vld [vmem:[%s7434_s23 + $0x218] sm:$0xff] }
 0x30a   :  { %1523 = vmatpush.msrb.mxu3 %v1384_v27  ;;  %1543 = vmatpush.msra.mxu0 %v1432_v28  ;;  %v1391_v23 = vld [vmem:[%s7434_s23 + $0xb0] sm:$0xff]  ;;  %v1484_v27 = vld [vmem:[%s7434_s23 + $0x398] sm:$0xff] }
 0x30b   :  { %1562 = vmatpush.msrb.mxu1 %v1483_v29  ;;  %1357 = vmatpush.msra.mxu2 %v1156_v31  ;;  %v1392_v28 = vld [vmem:[%s7434_s23 + $0xb8] sm:$0xff]  ;;  %v1433_v31 = vld [vmem:[%s7434_s23 + $0x200] sm:$0xff] }
 0x30c   :  { %1524 = vmatpush.msrb.mxu3 %v1381_v32  ;;  %1544 = vmatpush.msra.mxu0 %v1429_v33  ;;  %v1388_v29 = vld [vmem:[%s7434_s23 + $0x98] sm:$0xff]  ;;  %v1481_v32 = vld [vmem:[%s7434_s23 + $0x380] sm:$0xff] }
 0x30d   :  { %1563 = vmatpush.msrb.mxu1 %v1480_v34  ;;  %1358 = vmatpush.msra.mxu2 %v1153_v35  ;;  %v1389_v33 = vld [vmem:[%s7434_s23 + $0xa0] sm:$0xff]  ;;  %v1430_v35 = vld [vmem:[%s7434_s23 + $0x1e8] sm:$0xff] }
 0x30e   :  { %1525 = vmatpush.msrb.mxu3 %v1378_v36  ;;  %1545 = vmatpush.msra.mxu0 %v1426_v37  ;;  %v1385_v34 = vld [vmem:[%s7434_s23 + $0x80] sm:$0xff]  ;;  %v1478_v36 = vld [vmem:[%s7434_s23 + $0x368] sm:$0xff] }
 0x30f   :  { %1564 = vmatpush.msrb.mxu1 %v1477_v39  ;;  %1359 = vmatpush.msra.mxu2 %v1150_v41  ;;  %v1386_v37 = vld [vmem:[%s7434_s23 + $0x88] sm:$0xff]  ;;  %v1427_v41 = vld [vmem:[%s7434_s23 + $0x1d0] sm:$0xff] }
 0x310   :  { %1526 = vmatpush.msrb.mxu3 %v1375_v42  ;;  %1546 = vmatpush.msra.mxu0 %v1423_v44  ;;  %v1382_v39 = vld [vmem:[%s7434_s23 + $0x68] sm:$0xff]  ;;  %v1475_v42 = vld [vmem:[%s7434_s23 + $0x350] sm:$0xff] }
 0x311   :  { %1565 = vmatpush.msrb.mxu1 %v1474_v45  ;;  %1360 = vmatpush.msra.mxu2 %v1147_v47  ;;  %v1383_v44 = vld [vmem:[%s7434_s23 + $0x70] sm:$0xff]  ;;  %v1424_v47 = vld [vmem:[%s7434_s23 + $0x1b8] sm:$0xff] }
 0x312   :  { %1527 = vmatpush.msrb.mxu3 %v1372_v49  ;;  %1547 = vmatpush.msra.mxu0 %v1420_v51  ;;  %v1379_v45 = vld [vmem:[%s7434_s23 + $0x50] sm:$0xff]  ;;  %v1472_v49 = vld [vmem:[%s7434_s23 + $0x338] sm:$0xff] }
 0x313   :  { %1566 = vmatpush.msrb.mxu1 %v1471_v52  ;;  %1361 = vmatpush.msra.mxu2 %v1144_v54  ;;  %v1380_v51 = vld [vmem:[%s7434_s23 + $0x58] sm:$0xff]  ;;  %v1421_v54 = vld [vmem:[%s7434_s23 + $0x1a0] sm:$0xff] }
 0x314   :  { %1528 = vmatpush.msrb.mxu3 %v1369_v56  ;;  %1548 = vmatpush.msra.mxu0 %v1417_v60  ;;  %v1376_v52 = vld [vmem:[%s7434_s23 + $0x38] sm:$0xff]  ;;  %v1469_v56 = vld [vmem:[%s7434_s23 + $0x320] sm:$0xff] }
 0x315   :  { %1567 = vmatpush.msrb.mxu1 %v1468_v62  ;;  %1529 = vmatmul.f32.vlgmr.msrb.gmra.mxu3 %v7445_v58  ;;  %v1377_v60 = vld [vmem:[%s7434_s23 + $0x40] sm:$0xff] }
 0x316   :  { %1549 = vmatmul.f32.vlgmr.msra.gmra.mxu0 %v7439_v59  ;;  %1593 = vmatpush.msra.mxu3 %v1463_v0  ;;  %v1373_v62 = vld [vmem:[%s7434_s23 + $0x20] sm:$0xff]  ;;  %v1418_v0 = vld [vmem:[%s7434_s23 + $0x188] sm:$0xff] }
 0x317   :  { %1613 = vmatpush.msrb.mxu0 %v1511_v26  ;;  %1362 = vmatpush.msra.mxu2 %v1141_v2  ;;  %v1466_v26 = vld [vmem:[%s7434_s23 + $0x308] sm:$0xff] }
 0x318   :  { %1568 = vmatpush.msrb.mxu1 %v1465_v4  ;;  %1363 = vmatmul.f32.vlgmr.msra.gmra.mxu2 %v7442_v25  ;;  %v1374_v2 = vld [vmem:[%s7434_s23 + $0x28] sm:$0xff]  ;;  %v1512_v4 = vld [vmem:[%s7434_s23 + $0x478] sm:$0xff] }
 0x319   :  { %1569 = vmatmul.f32.vlgmr.msrb.gmra.mxu1 %v7442_v25  ;;  %1573 = vmatpush.msrb.mxu2 %v1415_v30  ;;  %v1370_v30 = vld [vmem:[%s7434_s23 + $0x8] sm:$0xff] }
 0x31a   :  { %1594 = vmatpush.msra.mxu3 %v1460_v6  ;;  %1614 = vmatpush.msrb.mxu0 %v1508_v8  ;;  %v1371_v6 = vld [vmem:[%s7434_s23 + $0x10] sm:$0xff]  ;;  %v1464_v8 = vld [vmem:[%s7434_s23 + $0x2f8] sm:$0xff] }
 0x31b   :  { %1633 = vmatpush.msra.mxu1 %v1416_v9  ;;  %1574 = vmatpush.msrb.mxu2 %v1412_v11  ;;  %v1509_v9 = vld [vmem:[%s7434_s23 + $0x460] sm:$0xff] }
 0x31c   :  { %1595 = vmatpush.msra.mxu3 %v1457_v12  ;;  %1615 = vmatpush.msrb.mxu0 %v1505_v13  ;;  %v1461_v11 = vld [vmem:[%s7434_s23 + $0x2e0] sm:$0xff]  ;;  %v1506_v12 = vld [vmem:[%s7434_s23 + $0x448] sm:$0xff] }
 0x31d   :  { %1634 = vmatpush.msra.mxu1 %v1413_v14  ;;  %1575 = vmatpush.msrb.mxu2 %v1409_v15  ;;  %v1458_v13 = vld [vmem:[%s7434_s23 + $0x2c8] sm:$0xff]  ;;  %v1503_v14 = vld [vmem:[%s7434_s23 + $0x430] sm:$0xff] }
 0x31e   :  { %1596 = vmatpush.msra.mxu3 %v1454_v38  ;;  %1616 = vmatpush.msrb.mxu0 %v1502_v16  ;;  %v1455_v15 = vld [vmem:[%s7434_s23 + $0x2b0] sm:$0xff]  ;;  %v1500_v38 = vld [vmem:[%s7434_s23 + $0x418] sm:$0xff] }
 0x31f   :  { %1635 = vmatpush.msra.mxu1 %v1410_v17  ;;  %1576 = vmatpush.msrb.mxu2 %v1406_v18  ;;  %v1452_v16 = vld [vmem:[%s7434_s23 + $0x298] sm:$0xff]  ;;  %v1497_v17 = vld [vmem:[%s7434_s23 + $0x400] sm:$0xff] }
 0x320   :  { %1597 = vmatpush.msra.mxu3 %v1451_v19  ;;  %1617 = vmatpush.msrb.mxu0 %v1499_v40  ;;  %v1449_v18 = vld [vmem:[%s7434_s23 + $0x280] sm:$0xff]  ;;  %v1494_v19 = vld [vmem:[%s7434_s23 + $0x3e8] sm:$0xff] }
 0x321   :  { %1636 = vmatpush.msra.mxu1 %v1407_v20  ;;  %1577 = vmatpush.msrb.mxu2 %v1403_v43  ;;  %v1446_v40 = vld [vmem:[%s7434_s23 + $0x268] sm:$0xff]  ;;  %v1491_v20 = vld [vmem:[%s7434_s23 + $0x3d0] sm:$0xff] }
 0x322   :  { %1598 = vmatpush.msra.mxu3 %v1448_v46  ;;  %1618 = vmatpush.msrb.mxu0 %v1496_v48  ;;  %v1443_v43 = vld [vmem:[%s7434_s23 + $0x250] sm:$0xff]  ;;  %v1488_v46 = vld [vmem:[%s7434_s23 + $0x3b8] sm:$0xff] }
 0x323   :  { %1637 = vmatpush.msra.mxu1 %v1404_v50  ;;  %1578 = vmatpush.msrb.mxu2 %v1400_v53  ;;  %v1440_v48 = vld [vmem:[%s7434_s23 + $0x238] sm:$0xff]  ;;  %v1485_v50 = vld [vmem:[%s7434_s23 + $0x3a0] sm:$0xff] }
 0x324   :  { %1599 = vmatpush.msra.mxu3 %v1445_v55  ;;  %1619 = vmatpush.msrb.mxu0 %v1493_v57  ;;  %v1437_v53 = vld [vmem:[%s7434_s23 + $0x220] sm:$0xff]  ;;  %v1482_v55 = vld [vmem:[%s7434_s23 + $0x388] sm:$0xff] }
 0x325   :  { %1638 = vmatpush.msra.mxu1 %v1401_v61  ;;  %1579 = vmatpush.msrb.mxu2 %v1397_v63  ;;  %v1434_v57 = vld [vmem:[%s7434_s23 + $0x208] sm:$0xff]  ;;  %v1479_v61 = vld [vmem:[%s7434_s23 + $0x370] sm:$0xff] }
 0x326   :  { %1600 = vmatpush.msra.mxu3 %v1442_v1  ;;  %1620 = vmatpush.msrb.mxu0 %v1490_v3  ;;  %v1431_v63 = vld [vmem:[%s7434_s23 + $0x1f0] sm:$0xff]  ;;  %v1476_v1 = vld [vmem:[%s7434_s23 + $0x358] sm:$0xff] }
 0x327   :  { %1639 = vmatpush.msra.mxu1 %v1398_v5  ;;  %1580 = vmatpush.msrb.mxu2 %v1394_v7  ;;  %v1428_v3 = vld [vmem:[%s7434_s23 + $0x1d8] sm:$0xff]  ;;  %v1473_v5 = vld [vmem:[%s7434_s23 + $0x340] sm:$0xff] }
 0x328   :  { %1601 = vmatpush.msra.mxu3 %v1439_v10  ;;  %1621 = vmatpush.msrb.mxu0 %v1487_v21  ;;  %v1425_v7 = vld [vmem:[%s7434_s23 + $0x1c0] sm:$0xff]  ;;  %v1470_v10 = vld [vmem:[%s7434_s23 + $0x328] sm:$0xff] }
 0x329   :  { %1640 = vmatpush.msra.mxu1 %v1395_v22  ;;  %1581 = vmatpush.msrb.mxu2 %v1391_v23  ;;  %v1422_v21 = vld [vmem:[%s7434_s23 + $0x1a8] sm:$0xff]  ;;  %v1467_v22 = vld [vmem:[%s7434_s23 + $0x310] sm:$0xff] }
 0x32a   :  { %1602 = vmatpush.msra.mxu3 %v1436_v24  ;;  %1622 = vmatpush.msrb.mxu0 %v1484_v27  ;;  %v1419_v23 = vld [vmem:[%s7434_s23 + $0x190] sm:$0xff]  ;;  %s8759_s23 = sld [smem:[%s9970_s0 + %s6875_s20]]   ;;  %s6890_s20 = smov 42  }
 0x32b   :  { %1641 = vmatpush.msra.mxu1 %v1392_v28  ;;  %1582 = vmatpush.msrb.mxu2 %v1388_v29 }
 0x32c   :  { %1603 = vmatpush.msra.mxu3 %v1433_v31  ;;  %1623 = vmatpush.msrb.mxu0 %v1481_v32 }
 0x32d   :  { %1642 = vmatpush.msra.mxu1 %v1389_v33  ;;  %1583 = vmatpush.msrb.mxu2 %v1385_v34  ;;  %v2005_v34 = vld [vmem:[%s7630_s27 + $0x468] sm:$0xff] }
 0x32e   :  { %1604 = vmatpush.msra.mxu3 %v1430_v35  ;;  %1624 = vmatpush.msrb.mxu0 %v1478_v36  ;;  %v7636_v35 = vld [vmem:[%s6562_s1] sm:$0xff] }
 0x32f   :  { %1643 = vmatpush.msra.mxu1 %v1386_v37  ;;  %1584 = vmatpush.msrb.mxu2 %v1382_v39  ;;  %v2002_v37 = vld [vmem:[%s7630_s27 + $0x450] sm:$0xff]  ;;  %v1999_v39 = vld [vmem:[%s7630_s27 + $0x438] sm:$0xff] }
 0x330   :  { %1605 = vmatpush.msra.mxu3 %v1427_v41  ;;  %1625 = vmatpush.msrb.mxu0 %v1475_v42  ;;  %v1996_v41 = vld [vmem:[%s7630_s27 + $0x420] sm:$0xff]  ;;  %v1993_v42 = vld [vmem:[%s7630_s27 + $0x408] sm:$0xff] }
 0x331   :  { %1644 = vmatpush.msra.mxu1 %v1383_v44  ;;  %1585 = vmatpush.msrb.mxu2 %v1379_v45  ;;  %v7647_v44 = vld [vmem:[%s6562_s1 + $0x8] sm:$0xf]  ;;  %v1990_v45 = vld [vmem:[%s7630_s27 + $0x3f0] sm:$0xff]  ;;  %s9147_s1 = sld [smem:[%s9970_s0 + %s6877_s28]]  }
 0x332   :  { %1606 = vmatpush.msra.mxu3 %v1424_v47  ;;  %1626 = vmatpush.msrb.mxu0 %v1472_v49  ;;  %v1987_v49 = vld [vmem:[%s7630_s27 + $0x3d8] sm:$0xff] }
 0x333   :  { %1645 = vmatpush.msra.mxu1 %v1380_v51  ;;  %1586 = vmatpush.msrb.mxu2 %v1376_v52  ;;  %v1984_v52 = vld [vmem:[%s7630_s27 + $0x3c0] sm:$0xff] }
 0x334   :  { %1607 = vmatpush.msra.mxu3 %v1421_v54  ;;  %1627 = vmatpush.msrb.mxu0 %v1469_v56  ;;  %v1981_v54 = vld [vmem:[%s7630_s27 + $0x3a8] sm:$0xff]  ;;  %v1978_v56 = vld [vmem:[%s7630_s27 + $0x390] sm:$0xff] }
 0x335   :  { %1646 = vmatpush.msra.mxu1 %v1377_v60  ;;  %1587 = vmatpush.msrb.mxu2 %v1373_v62 }
 0x336   :  { %1608 = vmatpush.msra.mxu3 %v1418_v0  ;;  %1628 = vmatpush.msrb.mxu0 %v1466_v26  ;;  %v1975_v0 = vld [vmem:[%s7630_s27 + $0x378] sm:$0xff] }
 0x337   :  { %1647 = vmatpush.msra.mxu1 %v1374_v2  ;;  %1609 = vmatmul.f32.vlgmr.msra.gmra.mxu3 %v7439_v59 }
 0x338   :  { %1629 = vmatmul.f32.vlgmr.msrb.gmra.mxu0 %v7442_v25  ;;  %1673 = vmatpush.msrb.mxu3 %v1512_v4 }
 0x339   :  { %1588 = vmatpush.msrb.mxu2 %v1370_v30  ;;  %1648 = vmatpush.msra.mxu1 %v1371_v6  ;;  %v1972_v30 = vld [vmem:[%s7630_s27 + $0x360] sm:$0xff] }
 0x33a   :  { %1589 = vmatmul.f32.vlgmr.msrb.gmra.mxu2 %v7445_v58  ;;  %1649 = vmatmul.f32.vlgmr.msra.gmra.mxu1 %v7445_v58 }
 0x33b   :  { %1653 = vmatpush.msra.mxu2 %v1464_v8  ;;  %1674 = vmatpush.msrb.mxu3 %v1509_v9 }
 0x33d   :  { %1654 = vmatpush.msra.mxu2 %v1461_v11  ;;  %1675 = vmatpush.msrb.mxu3 %v1506_v12  ;;  %v1910_v11 = vld [vmem:[%s7630_s27 + $0x170] sm:$0xff]  ;;  %v1969_v12 = vld [vmem:[%s7630_s27 + $0x348] sm:$0xff] }
 0x33f   :  { %1655 = vmatpush.msra.mxu2 %v1458_v13  ;;  %1676 = vmatpush.msrb.mxu3 %v1503_v14  ;;  %v1907_v13 = vld [vmem:[%s7630_s27 + $0x158] sm:$0xff]  ;;  %v1966_v14 = vld [vmem:[%s7630_s27 + $0x330] sm:$0xff] }
 0x341   :  { %1656 = vmatpush.msra.mxu2 %v1455_v15  ;;  %1677 = vmatpush.msrb.mxu3 %v1500_v38  ;;  %v1904_v15 = vld [vmem:[%s7630_s27 + $0x140] sm:$0xff]  ;;  %v1963_v38 = vld [vmem:[%s7630_s27 + $0x318] sm:$0xff] }
 0x343   :  { %1657 = vmatpush.msra.mxu2 %v1452_v16  ;;  %1678 = vmatpush.msrb.mxu3 %v1497_v17  ;;  %v1901_v16 = vld [vmem:[%s7630_s27 + $0x128] sm:$0xff]  ;;  %v1960_v17 = vld [vmem:[%s7630_s27 + $0x300] sm:$0xff] }
 0x345   :  { %1658 = vmatpush.msra.mxu2 %v1449_v18  ;;  %1679 = vmatpush.msrb.mxu3 %v1494_v19  ;;  %v7676_v18 = vld [vmem:[%s7661_s5] sm:$0xff]  ;;  %v1898_v19 = vld [vmem:[%s7630_s27 + $0x110] sm:$0xff] }
 0x347   :  { %1659 = vmatpush.msra.mxu2 %v1446_v40  ;;  %1680 = vmatpush.msrb.mxu3 %v1491_v20  ;;  %v1911_v40 = vld [vmem:[%s7630_s27 + $0x178] sm:$0xff] }
 0x348   :  { %v1895_v20 = vld [vmem:[%s7630_s27 + $0xf8] sm:$0xff] }
 0x349   :  { %1660 = vmatpush.msra.mxu2 %v1443_v43  ;;  %1681 = vmatpush.msrb.mxu3 %v1488_v46  ;;  %v1908_v43 = vld [vmem:[%s7630_s27 + $0x160] sm:$0xff] }
 0x34a   :  { %v1892_v46 = vld [vmem:[%s7630_s27 + $0xe0] sm:$0xff] }
 0x34b   :  { %1661 = vmatpush.msra.mxu2 %v1440_v48  ;;  %1682 = vmatpush.msrb.mxu3 %v1485_v50  ;;  %v1905_v48 = vld [vmem:[%s7630_s27 + $0x148] sm:$0xff] }
 0x34c   :  { %v1889_v50 = vld [vmem:[%s7630_s27 + $0xc8] sm:$0xff] }
 0x34d   :  { %1662 = vmatpush.msra.mxu2 %v1437_v53  ;;  %1683 = vmatpush.msrb.mxu3 %v1482_v55  ;;  %v1902_v53 = vld [vmem:[%s7630_s27 + $0x130] sm:$0xff]  ;;  %v7692_v55 = vld [vmem:[%s7661_s5 + $0x8] sm:$0xf]  ;;  %s9396_s5 = sld [smem:[%s9970_s0 + %s6878_s2]]  }
 0x34f   :  { %1663 = vmatpush.msra.mxu2 %v1434_v57  ;;  %1684 = vmatpush.msrb.mxu3 %v1479_v61  ;;  %v1886_v57 = vld [vmem:[%s7630_s27 + $0xb0] sm:$0xff]  ;;  %v1899_v61 = vld [vmem:[%s7630_s27 + $0x118] sm:$0xff] }
 0x351   :  { %1664 = vmatpush.msra.mxu2 %v1431_v63  ;;  %1685 = vmatpush.msrb.mxu3 %v1476_v1  ;;  %v1883_v63 = vld [vmem:[%s7630_s27 + $0x98] sm:$0xff]  ;;  %v1896_v1 = vld [vmem:[%s7630_s27 + $0x100] sm:$0xff] }
 0x353   :  { %1665 = vmatpush.msra.mxu2 %v1428_v3  ;;  %1686 = vmatpush.msrb.mxu3 %v1473_v5  ;;  %v1880_v3 = vld [vmem:[%s7630_s27 + $0x80] sm:$0xff]  ;;  %v1893_v5 = vld [vmem:[%s7630_s27 + $0xe8] sm:$0xff] }
 0x355   :  { %1666 = vmatpush.msra.mxu2 %v1425_v7  ;;  %1687 = vmatpush.msrb.mxu3 %v1470_v10  ;;  %v1877_v7 = vld [vmem:[%s7630_s27 + $0x68] sm:$0xff]  ;;  %v1890_v10 = vld [vmem:[%s7630_s27 + $0xd0] sm:$0xff] }
 0x357   :  { %1667 = vmatpush.msra.mxu2 %v1422_v21  ;;  %1688 = vmatpush.msrb.mxu3 %v1467_v22  ;;  %v1874_v21 = vld [vmem:[%s7630_s27 + $0x50] sm:$0xff]  ;;  %v1887_v22 = vld [vmem:[%s7630_s27 + $0xb8] sm:$0xff] }
 0x358   :  { %1689 = vmatmul.f32.vlgmr.msrb.gmra.mxu3 %v7442_v25 }
 0x359   :  { %1668 = vmatpush.msra.mxu2 %v1419_v23  ;;  %v1871_v23 = vld [vmem:[%s7630_s27 + $0x38] sm:$0xff] }
 0x35a   :  { %1669 = vmatmul.f32.vlgmr.msra.gmra.mxu2 %v7439_v59 }
 0x370   :  { %v7638_v36 = vpop.f32.mrf.mxu0 }
 0x372   :  { %v1264_v28 = vpop.f32.mrf.mxu1 }
 0x375   :  { %v7625_v27 = vpop.f32.mrf.mxu3 }
 0x377   :  { %v7623_v24 = vpop.f32.mrf.mxu2 }
 0x379   :  { %v1324_v47 = vpop.f32.mrf.mxu0 }
 0x37c   :  { %v1344_v51 = vpop.f32.mrf.mxu1 }
 0x37d   :  { %v1345_v2 = vadd.f32 %v1344_v51, %v1324_v47  ;;  %v1956_v47 = vld [vmem:[%s7630_s27 + $0x2e0] sm:$0xff] }
 0x37e   :  { %v1304_v32 = vpop.f32.mrf.mxu3 }
 0x381   :  { %v1284_v29 = vpop.f32.mrf.mxu2 }
 0x382   :  { %v1285_v31 = vadd.f32 %v1284_v29, %v1264_v28  ;;  %v1884_v28 = vld [vmem:[%s7630_s27 + $0xa0] sm:$0xff] }
 0x383   :  { %v1868_v29 = vld [vmem:[%s7630_s27 + $0x20] sm:$0xff] }
 0x384   :  { %v1305_v33 = vadd.f32 %v1304_v32, %v1285_v31  ;;  %v1881_v31 = vld [vmem:[%s7630_s27 + $0x88] sm:$0xff] }
 0x385   :  { %v1865_v32 = vld [vmem:[%s7630_s27 + $0x8] sm:$0xff] }
 0x386   :  { %6638 = vmatpush.msk.msrb.mxu2 %vm726_vm3, %v1305_v33  ;;  %v1878_v33 = vld [vmem:[%s7630_s27 + $0x70] sm:$0xff] }
 0x387   :  { %6639 = vmatmul.msk.f32.vlgmr.msrb.gmra.mxu2 %vm1695_vm7, %v7636_v35 }
 0x388   :  { %2048 = vmatpush.msra.mxu2 %v2005_v34  ;;  %v1959_v34 = vld [vmem:[%s7630_s27 + $0x2f8] sm:$0xff] }
 0x38a   :  { %2049 = vmatpush.msra.mxu2 %v2002_v37  ;;  %v1875_v37 = vld [vmem:[%s7630_s27 + $0x58] sm:$0xff] }
 0x38c   :  { %2050 = vmatpush.msra.mxu2 %v1999_v39 }
 0x38e   :  { %2051 = vmatpush.msra.mxu2 %v1996_v41 }
 0x38f   :  { %6640 = vmatmul.msk.f32.gmra.mxu2 %vm1695_vm7, %v7647_v44 }
 0x390   :  { %2052 = vmatpush.msra.mxu2 %v1993_v42  ;;  %v1225_v42 = vadd.f32 %v7625_v27, %v7623_v24  ;;  %v1957_v27 = vld [vmem:[%s7630_s27 + $0x2e8] sm:$0xff] }
 0x392   :  { %2053 = vmatpush.msra.mxu2 %v1990_v45  ;;  %v1245_v24 = vadd.f32 %v7638_v36, %v1225_v42  ;;  %v1951_v36 = vld [vmem:[%s7630_s27 + $0x2b8] sm:$0xff]  ;;  %v1885_v42 = vld [vmem:[%s7630_s27 + $0xa8] sm:$0xff] }
 0x393   :  { %v1550_v60 = vpop.f32.mrf.mxu0 }
 0x394   :  { %2054 = vmatpush.msra.mxu2 %v1987_v49  ;;  %v1872_v49 = vld [vmem:[%s7630_s27 + $0x40] sm:$0xff] }
 0x396   :  { %2055 = vmatpush.msra.mxu2 %v1984_v52  ;;  %v1570_v4 = vpop.f32.mrf.mxu1 }
 0x398   :  { %2056 = vmatpush.msra.mxu2 %v1981_v54  ;;  %v1530_v62 = vpop.f32.mrf.mxu3  ;;  %v1953_v54 = vld [vmem:[%s7630_s27 + $0x2c8] sm:$0xff] }
 0x399   :  { %v1551_v26 = vadd.f32 %v1550_v60, %v1530_v62  ;;  %v1950_v60 = vld [vmem:[%s7630_s27 + $0x2b0] sm:$0xff] }
 0x39a   :  { %2057 = vmatpush.msra.mxu2 %v1978_v56  ;;  %v1869_v56 = vld [vmem:[%s7630_s27 + $0x28] sm:$0xff]  ;;  %v1866_v62 = vld [vmem:[%s7630_s27 + $0x10] sm:$0xff] }
 0x39b   :  { %v1571_v6 = vadd.f32 %v1570_v4, %v1551_v26  ;;  %v1364_v8 = vpop.f32.mrf.mxu2  ;;  %v1947_v26 = vld [vmem:[%s7630_s27 + $0x298] sm:$0xff]  ;;  %v1948_v4 = vld [vmem:[%s7630_s27 + $0x2a0] sm:$0xff] }
 0x39c   :  { %2058 = vmatpush.msra.mxu2 %v1975_v0  ;;  %v1365_v9 = vadd.f32 %v1364_v8, %v1345_v2  ;;  %v1954_v0 = vld [vmem:[%s7630_s27 + $0x2d0] sm:$0xff]  ;;  %v1944_v2 = vld [vmem:[%s7630_s27 + $0x280] sm:$0xff] }
 0x39d   :  { %6626 = vmatpush.msk.msra.mxu0 %vm726_vm3, %v1571_v6  ;;  %v1945_v6 = vld [vmem:[%s7630_s27 + $0x288] sm:$0xff]  ;;  %v1938_v8 = vld [vmem:[%s7630_s27 + $0x250] sm:$0xff] }
 0x39e   :  { %2059 = vmatpush.msra.mxu2 %v1972_v30  ;;  %6641 = vmatpush.msk.msra.mxu3 %vm726_vm3, %v1365_v9  ;;  %v1941_v30 = vld [vmem:[%s7630_s27 + $0x268] sm:$0xff]  ;;  %v1942_v9 = vld [vmem:[%s7630_s27 + $0x270] sm:$0xff] }
 0x39f   :  { %6642 = vmatmul.msk.f32.vlgmr.msra.gmra.mxu3 %vm1695_vm7, %v7636_v35  ;;  %6627 = vmatmul.msk.f32.vlgmr.msra.gmra.mxu0 %vm1695_vm7, %v7676_v18 }
 0x3a0   :  { %2068 = vmatpush.msrb.mxu3 %v1910_v11  ;;  %2060 = vmatpush.msra.mxu2 %v1969_v12  ;;  %v1935_v11 = vld [vmem:[%s7630_s27 + $0x238] sm:$0xff] }
 0x3a1   :  { %v1939_v12 = vld [vmem:[%s7630_s27 + $0x258] sm:$0xff] }
 0x3a2   :  { %2069 = vmatpush.msrb.mxu3 %v1907_v13  ;;  %2061 = vmatpush.msra.mxu2 %v1966_v14  ;;  %v1932_v13 = vld [vmem:[%s7630_s27 + $0x220] sm:$0xff] }
 0x3a3   :  { %v1936_v14 = vld [vmem:[%s7630_s27 + $0x240] sm:$0xff] }
 0x3a4   :  { %2070 = vmatpush.msrb.mxu3 %v1904_v15  ;;  %2062 = vmatpush.msra.mxu2 %v1963_v38  ;;  %v1929_v15 = vld [vmem:[%s7630_s27 + $0x208] sm:$0xff] }
 0x3a5   :  { %v1933_v38 = vld [vmem:[%s7630_s27 + $0x228] sm:$0xff] }
 0x3a6   :  { %2071 = vmatpush.msrb.mxu3 %v1901_v16  ;;  %2063 = vmatpush.msra.mxu2 %v1960_v17  ;;  %v1926_v16 = vld [vmem:[%s7630_s27 + $0x1f0] sm:$0xff] }
 0x3a7   :  { %2064 = vmatmul.f32.vlgmr.msra.gmra.mxu2 %v7442_v25  ;;  %6643 = vmatmul.msk.f32.gmra.mxu3 %vm1695_vm7, %v7647_v44  ;;  %v1930_v17 = vld [vmem:[%s7630_s27 + $0x210] sm:$0xff] }
 0x3a8   :  { %2072 = vmatpush.msrb.mxu3 %v1898_v19  ;;  %2128 = vmatpush.msrb.mxu2 %v1911_v40  ;;  %v1923_v19 = vld [vmem:[%s7630_s27 + $0x1d8] sm:$0xff] }
 0x3a9   :  { %6628 = vmatmul.msk.f32.gmra.mxu0 %vm1695_vm7, %v7692_v55  ;;  %v1927_v40 = vld [vmem:[%s7630_s27 + $0x1f8] sm:$0xff] }
 0x3aa   :  { %2073 = vmatpush.msrb.mxu3 %v1895_v20  ;;  %2129 = vmatpush.msrb.mxu2 %v1908_v43  ;;  %v1920_v20 = vld [vmem:[%s7630_s27 + $0x1c0] sm:$0xff] }
 0x3ab   :  { %v1924_v43 = vld [vmem:[%s7630_s27 + $0x1e0] sm:$0xff] }
 0x3ac   :  { %2074 = vmatpush.msrb.mxu3 %v1892_v46  ;;  %2130 = vmatpush.msrb.mxu2 %v1905_v48  ;;  %v1917_v46 = vld [vmem:[%s7630_s27 + $0x1a8] sm:$0xff] }
 0x3ad   :  { %v1921_v48 = vld [vmem:[%s7630_s27 + $0x1c8] sm:$0xff] }
 0x3ae   :  { %2075 = vmatpush.msrb.mxu3 %v1889_v50  ;;  %2131 = vmatpush.msrb.mxu2 %v1902_v53  ;;  %v1914_v50 = vld [vmem:[%s7630_s27 + $0x190] sm:$0xff] }
 0x3b0   :  { %2076 = vmatpush.msrb.mxu3 %v1886_v57  ;;  %2132 = vmatpush.msrb.mxu2 %v1899_v61 }
 0x3b2   :  { %2077 = vmatpush.msrb.mxu3 %v1883_v63  ;;  %2133 = vmatpush.msrb.mxu2 %v1896_v1  ;;  %v1915_v63 = vld [vmem:[%s7630_s27 + $0x198] sm:$0xff] }
 0x3b4   :  { %2078 = vmatpush.msrb.mxu3 %v1880_v3  ;;  %2134 = vmatpush.msrb.mxu2 %v1893_v5  ;;  %v1909_v5 = vld [vmem:[%s7630_s27 + $0x168] sm:$0xff] }
 0x3b5   :  { %v1630_v51 = vpop.f32.mrf.mxu0 }
 0x3b6   :  { %2079 = vmatpush.msrb.mxu3 %v1877_v7  ;;  %2135 = vmatpush.msrb.mxu2 %v1890_v10  ;;  %v2006_v7 = vld [vmem:[%s7630_s27 + $0x470] sm:$0xff] }
 0x3b7   :  { %v1650_v53 = vpop.f32.mrf.mxu1  ;;  %v1906_v10 = vld [vmem:[%s7630_s27 + $0x150] sm:$0xff] }
 0x3b8   :  { %2080 = vmatpush.msrb.mxu3 %v1874_v21  ;;  %2136 = vmatpush.msrb.mxu2 %v1887_v22  ;;  %v2003_v21 = vld [vmem:[%s7630_s27 + $0x458] sm:$0xff] }
 0x3b9   :  { %v1903_v22 = vld [vmem:[%s7630_s27 + $0x138] sm:$0xff] }
 0x3ba   :  { %2081 = vmatpush.msrb.mxu3 %v1871_v23  ;;  %2137 = vmatpush.msrb.mxu2 %v1884_v28  ;;  %v1610_v39 = vpop.f32.mrf.mxu3  ;;  %v2000_v23 = vld [vmem:[%s7630_s27 + $0x440] sm:$0xff] }
 0x3bb   :  { %v1900_v28 = vld [vmem:[%s7630_s27 + $0x120] sm:$0xff] }
 0x3bc   :  { %2082 = vmatpush.msrb.mxu3 %v1868_v29  ;;  %2138 = vmatpush.msrb.mxu2 %v1881_v31  ;;  %v1997_v29 = vld [vmem:[%s7630_s27 + $0x428] sm:$0xff] }
 0x3bd   :  { %v1590_v41 = vpop.f32.mrf.mxu2  ;;  %v1897_v31 = vld [vmem:[%s7630_s27 + $0x108] sm:$0xff] }
 0x3be   :  { %2083 = vmatpush.msrb.mxu3 %v1865_v32  ;;  %2139 = vmatpush.msrb.mxu2 %v1878_v33  ;;  %v1611_v45 = vadd.f32 %v1610_v39, %v1590_v41  ;;  %v1994_v32 = vld [vmem:[%s7630_s27 + $0x410] sm:$0xff]  ;;  %v1888_v39 = vld [vmem:[%s7630_s27 + $0xc0] sm:$0xff]  ;;  %v1985_v41 = vld [vmem:[%s7630_s27 + $0x3c8] sm:$0xff] }
 0x3bf   :  { %2084 = vmatmul.f32.vlgmr.msrb.gmra.mxu3 %v7445_v58  ;;  %v1894_v33 = vld [vmem:[%s7630_s27 + $0xf0] sm:$0xff] }
 0x3c0   :  { %2148 = vmatpush.msra.mxu3 %v1959_v34  ;;  %2140 = vmatpush.msrb.mxu2 %v1875_v37  ;;  %v1631_v52 = vadd.f32 %v1630_v51, %v1611_v45  ;;  %v1891_v34 = vld [vmem:[%s7630_s27 + $0xd8] sm:$0xff]  ;;  %v1988_v37 = vld [vmem:[%s7630_s27 + $0x3e0] sm:$0xff]  ;;  %v1982_v45 = vld [vmem:[%s7630_s27 + $0x3b0] sm:$0xff] }
 0x3c1   :  { %v1976_v51 = vld [vmem:[%s7630_s27 + $0x380] sm:$0xff] }
 0x3c2   :  { %2149 = vmatpush.msra.mxu3 %v1956_v47  ;;  %2141 = vmatpush.msrb.mxu2 %v1872_v49  ;;  %v1882_v47 = vld [vmem:[%s7630_s27 + $0x90] sm:$0xff]  ;;  %v1879_v49 = vld [vmem:[%s7630_s27 + $0x78] sm:$0xff] }
 0x3c3   :  { %6629 = vmatpush.msk.msrb.mxu1 %vm726_vm3, %v1631_v52  ;;  %v1876_v52 = vld [vmem:[%s7630_s27 + $0x60] sm:$0xff] }
 0x3c4   :  { %6630 = vmatmul.msk.f32.vlgmr.msrb.gmra.mxu1 %vm1695_vm7, %v7676_v18  ;;  %2150 = vmatpush.msra.mxu3 %v1953_v54  ;;  %v1973_v54 = vld [vmem:[%s7630_s27 + $0x368] sm:$0xff] }
 0x3c5   :  { %6635 = vmatpush.msk.msra.mxu1 %vm726_vm3, %v1245_v24  ;;  %2142 = vmatpush.msrb.mxu2 %v1869_v56  ;;  %v1873_v56 = vld [vmem:[%s7630_s27 + $0x48] sm:$0xff]  ;;  %v1970_v24 = vld [vmem:[%s7630_s27 + $0x350] sm:$0xff] }
 0x3c6   :  { %2151 = vmatpush.msra.mxu3 %v1950_v60  ;;  %v1967_v60 = vld [vmem:[%s7630_s27 + $0x338] sm:$0xff] }
 0x3c7   :  { %2028 = vmatpush.msrb.mxu1 %v1957_v27  ;;  %2143 = vmatpush.msrb.mxu2 %v1866_v62  ;;  %v1870_v27 = vld [vmem:[%s7630_s27 + $0x30] sm:$0xff]  ;;  %v1867_v62 = vld [vmem:[%s7630_s27 + $0x18] sm:$0xff] }
 0x3c8   :  { %2152 = vmatpush.msra.mxu3 %v1947_v26  ;;  %2144 = vmatmul.f32.vlgmr.msrb.gmra.mxu2 %v7445_v58  ;;  %v1864_v26 = vld [vmem:[%s7630_s27] sm:$0xff] }
 0x3c9   :  { %2029 = vmatpush.msrb.mxu1 %v1954_v0  ;;  %v1964_v0 = vld [vmem:[%s7630_s27 + $0x320] sm:$0xff] }
 0x3ca   :  { %2153 = vmatpush.msra.mxu3 %v1944_v2  ;;  %v1961_v2 = vld [vmem:[%s7630_s27 + $0x308] sm:$0xff] }
 0x3cb   :  { %2030 = vmatpush.msrb.mxu1 %v1951_v36  ;;  %v1958_v36 = vld [vmem:[%s7630_s27 + $0x2f0] sm:$0xff] }
 0x3cc   :  { %2154 = vmatpush.msra.mxu3 %v1941_v30  ;;  %6631 = vmatmul.msk.f32.gmra.mxu1 %vm1695_vm7, %v7692_v55  ;;  %v1952_v30 = vld [vmem:[%s7630_s27 + $0x2c0] sm:$0xff] }
 0x3cd   :  { %2031 = vmatpush.msrb.mxu1 %v1948_v4  ;;  %v1955_v4 = vld [vmem:[%s7630_s27 + $0x2d8] sm:$0xff] }
 0x3ce   :  { %2155 = vmatpush.msra.mxu3 %v1938_v8  ;;  %v1946_v8 = vld [vmem:[%s7630_s27 + $0x290] sm:$0xff] }
 0x3cf   :  { %2032 = vmatpush.msrb.mxu1 %v1945_v6  ;;  %v1949_v6 = vld [vmem:[%s7630_s27 + $0x2a8] sm:$0xff] }
 0x3d0   :  { %2156 = vmatpush.msra.mxu3 %v1935_v11  ;;  %v1940_v11 = vld [vmem:[%s7630_s27 + $0x260] sm:$0xff] }
 0x3d1   :  { %2033 = vmatpush.msrb.mxu1 %v1942_v9  ;;  %v1943_v9 = vld [vmem:[%s7630_s27 + $0x278] sm:$0xff] }
 0x3d2   :  { %2157 = vmatpush.msra.mxu3 %v1932_v13  ;;  %v1934_v13 = vld [vmem:[%s7630_s27 + $0x230] sm:$0xff] }
 0x3d3   :  { %2034 = vmatpush.msrb.mxu1 %v1939_v12  ;;  %v1937_v12 = vld [vmem:[%s7630_s27 + $0x248] sm:$0xff] }
 0x3d4   :  { %2158 = vmatpush.msra.mxu3 %v1929_v15  ;;  %6636 = vmatmul.msk.f32.vlgmr.msra.gmra.mxu1 %vm1695_vm7, %v7636_v35  ;;  %v1918_v35 = vld [vmem:[%s7630_s27 + $0x1b0] sm:$0xff]  ;;  %v1928_v15 = vld [vmem:[%s7630_s27 + $0x200] sm:$0xff] }
 0x3d5   :  { %2035 = vmatpush.msrb.mxu1 %v1936_v14  ;;  %v1931_v14 = vld [vmem:[%s7630_s27 + $0x218] sm:$0xff] }
 0x3d6   :  { %2159 = vmatpush.msra.mxu3 %v1926_v16  ;;  %v1922_v16 = vld [vmem:[%s7630_s27 + $0x1d0] sm:$0xff] }
 0x3d7   :  { %2036 = vmatpush.msrb.mxu1 %v1933_v38  ;;  %v1925_v38 = vld [vmem:[%s7630_s27 + $0x1e8] sm:$0xff] }
 0x3d8   :  { %2160 = vmatpush.msra.mxu3 %v1923_v19  ;;  %v1916_v19 = vld [vmem:[%s7630_s27 + $0x1a0] sm:$0xff] }
 0x3d9   :  { %2037 = vmatpush.msrb.mxu1 %v1930_v17  ;;  %v1919_v17 = vld [vmem:[%s7630_s27 + $0x1b8] sm:$0xff] }
 0x3da   :  { %2161 = vmatpush.msra.mxu3 %v1920_v20  ;;  %v2007_v20 = vld [vmem:[%s7630_s27 + $0x478] sm:$0xff] }
 0x3db   :  { %2038 = vmatpush.msrb.mxu1 %v1927_v40  ;;  %v1690_v1 = vpop.f32.mrf.mxu3  ;;  %v1913_v40 = vld [vmem:[%s7630_s27 + $0x188] sm:$0xff] }
 0x3dc   :  { %2162 = vmatpush.msra.mxu3 %v1917_v46  ;;  %6637 = vmatmul.msk.f32.gmra.mxu1 %vm1695_vm7, %v7647_v44  ;;  %v1912_v44 = vld [vmem:[%s7630_s27 + $0x180] sm:$0xff]  ;;  %v2001_v46 = vld [vmem:[%s7630_s27 + $0x448] sm:$0xff] }
 0x3dd   :  { %2039 = vmatpush.msrb.mxu1 %v1924_v43  ;;  %v1670_v57 = vpop.f32.mrf.mxu2  ;;  %v2004_v43 = vld [vmem:[%s7630_s27 + $0x460] sm:$0xff] }
 0x3de   :  { %2163 = vmatpush.msra.mxu3 %v1914_v50  ;;  %v1671_v61 = vadd.f32 %v1670_v57, %v1650_v53  ;;  %v1995_v50 = vld [vmem:[%s7630_s27 + $0x418] sm:$0xff]  ;;  %v1989_v53 = vld [vmem:[%s7630_s27 + $0x3e8] sm:$0xff]  ;;  %v1986_v57 = vld [vmem:[%s7630_s27 + $0x3d0] sm:$0xff] }
 0x3df   :  { %2040 = vmatpush.msrb.mxu1 %v1921_v48  ;;  %2164 = vmatmul.f32.vlgmr.msra.gmra.mxu3 %v7439_v59  ;;  %v1998_v48 = vld [vmem:[%s7630_s27 + $0x430] sm:$0xff] }
 0x3e0   :  { %v1691_v3 = vadd.f32 %v1690_v1, %v1671_v61  ;;  %v1983_v61 = vld [vmem:[%s7630_s27 + $0x3b8] sm:$0xff]  ;;  %v1977_v1 = vld [vmem:[%s7630_s27 + $0x388] sm:$0xff] }
 0x3e1   :  { %2041 = vmatpush.msrb.mxu1 %v1918_v35  ;;  %v1992_v35 = vld [vmem:[%s7630_s27 + $0x400] sm:$0xff] }
 0x3e2   :  { %6632 = vmatpush.msk.msrb.mxu0 %vm726_vm3, %v1691_v3  ;;  %v1974_v3 = vld [vmem:[%s7630_s27 + $0x370] sm:$0xff] }
 0x3e3   :  { %2042 = vmatpush.msrb.mxu1 %v1915_v63  ;;  %6633 = vmatmul.msk.f32.vlgmr.msrb.gmra.mxu0 %vm1695_vm7, %v7676_v18  ;;  %v1991_v18 = vld [vmem:[%s7630_s27 + $0x3f8] sm:$0xff]  ;;  %v1980_v63 = vld [vmem:[%s7630_s27 + $0x3a0] sm:$0xff] }
 0x3e4   :  { %2008 = vmatpush.msra.mxu0 %v1909_v5  ;;  %v1971_v5 = vld [vmem:[%s7630_s27 + $0x358] sm:$0xff] }
 0x3e5   :  { %2043 = vmatpush.msrb.mxu1 %v1912_v44  ;;  %v1968_v44 = vld [vmem:[%s7630_s27 + $0x340] sm:$0xff] }
 0x3e6   :  { %2044 = vmatmul.f32.vlgmr.msrb.gmra.mxu1 %v7439_v59  ;;  %2009 = vmatpush.msra.mxu0 %v1906_v10  ;;  %v1962_v10 = vld [vmem:[%s7630_s27 + $0x310] sm:$0xff] }
 0x3e7   :  { %2108 = vmatpush.msra.mxu1 %v2006_v7  ;;  %v1965_v7 = vld [vmem:[%s7630_s27 + $0x328] sm:$0xff] }
 0x3e8   :  { %2010 = vmatpush.msra.mxu0 %v1903_v22  ;;  %v2323_v22 = vld [vmem:[%s7837_s9 + $0x158] sm:$0xff] }
 0x3e9   :  { %2109 = vmatpush.msra.mxu1 %v2003_v21  ;;  %v2326_v21 = vld [vmem:[%s7837_s9 + $0x170] sm:$0xff] }
 0x3ea   :  { %2011 = vmatpush.msra.mxu0 %v1900_v28  ;;  %v2317_v28 = vld [vmem:[%s7837_s9 + $0x128] sm:$0xff] }
 0x3eb   :  { %2110 = vmatpush.msra.mxu1 %v2000_v23  ;;  %6634 = vmatmul.msk.f32.gmra.mxu0 %vm1695_vm7, %v7692_v55  ;;  %v1979_v55 = vld [vmem:[%s7630_s27 + $0x398] sm:$0xff]  ;;  %v2320_v23 = vld [vmem:[%s7837_s9 + $0x140] sm:$0xff]  ;;  %s9127_s27 = sld [smem:[%s9970_s0 + %s6876_s24]]  }
 0x3ec   :  { %2012 = vmatpush.msra.mxu0 %v1897_v31  ;;  %v2311_v31 = vld [vmem:[%s7837_s9 + $0xf8] sm:$0xff] }
 0x3ed   :  { %2111 = vmatpush.msra.mxu1 %v1997_v29  ;;  %v2314_v29 = vld [vmem:[%s7837_s9 + $0x110] sm:$0xff] }
 0x3ee   :  { %2013 = vmatpush.msra.mxu0 %v1894_v33  ;;  %v2305_v33 = vld [vmem:[%s7837_s9 + $0xc8] sm:$0xff] }
 0x3ef   :  { %2112 = vmatpush.msra.mxu1 %v1994_v32  ;;  %v2308_v32 = vld [vmem:[%s7837_s9 + $0xe0] sm:$0xff] }
 0x3f0   :  { %2014 = vmatpush.msra.mxu0 %v1891_v34  ;;  %v2299_v34 = vld [vmem:[%s7837_s9 + $0x98] sm:$0xff] }
 0x3f1   :  { %2113 = vmatpush.msra.mxu1 %v1991_v18  ;;  %v2302_v18 = vld [vmem:[%s7837_s9 + $0xb0] sm:$0xff] }
 0x3f2   :  { %2015 = vmatpush.msra.mxu0 %v1888_v39  ;;  %v2293_v39 = vld [vmem:[%s7837_s9 + $0x68] sm:$0xff] }
 0x3f3   :  { %2114 = vmatpush.msra.mxu1 %v1988_v37  ;;  %v2296_v37 = vld [vmem:[%s7837_s9 + $0x80] sm:$0xff] }
 0x3f4   :  { %2016 = vmatpush.msra.mxu0 %v1885_v42 }
 0x3f5   :  { %2115 = vmatpush.msra.mxu1 %v1985_v41 }
 0x3f6   :  { %2017 = vmatpush.msra.mxu0 %v1882_v47  ;;  %v2287_v47 = vld [vmem:[%s7837_s9 + $0x38] sm:$0xff] }
 0x3f7   :  { %2116 = vmatpush.msra.mxu1 %v1982_v45  ;;  %v2290_v45 = vld [vmem:[%s7837_s9 + $0x50] sm:$0xff] }
 0x3f8   :  { %2018 = vmatpush.msra.mxu0 %v1879_v49  ;;  %v2281_v49 = vld [vmem:[%s7837_s9 + $0x8] sm:$0xff] }
 0x3f9   :  { %2117 = vmatpush.msra.mxu1 %v1979_v55  ;;  %v2284_v55 = vld [vmem:[%s7837_s9 + $0x20] sm:$0xff] }
 0x3fa   :  { %2019 = vmatpush.msra.mxu0 %v1876_v52 }
 0x3fb   :  { %2118 = vmatpush.msra.mxu1 %v1976_v51  ;;  %v2375_v51 = vld [vmem:[%s7837_s9 + $0x2f8] sm:$0xff] }
 0x3fc   :  { %2020 = vmatpush.msra.mxu0 %v1873_v56  ;;  %v2372_v56 = vld [vmem:[%s7837_s9 + $0x2e0] sm:$0xff] }
 0x3fd   :  { %2119 = vmatpush.msra.mxu1 %v1973_v54 }
 0x3fe   :  { %2021 = vmatpush.msra.mxu0 %v1870_v27  ;;  %v2366_v27 = vld [vmem:[%s7837_s9 + $0x2b0] sm:$0xff] }
 0x3ff   :  { %2120 = vmatpush.msra.mxu1 %v1970_v24  ;;  %v2369_v24 = vld [vmem:[%s7837_s9 + $0x2c8] sm:$0xff] }
 0x400   :  { %2022 = vmatpush.msra.mxu0 %v1867_v62  ;;  %v2360_v62 = vld [vmem:[%s7837_s9 + $0x280] sm:$0xff] }
 0x401   :  { %2121 = vmatpush.msra.mxu1 %v1967_v60  ;;  %v2363_v60 = vld [vmem:[%s7837_s9 + $0x298] sm:$0xff] }
 0x402   :  { %2023 = vmatpush.msra.mxu0 %v1864_v26 }
 0x403   :  { %2122 = vmatpush.msra.mxu1 %v1964_v0  ;;  %2024 = vmatmul.f32.vlgmr.msra.gmra.mxu0 %v7445_v58 }
 0x404   :  { %2088 = vmatpush.msrb.mxu0 %v1958_v36  ;;  %v2357_v36 = vld [vmem:[%s7837_s9 + $0x268] sm:$0xff] }
 0x405   :  { %2123 = vmatpush.msra.mxu1 %v1961_v2 }
 0x406   :  { %2124 = vmatmul.f32.vlgmr.msra.gmra.mxu1 %v7442_v25  ;;  %2089 = vmatpush.msrb.mxu0 %v1955_v4  ;;  %v2354_v4 = vld [vmem:[%s7837_s9 + $0x250] sm:$0xff] }
 0x408   :  { %2090 = vmatpush.msrb.mxu0 %v1952_v30  ;;  %v2351_v30 = vld [vmem:[%s7837_s9 + $0x238] sm:$0xff] }
 0x40a   :  { %2091 = vmatpush.msrb.mxu0 %v1949_v6  ;;  %v7879_v2 = vpop.f32.mrf.mxu2  ;;  %v2348_v6 = vld [vmem:[%s7837_s9 + $0x220] sm:$0xff] }
 0x40c   :  { %2092 = vmatpush.msrb.mxu0 %v1946_v8  ;;  %v2345_v8 = vld [vmem:[%s7837_s9 + $0x208] sm:$0xff] }
 0x40e   :  { %2093 = vmatpush.msrb.mxu0 %v1943_v9 }
 0x410   :  { %2094 = vmatpush.msrb.mxu0 %v1940_v11 }
 0x412   :  { %2095 = vmatpush.msrb.mxu0 %v1937_v12  ;;  %v2342_v12 = vld [vmem:[%s7837_s9 + $0x1f0] sm:$0xff] }
 0x414   :  { %2096 = vmatpush.msrb.mxu0 %v1934_v13  ;;  %v7890_v13 = vpop.f32.mrf.mxu2 }
 0x416   :  { %2097 = vmatpush.msrb.mxu0 %v1931_v14  ;;  %v2339_v14 = vld [vmem:[%s7837_s9 + $0x1d8] sm:$0xff] }
 0x418   :  { %2098 = vmatpush.msrb.mxu0 %v1928_v15  ;;  %v2336_v15 = vld [vmem:[%s7837_s9 + $0x1c0] sm:$0xff] }
 0x41a   :  { %2099 = vmatpush.msrb.mxu0 %v1925_v38  ;;  %v2333_v38 = vld [vmem:[%s7837_s9 + $0x1a8] sm:$0xff] }
 0x41c   :  { %2100 = vmatpush.msrb.mxu0 %v1922_v16  ;;  %v7857_v42 = vpop.f32.mrf.mxu0  ;;  %v2330_v16 = vld [vmem:[%s7837_s9 + $0x190] sm:$0xff] }
 0x41e   :  { %2101 = vmatpush.msrb.mxu0 %v1919_v17 }
 0x420   :  { %2102 = vmatpush.msrb.mxu0 %v1916_v19 }
 0x422   :  { %2103 = vmatpush.msrb.mxu0 %v1913_v40 }
 0x423   :  { %2104 = vmatmul.f32.vlgmr.msrb.gmra.mxu0 %v7439_v59 }
 0x424   :  { %2168 = vmatpush.msra.mxu0 %v2007_v20 }
 0x426   :  { %2169 = vmatpush.msra.mxu0 %v2004_v43  ;;  %v7866_v54 = vpop.f32.mrf.mxu0 }
 0x428   :  { %2170 = vmatpush.msra.mxu0 %v2001_v46  ;;  %v7900_v46 = vld [vmem:[%s6564_s13] sm:$0xff] }
 0x42a   :  { %2171 = vmatpush.msra.mxu0 %v1998_v48  ;;  %v2065_v20 = vpop.f32.mrf.mxu2  ;;  %v2325_v48 = vld [vmem:[%s7837_s9 + $0x168] sm:$0xff] }
 0x42c   :  { %2172 = vmatpush.msra.mxu0 %v1995_v50  ;;  %v2322_v50 = vld [vmem:[%s7837_s9 + $0x150] sm:$0xff] }
 0x42e   :  { %2173 = vmatpush.msra.mxu0 %v1992_v35  ;;  %v2319_v35 = vld [vmem:[%s7837_s9 + $0x138] sm:$0xff] }
 0x430   :  { %2174 = vmatpush.msra.mxu0 %v1989_v53  ;;  %v2316_v53 = vld [vmem:[%s7837_s9 + $0x120] sm:$0xff] }
 0x432   :  { %2175 = vmatpush.msra.mxu0 %v1986_v57  ;;  %v7909_v57 = vld [vmem:[%s6564_s13 + $0x8] sm:$0xf]  ;;  %s6578_s13 = sld [smem:[%s9970_s0 + %s6880_s10]]  }
 0x434   :  { %2176 = vmatpush.msra.mxu0 %v1983_v61  ;;  %v7911_v61 = vpop.f32.mrf.mxu3 }
 0x436   :  { %2177 = vmatpush.msra.mxu0 %v1980_v63  ;;  %v2313_v63 = vld [vmem:[%s7837_s9 + $0x108] sm:$0xff] }
 0x438   :  { %2178 = vmatpush.msra.mxu0 %v1977_v1  ;;  %v2310_v1 = vld [vmem:[%s7837_s9 + $0xf0] sm:$0xff] }
 0x43a   :  { %2179 = vmatpush.msra.mxu0 %v1974_v3  ;;  %v2307_v3 = vld [vmem:[%s7837_s9 + $0xd8] sm:$0xff] }
 0x43c   :  { %2180 = vmatpush.msra.mxu0 %v1971_v5  ;;  %v2304_v5 = vld [vmem:[%s7837_s9 + $0xc0] sm:$0xff] }
 0x43e   :  { %2181 = vmatpush.msra.mxu0 %v1968_v44  ;;  %v2301_v44 = vld [vmem:[%s7837_s9 + $0xa8] sm:$0xff] }
 0x440   :  { %2182 = vmatpush.msra.mxu0 %v1965_v7  ;;  %v7920_v7 = vpop.f32.mrf.mxu3 }
 0x441   :  { %v7855_v41 = vpop.f32.mrf.mxu1 }
 0x442   :  { %2183 = vmatpush.msra.mxu0 %v1962_v10  ;;  %v2298_v10 = vld [vmem:[%s7837_s9 + $0x90] sm:$0xff] }
 0x443   :  { %2184 = vmatmul.f32.vlgmr.msra.gmra.mxu0 %v7442_v25 }
 0x444   :  { %2484 = vmatpush.msrb.mxu0 %v2326_v21  ;;  %v2295_v21 = vld [vmem:[%s7837_s9 + $0x78] sm:$0xff] }
 0x446   :  { %2485 = vmatpush.msrb.mxu0 %v2323_v22  ;;  %v2292_v22 = vld [vmem:[%s7837_s9 + $0x60] sm:$0xff] }
 0x448   :  { %2486 = vmatpush.msrb.mxu0 %v2320_v23  ;;  %v2289_v23 = vld [vmem:[%s7837_s9 + $0x48] sm:$0xff] }
 0x449   :  { %v7864_v52 = vpop.f32.mrf.mxu1 }
 0x44a   :  { %2487 = vmatpush.msrb.mxu0 %v2317_v28  ;;  %v2286_v28 = vld [vmem:[%s7837_s9 + $0x30] sm:$0xff] }
 0x44c   :  { %2488 = vmatpush.msrb.mxu0 %v2314_v29  ;;  %v2085_v29 = vpop.f32.mrf.mxu3 }
 0x44e   :  { %2489 = vmatpush.msrb.mxu0 %v2311_v31 }
 0x450   :  { %2490 = vmatpush.msrb.mxu0 %v2308_v32  ;;  %v2283_v32 = vld [vmem:[%s7837_s9 + $0x18] sm:$0xff] }
 0x451   :  { %v7874_v0 = vpop.f32.mrf.mxu1 }
 0x452   :  { %2491 = vmatpush.msrb.mxu0 %v2305_v33 }
 0x454   :  { %2492 = vmatpush.msrb.mxu0 %v2302_v18 }
 0x456   :  { %2493 = vmatpush.msrb.mxu0 %v2299_v34  ;;  %v2280_v34 = vld [vmem:[%s7837_s9] sm:$0xff] }
 0x458   :  { %2494 = vmatpush.msrb.mxu0 %v2296_v37 }
 0x459   :  { %v7885_v9 = vpop.f32.mrf.mxu1 }
 0x45a   :  { %2495 = vmatpush.msrb.mxu0 %v2293_v39  ;;  %v2373_v39 = vld [vmem:[%s7837_s9 + $0x2e8] sm:$0xff] }
 0x45c   :  { %2496 = vmatpush.msrb.mxu0 %v2290_v45  ;;  %v2374_v45 = vld [vmem:[%s7837_s9 + $0x2f0] sm:$0xff] }
 0x45e   :  { %2497 = vmatpush.msrb.mxu0 %v2287_v47  ;;  %v2370_v47 = vld [vmem:[%s7837_s9 + $0x2d0] sm:$0xff] }
 0x460   :  { %2498 = vmatpush.msrb.mxu0 %v2284_v55  ;;  %v7876_v26 = vpop.f32.mrf.mxu0  ;;  %v2371_v55 = vld [vmem:[%s7837_s9 + $0x2d8] sm:$0xff] }
 0x462   :  { %2499 = vmatpush.msrb.mxu0 %v2281_v49  ;;  %v2367_v49 = vld [vmem:[%s7837_s9 + $0x2b8] sm:$0xff] }
 0x463   :  { %2500 = vmatmul.f32.vlgmr.msrb.gmra.mxu0 %v7445_v58  ;;  %v2045_v17 = vpop.f32.mrf.mxu1 }
 0x464   :  { %2564 = vmatpush.msra.mxu0 %v2375_v51  ;;  %v2368_v51 = vld [vmem:[%s7837_s9 + $0x2c0] sm:$0xff] }
 0x466   :  { %2565 = vmatpush.msra.mxu0 %v2372_v56  ;;  %v2364_v56 = vld [vmem:[%s7837_s9 + $0x2a0] sm:$0xff] }
 0x468   :  { %2566 = vmatpush.msra.mxu0 %v2369_v24  ;;  %v7887_v11 = vpop.f32.mrf.mxu0  ;;  %v2365_v24 = vld [vmem:[%s7837_s9 + $0x2a8] sm:$0xff] }
 0x46a   :  { %2567 = vmatpush.msra.mxu0 %v2366_v27  ;;  %v2361_v27 = vld [vmem:[%s7837_s9 + $0x288] sm:$0xff] }
 0x46c   :  { %2568 = vmatpush.msra.mxu0 %v2363_v60  ;;  %v2362_v60 = vld [vmem:[%s7837_s9 + $0x290] sm:$0xff] }
 0x46e   :  { %2569 = vmatpush.msra.mxu0 %v2360_v62  ;;  %v2358_v62 = vld [vmem:[%s7837_s9 + $0x270] sm:$0xff] }
 0x470   :  { %2570 = vmatpush.msra.mxu0 %v2357_v36  ;;  %v2359_v36 = vld [vmem:[%s7837_s9 + $0x278] sm:$0xff] }
 0x472   :  { %2571 = vmatpush.msra.mxu0 %v2354_v4  ;;  %v2355_v4 = vld [vmem:[%s7837_s9 + $0x258] sm:$0xff] }
 0x474   :  { %2572 = vmatpush.msra.mxu0 %v2351_v30  ;;  %v2356_v30 = vld [vmem:[%s7837_s9 + $0x260] sm:$0xff] }
 0x476   :  { %2573 = vmatpush.msra.mxu0 %v2348_v6  ;;  %v2352_v6 = vld [vmem:[%s7837_s9 + $0x240] sm:$0xff] }
 0x478   :  { %2574 = vmatpush.msra.mxu0 %v2345_v8  ;;  %v2353_v8 = vld [vmem:[%s7837_s9 + $0x248] sm:$0xff] }
 0x47a   :  { %2575 = vmatpush.msra.mxu0 %v2342_v12  ;;  %v2349_v12 = vld [vmem:[%s7837_s9 + $0x228] sm:$0xff] }
 0x47c   :  { %2576 = vmatpush.msra.mxu0 %v2339_v14  ;;  %v2350_v14 = vld [vmem:[%s7837_s9 + $0x230] sm:$0xff] }
 0x47e   :  { %2577 = vmatpush.msra.mxu0 %v2336_v15  ;;  %v2346_v15 = vld [vmem:[%s7837_s9 + $0x210] sm:$0xff] }
 0x480   :  { %2578 = vmatpush.msra.mxu0 %v2333_v38  ;;  %v2025_v19 = vpop.f32.mrf.mxu0  ;;  %v2347_v38 = vld [vmem:[%s7837_s9 + $0x218] sm:$0xff] }
 0x481   :  { %v2046_v40 = vadd.f32 %v2045_v17, %v2025_v19  ;;  %v2344_v17 = vld [vmem:[%s7837_s9 + $0x200] sm:$0xff] }
 0x482   :  { %2579 = vmatpush.msra.mxu0 %v2330_v16  ;;  %v2343_v16 = vld [vmem:[%s7837_s9 + $0x1f8] sm:$0xff]  ;;  %v2340_v19 = vld [vmem:[%s7837_s9 + $0x1e0] sm:$0xff] }
 0x483   :  { %2580 = vmatmul.f32.vlgmr.msra.gmra.mxu0 %v7439_v59  ;;  %v2066_v43 = vadd.f32 %v2065_v20, %v2046_v40  ;;  %v2125_v18 = vpop.f32.mrf.mxu1  ;;  %v2341_v40 = vld [vmem:[%s7837_s9 + $0x1e8] sm:$0xff]  ;;  %v2165_v20 = vpop.f32.mrf.mxu3 }
 0x485   :  { %6644 = vmatpush.msk.msrb.mxu1 %vm726_vm3, %v2066_v43  ;;  %v2337_v43 = vld [vmem:[%s7837_s9 + $0x1c8] sm:$0xff] }
 0x486   :  { %6645 = vmatmul.msk.f32.vlgmr.msrb.gmra.mxu1 %vm1695_vm7, %v7900_v46 }
 0x487   :  { %2424 = vmatpush.msra.mxu1 %v2325_v48  ;;  %v2338_v48 = vld [vmem:[%s7837_s9 + $0x1d0] sm:$0xff] }
 0x489   :  { %2425 = vmatpush.msra.mxu1 %v2322_v50  ;;  %v2145_v50 = vpop.f32.mrf.mxu2 }
 0x48b   :  { %2426 = vmatpush.msra.mxu1 %v2319_v35  ;;  %v2334_v35 = vld [vmem:[%s7837_s9 + $0x1b0] sm:$0xff] }
 0x48d   :  { %2427 = vmatpush.msra.mxu1 %v2316_v53  ;;  %v2335_v53 = vld [vmem:[%s7837_s9 + $0x1b8] sm:$0xff] }
 0x48e   :  { %6646 = vmatmul.msk.f32.gmra.mxu1 %vm1695_vm7, %v7909_v57 }
 0x48f   :  { %2428 = vmatpush.msra.mxu1 %v2313_v63  ;;  %v2166_v63 = vadd.f32 %v2165_v20, %v2145_v50  ;;  %v2382_v20 = vld [vmem:[%s7837_s9 + $0x330] sm:$0xff]  ;;  %v2379_v50 = vld [vmem:[%s7837_s9 + $0x318] sm:$0xff] }
 0x491   :  { %2429 = vmatpush.msra.mxu1 %v2310_v1 }
 0x493   :  { %2430 = vmatpush.msra.mxu1 %v2307_v3  ;;  %v2331_v3 = vld [vmem:[%s7837_s9 + $0x198] sm:$0xff] }
 0x495   :  { %2431 = vmatpush.msra.mxu1 %v2304_v5 }
 0x497   :  { %2432 = vmatpush.msra.mxu1 %v2301_v44  ;;  %v2332_v44 = vld [vmem:[%s7837_s9 + $0x1a0] sm:$0xff] }
 0x499   :  { %2433 = vmatpush.msra.mxu1 %v2298_v10  ;;  %v2421_v10 = vld [vmem:[%s7837_s9 + $0x468] sm:$0xff] }
 0x49b   :  { %2434 = vmatpush.msra.mxu1 %v2295_v21  ;;  %v2328_v21 = vld [vmem:[%s7837_s9 + $0x180] sm:$0xff] }
 0x49d   :  { %2435 = vmatpush.msra.mxu1 %v2292_v22  ;;  %v2329_v22 = vld [vmem:[%s7837_s9 + $0x188] sm:$0xff] }
 0x49f   :  { %2436 = vmatpush.msra.mxu1 %v2289_v23  ;;  %v2418_v23 = vld [vmem:[%s7837_s9 + $0x450] sm:$0xff] }
 0x4a0   :  { %v2105_v31 = vpop.f32.mrf.mxu0 }
 0x4a1   :  { %v2106_v33 = vadd.f32 %v2105_v31, %v2085_v29  ;;  %2437 = vmatpush.msra.mxu1 %v2286_v28  ;;  %v2422_v28 = vld [vmem:[%s7837_s9 + $0x470] sm:$0xff]  ;;  %v2423_v29 = vld [vmem:[%s7837_s9 + $0x478] sm:$0xff] }
 0x4a2   :  { %v2415_v31 = vld [vmem:[%s7837_s9 + $0x438] sm:$0xff] }
 0x4a3   :  { %v2126_v37 = vadd.f32 %v2125_v18, %v2106_v33  ;;  %2438 = vmatpush.msra.mxu1 %v2283_v32  ;;  %v2419_v32 = vld [vmem:[%s7837_s9 + $0x458] sm:$0xff]  ;;  %v2420_v33 = vld [vmem:[%s7837_s9 + $0x460] sm:$0xff] }
 0x4a4   :  { %v2416_v18 = vld [vmem:[%s7837_s9 + $0x440] sm:$0xff] }
 0x4a5   :  { %6647 = vmatpush.msk.msra.mxu2 %vm726_vm3, %v2126_v37  ;;  %2439 = vmatpush.msra.mxu1 %v2280_v34  ;;  %v2417_v34 = vld [vmem:[%s7837_s9 + $0x448] sm:$0xff] }
 0x4a6   :  { %6648 = vmatmul.msk.f32.vlgmr.msra.gmra.mxu2 %vm1695_vm7, %v7900_v46  ;;  %2440 = vmatmul.f32.vlgmr.msra.gmra.mxu1 %v7445_v58  ;;  %v2409_v37 = vld [vmem:[%s7837_s9 + $0x408] sm:$0xff] }
 0x4a7   :  { %2444 = vmatpush.msrb.mxu2 %v2373_v39  ;;  %2504 = vmatpush.msrb.mxu1 %v2374_v45  ;;  %v2414_v39 = vld [vmem:[%s7837_s9 + $0x430] sm:$0xff] }
 0x4a8   :  { %v2406_v45 = vld [vmem:[%s7837_s9 + $0x3f0] sm:$0xff] }
 0x4a9   :  { %2445 = vmatpush.msrb.mxu2 %v2370_v47  ;;  %2505 = vmatpush.msrb.mxu1 %v2371_v55  ;;  %v2410_v47 = vld [vmem:[%s7837_s9 + $0x410] sm:$0xff]  ;;  %v2411_v55 = vld [vmem:[%s7837_s9 + $0x418] sm:$0xff] }
 0x4ab   :  { %2446 = vmatpush.msrb.mxu2 %v2367_v49  ;;  %2506 = vmatpush.msrb.mxu1 %v2368_v51  ;;  %v2403_v49 = vld [vmem:[%s7837_s9 + $0x3d8] sm:$0xff] }
 0x4ac   :  { %v2407_v51 = vld [vmem:[%s7837_s9 + $0x3f8] sm:$0xff] }
 0x4ad   :  { %2447 = vmatpush.msrb.mxu2 %v2364_v56  ;;  %2507 = vmatpush.msrb.mxu1 %v2365_v24  ;;  %v2408_v56 = vld [vmem:[%s7837_s9 + $0x400] sm:$0xff] }
 0x4ae   :  { %6649 = vmatmul.msk.f32.gmra.mxu2 %vm1695_vm7, %v7909_v57  ;;  %v2400_v24 = vld [vmem:[%s7837_s9 + $0x3c0] sm:$0xff] }
 0x4af   :  { %2448 = vmatpush.msrb.mxu2 %v2361_v27  ;;  %2508 = vmatpush.msrb.mxu1 %v2362_v60  ;;  %v2405_v27 = vld [vmem:[%s7837_s9 + $0x3e8] sm:$0xff] }
 0x4b0   :  { %v2397_v60 = vld [vmem:[%s7837_s9 + $0x3a8] sm:$0xff] }
 0x4b1   :  { %2449 = vmatpush.msrb.mxu2 %v2358_v62  ;;  %2509 = vmatpush.msrb.mxu1 %v2359_v36  ;;  %v2401_v62 = vld [vmem:[%s7837_s9 + $0x3c8] sm:$0xff]  ;;  %v2402_v36 = vld [vmem:[%s7837_s9 + $0x3d0] sm:$0xff] }
 0x4b3   :  { %2450 = vmatpush.msrb.mxu2 %v2355_v4  ;;  %2510 = vmatpush.msrb.mxu1 %v2356_v30  ;;  %v2394_v4 = vld [vmem:[%s7837_s9 + $0x390] sm:$0xff] }
 0x4b4   :  { %v2398_v30 = vld [vmem:[%s7837_s9 + $0x3b0] sm:$0xff] }
 0x4b5   :  { %2451 = vmatpush.msrb.mxu2 %v2352_v6  ;;  %2511 = vmatpush.msrb.mxu1 %v2353_v8  ;;  %v2399_v6 = vld [vmem:[%s7837_s9 + $0x3b8] sm:$0xff] }
 0x4b6   :  { %v2391_v8 = vld [vmem:[%s7837_s9 + $0x378] sm:$0xff] }
 0x4b7   :  { %2452 = vmatpush.msrb.mxu2 %v2349_v12  ;;  %2512 = vmatpush.msrb.mxu1 %v2350_v14  ;;  %v2395_v12 = vld [vmem:[%s7837_s9 + $0x398] sm:$0xff]  ;;  %v2396_v14 = vld [vmem:[%s7837_s9 + $0x3a0] sm:$0xff] }
 0x4b9   :  { %2453 = vmatpush.msrb.mxu2 %v2346_v15  ;;  %2513 = vmatpush.msrb.mxu1 %v2347_v38  ;;  %v2388_v15 = vld [vmem:[%s7837_s9 + $0x360] sm:$0xff] }
 0x4ba   :  { %v2392_v38 = vld [vmem:[%s7837_s9 + $0x380] sm:$0xff] }
 0x4bb   :  { %2454 = vmatpush.msrb.mxu2 %v2343_v16  ;;  %2514 = vmatpush.msrb.mxu1 %v2344_v17  ;;  %v2393_v16 = vld [vmem:[%s7837_s9 + $0x388] sm:$0xff] }
 0x4bc   :  { %v2385_v17 = vld [vmem:[%s7837_s9 + $0x348] sm:$0xff] }
 0x4bd   :  { %2455 = vmatpush.msrb.mxu2 %v2340_v19  ;;  %2515 = vmatpush.msrb.mxu1 %v2341_v40  ;;  %v2389_v19 = vld [vmem:[%s7837_s9 + $0x368] sm:$0xff]  ;;  %v2390_v40 = vld [vmem:[%s7837_s9 + $0x370] sm:$0xff] }
 0x4bf   :  { %2456 = vmatpush.msrb.mxu2 %v2337_v43  ;;  %2516 = vmatpush.msrb.mxu1 %v2338_v48  ;;  %v2386_v43 = vld [vmem:[%s7837_s9 + $0x350] sm:$0xff]  ;;  %v2387_v48 = vld [vmem:[%s7837_s9 + $0x358] sm:$0xff] }
 0x4c0   :  { %v2185_v1 = vpop.f32.mrf.mxu0 }
 0x4c1   :  { %v2186_v5 = vadd.f32 %v2185_v1, %v2166_v63  ;;  %2457 = vmatpush.msrb.mxu2 %v2334_v35  ;;  %2517 = vmatpush.msrb.mxu1 %v2335_v53  ;;  %v2383_v35 = vld [vmem:[%s7837_s9 + $0x338] sm:$0xff]  ;;  %v2384_v53 = vld [vmem:[%s7837_s9 + $0x340] sm:$0xff] }
 0x4c2   :  { %v2376_v63 = vld [vmem:[%s7837_s9 + $0x300] sm:$0xff] }
 0x4c3   :  { %6650 = vmatpush.msk.msrb.mxu3 %vm726_vm3, %v2186_v5  ;;  %2458 = vmatpush.msrb.mxu2 %v2331_v3  ;;  %v2380_v1 = vld [vmem:[%s7837_s9 + $0x320] sm:$0xff]  ;;  %v2381_v3 = vld [vmem:[%s7837_s9 + $0x328] sm:$0xff]  ;;  %v2327_v5 = vld [vmem:[%s7837_s9 + $0x178] sm:$0xff] }
 0x4c4   :  { %2518 = vmatpush.msrb.mxu1 %v2332_v44  ;;  %6651 = vmatmul.msk.f32.vlgmr.msrb.gmra.mxu3 %vm1695_vm7, %v7900_v46  ;;  %v2412_v46 = vld [vmem:[%s7837_s9 + $0x420] sm:$0xff]  ;;  %v2377_v44 = vld [vmem:[%s7837_s9 + $0x308] sm:$0xff] }
 0x4c5   :  { %2464 = vmatpush.msra.mxu3 %v2421_v10  ;;  %2459 = vmatpush.msrb.mxu2 %v2328_v21  ;;  %v2378_v10 = vld [vmem:[%s7837_s9 + $0x310] sm:$0xff]  ;;  %v2324_v21 = vld [vmem:[%s7837_s9 + $0x160] sm:$0xff] }
 0x4c6   :  { %2519 = vmatpush.msrb.mxu1 %v2329_v22  ;;  %2460 = vmatmul.f32.vlgmr.msrb.gmra.mxu2 %v7439_v59  ;;  %v2321_v22 = vld [vmem:[%s7837_s9 + $0x148] sm:$0xff] }
 0x4c7   :  { %2465 = vmatpush.msra.mxu3 %v2418_v23  ;;  %2520 = vmatmul.f32.vlgmr.msrb.gmra.mxu1 %v7439_v59  ;;  %v2413_v59 = vld [vmem:[%s7837_s9 + $0x428] sm:$0xff]  ;;  %v2318_v23 = vld [vmem:[%s7837_s9 + $0x130] sm:$0xff] }
 0x4c8   :  { %2524 = vmatpush.msra.mxu2 %v2422_v28  ;;  %2584 = vmatpush.msra.mxu1 %v2423_v29  ;;  %v2315_v28 = vld [vmem:[%s7837_s9 + $0x118] sm:$0xff]  ;;  %v2312_v29 = vld [vmem:[%s7837_s9 + $0x100] sm:$0xff] }
 0x4c9   :  { %2466 = vmatpush.msra.mxu3 %v2415_v31  ;;  %v2309_v31 = vld [vmem:[%s7837_s9 + $0xe8] sm:$0xff] }
 0x4ca   :  { %2525 = vmatpush.msra.mxu2 %v2419_v32  ;;  %2585 = vmatpush.msra.mxu1 %v2420_v33  ;;  %v2306_v32 = vld [vmem:[%s7837_s9 + $0xd0] sm:$0xff]  ;;  %v2303_v33 = vld [vmem:[%s7837_s9 + $0xb8] sm:$0xff] }
 0x4cb   :  { %2467 = vmatpush.msra.mxu3 %v2412_v46  ;;  %v2300_v46 = vld [vmem:[%s7837_s9 + $0xa0] sm:$0xff] }
 0x4cc   :  { %2526 = vmatpush.msra.mxu2 %v2416_v18  ;;  %2586 = vmatpush.msra.mxu1 %v2417_v34  ;;  %v2294_v18 = vld [vmem:[%s7837_s9 + $0x70] sm:$0xff]  ;;  %v2291_v34 = vld [vmem:[%s7837_s9 + $0x58] sm:$0xff] }
 0x4cd   :  { %6652 = vmatmul.msk.f32.gmra.mxu3 %vm1695_vm7, %v7909_v57  ;;  %v2404_v57 = vld [vmem:[%s7837_s9 + $0x3e0] sm:$0xff] }
 0x4ce   :  { %2468 = vmatpush.msra.mxu3 %v2409_v37  ;;  %2527 = vmatpush.msra.mxu2 %v2413_v59  ;;  %v2288_v37 = vld [vmem:[%s7837_s9 + $0x40] sm:$0xff]  ;;  %v2285_v59 = vld [vmem:[%s7837_s9 + $0x28] sm:$0xff] }
 0x4cf   :  { %2587 = vmatpush.msra.mxu1 %v2414_v39  ;;  %v2282_v39 = vld [vmem:[%s7837_s9 + $0x10] sm:$0xff] }
 0x4d0   :  { %2469 = vmatpush.msra.mxu3 %v2406_v45  ;;  %2528 = vmatpush.msra.mxu2 %v2410_v47 }
 0x4d1   :  { %2588 = vmatpush.msra.mxu1 %v2411_v55 }
 0x4d2   :  { %2470 = vmatpush.msra.mxu3 %v2403_v49  ;;  %2529 = vmatpush.msra.mxu2 %v2407_v51 }
 0x4d3   :  { %2589 = vmatpush.msra.mxu1 %v2408_v56 }
 0x4d4   :  { %2471 = vmatpush.msra.mxu3 %v2400_v24  ;;  %2530 = vmatpush.msra.mxu2 %v2404_v57 }
 0x4d5   :  { %2590 = vmatpush.msra.mxu1 %v2405_v27 }
 0x4d6   :  { %2472 = vmatpush.msra.mxu3 %v2397_v60  ;;  %2531 = vmatpush.msra.mxu2 %v2401_v62 }
 0x4d7   :  { %2591 = vmatpush.msra.mxu1 %v2402_v36 }
 0x4d8   :  { %2473 = vmatpush.msra.mxu3 %v2394_v4  ;;  %2532 = vmatpush.msra.mxu2 %v2398_v30  ;;  %v2604_v30 = vld [vmem:[%s6565_s17] sm:$0xff] }
 0x4d9   :  { %2592 = vmatpush.msra.mxu1 %v2399_v6 }
 0x4da   :  { %2474 = vmatpush.msra.mxu3 %v2391_v8  ;;  %2533 = vmatpush.msra.mxu2 %v2395_v12  ;;  %v2605_v12 = vld [vmem:[%s6565_s17 + $0x8] sm:$0xf]  ;;  %s6579_s17 = sld [smem:[%s9970_s0 + %s6881_s14]]  }
 0x4db   :  { %2593 = vmatpush.msra.mxu1 %v2396_v14  ;;  %v2711_v14 = vld [vmem:[%s8064_s21 + $0x78] sm:$0xff] }
 0x4dc   :  { %2475 = vmatpush.msra.mxu3 %v2388_v15  ;;  %2534 = vmatpush.msra.mxu2 %v2392_v38  ;;  %v2710_v15 = vld [vmem:[%s8064_s21 + $0x70] sm:$0xff]  ;;  %v2709_v38 = vld [vmem:[%s8064_s21 + $0x68] sm:$0xff] }
 0x4dd   :  { %2594 = vmatpush.msra.mxu1 %v2393_v16  ;;  %v2727_v16 = vld [vmem:[%s8064_s21 + $0xf8] sm:$0xff] }
 0x4de   :  { %2476 = vmatpush.msra.mxu3 %v2385_v17  ;;  %2535 = vmatpush.msra.mxu2 %v2389_v19  ;;  %v2708_v17 = vld [vmem:[%s8064_s21 + $0x60] sm:$0xff]  ;;  %v2726_v19 = vld [vmem:[%s8064_s21 + $0xf0] sm:$0xff] }
 0x4df   :  { %2595 = vmatpush.msra.mxu1 %v2390_v40  ;;  %v2725_v40 = vld [vmem:[%s8064_s21 + $0xe8] sm:$0xff] }
 0x4e0   :  { %2477 = vmatpush.msra.mxu3 %v2382_v20  ;;  %2536 = vmatpush.msra.mxu2 %v2386_v43  ;;  %v2501_v60 = vpop.f32.mrf.mxu0  ;;  %v2707_v20 = vld [vmem:[%s8064_s21 + $0x58] sm:$0xff]  ;;  %v2724_v43 = vld [vmem:[%s8064_s21 + $0xe0] sm:$0xff] }
 0x4e1   :  { %2596 = vmatpush.msra.mxu1 %v2387_v48  ;;  %v2706_v48 = vld [vmem:[%s8064_s21 + $0x50] sm:$0xff] }
 0x4e2   :  { %2478 = vmatpush.msra.mxu3 %v2379_v50  ;;  %2537 = vmatpush.msra.mxu2 %v2383_v35  ;;  %v2705_v50 = vld [vmem:[%s8064_s21 + $0x48] sm:$0xff]  ;;  %v2704_v35 = vld [vmem:[%s8064_s21 + $0x40] sm:$0xff] }
 0x4e3   :  { %2597 = vmatpush.msra.mxu1 %v2384_v53  ;;  %v2703_v53 = vld [vmem:[%s8064_s21 + $0x38] sm:$0xff] }
 0x4e4   :  { %2479 = vmatpush.msra.mxu3 %v2376_v63  ;;  %2538 = vmatpush.msra.mxu2 %v2380_v1  ;;  %v2702_v63 = vld [vmem:[%s8064_s21 + $0x30] sm:$0xff] }
 0x4e5   :  { %2598 = vmatpush.msra.mxu1 %v2381_v3  ;;  %2480 = vmatmul.f32.vlgmr.msra.gmra.mxu3 %v7442_v25 }
 0x4e6   :  { %2544 = vmatpush.msrb.mxu3 %v2327_v5  ;;  %2539 = vmatpush.msra.mxu2 %v2377_v44  ;;  %v2701_v5 = vld [vmem:[%s8064_s21 + $0x28] sm:$0xff] }
 0x4e7   :  { %2599 = vmatpush.msra.mxu1 %v2378_v10  ;;  %2540 = vmatmul.f32.vlgmr.msra.gmra.mxu2 %v7442_v25 }
 0x4e8   :  { %2545 = vmatpush.msrb.mxu3 %v2324_v21  ;;  %2600 = vmatmul.f32.vlgmr.msra.gmra.mxu1 %v7442_v25  ;;  %v2297_v25 = vld [vmem:[%s7837_s9 + $0x88] sm:$0xff]  ;;  %v2700_v21 = vld [vmem:[%s8064_s21 + $0x20] sm:$0xff]  ;;  %s9413_s9 = sld [smem:[%s9970_s0 + %s6879_s6]]  }
 0x4e9   :  { %2885 = vmatpush.msrb.mxu1 %v2711_v14 }
 0x4ea   :  { %2546 = vmatpush.msrb.mxu3 %v2321_v22 }
 0x4eb   :  { %2886 = vmatpush.msrb.mxu1 %v2710_v15 }
 0x4ec   :  { %2547 = vmatpush.msrb.mxu3 %v2318_v23  ;;  %v2699_v23 = vld [vmem:[%s8064_s21 + $0x18] sm:$0xff] }
 0x4ed   :  { %2887 = vmatpush.msrb.mxu1 %v2709_v38 }
 0x4ee   :  { %2548 = vmatpush.msrb.mxu3 %v2315_v28  ;;  %v2698_v28 = vld [vmem:[%s8064_s21 + $0x10] sm:$0xff] }
 0x4ef   :  { %2888 = vmatpush.msrb.mxu1 %v2708_v17 }
 0x4f0   :  { %2549 = vmatpush.msrb.mxu3 %v2312_v29  ;;  %v2697_v29 = vld [vmem:[%s8064_s21 + $0x8] sm:$0xff] }
 0x4f1   :  { %2889 = vmatpush.msrb.mxu1 %v2707_v20 }
 0x4f2   :  { %2550 = vmatpush.msrb.mxu3 %v2309_v31  ;;  %v2723_v31 = vld [vmem:[%s8064_s21 + $0xd8] sm:$0xff] }
 0x4f3   :  { %2890 = vmatpush.msrb.mxu1 %v2706_v48 }
 0x4f4   :  { %2551 = vmatpush.msrb.mxu3 %v2306_v32  ;;  %v2696_v32 = vld [vmem:[%s8064_s21] sm:$0xff] }
 0x4f5   :  { %2891 = vmatpush.msrb.mxu1 %v2705_v50 }
 0x4f6   :  { %2552 = vmatpush.msrb.mxu3 %v2303_v33  ;;  %v2722_v33 = vld [vmem:[%s8064_s21 + $0xd0] sm:$0xff] }
 0x4f7   :  { %2892 = vmatpush.msrb.mxu1 %v2704_v35 }
 0x4f8   :  { %2553 = vmatpush.msrb.mxu3 %v2300_v46  ;;  %v2721_v46 = vld [vmem:[%s8064_s21 + $0xc8] sm:$0xff] }
 0x4f9   :  { %2893 = vmatpush.msrb.mxu1 %v2703_v53 }
 0x4fa   :  { %2554 = vmatpush.msrb.mxu3 %v2297_v25  ;;  %v2720_v25 = vld [vmem:[%s8064_s21 + $0xc0] sm:$0xff] }
 0x4fb   :  { %2894 = vmatpush.msrb.mxu1 %v2702_v63 }
 0x4fc   :  { %2555 = vmatpush.msrb.mxu3 %v2294_v18  ;;  %v2719_v18 = vld [vmem:[%s8064_s21 + $0xb8] sm:$0xff] }
 0x4fd   :  { %2895 = vmatpush.msrb.mxu1 %v2701_v5 }
 0x4fe   :  { %2556 = vmatpush.msrb.mxu3 %v2291_v34  ;;  %v2718_v34 = vld [vmem:[%s8064_s21 + $0xb0] sm:$0xff] }
 0x4ff   :  { %2896 = vmatpush.msrb.mxu1 %v2700_v21 }
 0x500   :  { %2557 = vmatpush.msrb.mxu3 %v2288_v37  ;;  %v2581_v1 = vpop.f32.mrf.mxu0  ;;  %v2717_v37 = vld [vmem:[%s8064_s21 + $0xa8] sm:$0xff] }
 0x501   :  { %2897 = vmatpush.msrb.mxu1 %v2699_v23 }
 0x502   :  { %2558 = vmatpush.msrb.mxu3 %v2285_v59  ;;  %v2716_v59 = vld [vmem:[%s8064_s21 + $0xa0] sm:$0xff] }
 0x503   :  { %v8042_v45 = vpop.f32.mrf.mxu1  ;;  %2898 = vmatpush.msrb.mxu1 %v2698_v28 }
 0x504   :  { %2559 = vmatpush.msrb.mxu3 %v2282_v39  ;;  %v2715_v39 = vld [vmem:[%s8064_s21 + $0x98] sm:$0xff] }
 0x505   :  { %2560 = vmatmul.f32.vlgmr.msrb.gmra.mxu3 %v7445_v58  ;;  %2899 = vmatpush.msrb.mxu1 %v2697_v29 }
 0x507   :  { %2900 = vmatpush.msrb.mxu1 %v2696_v32 }
 0x50b   :  { %v8046_v55 = vpop.f32.mrf.mxu1 }
 0x523   :  { %v2441_v56 = vpop.f32.mrf.mxu1 }
 0x529   :  { %v8044_v47 = vpop.f32.mrf.mxu2 }
 0x531   :  { %v8050_v51 = vpop.f32.mrf.mxu2 }
 0x544   :  { %v2521_v58 = vpop.f32.mrf.mxu1 }
 0x545   :  { %v2522_v36 = vadd.f32 %v2521_v58, %v2501_v60  ;;  %v2743_v58 = vld [vmem:[%s8064_s21 + $0x178] sm:$0xff]  ;;  %v2742_v60 = vld [vmem:[%s8064_s21 + $0x170] sm:$0xff] }
 0x547   :  { %v8048_v49 = vpop.f32.mrf.mxu3 }
 0x549   :  { %v2461_v57 = vpop.f32.mrf.mxu2 }
 0x54a   :  { %v2462_v27 = vadd.f32 %v2461_v57, %v2441_v56  ;;  %v2714_v56 = vld [vmem:[%s8064_s21 + $0x90] sm:$0xff]  ;;  %v2713_v57 = vld [vmem:[%s8064_s21 + $0x88] sm:$0xff] }
 0x550   :  { %v8052_v24 = vpop.f32.mrf.mxu3 }
 0x565   :  { %v2601_v10 = vpop.f32.mrf.mxu1 }
 0x568   :  { %v2481_v62 = vpop.f32.mrf.mxu3 }
 0x569   :  { %v2482_v4 = vadd.f32 %v2481_v62, %v2462_v27  ;;  %v2712_v27 = vld [vmem:[%s8064_s21 + $0x80] sm:$0xff]  ;;  %v2741_v62 = vld [vmem:[%s8064_s21 + $0x168] sm:$0xff] }
 0x56a   :  { %v2541_v6 = vpop.f32.mrf.mxu2 }
 0x56b   :  { %v2542_v8 = vadd.f32 %v2541_v6, %v2522_v36  ;;  %6653 = vmatpush.msk.msrb.mxu2 %vm726_vm3, %v2482_v4  ;;  %v2740_v36 = vld [vmem:[%s8064_s21 + $0x160] sm:$0xff]  ;;  %v2739_v4 = vld [vmem:[%s8064_s21 + $0x158] sm:$0xff] }
 0x56c   :  { %6654 = vmatmul.msk.f32.vlgmr.msrb.gmra.mxu2 %vm1695_vm7, %v2604_v30 }
 0x56d   :  { %6656 = vmatpush.msk.msra.mxu3 %vm726_vm3, %v2542_v8  ;;  %2825 = vmatpush.msra.mxu2 %v2711_v14  ;;  %v2737_v8 = vld [vmem:[%s8064_s21 + $0x148] sm:$0xff]  ;;  %v1813_v14 = vadd.f32 %v7874_v0, %v7857_v42 }
 0x56e   :  { %6657 = vmatmul.msk.f32.vlgmr.msra.gmra.mxu3 %vm1695_vm7, %v2604_v30 }
 0x56f   :  { %2826 = vmatpush.msra.mxu2 %v2710_v15  ;;  %2845 = vmatpush.msrb.mxu3 %v2727_v16  ;;  %v2736_v15 = vld [vmem:[%s8064_s21 + $0x140] sm:$0xff] }
 0x571   :  { %2827 = vmatpush.msra.mxu2 %v2709_v38  ;;  %2846 = vmatpush.msrb.mxu3 %v2726_v19  ;;  %v1816_v38 = vadd.f32 %v7885_v9, %v7866_v54  ;;  %v2734_v9 = vld [vmem:[%s8064_s21 + $0x130] sm:$0xff] }
 0x573   :  { %2828 = vmatpush.msra.mxu2 %v2708_v17  ;;  %2847 = vmatpush.msrb.mxu3 %v2725_v40  ;;  %v2274_v17 = vadd.f32 %v8042_v45, %v1813_v14 }
 0x574   :  { %6655 = vmatmul.msk.f32.gmra.mxu2 %vm1695_vm7, %v2605_v12 }
 0x575   :  { %2829 = vmatpush.msra.mxu2 %v2707_v20  ;;  %2848 = vmatpush.msrb.mxu3 %v2724_v43  ;;  %v2277_v20 = vadd.f32 %v8046_v55, %v1816_v38 }
 0x576   :  { %6658 = vmatmul.msk.f32.gmra.mxu3 %vm1695_vm7, %v2605_v12 }
 0x577   :  { %2830 = vmatpush.msra.mxu2 %v2706_v48  ;;  %2849 = vmatpush.msrb.mxu3 %v2723_v31 }
 0x579   :  { %2831 = vmatpush.msra.mxu2 %v2705_v50  ;;  %2850 = vmatpush.msrb.mxu3 %v2722_v33  ;;  %v2732_v50 = vld [vmem:[%s8064_s21 + $0x120] sm:$0xff] }
 0x57b   :  { %2832 = vmatpush.msra.mxu2 %v2704_v35  ;;  %2851 = vmatpush.msrb.mxu3 %v2721_v46 }
 0x57d   :  { %2833 = vmatpush.msra.mxu2 %v2703_v53  ;;  %2852 = vmatpush.msrb.mxu3 %v2720_v25 }
 0x57f   :  { %2834 = vmatpush.msra.mxu2 %v2702_v63  ;;  %2853 = vmatpush.msrb.mxu3 %v2719_v18 }
 0x581   :  { %2835 = vmatpush.msra.mxu2 %v2701_v5  ;;  %2854 = vmatpush.msrb.mxu3 %v2718_v34 }
 0x583   :  { %2836 = vmatpush.msra.mxu2 %v2700_v21  ;;  %2855 = vmatpush.msrb.mxu3 %v2717_v37  ;;  %v2730_v21 = vld [vmem:[%s8064_s21 + $0x110] sm:$0xff] }
 0x585   :  { %2837 = vmatpush.msra.mxu2 %v2699_v23  ;;  %2856 = vmatpush.msrb.mxu3 %v2716_v59 }
 0x587   :  { %2838 = vmatpush.msra.mxu2 %v2698_v28  ;;  %2857 = vmatpush.msrb.mxu3 %v2715_v39 }
 0x588   :  { %v2561_v3 = vpop.f32.mrf.mxu3 }
 0x589   :  { %v2582_v44 = vadd.f32 %v2581_v1, %v2561_v3  ;;  %2839 = vmatpush.msra.mxu2 %v2697_v29  ;;  %2858 = vmatpush.msrb.mxu3 %v2714_v56 }
 0x58b   :  { %v2602_v22 = vadd.f32 %v2601_v10, %v2582_v44  ;;  %2840 = vmatpush.msra.mxu2 %v2696_v32  ;;  %2859 = vmatpush.msrb.mxu3 %v2713_v57  ;;  %v2731_v10 = vld [vmem:[%s8064_s21 + $0x118] sm:$0xff]  ;;  %v2729_v32 = vld [vmem:[%s8064_s21 + $0x108] sm:$0xff] }
 0x58d   :  { %6659 = vmatpush.msk.msrb.mxu0 %vm726_vm3, %v2602_v22  ;;  %2905 = vmatpush.msrb.mxu2 %v2727_v16  ;;  %v1836_v16 = vadd.f32 %v7879_v2, %v7855_v41 }
 0x58e   :  { %6660 = vmatmul.msk.f32.vlgmr.msrb.gmra.mxu0 %vm1695_vm7, %v2604_v30  ;;  %2860 = vmatpush.msrb.mxu3 %v2712_v27  ;;  %v2738_v30 = vld [vmem:[%s8064_s21 + $0x150] sm:$0xff] }
 0x58f   :  { %2906 = vmatpush.msrb.mxu2 %v2726_v19  ;;  %2865 = vmatpush.msra.mxu0 %v2743_v58  ;;  %v2735_v19 = vld [vmem:[%s8064_s21 + $0x138] sm:$0xff]  ;;  %v2275_v42 = vadd.f32 %v8044_v47, %v1836_v16  ;;  %v1862_v16 = vadd.f32 %v7920_v7, %v7887_v11 }
 0x590   :  { %2925 = vmatpush.msra.mxu3 %v2743_v58 }
 0x591   :  { %2907 = vmatpush.msrb.mxu2 %v2725_v40  ;;  %2866 = vmatpush.msra.mxu0 %v2742_v60  ;;  %v1839_v40 = vadd.f32 %v7890_v13, %v7864_v52  ;;  %v2733_v13 = vld [vmem:[%s8064_s21 + $0x128] sm:$0xff] }
 0x592   :  { %2926 = vmatpush.msra.mxu3 %v2742_v60 }
 0x593   :  { %2908 = vmatpush.msrb.mxu2 %v2724_v43  ;;  %2867 = vmatpush.msra.mxu0 %v2741_v62  ;;  %v2278_v41 = vadd.f32 %v8050_v51, %v1839_v40 }
 0x594   :  { %2927 = vmatpush.msra.mxu3 %v2741_v62 }
 0x595   :  { %2909 = vmatpush.msrb.mxu2 %v2723_v31  ;;  %2868 = vmatpush.msra.mxu0 %v2740_v36 }
 0x596   :  { %6661 = vmatmul.msk.f32.gmra.mxu0 %vm1695_vm7, %v2605_v12  ;;  %2928 = vmatpush.msra.mxu3 %v2740_v36 }
 0x597   :  { %2910 = vmatpush.msrb.mxu2 %v2722_v33  ;;  %2869 = vmatpush.msra.mxu0 %v2739_v4 }
 0x598   :  { %2929 = vmatpush.msra.mxu3 %v2739_v4 }
 0x599   :  { %2911 = vmatpush.msrb.mxu2 %v2721_v46  ;;  %2870 = vmatpush.msra.mxu0 %v2738_v30 }
 0x59a   :  { %2930 = vmatpush.msra.mxu3 %v2738_v30 }
 0x59b   :  { %2912 = vmatpush.msrb.mxu2 %v2720_v25  ;;  %2871 = vmatpush.msra.mxu0 %v2737_v8 }
 0x59c   :  { %2931 = vmatpush.msra.mxu3 %v2737_v8 }
 0x59d   :  { %2913 = vmatpush.msrb.mxu2 %v2719_v18  ;;  %2872 = vmatpush.msra.mxu0 %v2736_v15 }
 0x59e   :  { %2932 = vmatpush.msra.mxu3 %v2736_v15  ;;  %v1859_v15 = vadd.f32 %v7911_v61, %v7876_v26 }
 0x59f   :  { %2914 = vmatpush.msrb.mxu2 %v2718_v34  ;;  %2873 = vmatpush.msra.mxu0 %v2735_v19  ;;  %v2728_v34 = vld [vmem:[%s8064_s21 + $0x100] sm:$0xff]  ;;  %s9460_s21 = sld [smem:[%s9970_s0 + %s6882_s18]]  }
 0x5a0   :  { %2933 = vmatpush.msra.mxu3 %v2735_v19  ;;  %v2279_v19 = vadd.f32 %v8052_v24, %v1862_v16  ;;  %v3173_v16 = vld [vmem:[%s8204_s29 + $0x1e8] sm:$0xff] }
 0x5a1   :  { %2915 = vmatpush.msrb.mxu2 %v2717_v37  ;;  %2874 = vmatpush.msra.mxu0 %v2734_v9 }
 0x5a2   :  { %2934 = vmatpush.msra.mxu3 %v2734_v9 }
 0x5a3   :  { %2916 = vmatpush.msrb.mxu2 %v2716_v59  ;;  %2875 = vmatpush.msra.mxu0 %v2733_v13 }
 0x5a4   :  { %2935 = vmatpush.msra.mxu3 %v2733_v13 }
 0x5a5   :  { %2917 = vmatpush.msrb.mxu2 %v2715_v39  ;;  %2876 = vmatpush.msra.mxu0 %v2732_v50 }
 0x5a6   :  { %2936 = vmatpush.msra.mxu3 %v2732_v50 }
 0x5a7   :  { %2918 = vmatpush.msrb.mxu2 %v2714_v56  ;;  %2877 = vmatpush.msra.mxu0 %v2731_v10 }
 0x5a8   :  { %2937 = vmatpush.msra.mxu3 %v2731_v10  ;;  %v2760_v10 = vld [vmem:[%s8176_s25 + $0x80] sm:$0xff] }
 0x5a9   :  { %2919 = vmatpush.msrb.mxu2 %v2713_v57  ;;  %2878 = vmatpush.msra.mxu0 %v2730_v21 }
 0x5aa   :  { %2938 = vmatpush.msra.mxu3 %v2730_v21  ;;  %v2756_v21 = vld [vmem:[%s8176_s25 + $0x60] sm:$0xff] }
 0x5ab   :  { %2920 = vmatpush.msrb.mxu2 %v2712_v27  ;;  %2879 = vmatpush.msra.mxu0 %v2729_v32 }
 0x5ac   :  { %2939 = vmatpush.msra.mxu3 %v2729_v32  ;;  %v2767_v32 = vld [vmem:[%s8176_s25 + $0xb8] sm:$0xff] }
 0x5ad   :  { %2880 = vmatpush.msra.mxu0 %v2728_v34 }
 0x5ae   :  { %2940 = vmatpush.msra.mxu3 %v2728_v34  ;;  %v2744_v34 = vld [vmem:[%s8176_s25] sm:$0xff] }
 0x5ef   :  { %v2638_v6 = vpop.f32.mrf.mxu2 }
 0x5f0   :  { %v8123_v0 = vadd.f32 %v2638_v6, %v2274_v17  ;;  %v2276_v17 = vadd.f32 %v8048_v49, %v1859_v15 }
 0x5f1   :  { %v2661_v12 = vpop.f32.mrf.mxu3 }
 0x5f2   :  { %v8129_v45 = vadd.f32 %v2661_v12, %v2275_v42  ;;  %v2795_v51 = vmul.f32 %v8123_v0, %v8123_v0 }
 0x5f4   :  { %v2796_v1 = vmul.f32 %v8129_v45, %v8129_v45 }
 0x5f7   :  { %v2641_v54 = vpop.f32.mrf.mxu2 }
 0x5f8   :  { %v8127_v2 = vadd.f32 %v2641_v54, %v2277_v20 }
 0x5f9   :  { %v2664_v52 = vpop.f32.mrf.mxu3 }
 0x5fa   :  { %v2771_v55 = vsel %vm2770_vm8, %v8127_v2, 0.0  ;;  %v2798_v47 = vmul.f32 %v8127_v2, %v8127_v2  ;;  %v8136_v43 = vadd.f32 %v2664_v52, %v2278_v41 }
 0x5fb   :  { %v2772_v48 = vadd.f32 %v2771_v55, %v8123_v0 }
 0x5fc   :  { %v2801_v35 = vsel %vm2770_vm8, %v2798_v47, 0.0  ;;  %v2779_v53 = vsel %vm2770_vm8, %v8136_v43, 0.0  ;;  %v2799_v63 = vmul.f32 %v8136_v43, %v8136_v43 }
 0x5fd   :  { %v2773_v3 = vrot.slane %v2772_v48, 4  ;;  %v2802_v5 = vadd.f32 %v2801_v35, %v2795_v51  ;;  %v2780_v44 = vadd.f32 %v2779_v53, %v8129_v45 }
 0x5fe   :  { %v2809_v22 = vsel %vm2770_vm8, %v2799_v63, 0.0  ;;  %v2765_v63 = vld [vmem:[%s8176_s25 + $0xa8] sm:$0xff] }
 0x5ff   :  { %v2774_v23 = vadd.f32 %v2773_v3, %v2772_v48  ;;  %v2803_v28 = vrot.slane %v2802_v5, 4  ;;  %v2781_v29 = vrot.slane %v2780_v44, 4  ;;  %v2810_v31 = vadd.f32 %v2809_v22, %v2796_v1  ;;  %v2766_v1 = vld [vmem:[%s8176_s25 + $0xb0] sm:$0xff]  ;;  %2973 = vmatpush.msrb.mxu0 %v2765_v63  ;;  %v2757_v22 = vld [vmem:[%s8176_s25 + $0x68] sm:$0xff] }
 0x600   :  { %2993 = vmatpush.msra.mxu1 %v2766_v1  ;;  %v2762_v3 = vld [vmem:[%s8176_s25 + $0x90] sm:$0xff] }
 0x601   :  { %v2775_v33 = vrot.slane %v2774_v23, 2  ;;  %v2804_v46 = vadd.f32 %v2803_v28, %v2802_v5  ;;  %v2782_v25 = vadd.f32 %v2781_v29, %v2780_v44  ;;  %v2811_v18 = vrot.slane %v2810_v31, 4  ;;  %v2763_v5 = vld [vmem:[%s8176_s25 + $0x98] sm:$0xff]  ;;  %2974 = vmatpush.msrb.mxu0 %v2762_v3  ;;  %v2754_v28 = vld [vmem:[%s8176_s25 + $0x50] sm:$0xff] }
 0x602   :  { %2994 = vmatpush.msra.mxu1 %v2763_v5  ;;  %v2759_v44 = vld [vmem:[%s8176_s25 + $0x78] sm:$0xff]  ;;  %v2750_v29 = vld [vmem:[%s8176_s25 + $0x30] sm:$0xff] }
 0x603   :  { %v2776_v37 = vadd.f32 %v2775_v33, %v2774_v23  ;;  %v2783_v59 = vrot.slane %v2782_v25, 2  ;;  %v2812_v39 = vadd.f32 %v2811_v18, %v2810_v31  ;;  %v2805_v56 = vrot.slane %v2804_v46, 2  ;;  %2975 = vmatpush.msrb.mxu0 %v2759_v44  ;;  %v2753_v23 = vld [vmem:[%s8176_s25 + $0x48] sm:$0xff]  ;;  %v2751_v31 = vld [vmem:[%s8176_s25 + $0x38] sm:$0xff] }
 0x604   :  { %2995 = vmatpush.msra.mxu1 %v2760_v10  ;;  %v2747_v33 = vld [vmem:[%s8176_s25 + $0x18] sm:$0xff] }
 0x605   :  { %v2777_v57 = vrot.slane %v2776_v37, 1  ;;  %v2813_v58 = vrot.slane %v2812_v39, 2  ;;  %v2784_v27 = vadd.f32 %v2783_v59, %v2782_v25  ;;  %v2806_v60 = vadd.f32 %v2805_v56, %v2804_v46  ;;  %2976 = vmatpush.msrb.mxu0 %v2756_v21  ;;  %v2748_v46 = vld [vmem:[%s8176_s25 + $0x20] sm:$0xff]  ;;  %v2761_v59 = vld [vmem:[%s8176_s25 + $0x88] sm:$0xff]  ;;  %v2755_v56 = vld [vmem:[%s8176_s25 + $0x58] sm:$0xff] }
 0x606   :  { %2996 = vmatpush.msra.mxu1 %v2757_v22  ;;  %v2764_v25 = vld [vmem:[%s8176_s25 + $0xa0] sm:$0xff] }
 0x607   :  { %v2814_v62 = vadd.f32 %v2813_v58, %v2812_v39  ;;  %v2778_v36 = vadd.f32 %v2777_v57, %v2776_v37  ;;  %v2785_v4 = vrot.slane %v2784_v27, 1  ;;  %v2807_v30 = vrot.slane %v2806_v60, 1  ;;  %2977 = vmatpush.msrb.mxu0 %v2753_v23  ;;  %v2745_v37 = vld [vmem:[%s8176_s25 + $0x8] sm:$0xff]  ;;  %v2758_v39 = vld [vmem:[%s8176_s25 + $0x70] sm:$0xff]  ;;  %v2752_v58 = vld [vmem:[%s8176_s25 + $0x40] sm:$0xff] }
 0x608   :  { %2997 = vmatpush.msra.mxu1 %v2754_v28 }
 0x609   :  { %2841 = vmatmul.f32.vlgmr.msra.gmra.mxu2 %v2778_v36  ;;  %v2786_v6 = vadd.f32 %v2785_v4, %v2784_v27  ;;  %v2808_v8 = vadd.f32 %v2807_v30, %v2806_v60  ;;  %v2815_v14 = vrot.slane %v2814_v62, 1  ;;  %2978 = vmatpush.msrb.mxu0 %v2750_v29  ;;  %v2746_v4 = vld [vmem:[%s8176_s25 + $0x10] sm:$0xff] }
 0x60a   :  { %3056 = vmatpush.msra.mxu2 %v2766_v1  ;;  %2998 = vmatpush.msra.mxu1 %v2751_v31  ;;  %v3137_v1 = vld [vmem:[%s8204_s29 + $0xc8] sm:$0xff] }
 0x60b   :  { %v2684_v12 = vpop.f32.mrf.mxu0  ;;  %2861 = vmatmul.f32.vlgmr.msrb.gmra.mxu3 %v2786_v6  ;;  %2901 = vmatmul.f32.vlgmr.msrb.gmra.mxu1 %v2808_v8  ;;  %v2816_v38 = vadd.f32 %v2815_v14, %v2814_v62  ;;  %v2749_v62 = vld [vmem:[%s8176_s25 + $0x28] sm:$0xff]  ;;  %s9571_s25 = sld [smem:[%s9970_s0 + %s6883_s22]]  }
 0x60c   :  { %v8161_v40 = vadd.f32 %v2684_v12, %v2276_v17  ;;  %3057 = vmatpush.msra.mxu2 %v2763_v5  ;;  %3076 = vmatpush.msrb.mxu3 %v2767_v32  ;;  %v3300_v17 = vld [vmem:[%s8204_s29 + $0x5e0] sm:$0xff] }
 0x60d   :  { %2979 = vmatpush.msrb.mxu0 %v2747_v33  ;;  %2999 = vmatpush.msra.mxu1 %v2748_v46  ;;  %v3264_v5 = vld [vmem:[%s8204_s29 + $0x4c0] sm:$0xff] }
 0x60e   :  { %v2797_v61 = vmul.f32 %v8161_v40, %v8161_v40  ;;  %3058 = vmatpush.msra.mxu2 %v2760_v10  ;;  %3077 = vmatpush.msrb.mxu3 %v2764_v25 }
 0x60f   :  { %2980 = vmatpush.msrb.mxu0 %v2744_v34  ;;  %3000 = vmatpush.msra.mxu1 %v2745_v37 }
 0x610   :  { %3059 = vmatpush.msra.mxu2 %v2757_v22  ;;  %3078 = vmatpush.msrb.mxu3 %v2761_v59  ;;  %v3260_v22 = vld [vmem:[%s8204_s29 + $0x4a0] sm:$0xff] }
 0x611   :  { %2921 = vmatmul.f32.vlgmr.msrb.gmra.mxu2 %v2816_v38  ;;  %3036 = vmatpush.msrb.mxu1 %v2765_v63  ;;  %v3268_v63 = vld [vmem:[%s8204_s29 + $0x4e0] sm:$0xff] }
 0x612   :  { %3060 = vmatpush.msra.mxu2 %v2754_v28  ;;  %3079 = vmatpush.msrb.mxu3 %v2758_v39 }
 0x613   :  { %v2687_v20 = vpop.f32.mrf.mxu0  ;;  %3037 = vmatpush.msrb.mxu1 %v2762_v3 }
 0x614   :  { %v8163_v42 = vadd.f32 %v2687_v20, %v2279_v19  ;;  %3061 = vmatpush.msra.mxu2 %v2751_v31  ;;  %3080 = vmatpush.msrb.mxu3 %v2755_v56  ;;  %v3169_v19 = vld [vmem:[%s8204_s29 + $0x1c8] sm:$0xff]  ;;  %v3172_v31 = vld [vmem:[%s8204_s29 + $0x1e0] sm:$0xff] }
 0x615   :  { %3038 = vmatpush.msrb.mxu1 %v2759_v44  ;;  %v3133_v44 = vld [vmem:[%s8204_s29 + $0xa8] sm:$0xff] }
 0x616   :  { %v2787_v54 = vsel %vm2770_vm8, %v8163_v42, 0.0  ;;  %v2800_v26 = vmul.f32 %v8163_v42, %v8163_v42  ;;  %3062 = vmatpush.msra.mxu2 %v2748_v46  ;;  %3081 = vmatpush.msrb.mxu3 %v2752_v58  ;;  %v3256_v46 = vld [vmem:[%s8204_s29 + $0x480] sm:$0xff] }
 0x617   :  { %v2788_v11 = vadd.f32 %v2787_v54, %v8161_v40  ;;  %3039 = vmatpush.msrb.mxu1 %v2756_v21  ;;  %v3296_v54 = vld [vmem:[%s8204_s29 + $0x5c0] sm:$0xff] }
 0x618   :  { %v2817_v7 = vsel %vm2770_vm8, %v2800_v26, 0.0  ;;  %3063 = vmatpush.msra.mxu2 %v2745_v37  ;;  %3082 = vmatpush.msrb.mxu3 %v2749_v62  ;;  %v3165_v26 = vld [vmem:[%s8204_s29 + $0x1a8] sm:$0xff]  ;;  %v2768_v21 = vld [vmem:[%s6568_s3] sm:$0x1]  ;;  %s9809_s3 = sld [smem:[%s9970_s0 + %s6885_s30]]  }
 0x619   :  { %v2789_v49 = vrot.slane %v2788_v11, 4  ;;  %v2818_v24 = vadd.f32 %v2817_v7, %v2797_v61  ;;  %3040 = vmatpush.msrb.mxu1 %v2753_v23  ;;  %v3292_v61 = vld [vmem:[%s8204_s29 + $0x5a0] sm:$0xff]  ;;  %v3129_v23 = vld [vmem:[%s8204_s29 + $0x88] sm:$0xff] }
 0x61a   :  { %3083 = vmatpush.msrb.mxu3 %v2746_v4  ;;  %3350 = vmatpush.msrb.mxu2 %v3300_v17  ;;  %v3288_v7 = vld [vmem:[%s8204_s29 + $0x580] sm:$0xff] }
 0x61b   :  { %v2790_v9 = vadd.f32 %v2789_v49, %v2788_v11  ;;  %v2819_v41 = vrot.slane %v2818_v24, 4  ;;  %3041 = vmatpush.msrb.mxu1 %v2750_v29  ;;  %v3161_v11 = vld [vmem:[%s8204_s29 + $0x188] sm:$0xff]  ;;  %v3232_v37 = vld [vmem:[%s8204_s29 + $0x3c0] sm:$0xff] }
 0x61c   :  { %3351 = vmatpush.msrb.mxu2 %v3296_v54  ;;  %v3157_v49 = vld [vmem:[%s8204_s29 + $0x168] sm:$0xff]  ;;  %v3240_v17 = vld [vmem:[%s8204_s29 + $0x400] sm:$0xff]  ;;  %v3174_v54 = vld [vmem:[%s8204_s29 + $0x1f0] sm:$0xff] }
 0x61d   :  { %v2791_v52 = vrot.slane %v2790_v9, 2  ;;  %v2820_v13 = vadd.f32 %v2819_v41, %v2818_v24  ;;  %3042 = vmatpush.msrb.mxu1 %v2747_v33  ;;  %v3284_v24 = vld [vmem:[%s8204_s29 + $0x560] sm:$0xff] }
 0x61e   :  { %3352 = vmatpush.msrb.mxu2 %v3292_v61  ;;  %v3280_v41 = vld [vmem:[%s8204_s29 + $0x540] sm:$0xff] }
 0x61f   :  { %v2792_v55 = vadd.f32 %v2791_v52, %v2790_v9  ;;  %v2821_v47 = vrot.slane %v2820_v13, 2  ;;  %3043 = vmatpush.msrb.mxu1 %v2744_v34  ;;  %v3153_v9 = vld [vmem:[%s8204_s29 + $0x148] sm:$0xff]  ;;  %v2769_v33 = vld [vmem:[%s6569_s7] sm:$0x1]  ;;  %s9838_s7 = sld [smem:[%s9970_s0 + %s6886_s4]]  }
 0x620   :  { %3353 = vmatpush.msrb.mxu2 %v3288_v7  ;;  %v3168_v34 = vld [vmem:[%s8204_s29 + $0x1c0] sm:$0xff]  ;;  %v3170_v7 = vld [vmem:[%s8204_s29 + $0x1d0] sm:$0xff] }
 0x621   :  { %v2793_v51 = vrot.slane %v2792_v55, 1  ;;  %v2822_v48 = vadd.f32 %v2821_v47, %v2820_v13  ;;  %v3149_v13 = vld [vmem:[%s8204_s29 + $0x128] sm:$0xff]  ;;  %v3276_v47 = vld [vmem:[%s8204_s29 + $0x520] sm:$0xff] }
 0x622   :  { %3354 = vmatpush.msrb.mxu2 %v3284_v24  ;;  %v3140_v61 = vld [vmem:[%s8204_s29 + $0xe0] sm:$0xff] }
 0x623   :  { %v2794_v50 = vadd.f32 %v2793_v51, %v2792_v55  ;;  %v2823_v35 = vrot.slane %v2822_v48, 1  ;;  %v3145_v51 = vld [vmem:[%s8204_s29 + $0x108] sm:$0xff]  ;;  %v3136_v24 = vld [vmem:[%s8204_s29 + $0xc0] sm:$0xff] }
 0x624   :  { %3355 = vmatpush.msrb.mxu2 %v3280_v41  ;;  %v3166_v41 = vld [vmem:[%s8204_s29 + $0x1b0] sm:$0xff] }
 0x625   :  { %2881 = vmatmul.f32.vlgmr.msra.gmra.mxu0 %v2794_v50  ;;  %v2824_v53 = vadd.f32 %v2823_v35, %v2822_v48  ;;  %v3272_v50 = vld [vmem:[%s8204_s29 + $0x500] sm:$0xff]  ;;  %v3141_v35 = vld [vmem:[%s8204_s29 + $0xe8] sm:$0xff] }
 0x626   :  { %3013 = vmatpush.msra.mxu0 %v2767_v32  ;;  %3356 = vmatpush.msrb.mxu2 %v3276_v47  ;;  %v3236_v32 = vld [vmem:[%s8204_s29 + $0x3e0] sm:$0xff]  ;;  %v3162_v47 = vld [vmem:[%s8204_s29 + $0x190] sm:$0xff] }
 0x627   :  { %2941 = vmatmul.f32.vlgmr.msra.gmra.mxu3 %v2824_v53 }
 0x628   :  { %3014 = vmatpush.msra.mxu0 %v2764_v25  ;;  %3373 = vmatpush.msra.mxu3 %v3173_v16  ;;  %v3125_v25 = vld [vmem:[%s8204_s29 + $0x68] sm:$0xff]  ;;  %v3238_v16 = vld [vmem:[%s8204_s29 + $0x3f0] sm:$0xff] }
 0x629   :  { %3357 = vmatpush.msrb.mxu2 %v3272_v50  ;;  %v3192_v50 = vld [vmem:[%s8204_s29 + $0x280] sm:$0xff] }
 0x62a   :  { %3015 = vmatpush.msra.mxu0 %v2761_v59  ;;  %3374 = vmatpush.msra.mxu3 %v3169_v19  ;;  %v3144_v19 = vld [vmem:[%s8204_s29 + $0x100] sm:$0xff] }
 0x62b   :  { %3358 = vmatpush.msrb.mxu2 %v3268_v63  ;;  %v3124_v63 = vld [vmem:[%s8204_s29 + $0x60] sm:$0xff] }
 0x62c   :  { %3016 = vmatpush.msra.mxu0 %v2758_v39  ;;  %3375 = vmatpush.msra.mxu3 %v3165_v26  ;;  %v3164_v39 = vld [vmem:[%s8204_s29 + $0x1a0] sm:$0xff]  ;;  %v3234_v26 = vld [vmem:[%s8204_s29 + $0x3d0] sm:$0xff] }
 0x62d   :  { %3359 = vmatpush.msrb.mxu2 %v3264_v5  ;;  %v3214_v5 = vld [vmem:[%s8204_s29 + $0x330] sm:$0xff] }
 0x62e   :  { %3017 = vmatpush.msra.mxu0 %v2755_v56  ;;  %3376 = vmatpush.msra.mxu3 %v3161_v11  ;;  %v3228_v56 = vld [vmem:[%s8204_s29 + $0x3a0] sm:$0xff] }
 0x62f   :  { %3360 = vmatpush.msrb.mxu2 %v3260_v22  ;;  %v3204_v11 = vld [vmem:[%s8204_s29 + $0x2e0] sm:$0xff]  ;;  %v3210_v22 = vld [vmem:[%s8204_s29 + $0x310] sm:$0xff] }
 0x630   :  { %3018 = vmatpush.msra.mxu0 %v2752_v58  ;;  %3377 = vmatpush.msra.mxu3 %v3157_v49  ;;  %v3121_v58 = vld [vmem:[%s8204_s29 + $0x48] sm:$0xff]  ;;  %v3230_v49 = vld [vmem:[%s8204_s29 + $0x3b0] sm:$0xff] }
 0x631   :  { %3361 = vmatpush.msrb.mxu2 %v3256_v46  ;;  %v3233_v46 = vld [vmem:[%s8204_s29 + $0x3c8] sm:$0xff] }
 0x632   :  { %3019 = vmatpush.msra.mxu0 %v2749_v62  ;;  %3378 = vmatpush.msra.mxu3 %v3153_v9  ;;  %v3156_v62 = vld [vmem:[%s8204_s29 + $0x160] sm:$0xff] }
 0x633   :  { %v3200_v9 = vld [vmem:[%s8204_s29 + $0x2c0] sm:$0xff] }
 0x634   :  { %3020 = vmatpush.msra.mxu0 %v2746_v4  ;;  %3379 = vmatpush.msra.mxu3 %v3149_v13  ;;  %v3248_v4 = vld [vmem:[%s8204_s29 + $0x440] sm:$0xff] }
 0x635   :  { %v3132_v13 = vld [vmem:[%s8204_s29 + $0xa0] sm:$0xff] }
 0x636   :  { %3380 = vmatpush.msra.mxu3 %v3145_v51  ;;  %v3222_v51 = vld [vmem:[%s8204_s29 + $0x370] sm:$0xff] }
 0x638   :  { %3381 = vmatpush.msra.mxu3 %v3141_v35  ;;  %v3158_v35 = vld [vmem:[%s8204_s29 + $0x170] sm:$0xff] }
 0x63a   :  { %3382 = vmatpush.msra.mxu3 %v3137_v1  ;;  %v3188_v1 = vld [vmem:[%s8204_s29 + $0x260] sm:$0xff] }
 0x63c   :  { %3383 = vmatpush.msra.mxu3 %v3133_v44  ;;  %v3120_v44 = vld [vmem:[%s8204_s29 + $0x40] sm:$0xff] }
 0x63e   :  { %3384 = vmatpush.msra.mxu3 %v3129_v23  ;;  %v3116_v23 = vld [vmem:[%s8204_s29 + $0x20] sm:$0xff] }
 0x640   :  { %3385 = vmatpush.msra.mxu3 %v3125_v25  ;;  %v3297_v25 = vld [vmem:[%s8204_s29 + $0x5c8] sm:$0xff] }
 0x642   :  { %3386 = vmatpush.msra.mxu3 %v3121_v58  ;;  %v3281_v58 = vld [vmem:[%s8204_s29 + $0x548] sm:$0xff] }
 0x688   :  { %v2902_v6 = vpop.f32.mrf.mxu1 }
 0x68c   :  { %v2842_v18 = vpop.f32.mrf.mxu2 }
 0x68e   :  { %v2862_v57 = vpop.f32.mrf.mxu3 }
 0x68f   :  { %v2863_v60 = vadd.f32 %v2862_v57, %v2842_v18  ;;  %v3252_v57 = vld [vmem:[%s8204_s29 + $0x460] sm:$0xff] }
 0x690   :  { %3362 = vmatpush.msrb.mxu2 %v3252_v57  ;;  %v3217_v57 = vld [vmem:[%s8204_s29 + $0x348] sm:$0xff] }
 0x692   :  { %3363 = vmatpush.msrb.mxu2 %v3248_v4  ;;  %v3273_v4 = vld [vmem:[%s8204_s29 + $0x508] sm:$0xff] }
 0x694   :  { %v2922_v36 = vpop.f32.mrf.mxu2 }
 0x695   :  { %v2923_v8 = vadd.f32 %v2922_v36, %v2902_v6  ;;  %v3220_v36 = vld [vmem:[%s8204_s29 + $0x360] sm:$0xff] }
 0x696   :  { %v3152_v6 = vld [vmem:[%s8204_s29 + $0x140] sm:$0xff] }
 0x6a2   :  { %v2882_v27 = vpop.f32.mrf.mxu0 }
 0x6a3   :  { %v8207_v30 = vadd.f32 %v2882_v27, %v2863_v60  ;;  %v3160_v27 = vld [vmem:[%s8204_s29 + $0x180] sm:$0xff] }
 0x6a4   :  { %v3224_v60 = vld [vmem:[%s8204_s29 + $0x380] sm:$0xff] }
 0x6a5   :  { %v2945_v14 = vmul.f32 %v8207_v30, %v8207_v30 }
 0x6aa   :  { %v2942_v12 = vpop.f32.mrf.mxu3 }
 0x6ab   :  { %v2943_v15 = vadd.f32 %v2942_v12, %v2923_v8  ;;  %v3216_v8 = vld [vmem:[%s8204_s29 + $0x340] sm:$0xff] }
 0x6ac   :  { %v3244_v12 = vld [vmem:[%s8204_s29 + $0x420] sm:$0xff] }
 0x6ad   :  { %v2946_v38 = vsub.f32 %v2943_v15, %v2945_v14  ;;  %v3113_v14 = vld [vmem:[%s8204_s29 + $0x8] sm:$0xff]  ;;  %v3148_v15 = vld [vmem:[%s8204_s29 + $0x120] sm:$0xff]  ;;  %3364 = vmatpush.msrb.mxu2 %v3244_v12 }
 0x6ae   :  { %v3269_v12 = vld [vmem:[%s8204_s29 + $0x4e8] sm:$0xff] }
 0x6af   :  { %v2947_v20 = vadd.f32 1e-05, %v2946_v38  ;;  %v3212_v38 = vld [vmem:[%s8204_s29 + $0x320] sm:$0xff]  ;;  %3365 = vmatpush.msrb.mxu2 %v3240_v17  ;;  %v3138_v17 = vld [vmem:[%s8204_s29 + $0xd0] sm:$0xff] }
 0x6b1   :  { %6831 = vrsqrt.f32 %v2947_v20  ;;  %vm2954_vm10 = vweird.f32 %v2947_v20 }
 0x6b7   :  { %v6832_v52 = vpop.eup %6831 }
 0x6b8   :  { %v2949_v55 = vmul.f32 %v6832_v52, %v2947_v20  ;;  %vm2955_vm9 = vweird.f32 %v6832_v52  ;;  %v3208_v20 = vld [vmem:[%s8204_s29 + $0x300] sm:$0xff] }
 0x6b9   :  { %vm2956_vm11 = vmor %vm2954_vm10, %vm2955_vm9 }
 0x6ba   :  { %v2950_v48 = vmul.f32 %v6832_v52, %v2949_v55  ;;  %v3196_v55 = vld [vmem:[%s8204_s29 + $0x2a0] sm:$0xff] }
 0x6bc   :  { %v2951_v53 = vmul.f32 0.5, %v2950_v48  ;;  %v3128_v48 = vld [vmem:[%s8204_s29 + $0x80] sm:$0xff] }
 0x6be   :  { %v2952_v3 = vsub.f32 1.5, %v2951_v53  ;;  %v3218_v53 = vld [vmem:[%s8204_s29 + $0x350] sm:$0xff] }
 0x6c0   :  { %v2953_v10 = vmul.f32 %v6832_v52, %v2952_v3  ;;  %v3154_v3 = vld [vmem:[%s8204_s29 + $0x150] sm:$0xff] }
 0x6c2   :  { %v2957_v28 = vsel %vm2956_vm11, %v6832_v52, %v2953_v10  ;;  %v3226_v52 = vld [vmem:[%s8204_s29 + $0x390] sm:$0xff]  ;;  %v3184_v10 = vld [vmem:[%s8204_s29 + $0x240] sm:$0xff] }
 0x6c3   :  { %v2958_v29 = vmul.f32 %v2957_v28, %v2768_v21  ;;  %v3150_v21 = vld [vmem:[%s8204_s29 + $0x130] sm:$0xff]  ;;  %v3180_v28 = vld [vmem:[%s8204_s29 + $0x220] sm:$0xff] }
 0x6c5   :  { %6662 = vmatmul.msk.f32.vlgmr.msrb.gmra.mxu0 %vm2961_vm12, %v2958_v29  ;;  %6663 = vmatmul.msk.f32.vlgmr.msra.gmra.mxu1 %vm2961_vm12, %v2958_v29  ;;  %v2959_v18 = vmul.f32 %v2958_v29, %v8207_v30  ;;  %v3117_v30 = vld [vmem:[%s8204_s29 + $0x28] sm:$0xff] }
 0x6c6   :  { %3304 = vmatpush.msrb.mxu0 %v3172_v31  ;;  %3327 = vmatpush.msra.mxu1 %v3236_v32  ;;  %v3176_v31 = vld [vmem:[%s8204_s29 + $0x200] sm:$0xff]  ;;  %v3237_v32 = vld [vmem:[%s8204_s29 + $0x3e8] sm:$0xff] }
 0x6c7   :  { %v2960_v59 = vsub.f32 %v2769_v33, %v2959_v18  ;;  %3387 = vmatpush.msra.mxu3 %v3117_v30  ;;  %v3301_v33 = vld [vmem:[%s8204_s29 + $0x5e8] sm:$0xff]  ;;  %v3146_v30 = vld [vmem:[%s8204_s29 + $0x110] sm:$0xff] }
 0x6c8   :  { %3305 = vmatpush.msrb.mxu0 %v3168_v34  ;;  %3328 = vmatpush.msra.mxu1 %v3232_v37  ;;  %v3229_v18 = vld [vmem:[%s8204_s29 + $0x3a8] sm:$0xff] }
 0x6c9   :  { %6666 = vmatmul.msk.f32.vlgmr.msra.gmra.mxu2 %vm2961_vm12, %v2960_v59  ;;  %6667 = vmatmul.msk.f32.vlgmr.msrb.gmra.mxu3 %vm2961_vm12, %v2960_v59  ;;  %v3293_v34 = vld [vmem:[%s8204_s29 + $0x5a8] sm:$0xff] }
 0x6ca   :  { %3306 = vmatpush.msrb.mxu0 %v3164_v39  ;;  %3329 = vmatpush.msra.mxu1 %v3228_v56  ;;  %v3225_v37 = vld [vmem:[%s8204_s29 + $0x388] sm:$0xff] }
 0x6cb   :  { %3388 = vmatpush.msra.mxu3 %v3113_v14  ;;  %3442 = vmatpush.msra.mxu2 %v3174_v54  ;;  %v3221_v39 = vld [vmem:[%s8204_s29 + $0x368] sm:$0xff]  ;;  %v3142_v14 = vld [vmem:[%s8204_s29 + $0xf0] sm:$0xff] }
 0x6cc   :  { %3307 = vmatpush.msrb.mxu0 %v3160_v27  ;;  %3330 = vmatpush.msra.mxu1 %v3224_v60  ;;  %v3285_v56 = vld [vmem:[%s8204_s29 + $0x568] sm:$0xff] }
 0x6cd   :  { %6664 = vmatmul.msk.f32.vlgmr.msra.gmra.mxu0 %vm2961_vm12, %v2958_v29  ;;  %6665 = vmatmul.msk.f32.vlgmr.msrb.gmra.mxu1 %vm2961_vm12, %v2960_v59  ;;  %v3112_v29 = vld [vmem:[%s8204_s29] sm:$0xff]  ;;  %v3289_v59 = vld [vmem:[%s8204_s29 + $0x588] sm:$0xff] }
 0x6ce   :  { %3308 = vmatpush.msrb.mxu0 %v3156_v62  ;;  %3331 = vmatpush.msra.mxu1 %v3220_v36  ;;  %v3213_v27 = vld [vmem:[%s8204_s29 + $0x328] sm:$0xff] }
 0x6cf   :  { %3465 = vmatpush.msrb.mxu3 %v3238_v16  ;;  %3443 = vmatpush.msra.mxu2 %v3170_v7  ;;  %v3277_v60 = vld [vmem:[%s8204_s29 + $0x528] sm:$0xff] }
 0x6d0   :  { %3309 = vmatpush.msrb.mxu0 %v3152_v6  ;;  %3332 = vmatpush.msra.mxu1 %v3216_v8  ;;  %v3209_v62 = vld [vmem:[%s8204_s29 + $0x308] sm:$0xff]  ;;  %v3206_v6 = vld [vmem:[%s8204_s29 + $0x2f0] sm:$0xff] }
 0x6d1   :  { %3466 = vmatpush.msrb.mxu3 %v3234_v26  ;;  %3444 = vmatpush.msra.mxu2 %v3166_v41  ;;  %v3205_v36 = vld [vmem:[%s8204_s29 + $0x2e8] sm:$0xff]  ;;  %v3134_v26 = vld [vmem:[%s8204_s29 + $0xb0] sm:$0xff] }
 0x6d2   :  { %3310 = vmatpush.msrb.mxu0 %v3148_v15  ;;  %3333 = vmatpush.msra.mxu1 %v3212_v38  ;;  %v3201_v8 = vld [vmem:[%s8204_s29 + $0x2c8] sm:$0xff]  ;;  %v3202_v15 = vld [vmem:[%s8204_s29 + $0x2d0] sm:$0xff] }
 0x6d3   :  { %3467 = vmatpush.msrb.mxu3 %v3230_v49  ;;  %3445 = vmatpush.msra.mxu2 %v3162_v47  ;;  %v3197_v38 = vld [vmem:[%s8204_s29 + $0x2a8] sm:$0xff]  ;;  %v3130_v49 = vld [vmem:[%s8204_s29 + $0x90] sm:$0xff] }
 0x6d4   :  { %3311 = vmatpush.msrb.mxu0 %v3144_v19  ;;  %3334 = vmatpush.msra.mxu1 %v3208_v20  ;;  %v3265_v16 = vld [vmem:[%s8204_s29 + $0x4c8] sm:$0xff]  ;;  %v3198_v19 = vld [vmem:[%s8204_s29 + $0x2b0] sm:$0xff] }
 0x6d5   :  { %3468 = vmatpush.msrb.mxu3 %v3226_v52  ;;  %3446 = vmatpush.msra.mxu2 %v3158_v35  ;;  %v3193_v20 = vld [vmem:[%s8204_s29 + $0x288] sm:$0xff]  ;;  %v3126_v52 = vld [vmem:[%s8204_s29 + $0x70] sm:$0xff] }
 0x6d6   :  { %3312 = vmatpush.msrb.mxu0 %v3140_v61  ;;  %3335 = vmatpush.msra.mxu1 %v3204_v11  ;;  %v3261_v54 = vld [vmem:[%s8204_s29 + $0x4a8] sm:$0xff]  ;;  %v3194_v61 = vld [vmem:[%s8204_s29 + $0x290] sm:$0xff] }
 0x6d7   :  { %3469 = vmatpush.msrb.mxu3 %v3222_v51  ;;  %3447 = vmatpush.msra.mxu2 %v3154_v3  ;;  %v3189_v11 = vld [vmem:[%s8204_s29 + $0x268] sm:$0xff]  ;;  %v3122_v51 = vld [vmem:[%s8204_s29 + $0x50] sm:$0xff] }
 0x6d8   :  { %3313 = vmatpush.msrb.mxu0 %v3136_v24  ;;  %3336 = vmatpush.msra.mxu1 %v3200_v9  ;;  %v3257_v7 = vld [vmem:[%s8204_s29 + $0x488] sm:$0xff]  ;;  %v3190_v24 = vld [vmem:[%s8204_s29 + $0x270] sm:$0xff] }
 0x6d9   :  { %3470 = vmatpush.msrb.mxu3 %v3218_v53  ;;  %3448 = vmatpush.msra.mxu2 %v3150_v21  ;;  %v3185_v9 = vld [vmem:[%s8204_s29 + $0x248] sm:$0xff]  ;;  %v3118_v53 = vld [vmem:[%s8204_s29 + $0x30] sm:$0xff] }
 0x6da   :  { %3314 = vmatpush.msrb.mxu0 %v3132_v13  ;;  %3337 = vmatpush.msra.mxu1 %v3196_v55  ;;  %v3253_v41 = vld [vmem:[%s8204_s29 + $0x468] sm:$0xff]  ;;  %v3186_v13 = vld [vmem:[%s8204_s29 + $0x250] sm:$0xff] }
 0x6db   :  { %3471 = vmatpush.msrb.mxu3 %v3214_v5  ;;  %3449 = vmatpush.msra.mxu2 %v3146_v30  ;;  %v3181_v55 = vld [vmem:[%s8204_s29 + $0x228] sm:$0xff]  ;;  %v3114_v3 = vld [vmem:[%s8204_s29 + $0x10] sm:$0xff] }
 0x6dc   :  { %3315 = vmatpush.msrb.mxu0 %v3128_v48  ;;  %3338 = vmatpush.msra.mxu1 %v3192_v50  ;;  %v3249_v47 = vld [vmem:[%s8204_s29 + $0x448] sm:$0xff]  ;;  %v3182_v48 = vld [vmem:[%s8204_s29 + $0x230] sm:$0xff] }
 0x6dd   :  { %3472 = vmatpush.msrb.mxu3 %v3210_v22  ;;  %3450 = vmatpush.msra.mxu2 %v3142_v14  ;;  %v3177_v50 = vld [vmem:[%s8204_s29 + $0x208] sm:$0xff]  ;;  %v3294_v30 = vld [vmem:[%s8204_s29 + $0x5b0] sm:$0xff]  ;;  %v3295_v14 = vld [vmem:[%s8204_s29 + $0x5b8] sm:$0xff] }
 0x6de   :  { %3316 = vmatpush.msrb.mxu0 %v3124_v63  ;;  %3339 = vmatpush.msra.mxu1 %v3188_v1  ;;  %v3245_v35 = vld [vmem:[%s8204_s29 + $0x428] sm:$0xff]  ;;  %v3178_v63 = vld [vmem:[%s8204_s29 + $0x210] sm:$0xff] }
 0x6df   :  { %3473 = vmatpush.msrb.mxu3 %v3206_v6  ;;  %3451 = vmatpush.msra.mxu2 %v3138_v17  ;;  %v3241_v1 = vld [vmem:[%s8204_s29 + $0x408] sm:$0xff]  ;;  %v3171_v6 = vld [vmem:[%s8204_s29 + $0x1d8] sm:$0xff] }
 0x6e0   :  { %3317 = vmatpush.msrb.mxu0 %v3120_v44  ;;  %3340 = vmatpush.msra.mxu1 %v3184_v10 }
 0x6e1   :  { %3474 = vmatpush.msrb.mxu3 %v3202_v15  ;;  %3452 = vmatpush.msra.mxu2 %v3134_v26  ;;  %v3167_v15 = vld [vmem:[%s8204_s29 + $0x1b8] sm:$0xff] }
 0x6e2   :  { %3318 = vmatpush.msrb.mxu0 %v3116_v23  ;;  %3341 = vmatpush.msra.mxu1 %v3180_v28  ;;  %v3227_v26 = vld [vmem:[%s8204_s29 + $0x398] sm:$0xff] }
 0x6e3   :  { %3475 = vmatpush.msrb.mxu3 %v3198_v19  ;;  %3453 = vmatpush.msra.mxu2 %v3130_v49  ;;  %v3282_v49 = vld [vmem:[%s8204_s29 + $0x550] sm:$0xff] }
 0x6e4   :  { %3319 = vmatpush.msrb.mxu0 %v3112_v29  ;;  %3342 = vmatpush.msra.mxu1 %v3176_v31 }
 0x6e5   :  { %3476 = vmatpush.msrb.mxu3 %v3194_v61  ;;  %3454 = vmatpush.msra.mxu2 %v3126_v52  ;;  %v3287_v61 = vld [vmem:[%s8204_s29 + $0x578] sm:$0xff]  ;;  %v3278_v52 = vld [vmem:[%s8204_s29 + $0x530] sm:$0xff] }
 0x6e6   :  { %3396 = vmatpush.msra.mxu0 %v3237_v32  ;;  %3419 = vmatpush.msrb.mxu1 %v3301_v33 }
 0x6e7   :  { %3477 = vmatpush.msrb.mxu3 %v3190_v24  ;;  %3455 = vmatpush.msra.mxu2 %v3122_v51  ;;  %v3159_v24 = vld [vmem:[%s8204_s29 + $0x178] sm:$0xff]  ;;  %v3274_v51 = vld [vmem:[%s8204_s29 + $0x510] sm:$0xff] }
 0x6e8   :  { %3397 = vmatpush.msra.mxu0 %v3233_v46  ;;  %3420 = vmatpush.msrb.mxu1 %v3297_v25 }
 0x6e9   :  { %3478 = vmatpush.msrb.mxu3 %v3186_v13  ;;  %3456 = vmatpush.msra.mxu2 %v3118_v53  ;;  %v3155_v13 = vld [vmem:[%s8204_s29 + $0x158] sm:$0xff]  ;;  %v3270_v53 = vld [vmem:[%s8204_s29 + $0x4f0] sm:$0xff] }
 0x6ea   :  { %3398 = vmatpush.msra.mxu0 %v3229_v18  ;;  %3421 = vmatpush.msrb.mxu1 %v3293_v34 }
 0x6eb   :  { %3479 = vmatpush.msrb.mxu3 %v3182_v48  ;;  %3457 = vmatpush.msra.mxu2 %v3114_v3  ;;  %v3151_v48 = vld [vmem:[%s8204_s29 + $0x138] sm:$0xff] }
 0x6ec   :  { %3399 = vmatpush.msra.mxu0 %v3225_v37  ;;  %3422 = vmatpush.msrb.mxu1 %v3289_v59  ;;  %v3271_v3 = vld [vmem:[%s8204_s29 + $0x4f8] sm:$0xff] }
 0x6ed   :  { %3480 = vmatpush.msrb.mxu3 %v3178_v63  ;;  %v3147_v63 = vld [vmem:[%s8204_s29 + $0x118] sm:$0xff] }
 0x6ee   :  { %3400 = vmatpush.msra.mxu0 %v3221_v39  ;;  %3423 = vmatpush.msrb.mxu1 %v3285_v56  ;;  %v3302_v39 = vld [vmem:[%s8204_s29 + $0x5f0] sm:$0xff]  ;;  %v3303_v56 = vld [vmem:[%s8204_s29 + $0x5f8] sm:$0xff] }
 0x6f0   :  { %3401 = vmatpush.msra.mxu0 %v3217_v57  ;;  %3424 = vmatpush.msrb.mxu1 %v3281_v58 }
 0x6f2   :  { %3402 = vmatpush.msra.mxu0 %v3213_v27  ;;  %3425 = vmatpush.msrb.mxu1 %v3277_v60  ;;  %v3175_v27 = vld [vmem:[%s8204_s29 + $0x1f8] sm:$0xff] }
 0x6f4   :  { %3403 = vmatpush.msra.mxu0 %v3209_v62  ;;  %3426 = vmatpush.msrb.mxu1 %v3273_v4  ;;  %v3239_v62 = vld [vmem:[%s8204_s29 + $0x3f8] sm:$0xff] }
 0x6f6   :  { %3404 = vmatpush.msra.mxu0 %v3205_v36  ;;  %3427 = vmatpush.msrb.mxu1 %v3269_v12  ;;  %v3299_v36 = vld [vmem:[%s8204_s29 + $0x5d8] sm:$0xff] }
 0x6f7   :  { %v3235_v12 = vld [vmem:[%s8204_s29 + $0x3d8] sm:$0xff] }
 0x6f8   :  { %3405 = vmatpush.msra.mxu0 %v3201_v8  ;;  %3428 = vmatpush.msrb.mxu1 %v3265_v16  ;;  %v3291_v16 = vld [vmem:[%s8204_s29 + $0x598] sm:$0xff] }
 0x6fa   :  { %3406 = vmatpush.msra.mxu0 %v3197_v38  ;;  %3429 = vmatpush.msrb.mxu1 %v3261_v54  ;;  %v3231_v38 = vld [vmem:[%s8204_s29 + $0x3b8] sm:$0xff] }
 0x6fb   :  { %v3163_v54 = vld [vmem:[%s8204_s29 + $0x198] sm:$0xff] }
 0x6fc   :  { %3407 = vmatpush.msra.mxu0 %v3193_v20  ;;  %3430 = vmatpush.msrb.mxu1 %v3257_v7 }
 0x6fe   :  { %3408 = vmatpush.msra.mxu0 %v3189_v11  ;;  %3431 = vmatpush.msrb.mxu1 %v3253_v41  ;;  %v3283_v41 = vld [vmem:[%s8204_s29 + $0x558] sm:$0xff] }
 0x700   :  { %3409 = vmatpush.msra.mxu0 %v3185_v9  ;;  %3432 = vmatpush.msrb.mxu1 %v3249_v47  ;;  %v3223_v9 = vld [vmem:[%s8204_s29 + $0x378] sm:$0xff] }
 0x701   :  { %v3279_v47 = vld [vmem:[%s8204_s29 + $0x538] sm:$0xff] }
 0x702   :  { %3410 = vmatpush.msra.mxu0 %v3181_v55  ;;  %3433 = vmatpush.msrb.mxu1 %v3245_v35  ;;  %v3219_v55 = vld [vmem:[%s8204_s29 + $0x358] sm:$0xff] }
 0x703   :  { %v3275_v35 = vld [vmem:[%s8204_s29 + $0x518] sm:$0xff] }
 0x704   :  { %3411 = vmatpush.msra.mxu0 %v3177_v50  ;;  %3434 = vmatpush.msrb.mxu1 %v3241_v1  ;;  %v3215_v50 = vld [vmem:[%s8204_s29 + $0x338] sm:$0xff] }
 0x705   :  { %v3211_v1 = vld [vmem:[%s8204_s29 + $0x318] sm:$0xff] }
 0x742   :  { %v2982_v5 = vpop.f32.mrf.mxu0  ;;  %v3002_v44 = vpop.f32.mrf.mxu1 }
 0x743   :  { %v3088_v10 = vperm.slane %v2982_v5, 0  ;;  %v3089_v21 = vperm.slane %v3002_v44, 0  ;;  %v3266_v5 = vld [vmem:[%s8204_s29 + $0x4d0] sm:$0xff]  ;;  %v3143_v44 = vld [vmem:[%s8204_s29 + $0xf8] sm:$0xff] }
 0x745   :  { %v3091_v28 = vmul.f32 %v3088_v10, %v8123_v0  ;;  %v3092_v18 = vmul.f32 %v3089_v21, %v8129_v45  ;;  %v3298_v45 = vld [vmem:[%s8204_s29 + $0x5d0] sm:$0xff]  ;;  %v3094_v60 = vmul.f32 %v3088_v10, %v8127_v2  ;;  %v3095_v2 = vmul.f32 %v3089_v21, %v8136_v43  ;;  %v3207_v10 = vld [vmem:[%s8204_s29 + $0x2f8] sm:$0xff] }
 0x746   :  { %v3286_v43 = vld [vmem:[%s8204_s29 + $0x570] sm:$0xff]  ;;  %v3267_v21 = vld [vmem:[%s8204_s29 + $0x4d8] sm:$0xff] }
 0x74a   :  { %v3022_v22 = vpop.f32.mrf.mxu0  ;;  %v3045_v23 = vpop.f32.mrf.mxu1 }
 0x74b   :  { %v3090_v29 = vperm.slane %v3022_v22, 0  ;;  %v3097_v31 = vperm.slane %v3045_v23, 0  ;;  %v3262_v22 = vld [vmem:[%s8204_s29 + $0x4b0] sm:$0xff]  ;;  %v3139_v23 = vld [vmem:[%s8204_s29 + $0xd8] sm:$0xff] }
 0x74c   :  { %v3065_v32 = vpop.f32.mrf.mxu2  ;;  %v3085_v33 = vpop.f32.mrf.mxu3 }
 0x74d   :  { %v3093_v46 = vmul.f32 %v3090_v29, %v8161_v40  ;;  %v3100_v25 = vadd.f32 %v3097_v31, %v3091_v28  ;;  %v3098_v34 = vperm.slane %v3065_v32, 0  ;;  %v3099_v37 = vperm.slane %v3085_v33, 0  ;;  %v3203_v28 = vld [vmem:[%s8204_s29 + $0x2d8] sm:$0xff] }
 0x74e   :  { %v3096_v4 = vmul.f32 %v3090_v29, %v8163_v42  ;;  %v3103_v8 = vadd.f32 %v3097_v31, %v3094_v60  ;;  %v3290_v42 = vld [vmem:[%s8204_s29 + $0x590] sm:$0xff]  ;;  %v3263_v29 = vld [vmem:[%s8204_s29 + $0x4b8] sm:$0xff] }
 0x74f   :  { %v8355_v59 = vmax.f32 %v3100_v25, 0.0  ;;  %v3101_v0 = vadd.f32 %v3098_v34, %v3092_v18  ;;  %v3102_v57 = vadd.f32 %v3099_v37, %v3093_v46  ;;  %v3104_v17 = vadd.f32 %v3098_v34, %v3095_v2  ;;  %v3258_v31 = vld [vmem:[%s8204_s29 + $0x490] sm:$0xff]  ;;  %v3135_v32 = vld [vmem:[%s8204_s29 + $0xb8] sm:$0xff] }
 0x750   :  { %v3105_v19 = vadd.f32 %v3099_v37, %v3096_v4  ;;  %v8382_v20 = vmax.f32 %v3103_v8, 0.0  ;;  %v3199_v33 = vld [vmem:[%s8204_s29 + $0x2b8] sm:$0xff]  ;;  %v3254_v25 = vld [vmem:[%s8204_s29 + $0x470] sm:$0xff]  ;;  %v3644_v8 = vld [vmem:[%s8435_s11 + $0x1e0] sm:$0xff] }
 0x751   :  { %3320 = vmatmul.f32.vlgmr.msrb.gmra.mxu0 %v8355_v59  ;;  %3389 = vmatmul.f32.vlgmr.msra.gmra.mxu3 %v8355_v59  ;;  %v8361_v40 = vmax.f32 %v3101_v0, 0.0  ;;  %v8363_v58 = vmax.f32 %v3102_v57, 0.0  ;;  %v8390_v11 = vmax.f32 %v3104_v17, 0.0  ;;  %v3259_v46 = vld [vmem:[%s8204_s29 + $0x498] sm:$0xff]  ;;  %v3636_v17 = vld [vmem:[%s8435_s11 + $0x1a0] sm:$0xff] }
 0x752   :  { %3488 = vmatpush.msrb.mxu0 %v3302_v39  ;;  %3557 = vmatpush.msra.mxu3 %v3303_v56  ;;  %v8392_v7 = vmax.f32 %v3105_v19, 0.0  ;;  %v3131_v18 = vld [vmem:[%s8204_s29 + $0x98] sm:$0xff]  ;;  %v3250_v39 = vld [vmem:[%s8204_s29 + $0x450] sm:$0xff]  ;;  %v3704_v19 = vld [vmem:[%s8435_s11 + $0x3c0] sm:$0xff] }
 0x753   :  { %3343 = vmatmul.f32.vlgmr.msra.gmra.mxu1 %v8361_v40  ;;  %3366 = vmatmul.f32.vlgmr.msrb.gmra.mxu2 %v8363_v58  ;;  %v3195_v34 = vld [vmem:[%s8204_s29 + $0x298] sm:$0xff] }
 0x754   :  { %3489 = vmatpush.msrb.mxu0 %v3298_v45  ;;  %3511 = vmatpush.msra.mxu1 %v3175_v27  ;;  %v3255_v37 = vld [vmem:[%s8204_s29 + $0x478] sm:$0xff]  ;;  %v3246_v45 = vld [vmem:[%s8204_s29 + $0x430] sm:$0xff] }
 0x755   :  { %3534 = vmatpush.msrb.mxu2 %v3239_v62  ;;  %3558 = vmatpush.msra.mxu3 %v3299_v36  ;;  %v3127_v56 = vld [vmem:[%s8204_s29 + $0x78] sm:$0xff]  ;;  %v3242_v36 = vld [vmem:[%s8204_s29 + $0x410] sm:$0xff] }
 0x756   :  { %3490 = vmatpush.msrb.mxu0 %v3294_v30  ;;  %3512 = vmatpush.msra.mxu1 %v3171_v6  ;;  %v3191_v0 = vld [vmem:[%s8204_s29 + $0x278] sm:$0xff] }
 0x757   :  { %3535 = vmatpush.msrb.mxu2 %v3235_v12  ;;  %3559 = vmatpush.msra.mxu3 %v3295_v14  ;;  %v3251_v57 = vld [vmem:[%s8204_s29 + $0x458] sm:$0xff]  ;;  %v3645_v12 = vld [vmem:[%s8435_s11 + $0x1e8] sm:$0xff] }
 0x758   :  { %3491 = vmatpush.msrb.mxu0 %v3290_v42  ;;  %3513 = vmatpush.msra.mxu1 %v3167_v15  ;;  %v3123_v27 = vld [vmem:[%s8204_s29 + $0x58] sm:$0xff]  ;;  %v3640_v42 = vld [vmem:[%s8435_s11 + $0x1c0] sm:$0xff] }
 0x759   :  { %3536 = vmatpush.msrb.mxu2 %v3231_v38  ;;  %3560 = vmatpush.msra.mxu3 %v3291_v16  ;;  %v3187_v60 = vld [vmem:[%s8204_s29 + $0x258] sm:$0xff]  ;;  %v3708_v15 = vld [vmem:[%s8435_s11 + $0x3e0] sm:$0xff]  ;;  %v3641_v16 = vld [vmem:[%s8435_s11 + $0x1c8] sm:$0xff] }
 0x75a   :  { %3323 = vmatmul.f32.gmra.mxu0 %v8382_v20  ;;  %3392 = vmatmul.f32.gmra.mxu3 %v8382_v20  ;;  %v3247_v62 = vld [vmem:[%s8204_s29 + $0x438] sm:$0xff]  ;;  %v3772_v38 = vld [vmem:[%s8435_s11 + $0x5e0] sm:$0xff] }
 0x75b   :  { %3492 = vmatpush.msrb.mxu0 %v3286_v43  ;;  %3514 = vmatpush.msra.mxu1 %v3163_v54  ;;  %v3119_v4 = vld [vmem:[%s8204_s29 + $0x38] sm:$0xff]  ;;  %v3768_v43 = vld [vmem:[%s8435_s11 + $0x5c0] sm:$0xff]  ;;  %v3637_v54 = vld [vmem:[%s8435_s11 + $0x1a8] sm:$0xff] }
 0x75c   :  { %3537 = vmatpush.msrb.mxu2 %v3227_v26  ;;  %3561 = vmatpush.msra.mxu3 %v3287_v61  ;;  %v3183_v30 = vld [vmem:[%s8204_s29 + $0x238] sm:$0xff]  ;;  %v3632_v26 = vld [vmem:[%s8435_s11 + $0x180] sm:$0xff] }
 0x75d   :  { %3346 = vmatmul.f32.gmra.mxu1 %v8390_v11  ;;  %3369 = vmatmul.f32.gmra.mxu2 %v8392_v7  ;;  %v3243_v6 = vld [vmem:[%s8204_s29 + $0x418] sm:$0xff]  ;;  %v3700_v61 = vld [vmem:[%s8435_s11 + $0x3a0] sm:$0xff] }
 0x75e   :  { %3493 = vmatpush.msrb.mxu0 %v3282_v49  ;;  %3515 = vmatpush.msra.mxu1 %v3159_v24  ;;  %v3115_v14 = vld [vmem:[%s8204_s29 + $0x18] sm:$0xff]  ;;  %v3764_v49 = vld [vmem:[%s8435_s11 + $0x5a0] sm:$0xff]  ;;  %v3633_v24 = vld [vmem:[%s8435_s11 + $0x188] sm:$0xff] }
 0x75f   :  { %3538 = vmatpush.msrb.mxu2 %v3223_v9  ;;  %3562 = vmatpush.msra.mxu3 %v3283_v41  ;;  %v3179_v2 = vld [vmem:[%s8204_s29 + $0x218] sm:$0xff]  ;;  %v3628_v9 = vld [vmem:[%s8435_s11 + $0x160] sm:$0xff]  ;;  %s9728_s29 = sld [smem:[%s9970_s0 + %s6884_s26]]  }
 0x760   :  { %3494 = vmatpush.msrb.mxu0 %v3278_v52  ;;  %3516 = vmatpush.msra.mxu1 %v3155_v13  ;;  %v3696_v41 = vld [vmem:[%s8435_s11 + $0x380] sm:$0xff]  ;;  %v3629_v13 = vld [vmem:[%s8435_s11 + $0x168] sm:$0xff] }
 0x761   :  { %3539 = vmatpush.msrb.mxu2 %v3219_v55  ;;  %3563 = vmatpush.msra.mxu3 %v3279_v47  ;;  %v3760_v52 = vld [vmem:[%s8435_s11 + $0x580] sm:$0xff] }
 0x762   :  { %3495 = vmatpush.msrb.mxu0 %v3274_v51  ;;  %3517 = vmatpush.msra.mxu1 %v3151_v48  ;;  %v3624_v55 = vld [vmem:[%s8435_s11 + $0x140] sm:$0xff]  ;;  %v3625_v48 = vld [vmem:[%s8435_s11 + $0x148] sm:$0xff] }
 0x763   :  { %3540 = vmatpush.msrb.mxu2 %v3215_v50  ;;  %3564 = vmatpush.msra.mxu3 %v3275_v35  ;;  %v3692_v47 = vld [vmem:[%s8435_s11 + $0x360] sm:$0xff] }
 0x764   :  { %3412 = vmatmul.f32.vlgmr.msra.gmra.mxu0 %v8361_v40  ;;  %3481 = vmatmul.f32.vlgmr.msrb.gmra.mxu3 %v8361_v40  ;;  %v3756_v51 = vld [vmem:[%s8435_s11 + $0x560] sm:$0xff] }
 0x765   :  { %3496 = vmatpush.msrb.mxu0 %v3270_v53  ;;  %3518 = vmatpush.msra.mxu1 %v3147_v63  ;;  %v3620_v50 = vld [vmem:[%s8435_s11 + $0x120] sm:$0xff]  ;;  %v3621_v63 = vld [vmem:[%s8435_s11 + $0x128] sm:$0xff] }
 0x766   :  { %3541 = vmatpush.msrb.mxu2 %v3211_v1  ;;  %3565 = vmatpush.msra.mxu3 %v3271_v3  ;;  %v3688_v35 = vld [vmem:[%s8435_s11 + $0x340] sm:$0xff] }
 0x767   :  { %3435 = vmatmul.f32.vlgmr.msrb.gmra.mxu1 %v8363_v58  ;;  %3458 = vmatmul.f32.vlgmr.msra.gmra.mxu2 %v8355_v59  ;;  %v3752_v53 = vld [vmem:[%s8435_s11 + $0x540] sm:$0xff] }
 0x768   :  { %3497 = vmatpush.msrb.mxu0 %v3266_v5  ;;  %3519 = vmatpush.msra.mxu1 %v3143_v44  ;;  %v3616_v1 = vld [vmem:[%s8435_s11 + $0x100] sm:$0xff]  ;;  %v3617_v44 = vld [vmem:[%s8435_s11 + $0x108] sm:$0xff] }
 0x769   :  { %3542 = vmatpush.msrb.mxu2 %v3207_v10  ;;  %3566 = vmatpush.msra.mxu3 %v3267_v21  ;;  %v3684_v3 = vld [vmem:[%s8435_s11 + $0x320] sm:$0xff] }
 0x76a   :  { %3498 = vmatpush.msrb.mxu0 %v3262_v22  ;;  %3520 = vmatpush.msra.mxu1 %v3139_v23  ;;  %v3748_v5 = vld [vmem:[%s8435_s11 + $0x520] sm:$0xff]  ;;  %v3613_v23 = vld [vmem:[%s8435_s11 + $0xe8] sm:$0xff] }
 0x76b   :  { %3543 = vmatpush.msrb.mxu2 %v3203_v28  ;;  %3567 = vmatpush.msra.mxu3 %v3263_v29  ;;  %v3612_v10 = vld [vmem:[%s8435_s11 + $0xe0] sm:$0xff] }
 0x76c   :  { %3499 = vmatpush.msrb.mxu0 %v3258_v31  ;;  %3521 = vmatpush.msra.mxu1 %v3135_v32  ;;  %v3680_v21 = vld [vmem:[%s8435_s11 + $0x300] sm:$0xff]  ;;  %v3609_v32 = vld [vmem:[%s8435_s11 + $0xc8] sm:$0xff] }
 0x76d   :  { %3544 = vmatpush.msrb.mxu2 %v3199_v33  ;;  %3568 = vmatpush.msra.mxu3 %v3259_v46  ;;  %v3744_v22 = vld [vmem:[%s8435_s11 + $0x500] sm:$0xff] }
 0x76e   :  { %3415 = vmatmul.f32.gmra.mxu0 %v8390_v11  ;;  %3484 = vmatmul.f32.gmra.mxu3 %v8390_v11  ;;  %v3608_v28 = vld [vmem:[%s8435_s11 + $0xc0] sm:$0xff] }
 0x76f   :  { %3500 = vmatpush.msrb.mxu0 %v3254_v25  ;;  %3522 = vmatpush.msra.mxu1 %v3131_v18  ;;  %v3676_v29 = vld [vmem:[%s8435_s11 + $0x2e0] sm:$0xff]  ;;  %v3605_v18 = vld [vmem:[%s8435_s11 + $0xa8] sm:$0xff] }
 0x770   :  { %3545 = vmatpush.msrb.mxu2 %v3195_v34  ;;  %3569 = vmatpush.msra.mxu3 %v3255_v37  ;;  %v3740_v31 = vld [vmem:[%s8435_s11 + $0x4e0] sm:$0xff] }
 0x771   :  { %3438 = vmatmul.f32.gmra.mxu1 %v8392_v7  ;;  %3461 = vmatmul.f32.gmra.mxu2 %v8382_v20  ;;  %v3604_v33 = vld [vmem:[%s8435_s11 + $0xa0] sm:$0xff] }
 0x772   :  { %3501 = vmatpush.msrb.mxu0 %v3250_v39  ;;  %3523 = vmatpush.msra.mxu1 %v3127_v56  ;;  %v3672_v46 = vld [vmem:[%s8435_s11 + $0x2c0] sm:$0xff]  ;;  %v3601_v56 = vld [vmem:[%s8435_s11 + $0x88] sm:$0xff] }
 0x773   :  { %3546 = vmatpush.msrb.mxu2 %v3191_v0  ;;  %3570 = vmatpush.msra.mxu3 %v3251_v57  ;;  %v3736_v25 = vld [vmem:[%s8435_s11 + $0x4c0] sm:$0xff] }
 0x774   :  { %3502 = vmatpush.msrb.mxu0 %v3246_v45  ;;  %3524 = vmatpush.msra.mxu1 %v3123_v27  ;;  %v3600_v34 = vld [vmem:[%s8435_s11 + $0x80] sm:$0xff]  ;;  %v3597_v27 = vld [vmem:[%s8435_s11 + $0x68] sm:$0xff] }
 0x775   :  { %3547 = vmatpush.msrb.mxu2 %v3187_v60  ;;  %3571 = vmatpush.msra.mxu3 %v3247_v62  ;;  %v3668_v37 = vld [vmem:[%s8435_s11 + $0x2a0] sm:$0xff] }
 0x776   :  { %3503 = vmatpush.msrb.mxu0 %v3242_v36  ;;  %3525 = vmatpush.msra.mxu1 %v3119_v4  ;;  %v3732_v39 = vld [vmem:[%s8435_s11 + $0x4a0] sm:$0xff]  ;;  %v3593_v4 = vld [vmem:[%s8435_s11 + $0x48] sm:$0xff] }
 0x777   :  { %3548 = vmatpush.msrb.mxu2 %v3183_v30  ;;  %3572 = vmatpush.msra.mxu3 %v3243_v6  ;;  %v3596_v0 = vld [vmem:[%s8435_s11 + $0x60] sm:$0xff] }
 0x778   :  { %3776 = vmatpush.msra.mxu0 %v3644_v8  ;;  %3526 = vmatpush.msra.mxu1 %v3115_v14  ;;  %v3664_v57 = vld [vmem:[%s8435_s11 + $0x280] sm:$0xff] }
 0x779   :  { %3845 = vmatpush.msrb.mxu3 %v3645_v12  ;;  %3504 = vmatmul.f32.vlgmr.msrb.gmra.mxu0 %v8363_v58  ;;  %v3728_v45 = vld [vmem:[%s8435_s11 + $0x480] sm:$0xff]  ;;  %v3589_v12 = vld [vmem:[%s8435_s11 + $0x28] sm:$0xff] }
 0x77a   :  { %3549 = vmatpush.msrb.mxu2 %v3179_v2  ;;  %3573 = vmatmul.f32.vlgmr.msra.gmra.mxu3 %v8363_v58  ;;  %v3592_v60 = vld [vmem:[%s8435_s11 + $0x40] sm:$0xff] }
 0x77b   :  { %3777 = vmatpush.msra.mxu0 %v3640_v42  ;;  %3799 = vmatpush.msrb.mxu1 %v3708_v15  ;;  %v3660_v62 = vld [vmem:[%s8435_s11 + $0x260] sm:$0xff]  ;;  %v3585_v15 = vld [vmem:[%s8435_s11 + $0x8] sm:$0xff] }
 0x77c   :  { %3822 = vmatpush.msra.mxu2 %v3772_v38  ;;  %3846 = vmatpush.msrb.mxu3 %v3641_v16  ;;  %v3724_v36 = vld [vmem:[%s8435_s11 + $0x460] sm:$0xff]  ;;  %v3709_v38 = vld [vmem:[%s8435_s11 + $0x3e8] sm:$0xff]  ;;  %v3710_v16 = vld [vmem:[%s8435_s11 + $0x3f0] sm:$0xff] }
 0x77d   :  { %3527 = vmatmul.f32.vlgmr.msra.gmra.mxu1 %v8355_v59  ;;  %3550 = vmatmul.f32.vlgmr.msrb.gmra.mxu2 %v8361_v40  ;;  %v3588_v30 = vld [vmem:[%s8435_s11 + $0x20] sm:$0xff] }
 0x77e   :  { %3778 = vmatpush.msra.mxu0 %v3636_v17  ;;  %3800 = vmatpush.msrb.mxu1 %v3704_v19  ;;  %v3656_v6 = vld [vmem:[%s8435_s11 + $0x240] sm:$0xff] }
 0x77f   :  { %3823 = vmatpush.msra.mxu2 %v3768_v43  ;;  %3847 = vmatpush.msrb.mxu3 %v3637_v54  ;;  %v3720_v8 = vld [vmem:[%s8435_s11 + $0x440] sm:$0xff]  ;;  %v3705_v43 = vld [vmem:[%s8435_s11 + $0x3c8] sm:$0xff] }
 0x780   :  { %3779 = vmatpush.msra.mxu0 %v3632_v26  ;;  %3801 = vmatpush.msrb.mxu1 %v3700_v61  ;;  %v3584_v14 = vld [vmem:[%s8435_s11] sm:$0xff]  ;;  %v3773_v54 = vld [vmem:[%s8435_s11 + $0x5e8] sm:$0xff]  ;;  %v3646_v26 = vld [vmem:[%s8435_s11 + $0x1f0] sm:$0xff] }
 0x781   :  { %3824 = vmatpush.msra.mxu2 %v3764_v49  ;;  %3848 = vmatpush.msrb.mxu3 %v3633_v24  ;;  %v3652_v2 = vld [vmem:[%s8435_s11 + $0x220] sm:$0xff]  ;;  %v3706_v61 = vld [vmem:[%s8435_s11 + $0x3d0] sm:$0xff]  ;;  %v3701_v49 = vld [vmem:[%s8435_s11 + $0x3a8] sm:$0xff] }
 0x782   :  { %3780 = vmatpush.msra.mxu0 %v3628_v9  ;;  %3802 = vmatpush.msrb.mxu1 %v3696_v41  ;;  %v3716_v42 = vld [vmem:[%s8435_s11 + $0x420] sm:$0xff]  ;;  %v3769_v24 = vld [vmem:[%s8435_s11 + $0x5c8] sm:$0xff]  ;;  %v3642_v9 = vld [vmem:[%s8435_s11 + $0x1d0] sm:$0xff] }
 0x783   :  { %3825 = vmatpush.msra.mxu2 %v3760_v52  ;;  %3849 = vmatpush.msrb.mxu3 %v3629_v13  ;;  %v3648_v17 = vld [vmem:[%s8435_s11 + $0x200] sm:$0xff]  ;;  %v3702_v41 = vld [vmem:[%s8435_s11 + $0x3b0] sm:$0xff]  ;;  %v3697_v52 = vld [vmem:[%s8435_s11 + $0x388] sm:$0xff] }
 0x784   :  { %3507 = vmatmul.f32.gmra.mxu0 %v8392_v7  ;;  %3576 = vmatmul.f32.gmra.mxu3 %v8392_v7  ;;  %v3712_v19 = vld [vmem:[%s8435_s11 + $0x400] sm:$0xff]  ;;  %v3765_v13 = vld [vmem:[%s8435_s11 + $0x5a8] sm:$0xff] }
 0x785   :  { %3781 = vmatpush.msra.mxu0 %v3624_v55  ;;  %3803 = vmatpush.msrb.mxu1 %v3692_v47  ;;  %v3638_v55 = vld [vmem:[%s8435_s11 + $0x1b0] sm:$0xff] }
 0x786   :  { %3826 = vmatpush.msra.mxu2 %v3756_v51  ;;  %3850 = vmatpush.msrb.mxu3 %v3625_v48  ;;  %v3698_v47 = vld [vmem:[%s8435_s11 + $0x390] sm:$0xff]  ;;  %v3693_v51 = vld [vmem:[%s8435_s11 + $0x368] sm:$0xff] }
 0x787   :  { %3530 = vmatmul.f32.gmra.mxu1 %v8382_v20  ;;  %3553 = vmatmul.f32.gmra.mxu2 %v8390_v11  ;;  %v3761_v48 = vld [vmem:[%s8435_s11 + $0x588] sm:$0xff] }
 0x788   :  { %3782 = vmatpush.msra.mxu0 %v3620_v50  ;;  %3804 = vmatpush.msrb.mxu1 %v3688_v35  ;;  %v3634_v50 = vld [vmem:[%s8435_s11 + $0x190] sm:$0xff] }
 0x789   :  { %3827 = vmatpush.msra.mxu2 %v3752_v53  ;;  %3851 = vmatpush.msrb.mxu3 %v3621_v63  ;;  %v3694_v35 = vld [vmem:[%s8435_s11 + $0x370] sm:$0xff]  ;;  %v3689_v53 = vld [vmem:[%s8435_s11 + $0x348] sm:$0xff] }
 0x78a   :  { %3783 = vmatpush.msra.mxu0 %v3616_v1  ;;  %3805 = vmatpush.msrb.mxu1 %v3684_v3  ;;  %v3757_v63 = vld [vmem:[%s8435_s11 + $0x568] sm:$0xff]  ;;  %v3630_v1 = vld [vmem:[%s8435_s11 + $0x170] sm:$0xff] }
 0x78b   :  { %3828 = vmatpush.msra.mxu2 %v3748_v5  ;;  %3852 = vmatpush.msrb.mxu3 %v3617_v44  ;;  %v3690_v3 = vld [vmem:[%s8435_s11 + $0x350] sm:$0xff]  ;;  %v3685_v5 = vld [vmem:[%s8435_s11 + $0x328] sm:$0xff] }
 0x78c   :  { %3784 = vmatpush.msra.mxu0 %v3612_v10  ;;  %3806 = vmatpush.msrb.mxu1 %v3680_v21  ;;  %v3753_v44 = vld [vmem:[%s8435_s11 + $0x548] sm:$0xff]  ;;  %v3626_v10 = vld [vmem:[%s8435_s11 + $0x150] sm:$0xff] }
 0x78d   :  { %3829 = vmatpush.msra.mxu2 %v3744_v22  ;;  %3853 = vmatpush.msrb.mxu3 %v3613_v23  ;;  %v3686_v21 = vld [vmem:[%s8435_s11 + $0x330] sm:$0xff]  ;;  %v3681_v22 = vld [vmem:[%s8435_s11 + $0x308] sm:$0xff] }
 0x78e   :  { %3785 = vmatpush.msra.mxu0 %v3608_v28  ;;  %3807 = vmatpush.msrb.mxu1 %v3676_v29  ;;  %v3749_v23 = vld [vmem:[%s8435_s11 + $0x528] sm:$0xff]  ;;  %v3622_v28 = vld [vmem:[%s8435_s11 + $0x130] sm:$0xff] }
 0x78f   :  { %3830 = vmatpush.msra.mxu2 %v3740_v31  ;;  %3854 = vmatpush.msrb.mxu3 %v3609_v32  ;;  %v3682_v29 = vld [vmem:[%s8435_s11 + $0x310] sm:$0xff]  ;;  %v3677_v31 = vld [vmem:[%s8435_s11 + $0x2e8] sm:$0xff] }
 0x790   :  { %3786 = vmatpush.msra.mxu0 %v3604_v33  ;;  %3808 = vmatpush.msrb.mxu1 %v3672_v46  ;;  %v3745_v32 = vld [vmem:[%s8435_s11 + $0x508] sm:$0xff]  ;;  %v3618_v33 = vld [vmem:[%s8435_s11 + $0x110] sm:$0xff] }
 0x791   :  { %3831 = vmatpush.msra.mxu2 %v3736_v25  ;;  %3855 = vmatpush.msrb.mxu3 %v3605_v18  ;;  %v3678_v46 = vld [vmem:[%s8435_s11 + $0x2f0] sm:$0xff]  ;;  %v3673_v25 = vld [vmem:[%s8435_s11 + $0x2c8] sm:$0xff] }
 0x792   :  { %3787 = vmatpush.msra.mxu0 %v3600_v34  ;;  %3809 = vmatpush.msrb.mxu1 %v3668_v37  ;;  %v3741_v18 = vld [vmem:[%s8435_s11 + $0x4e8] sm:$0xff]  ;;  %v3614_v34 = vld [vmem:[%s8435_s11 + $0xf0] sm:$0xff] }
 0x793   :  { %3832 = vmatpush.msra.mxu2 %v3732_v39  ;;  %3856 = vmatpush.msrb.mxu3 %v3601_v56  ;;  %v3674_v37 = vld [vmem:[%s8435_s11 + $0x2d0] sm:$0xff]  ;;  %v3669_v39 = vld [vmem:[%s8435_s11 + $0x2a8] sm:$0xff] }
 0x794   :  { %3788 = vmatpush.msra.mxu0 %v3596_v0  ;;  %3810 = vmatpush.msrb.mxu1 %v3664_v57  ;;  %v3737_v56 = vld [vmem:[%s8435_s11 + $0x4c8] sm:$0xff]  ;;  %v3610_v0 = vld [vmem:[%s8435_s11 + $0xd0] sm:$0xff] }
 0x795   :  { %3833 = vmatpush.msra.mxu2 %v3728_v45  ;;  %3857 = vmatpush.msrb.mxu3 %v3597_v27  ;;  %v3670_v57 = vld [vmem:[%s8435_s11 + $0x2b0] sm:$0xff]  ;;  %v3665_v45 = vld [vmem:[%s8435_s11 + $0x288] sm:$0xff] }
 0x796   :  { %3789 = vmatpush.msra.mxu0 %v3592_v60  ;;  %3811 = vmatpush.msrb.mxu1 %v3660_v62  ;;  %v3733_v27 = vld [vmem:[%s8435_s11 + $0x4a8] sm:$0xff]  ;;  %v3606_v60 = vld [vmem:[%s8435_s11 + $0xb0] sm:$0xff] }
 0x797   :  { %3834 = vmatpush.msra.mxu2 %v3724_v36  ;;  %3858 = vmatpush.msrb.mxu3 %v3593_v4  ;;  %v3666_v62 = vld [vmem:[%s8435_s11 + $0x290] sm:$0xff]  ;;  %v3661_v36 = vld [vmem:[%s8435_s11 + $0x268] sm:$0xff] }
 0x798   :  { %3790 = vmatpush.msra.mxu0 %v3588_v30  ;;  %3812 = vmatpush.msrb.mxu1 %v3656_v6  ;;  %v3729_v4 = vld [vmem:[%s8435_s11 + $0x488] sm:$0xff]  ;;  %v3602_v30 = vld [vmem:[%s8435_s11 + $0x90] sm:$0xff] }
 0x799   :  { %3835 = vmatpush.msra.mxu2 %v3720_v8  ;;  %3859 = vmatpush.msrb.mxu3 %v3589_v12  ;;  %v3662_v6 = vld [vmem:[%s8435_s11 + $0x270] sm:$0xff]  ;;  %v3657_v8 = vld [vmem:[%s8435_s11 + $0x248] sm:$0xff] }
 0x79a   :  { %3791 = vmatpush.msra.mxu0 %v3584_v14  ;;  %3813 = vmatpush.msrb.mxu1 %v3652_v2  ;;  %v3725_v12 = vld [vmem:[%s8435_s11 + $0x468] sm:$0xff]  ;;  %v3598_v14 = vld [vmem:[%s8435_s11 + $0x70] sm:$0xff] }
 0x79b   :  { %3836 = vmatpush.msra.mxu2 %v3716_v42  ;;  %3860 = vmatpush.msrb.mxu3 %v3585_v15  ;;  %v3658_v2 = vld [vmem:[%s8435_s11 + $0x250] sm:$0xff]  ;;  %v3653_v42 = vld [vmem:[%s8435_s11 + $0x228] sm:$0xff] }
 0x79c   :  { %3792 = vmatmul.f32.vlgmr.msra.gmra.mxu0 %v8355_v59  ;;  %3861 = vmatmul.f32.vlgmr.msrb.gmra.mxu3 %v8355_v59  ;;  %v3721_v15 = vld [vmem:[%s8435_s11 + $0x448] sm:$0xff] }
 0x79d   :  { %3868 = vmatpush.msrb.mxu0 %v3709_v38  ;;  %3937 = vmatpush.msra.mxu3 %v3710_v16  ;;  %v3594_v38 = vld [vmem:[%s8435_s11 + $0x50] sm:$0xff] }
 0x79e   :  { %3814 = vmatpush.msrb.mxu1 %v3648_v17  ;;  %3837 = vmatpush.msra.mxu2 %v3712_v19  ;;  %v3654_v16 = vld [vmem:[%s8435_s11 + $0x230] sm:$0xff]  ;;  %v3649_v17 = vld [vmem:[%s8435_s11 + $0x208] sm:$0xff] }
 0x79f   :  { %3815 = vmatmul.f32.vlgmr.msrb.gmra.mxu1 %v8361_v40  ;;  %3838 = vmatmul.f32.vlgmr.msra.gmra.mxu2 %v8363_v58  ;;  %v3717_v19 = vld [vmem:[%s8435_s11 + $0x428] sm:$0xff] }
 0x7a0   :  { %3869 = vmatpush.msrb.mxu0 %v3705_v43  ;;  %3891 = vmatpush.msra.mxu1 %v3773_v54  ;;  %v3590_v43 = vld [vmem:[%s8435_s11 + $0x30] sm:$0xff] }
 0x7a1   :  { %3914 = vmatpush.msrb.mxu2 %v3646_v26  ;;  %3938 = vmatpush.msra.mxu3 %v3706_v61  ;;  %v3650_v54 = vld [vmem:[%s8435_s11 + $0x210] sm:$0xff]  ;;  %v3775_v61 = vld [vmem:[%s8435_s11 + $0x5f8] sm:$0xff] }
 0x7a2   :  { %3870 = vmatpush.msrb.mxu0 %v3701_v49  ;;  %3892 = vmatpush.msra.mxu1 %v3769_v24  ;;  %v3774_v26 = vld [vmem:[%s8435_s11 + $0x5f0] sm:$0xff]  ;;  %v3713_v49 = vld [vmem:[%s8435_s11 + $0x408] sm:$0xff] }
 0x7a3   :  { %3915 = vmatpush.msrb.mxu2 %v3642_v9  ;;  %3939 = vmatpush.msra.mxu3 %v3702_v41  ;;  %v3586_v24 = vld [vmem:[%s8435_s11 + $0x10] sm:$0xff]  ;;  %v3647_v41 = vld [vmem:[%s8435_s11 + $0x1f8] sm:$0xff] }
 0x7a4   :  { %3871 = vmatpush.msrb.mxu0 %v3697_v52  ;;  %3893 = vmatpush.msra.mxu1 %v3765_v13  ;;  %v3770_v9 = vld [vmem:[%s8435_s11 + $0x5d0] sm:$0xff]  ;;  %v3711_v52 = vld [vmem:[%s8435_s11 + $0x3f8] sm:$0xff] }
 0x7a5   :  { %3916 = vmatpush.msrb.mxu2 %v3638_v55  ;;  %3940 = vmatpush.msra.mxu3 %v3698_v47  ;;  %v3771_v13 = vld [vmem:[%s8435_s11 + $0x5d8] sm:$0xff]  ;;  %v3766_v55 = vld [vmem:[%s8435_s11 + $0x5b0] sm:$0xff] }
 0x7a6   :  { %3795 = vmatmul.f32.gmra.mxu0 %v8382_v20  ;;  %3864 = vmatmul.f32.gmra.mxu3 %v8382_v20  ;;  %v3643_v47 = vld [vmem:[%s8435_s11 + $0x1d8] sm:$0xff] }
 0x7a7   :  { %3872 = vmatpush.msrb.mxu0 %v3693_v51  ;;  %3894 = vmatpush.msra.mxu1 %v3761_v48  ;;  %v3707_v51 = vld [vmem:[%s8435_s11 + $0x3d8] sm:$0xff] }
 0x7a8   :  { %3917 = vmatpush.msrb.mxu2 %v3634_v50  ;;  %3941 = vmatpush.msra.mxu3 %v3694_v35  ;;  %v3767_v48 = vld [vmem:[%s8435_s11 + $0x5b8] sm:$0xff]  ;;  %v3762_v50 = vld [vmem:[%s8435_s11 + $0x590] sm:$0xff] }
 0x7a9   :  { %3818 = vmatmul.f32.gmra.mxu1 %v8390_v11  ;;  %3841 = vmatmul.f32.gmra.mxu2 %v8392_v7  ;;  %v3639_v35 = vld [vmem:[%s8435_s11 + $0x1b8] sm:$0xff] }
 0x7aa   :  { %3873 = vmatpush.msrb.mxu0 %v3689_v53  ;;  %3895 = vmatpush.msra.mxu1 %v3757_v63  ;;  %v3703_v53 = vld [vmem:[%s8435_s11 + $0x3b8] sm:$0xff] }
 0x7ab   :  { %3918 = vmatpush.msrb.mxu2 %v3630_v1  ;;  %3942 = vmatpush.msra.mxu3 %v3690_v3  ;;  %v3763_v63 = vld [vmem:[%s8435_s11 + $0x598] sm:$0xff]  ;;  %v3758_v1 = vld [vmem:[%s8435_s11 + $0x570] sm:$0xff] }
 0x7ac   :  { %3874 = vmatpush.msrb.mxu0 %v3685_v5  ;;  %3896 = vmatpush.msra.mxu1 %v3753_v44  ;;  %v3635_v3 = vld [vmem:[%s8435_s11 + $0x198] sm:$0xff] }
 0x7ad   :  { %3919 = vmatpush.msrb.mxu2 %v3626_v10  ;;  %3943 = vmatpush.msra.mxu3 %v3686_v21  ;;  %v3699_v5 = vld [vmem:[%s8435_s11 + $0x398] sm:$0xff]  ;;  %v3754_v10 = vld [vmem:[%s8435_s11 + $0x550] sm:$0xff] }
 0x7ae   :  { %3875 = vmatpush.msrb.mxu0 %v3681_v22  ;;  %3897 = vmatpush.msra.mxu1 %v3749_v23  ;;  %v3759_v44 = vld [vmem:[%s8435_s11 + $0x578] sm:$0xff] }
 0x7af   :  { %3920 = vmatpush.msrb.mxu2 %v3622_v28  ;;  %3944 = vmatpush.msra.mxu3 %v3682_v29  ;;  %v3631_v21 = vld [vmem:[%s8435_s11 + $0x178] sm:$0xff]  ;;  %v3750_v28 = vld [vmem:[%s8435_s11 + $0x530] sm:$0xff] }
 0x7b0   :  { %3876 = vmatpush.msrb.mxu0 %v3677_v31  ;;  %3898 = vmatpush.msra.mxu1 %v3745_v32  ;;  %v3695_v22 = vld [vmem:[%s8435_s11 + $0x378] sm:$0xff] }
 0x7b1   :  { %3921 = vmatpush.msrb.mxu2 %v3618_v33  ;;  %3945 = vmatpush.msra.mxu3 %v3678_v46  ;;  %v3755_v23 = vld [vmem:[%s8435_s11 + $0x558] sm:$0xff]  ;;  %v3746_v33 = vld [vmem:[%s8435_s11 + $0x510] sm:$0xff] }
 0x7b2   :  { %3877 = vmatpush.msrb.mxu0 %v3673_v25  ;;  %3899 = vmatpush.msra.mxu1 %v3741_v18  ;;  %v3627_v29 = vld [vmem:[%s8435_s11 + $0x158] sm:$0xff] }
 0x7b3   :  { %3922 = vmatpush.msrb.mxu2 %v3614_v34  ;;  %3946 = vmatpush.msra.mxu3 %v3674_v37  ;;  %v3691_v31 = vld [vmem:[%s8435_s11 + $0x358] sm:$0xff]  ;;  %v3742_v34 = vld [vmem:[%s8435_s11 + $0x4f0] sm:$0xff] }
 0x7b4   :  { %3878 = vmatpush.msrb.mxu0 %v3669_v39  ;;  %3900 = vmatpush.msra.mxu1 %v3737_v56  ;;  %v3751_v32 = vld [vmem:[%s8435_s11 + $0x538] sm:$0xff] }
 0x7b5   :  { %3923 = vmatpush.msrb.mxu2 %v3610_v0  ;;  %3947 = vmatpush.msra.mxu3 %v3670_v57  ;;  %v3623_v46 = vld [vmem:[%s8435_s11 + $0x138] sm:$0xff]  ;;  %v3738_v0 = vld [vmem:[%s8435_s11 + $0x4d0] sm:$0xff] }
 0x7b6   :  { %3879 = vmatpush.msrb.mxu0 %v3665_v45  ;;  %3901 = vmatpush.msra.mxu1 %v3733_v27  ;;  %v3687_v25 = vld [vmem:[%s8435_s11 + $0x338] sm:$0xff] }
 0x7b7   :  { %3924 = vmatpush.msrb.mxu2 %v3606_v60  ;;  %3948 = vmatpush.msra.mxu3 %v3666_v62  ;;  %v3747_v18 = vld [vmem:[%s8435_s11 + $0x518] sm:$0xff]  ;;  %v3734_v60 = vld [vmem:[%s8435_s11 + $0x4b0] sm:$0xff] }
 0x7b8   :  { %3880 = vmatpush.msrb.mxu0 %v3661_v36  ;;  %3902 = vmatpush.msra.mxu1 %v3729_v4  ;;  %v3619_v37 = vld [vmem:[%s8435_s11 + $0x118] sm:$0xff] }
 0x7b9   :  { %3925 = vmatpush.msrb.mxu2 %v3602_v30  ;;  %3949 = vmatpush.msra.mxu3 %v3662_v6  ;;  %v3683_v39 = vld [vmem:[%s8435_s11 + $0x318] sm:$0xff]  ;;  %v3730_v30 = vld [vmem:[%s8435_s11 + $0x490] sm:$0xff] }
 0x7ba   :  { %3881 = vmatpush.msrb.mxu0 %v3657_v8  ;;  %3903 = vmatpush.msra.mxu1 %v3725_v12  ;;  %v3743_v56 = vld [vmem:[%s8435_s11 + $0x4f8] sm:$0xff] }
 0x7bb   :  { %3926 = vmatpush.msrb.mxu2 %v3598_v14  ;;  %3950 = vmatpush.msra.mxu3 %v3658_v2  ;;  %v3615_v57 = vld [vmem:[%s8435_s11 + $0xf8] sm:$0xff]  ;;  %v3726_v14 = vld [vmem:[%s8435_s11 + $0x470] sm:$0xff] }
 0x7bc   :  { %3882 = vmatpush.msrb.mxu0 %v3653_v42  ;;  %3904 = vmatpush.msra.mxu1 %v3721_v15  ;;  %v3679_v45 = vld [vmem:[%s8435_s11 + $0x2f8] sm:$0xff] }
 0x7bd   :  { %3927 = vmatpush.msrb.mxu2 %v3594_v38  ;;  %3951 = vmatpush.msra.mxu3 %v3654_v16  ;;  %v3739_v27 = vld [vmem:[%s8435_s11 + $0x4d8] sm:$0xff]  ;;  %v3722_v38 = vld [vmem:[%s8435_s11 + $0x450] sm:$0xff] }
 0x7be   :  { %3883 = vmatpush.msrb.mxu0 %v3649_v17  ;;  %3905 = vmatpush.msra.mxu1 %v3717_v19  ;;  %v3611_v62 = vld [vmem:[%s8435_s11 + $0xd8] sm:$0xff] }
 0x7bf   :  { %3928 = vmatpush.msrb.mxu2 %v3590_v43  ;;  %3952 = vmatpush.msra.mxu3 %v3650_v54  ;;  %v3675_v36 = vld [vmem:[%s8435_s11 + $0x2d8] sm:$0xff]  ;;  %v3718_v43 = vld [vmem:[%s8435_s11 + $0x430] sm:$0xff] }
 0x7c0   :  { %3884 = vmatmul.f32.vlgmr.msrb.gmra.mxu0 %v8361_v40  ;;  %3953 = vmatmul.f32.vlgmr.msra.gmra.mxu3 %v8361_v40  ;;  %v3735_v4 = vld [vmem:[%s8435_s11 + $0x4b8] sm:$0xff] }
 0x7c1   :  { %3960 = vmatpush.msra.mxu0 %v3774_v26  ;;  %4029 = vmatpush.msrb.mxu3 %v3775_v61  ;;  %v3607_v6 = vld [vmem:[%s8435_s11 + $0xb8] sm:$0xff] }
 0x7c2   :  { %3906 = vmatpush.msra.mxu1 %v3713_v49  ;;  %3929 = vmatpush.msrb.mxu2 %v3586_v24  ;;  %v3671_v8 = vld [vmem:[%s8435_s11 + $0x2b8] sm:$0xff]  ;;  %v3714_v49 = vld [vmem:[%s8435_s11 + $0x410] sm:$0xff] }
 0x7c3   :  { %3907 = vmatmul.f32.vlgmr.msra.gmra.mxu1 %v8363_v58  ;;  %3930 = vmatmul.f32.vlgmr.msrb.gmra.mxu2 %v8355_v59  ;;  %v3731_v12 = vld [vmem:[%s8435_s11 + $0x498] sm:$0xff] }
 0x7c4   :  { %3961 = vmatpush.msra.mxu0 %v3770_v9  ;;  %3983 = vmatpush.msrb.mxu1 %v3647_v41  ;;  %v3603_v2 = vld [vmem:[%s8435_s11 + $0x98] sm:$0xff] }
 0x7c5   :  { %4006 = vmatpush.msra.mxu2 %v3711_v52  ;;  %4030 = vmatpush.msrb.mxu3 %v3771_v13  ;;  %v3667_v42 = vld [vmem:[%s8435_s11 + $0x298] sm:$0xff] }
 0x7c6   :  { %3962 = vmatpush.msra.mxu0 %v3766_v55  ;;  %3984 = vmatpush.msrb.mxu1 %v3643_v47  ;;  %v3727_v15 = vld [vmem:[%s8435_s11 + $0x478] sm:$0xff] }
 0x7c7   :  { %4007 = vmatpush.msra.mxu2 %v3707_v51  ;;  %4031 = vmatpush.msrb.mxu3 %v3767_v48  ;;  %v3599_v16 = vld [vmem:[%s8435_s11 + $0x78] sm:$0xff] }
 0x7c8   :  { %3963 = vmatpush.msra.mxu0 %v3762_v50  ;;  %3985 = vmatpush.msrb.mxu1 %v3639_v35  ;;  %v3663_v17 = vld [vmem:[%s8435_s11 + $0x278] sm:$0xff] }
 0x7c9   :  { %4008 = vmatpush.msra.mxu2 %v3703_v53  ;;  %4032 = vmatpush.msrb.mxu3 %v3763_v63  ;;  %v3723_v19 = vld [vmem:[%s8435_s11 + $0x458] sm:$0xff] }
 0x7ca   :  { %3887 = vmatmul.f32.gmra.mxu0 %v8390_v11  ;;  %3956 = vmatmul.f32.gmra.mxu3 %v8390_v11  ;;  %v3595_v54 = vld [vmem:[%s8435_s11 + $0x58] sm:$0xff] }
 0x7cb   :  { %3964 = vmatpush.msra.mxu0 %v3758_v1  ;;  %3986 = vmatpush.msrb.mxu1 %v3635_v3  ;;  %v3659_v26 = vld [vmem:[%s8435_s11 + $0x258] sm:$0xff] }
 0x7cc   :  { %4009 = vmatpush.msra.mxu2 %v3699_v5  ;;  %4033 = vmatpush.msrb.mxu3 %v3759_v44  ;;  %v3719_v61 = vld [vmem:[%s8435_s11 + $0x438] sm:$0xff] }
 0x7cd   :  { %3910 = vmatmul.f32.gmra.mxu1 %v8392_v7  ;;  %3933 = vmatmul.f32.gmra.mxu2 %v8382_v20  ;;  %v3591_v24 = vld [vmem:[%s8435_s11 + $0x38] sm:$0xff] }
 0x7ce   :  { %3965 = vmatpush.msra.mxu0 %v3754_v10  ;;  %3987 = vmatpush.msrb.mxu1 %v3631_v21  ;;  %v3655_v9 = vld [vmem:[%s8435_s11 + $0x238] sm:$0xff]  ;;  %v3321_v47 = vpop.f32.mrf.mxu0 }
 0x7cf   :  { %4010 = vmatpush.msra.mxu2 %v3695_v22  ;;  %4034 = vmatpush.msrb.mxu3 %v3755_v23  ;;  %v3715_v41 = vld [vmem:[%s8435_s11 + $0x418] sm:$0xff] }
 0x7d0   :  { %3966 = vmatpush.msra.mxu0 %v3750_v28  ;;  %3988 = vmatpush.msrb.mxu1 %v3627_v29  ;;  %v3587_v52 = vld [vmem:[%s8435_s11 + $0x18] sm:$0xff]  ;;  %v3344_v55 = vpop.f32.mrf.mxu1 }
 0x7d1   :  { %4011 = vmatpush.msra.mxu2 %v3691_v31  ;;  %4035 = vmatpush.msrb.mxu3 %v3751_v32  ;;  %v3651_v13 = vld [vmem:[%s8435_s11 + $0x218] sm:$0xff]  ;;  %s9886_s11 = sld [smem:[%s9970_s0 + %s6887_s8]]  }
 0x7d2   :  { %3967 = vmatpush.msra.mxu0 %v3746_v33  ;;  %3989 = vmatpush.msrb.mxu1 %v3623_v46 }
 0x7d3   :  { %4012 = vmatpush.msra.mxu2 %v3687_v25  ;;  %4036 = vmatpush.msrb.mxu3 %v3747_v18 }
 0x7d4   :  { %3968 = vmatpush.msra.mxu0 %v3742_v34  ;;  %3990 = vmatpush.msrb.mxu1 %v3619_v37  ;;  %v8687_v5 = vpop.f32.mrf.mxu3 }
 0x7d5   :  { %4013 = vmatpush.msra.mxu2 %v3683_v39  ;;  %4037 = vmatpush.msrb.mxu3 %v3743_v56 }
 0x7d6   :  { %3969 = vmatpush.msra.mxu0 %v3738_v0  ;;  %3991 = vmatpush.msrb.mxu1 %v3615_v57  ;;  %v3367_v51 = vpop.f32.mrf.mxu2 }
 0x7d7   :  { %4014 = vmatpush.msra.mxu2 %v3679_v45  ;;  %4038 = vmatpush.msrb.mxu3 %v3739_v27  ;;  %v3324_v50 = vpop.f32.mrf.mxu0 }
 0x7d8   :  { %3970 = vmatpush.msra.mxu0 %v3734_v60  ;;  %3992 = vmatpush.msrb.mxu1 %v3611_v62 }
 0x7d9   :  { %4015 = vmatpush.msra.mxu2 %v3675_v36  ;;  %4039 = vmatpush.msrb.mxu3 %v3735_v4  ;;  %v8725_v36 = vld [vmem:[%s8714_s15] sm:$0xff]  ;;  %v3345_v4 = vadd.f32 %v3344_v55, %v3321_v47  ;;  %v8754_v55 = vld [vmem:[%s8714_s15 + $0x18] sm:$0x3] }
 0x7da   :  { %3971 = vmatpush.msra.mxu0 %v3730_v30  ;;  %3993 = vmatpush.msrb.mxu1 %v3607_v6  ;;  %v3347_v48 = vpop.f32.mrf.mxu1 }
 0x7db   :  { %4016 = vmatpush.msra.mxu2 %v3671_v8  ;;  %4040 = vmatpush.msrb.mxu3 %v3731_v12  ;;  %v3348_v60 = vadd.f32 %v3347_v48, %v3324_v50  ;;  %v3368_v6 = vadd.f32 %v3367_v51, %v3345_v4  ;;  %v4397_v8 = vld [vmem:[%s8721_s19 + $0x1e0] sm:$0xff] }
 0x7dc   :  { %3972 = vmatpush.msra.mxu0 %v3726_v14  ;;  %3994 = vmatpush.msrb.mxu1 %v3603_v2  ;;  %v4393_v14 = vld [vmem:[%s8721_s19 + $0x1c0] sm:$0xff] }
 0x7dd   :  { %4017 = vmatpush.msra.mxu2 %v3667_v42  ;;  %4041 = vmatpush.msrb.mxu3 %v3727_v15  ;;  %v8695_v22 = vpop.f32.mrf.mxu3  ;;  %v4389_v2 = vld [vmem:[%s8721_s19 + $0x1a0] sm:$0xff]  ;;  %v8736_v42 = vld [vmem:[%s8714_s15 + $0x8] sm:$0xff] }
 0x7de   :  { %3973 = vmatpush.msra.mxu0 %v3722_v38  ;;  %3995 = vmatpush.msrb.mxu1 %v3599_v16  ;;  %v4385_v15 = vld [vmem:[%s8721_s19 + $0x180] sm:$0xff] }
 0x7df   :  { %4018 = vmatpush.msra.mxu2 %v3663_v17  ;;  %4042 = vmatpush.msrb.mxu3 %v3723_v19  ;;  %v4381_v38 = vld [vmem:[%s8721_s19 + $0x160] sm:$0xff] }
 0x7e0   :  { %3974 = vmatpush.msra.mxu0 %v3718_v43  ;;  %3996 = vmatpush.msrb.mxu1 %v3595_v54  ;;  %v3370_v35 = vpop.f32.mrf.mxu2  ;;  %v4377_v19 = vld [vmem:[%s8721_s19 + $0x140] sm:$0xff] }
 0x7e1   :  { %4019 = vmatpush.msra.mxu2 %v3659_v26  ;;  %4043 = vmatpush.msrb.mxu3 %v3719_v61  ;;  %v8681_v63 = vpop.f32.mrf.mxu0  ;;  %v3371_v30 = vadd.f32 %v3370_v35, %v3348_v60  ;;  %v4373_v43 = vld [vmem:[%s8721_s19 + $0x120] sm:$0xff]  ;;  %v8745_v26 = vld [vmem:[%s8714_s15 + $0x10] sm:$0xff]  ;;  %v4454_v60 = vld [vmem:[%s8721_s19 + $0x3a8] sm:$0xff]  ;;  %s9920_s15 = sld [smem:[%s9970_s0 + %s6888_s12]]  }
 0x7e2   :  { %3975 = vmatpush.msra.mxu0 %v3714_v49  ;;  %3997 = vmatpush.msrb.mxu1 %v3591_v24  ;;  %v4369_v61 = vld [vmem:[%s8721_s19 + $0x100] sm:$0xff] }
 0x7e3   :  { %4020 = vmatpush.msra.mxu2 %v3655_v9  ;;  %4044 = vmatpush.msrb.mxu3 %v3715_v41  ;;  %v4365_v49 = vld [vmem:[%s8721_s19 + $0xe0] sm:$0xff] }
 0x7e4   :  { %3976 = vmatmul.f32.vlgmr.msra.gmra.mxu0 %v8363_v58  ;;  %4045 = vmatmul.f32.vlgmr.msrb.gmra.mxu3 %v8363_v58  ;;  %v8679_v53 = vpop.f32.mrf.mxu1  ;;  %v4361_v24 = vld [vmem:[%s8721_s19 + $0xc0] sm:$0xff] }
 0x7e5   :  { %3998 = vmatpush.msrb.mxu1 %v3587_v52  ;;  %4021 = vmatpush.msra.mxu2 %v3651_v13  ;;  %v4357_v52 = vld [vmem:[%s8721_s19 + $0xa0] sm:$0xff] }
 0x7e6   :  { %3999 = vmatmul.f32.vlgmr.msrb.gmra.mxu1 %v8355_v59  ;;  %4022 = vmatmul.f32.vlgmr.msra.gmra.mxu2 %v8361_v40  ;;  %v4353_v51 = vld [vmem:[%s8721_s19 + $0x80] sm:$0xff] }
 0x7e7   :  { %v8703_v31 = vpop.f32.mrf.mxu3  ;;  %v4449_v4 = vld [vmem:[%s8721_s19 + $0x380] sm:$0xff] }
 0x7ea   :  { %v8683_v1 = vpop.f32.mrf.mxu2 }
 0x7eb   :  { %v8689_v44 = vpop.f32.mrf.mxu0 }
 0x7ec   :  { %3979 = vmatmul.f32.gmra.mxu0 %v8392_v7  ;;  %4048 = vmatmul.f32.gmra.mxu3 %v8392_v7  ;;  %v3417_v50 = vadd.f32 %v8689_v44, %v8695_v22  ;;  %v4341_v22 = vld [vmem:[%s8721_s19 + $0x20] sm:$0xff] }
 0x7ee   :  { %4002 = vmatmul.f32.gmra.mxu1 %v8382_v20  ;;  %4025 = vmatmul.f32.gmra.mxu2 %v8390_v11  ;;  %v8685_v3 = vpop.f32.mrf.mxu1 }
 0x7ef   :  { %v3440_v44 = vadd.f32 %v8685_v3, %v3417_v50  ;;  %v4462_v3 = vld [vmem:[%s8721_s19 + $0x3e8] sm:$0xff] }
 0x7f1   :  { %v8709_v18 = vpop.f32.mrf.mxu3 }
 0x7f4   :  { %v8691_v10 = vpop.f32.mrf.mxu2 }
 0x7f6   :  { %v8697_v23 = vpop.f32.mrf.mxu0 }
 0x7fa   :  { %v8693_v21 = vpop.f32.mrf.mxu1 }
 0x7fd   :  { %v8716_v56 = vpop.f32.mrf.mxu3 }
 0x800   :  { %v8699_v28 = vpop.f32.mrf.mxu2 }
 0x801   :  { %v8705_v32 = vpop.f32.mrf.mxu0 }
 0x804   :  { %v8701_v29 = vpop.f32.mrf.mxu1 }
 0x807   :  { %v8731_v12 = vpop.f32.mrf.mxu3 }
 0x80a   :  { %v8707_v33 = vpop.f32.mrf.mxu2 }
 0x819   :  { %v3793_v25 = vpop.f32.mrf.mxu0 }
 0x81c   :  { %v3816_v46 = vpop.f32.mrf.mxu1 }
 0x81d   :  { %v3817_v45 = vadd.f32 %v3816_v46, %v3793_v25  ;;  %v4349_v46 = vld [vmem:[%s8721_s19 + $0x60] sm:$0xff]  ;;  %v3414_v25 = vadd.f32 %v8681_v63, %v8687_v5 }
 0x81e   :  { %v4461_v5 = vld [vmem:[%s8721_s19 + $0x3e0] sm:$0xff] }
 0x81f   :  { %v3862_v16 = vpop.f32.mrf.mxu3  ;;  %v3437_v63 = vadd.f32 %v8679_v53, %v3414_v25  ;;  %v4453_v53 = vld [vmem:[%s8721_s19 + $0x3a0] sm:$0xff] }
 0x822   :  { %v3839_v34 = vpop.f32.mrf.mxu2 }
 0x823   :  { %v3796_v39 = vpop.f32.mrf.mxu0  ;;  %v3840_v62 = vadd.f32 %v3839_v34, %v3817_v45  ;;  %v4458_v45 = vld [vmem:[%s8721_s19 + $0x3c8] sm:$0xff] }
 0x826   :  { %v3819_v37 = vpop.f32.mrf.mxu1 }
 0x827   :  { %v3820_v0 = vadd.f32 %v3819_v37, %v3796_v39  ;;  %v4345_v37 = vld [vmem:[%s8721_s19 + $0x40] sm:$0xff] }
 0x828   :  { %v8776_v39 = vld [vmem:[%s8759_s23] sm:$0xff] }
 0x829   :  { %v3865_v9 = vpop.f32.mrf.mxu3 }
 0x82c   :  { %v3842_v57 = vpop.f32.mrf.mxu2 }
 0x82d   :  { %v3843_v27 = vadd.f32 %v3842_v57, %v3820_v0  ;;  %v4337_v0 = vld [vmem:[%s8721_s19] sm:$0xff] }
 0x82e   :  { %v4457_v57 = vld [vmem:[%s8721_s19 + $0x3c0] sm:$0xff] }
 0x82f   :  { %6668 = vmatpush.msk.msrb.mxu0 %vm2770_vm8, %v3843_v27 }
 0x831   :  { %4096 = vmatpush.msrb.mxu0 %v3840_v62 }
 0x832   :  { %6669 = vmatmul.msk.f32.vlgmr.msrb.gmra.mxu0 %vm4056_vm13, %v8725_v36 }
 0x833   :  { %6688 = vmatpush.msk.msra.mxu0 %vm2770_vm8, %v3371_v30  ;;  %v8791_v30 = vld [vmem:[%s8759_s23 + $0x8] sm:$0xff] }
 0x835   :  { %4236 = vmatpush.msra.mxu0 %v3368_v6  ;;  %v4445_v6 = vld [vmem:[%s8721_s19 + $0x360] sm:$0xff] }
 0x837   :  { %4529 = vmatpush.msrb.mxu0 %v4397_v8  ;;  %v4450_v8 = vld [vmem:[%s8721_s19 + $0x388] sm:$0xff] }
 0x839   :  { %4530 = vmatpush.msrb.mxu0 %v4393_v14  ;;  %v4441_v14 = vld [vmem:[%s8721_s19 + $0x340] sm:$0xff] }
 0x83a   :  { %6670 = vmatmul.msk.f32.gmra.mxu0 %vm4056_vm13, %v8736_v42 }
 0x83b   :  { %4531 = vmatpush.msrb.mxu0 %v4389_v2  ;;  %v4446_v2 = vld [vmem:[%s8721_s19 + $0x368] sm:$0xff] }
 0x83d   :  { %4532 = vmatpush.msrb.mxu0 %v4385_v15  ;;  %v3885_v17 = vpop.f32.mrf.mxu0  ;;  %v4437_v15 = vld [vmem:[%s8721_s19 + $0x320] sm:$0xff] }
 0x83e   :  { %v3886_v47 = vadd.f32 %v3885_v17, %v3862_v16  ;;  %v4433_v16 = vld [vmem:[%s8721_s19 + $0x300] sm:$0xff]  ;;  %v4438_v17 = vld [vmem:[%s8721_s19 + $0x328] sm:$0xff] }
 0x83f   :  { %4533 = vmatpush.msrb.mxu0 %v4381_v38  ;;  %v4442_v38 = vld [vmem:[%s8721_s19 + $0x348] sm:$0xff] }
 0x840   :  { %v3908_v54 = vpop.f32.mrf.mxu1 }
 0x841   :  { %4534 = vmatpush.msrb.mxu0 %v4377_v19  ;;  %v3909_v34 = vadd.f32 %v3908_v54, %v3886_v47 }
 0x842   :  { %6671 = vmatmul.msk.f32.gmra.mxu0 %vm4056_vm13, %v8745_v26 }
 0x843   :  { %4535 = vmatpush.msrb.mxu0 %v4373_v43  ;;  %v3954_v27 = vpop.f32.mrf.mxu3  ;;  %v8806_v43 = vld [vmem:[%s8759_s23 + $0x10] sm:$0xff] }
 0x845   :  { %4536 = vmatpush.msrb.mxu0 %v4369_v61 }
 0x846   :  { %v3931_v62 = vpop.f32.mrf.mxu2 }
 0x847   :  { %4537 = vmatpush.msrb.mxu0 %v4365_v49  ;;  %v3888_v41 = vpop.f32.mrf.mxu0  ;;  %v4429_v49 = vld [vmem:[%s8721_s19 + $0x2e0] sm:$0xff] }
 0x848   :  { %v3889_v13 = vadd.f32 %v3888_v41, %v3865_v9  ;;  %v4425_v9 = vld [vmem:[%s8721_s19 + $0x2c0] sm:$0xff]  ;;  %v4430_v41 = vld [vmem:[%s8721_s19 + $0x2e8] sm:$0xff] }
 0x849   :  { %4538 = vmatpush.msrb.mxu0 %v4361_v24  ;;  %v4434_v24 = vld [vmem:[%s8721_s19 + $0x308] sm:$0xff] }
 0x84a   :  { %v3911_v48 = vpop.f32.mrf.mxu1  ;;  %6672 = vmatmul.msk.f32.gmra.mxu0 %vm4056_vm13, %v8754_v55 }
 0x84b   :  { %4539 = vmatpush.msrb.mxu0 %v4357_v52  ;;  %v3912_v35 = vadd.f32 %v3911_v48, %v3889_v13  ;;  %v4421_v52 = vld [vmem:[%s8721_s19 + $0x2a0] sm:$0xff]  ;;  %v4426_v13 = vld [vmem:[%s8721_s19 + $0x2c8] sm:$0xff] }
 0x84c   :  { %v4422_v48 = vld [vmem:[%s8721_s19 + $0x2a8] sm:$0xff] }
 0x84d   :  { %4540 = vmatpush.msrb.mxu0 %v4353_v51  ;;  %6673 = vmatpush.msk.msra.mxu1 %vm2770_vm8, %v3912_v35  ;;  %v3957_v19 = vpop.f32.mrf.mxu3  ;;  %v4417_v51 = vld [vmem:[%s8721_s19 + $0x280] sm:$0xff] }
 0x84f   :  { %4541 = vmatpush.msrb.mxu0 %v4349_v46  ;;  %4125 = vmatpush.msra.mxu1 %v3909_v34  ;;  %v8821_v46 = vld [vmem:[%s8759_s23 + $0x18] sm:$0x3]  ;;  %s9948_s23 = sld [smem:[%s9970_s0 + %s6890_s20]]  }
 0x850   :  { %6674 = vmatmul.msk.f32.vlgmr.msra.gmra.mxu1 %vm4056_vm13, %v8725_v36  ;;  %v3934_v54 = vpop.f32.mrf.mxu2 }
 0x851   :  { %4542 = vmatpush.msrb.mxu0 %v4345_v37  ;;  %6693 = vmatpush.msk.msrb.mxu1 %vm2770_vm8, %v3440_v44  ;;  %v3958_v50 = vadd.f32 %v3957_v19, %v3934_v54  ;;  %v4413_v37 = vld [vmem:[%s8721_s19 + $0x260] sm:$0xff]  ;;  %v3955_v44 = vadd.f32 %v3954_v27, %v3931_v62 }
 0x852   :  { %6689 = vmatmul.msk.f32.vlgmr.msra.gmra.mxu0 %vm4056_vm13, %v8776_v39  ;;  %v4525_v62 = vld [vmem:[%s8721_s19 + $0x5e0] sm:$0xff] }
 0x853   :  { %4543 = vmatpush.msrb.mxu0 %v4341_v22  ;;  %4265 = vmatpush.msrb.mxu1 %v3437_v63  ;;  %v4418_v63 = vld [vmem:[%s8721_s19 + $0x288] sm:$0xff]  ;;  %v4513_v54 = vld [vmem:[%s8721_s19 + $0x580] sm:$0xff] }
 0x855   :  { %4552 = vmatpush.msra.mxu1 %v4461_v5  ;;  %4544 = vmatpush.msrb.mxu0 %v4337_v0  ;;  %v4409_v5 = vld [vmem:[%s8721_s19 + $0x240] sm:$0xff]  ;;  %v3486_v0 = vadd.f32 %v8709_v18, %v8691_v10 }
 0x856   :  { %v4401_v10 = vld [vmem:[%s8721_s19 + $0x200] sm:$0xff] }
 0x857   :  { %4621 = vmatpush.msra.mxu0 %v4462_v3  ;;  %4553 = vmatpush.msra.mxu1 %v4457_v57  ;;  %v4414_v57 = vld [vmem:[%s8721_s19 + $0x268] sm:$0xff]  ;;  %v3509_v27 = vadd.f32 %v8705_v32, %v3486_v0  ;;  %v4507_v0 = vld [vmem:[%s8721_s19 + $0x550] sm:$0xff] }
 0x858   :  { %6675 = vmatmul.msk.f32.gmra.mxu1 %vm4056_vm13, %v8736_v42 }
 0x859   :  { %4622 = vmatpush.msra.mxu0 %v4458_v45  ;;  %4554 = vmatpush.msra.mxu1 %v4453_v53  ;;  %v4405_v45 = vld [vmem:[%s8721_s19 + $0x220] sm:$0xff]  ;;  %v3483_v53 = vadd.f32 %v8703_v31, %v8683_v1  ;;  %v4526_v1 = vld [vmem:[%s8721_s19 + $0x5e8] sm:$0xff] }
 0x85a   :  { %6690 = vmatmul.msk.f32.gmra.mxu0 %vm4056_vm13, %v8791_v30 }
 0x85b   :  { %4623 = vmatpush.msra.mxu0 %v4454_v60  ;;  %4555 = vmatpush.msra.mxu1 %v4449_v4  ;;  %v4410_v60 = vld [vmem:[%s8721_s19 + $0x248] sm:$0xff]  ;;  %v3506_v18 = vadd.f32 %v8697_v23, %v3483_v53  ;;  %v4521_v23 = vld [vmem:[%s8721_s19 + $0x5c0] sm:$0xff] }
 0x85c   :  { %v4406_v4 = vld [vmem:[%s8721_s19 + $0x228] sm:$0xff]  ;;  %v4481_v53 = vld [vmem:[%s8721_s19 + $0x480] sm:$0xff] }
 0x85d   :  { %4556 = vmatpush.msra.mxu1 %v4445_v6  ;;  %4624 = vmatpush.msra.mxu0 %v4450_v8 }
 0x85f   :  { %4557 = vmatpush.msra.mxu1 %v4441_v14  ;;  %4625 = vmatpush.msra.mxu0 %v4446_v2  ;;  %v4522_v14 = vld [vmem:[%s8721_s19 + $0x5c8] sm:$0xff] }
 0x860   :  { %6676 = vmatmul.msk.f32.gmra.mxu1 %vm4056_vm13, %v8745_v26 }
 0x861   :  { %4558 = vmatpush.msra.mxu1 %v4437_v15  ;;  %4626 = vmatpush.msra.mxu0 %v4442_v38  ;;  %v3977_v61 = vpop.f32.mrf.mxu0  ;;  %v3555_v15 = vadd.f32 %v8707_v33, %v8701_v29  ;;  %v4402_v29 = vld [vmem:[%s8721_s19 + $0x208] sm:$0xff] }
 0x862   :  { %6691 = vmatmul.msk.f32.gmra.mxu0 %vm4056_vm13, %v8806_v43  ;;  %v3978_v3 = vadd.f32 %v3977_v61, %v3955_v44  ;;  %v3552_v61 = vadd.f32 %v8699_v28, %v8693_v21  ;;  %v4527_v21 = vld [vmem:[%s8721_s19 + $0x5f0] sm:$0xff]  ;;  %v4505_v28 = vld [vmem:[%s8721_s19 + $0x540] sm:$0xff] }
 0x863   :  { %4559 = vmatpush.msra.mxu1 %v4433_v16  ;;  %4627 = vmatpush.msra.mxu0 %v4438_v17  ;;  %v4000_v47 = vpop.f32.mrf.mxu1  ;;  %v4517_v16 = vld [vmem:[%s8721_s19 + $0x5a0] sm:$0xff]  ;;  %v4518_v17 = vld [vmem:[%s8721_s19 + $0x5a8] sm:$0xff]  ;;  %v3578_v33 = vadd.f32 %v8731_v12, %v3555_v15  ;;  %v4511_v44 = vld [vmem:[%s8721_s19 + $0x570] sm:$0xff] }
 0x864   :  { %v3575_v12 = vadd.f32 %v8716_v56, %v3552_v61  ;;  %v4519_v56 = vld [vmem:[%s8721_s19 + $0x5b0] sm:$0xff]  ;;  %v4465_v15 = vld [vmem:[%s8721_s19 + $0x400] sm:$0xff]  ;;  %v4466_v61 = vld [vmem:[%s8721_s19 + $0x408] sm:$0xff] }
 0x865   :  { %4560 = vmatpush.msra.mxu1 %v4429_v49  ;;  %4628 = vmatpush.msra.mxu0 %v4434_v24  ;;  %v4509_v49 = vld [vmem:[%s8721_s19 + $0x560] sm:$0xff]  ;;  %v4514_v24 = vld [vmem:[%s8721_s19 + $0x588] sm:$0xff] }
 0x867   :  { %4561 = vmatpush.msra.mxu1 %v4425_v9  ;;  %4629 = vmatpush.msra.mxu0 %v4430_v41  ;;  %v4046_v35 = vpop.f32.mrf.mxu3  ;;  %v4398_v9 = vld [vmem:[%s8721_s19 + $0x1e8] sm:$0xff] }
 0x868   :  { %6677 = vmatmul.msk.f32.gmra.mxu1 %vm4056_vm13, %v8754_v55  ;;  %v4510_v41 = vld [vmem:[%s8721_s19 + $0x568] sm:$0xff] }
 0x869   :  { %4562 = vmatpush.msra.mxu1 %v4421_v52  ;;  %4630 = vmatpush.msra.mxu0 %v4426_v13  ;;  %v3980_v25 = vpop.f32.mrf.mxu0  ;;  %v4023_v34 = vpop.f32.mrf.mxu2  ;;  %v4501_v52 = vld [vmem:[%s8721_s19 + $0x520] sm:$0xff]  ;;  %v4394_v13 = vld [vmem:[%s8721_s19 + $0x1c8] sm:$0xff] }
 0x86a   :  { %v3981_v22 = vadd.f32 %v3980_v25, %v3958_v50  ;;  %6692 = vmatmul.msk.f32.gmra.mxu0 %vm4056_vm13, %v8821_v46  ;;  %v4024_v6 = vadd.f32 %v4023_v34, %v4000_v47  ;;  %v4506_v47 = vld [vmem:[%s8721_s19 + $0x548] sm:$0xff]  ;;  %v4493_v25 = vld [vmem:[%s8721_s19 + $0x4e0] sm:$0xff] }
 0x86b   :  { %4563 = vmatpush.msra.mxu1 %v4417_v51  ;;  %4631 = vmatpush.msra.mxu0 %v4422_v48  ;;  %v4003_v31 = vpop.f32.mrf.mxu1  ;;  %v4497_v51 = vld [vmem:[%s8721_s19 + $0x500] sm:$0xff]  ;;  %v4390_v48 = vld [vmem:[%s8721_s19 + $0x1a8] sm:$0xff] }
 0x86c   :  { %6678 = vmatpush.msk.msrb.mxu2 %vm2770_vm8, %v3981_v22  ;;  %v4047_v19 = vadd.f32 %v4046_v35, %v4024_v6  ;;  %v4502_v50 = vld [vmem:[%s8721_s19 + $0x528] sm:$0xff]  ;;  %v4515_v35 = vld [vmem:[%s8721_s19 + $0x590] sm:$0xff]  ;;  %v4489_v22 = vld [vmem:[%s8721_s19 + $0x4c0] sm:$0xff] }
 0x86d   :  { %4564 = vmatpush.msra.mxu1 %v4413_v37  ;;  %4632 = vmatpush.msra.mxu0 %v4418_v63  ;;  %v4386_v34 = vld [vmem:[%s8721_s19 + $0x188] sm:$0xff] }
 0x86e   :  { %4154 = vmatpush.msrb.mxu2 %v3978_v3  ;;  %v4498_v37 = vld [vmem:[%s8721_s19 + $0x508] sm:$0xff]  ;;  %v4485_v3 = vld [vmem:[%s8721_s19 + $0x4a0] sm:$0xff] }
 0x86f   :  { %4565 = vmatpush.msra.mxu1 %v4409_v5  ;;  %6679 = vmatmul.msk.f32.vlgmr.msrb.gmra.mxu2 %vm4056_vm13, %v8725_v36  ;;  %v4049_v2 = vpop.f32.mrf.mxu3  ;;  %v4382_v63 = vld [vmem:[%s8721_s19 + $0x168] sm:$0xff] }
 0x870   :  { %4633 = vmatpush.msra.mxu0 %v4414_v57  ;;  %6698 = vmatpush.msk.msra.mxu2 %vm2770_vm8, %v3509_v27  ;;  %v4494_v5 = vld [vmem:[%s8721_s19 + $0x4e8] sm:$0xff] }
 0x871   :  { %4566 = vmatpush.msra.mxu1 %v4405_v45  ;;  %v4026_v32 = vpop.f32.mrf.mxu2  ;;  %v4490_v57 = vld [vmem:[%s8721_s19 + $0x4c8] sm:$0xff]  ;;  %v4503_v45 = vld [vmem:[%s8721_s19 + $0x530] sm:$0xff] }
 0x872   :  { %6694 = vmatmul.msk.f32.vlgmr.msrb.gmra.mxu1 %vm4056_vm13, %v8776_v39  ;;  %4634 = vmatpush.msra.mxu0 %v4410_v60  ;;  %v4027_v8 = vadd.f32 %v4026_v32, %v4003_v31  ;;  %v4374_v27 = vld [vmem:[%s8721_s19 + $0x128] sm:$0xff]  ;;  %v4495_v31 = vld [vmem:[%s8721_s19 + $0x4f0] sm:$0xff]  ;;  %v4473_v32 = vld [vmem:[%s8721_s19 + $0x440] sm:$0xff] }
 0x873   :  { %4294 = vmatpush.msra.mxu2 %v3506_v18  ;;  %4567 = vmatpush.msra.mxu1 %v4401_v10  ;;  %v4486_v60 = vld [vmem:[%s8721_s19 + $0x4a8] sm:$0xff]  ;;  %v4499_v10 = vld [vmem:[%s8721_s19 + $0x510] sm:$0xff]  ;;  %v4477_v18 = vld [vmem:[%s8721_s19 + $0x460] sm:$0xff] }
 0x874   :  { %v4050_v38 = vadd.f32 %v4049_v2, %v4027_v8  ;;  %4635 = vmatpush.msra.mxu0 %v4406_v4  ;;  %v4366_v4 = vld [vmem:[%s8721_s19 + $0xe8] sm:$0xff]  ;;  %v4491_v8 = vld [vmem:[%s8721_s19 + $0x4d0] sm:$0xff] }
 0x875   :  { %4575 = vmatpush.msrb.mxu2 %v4525_v62  ;;  %4644 = vmatpush.msrb.mxu1 %v4526_v1  ;;  %v4370_v62 = vld [vmem:[%s8721_s19 + $0x108] sm:$0xff]  ;;  %v4487_v2 = vld [vmem:[%s8721_s19 + $0x4b0] sm:$0xff] }
 0x876   :  { %6683 = vmatpush.msk.msra.mxu3 %vm2770_vm8, %v4050_v38  ;;  %4545 = vmatmul.f32.vlgmr.msrb.gmra.mxu0 %v8355_v59  ;;  %v4482_v1 = vld [vmem:[%s8721_s19 + $0x488] sm:$0xff] }
 0x877   :  { %4576 = vmatpush.msrb.mxu2 %v4521_v23  ;;  %4645 = vmatpush.msrb.mxu1 %v4522_v14  ;;  %v4478_v6 = vld [vmem:[%s8721_s19 + $0x468] sm:$0xff]  ;;  %v4469_v23 = vld [vmem:[%s8721_s19 + $0x420] sm:$0xff] }
 0x878   :  { %6680 = vmatmul.msk.f32.gmra.mxu2 %vm4056_vm13, %v8736_v42  ;;  %4183 = vmatpush.msra.mxu3 %v4047_v19  ;;  %v4474_v14 = vld [vmem:[%s8721_s19 + $0x448] sm:$0xff]  ;;  %v4399_v19 = vld [vmem:[%s8721_s19 + $0x1f0] sm:$0xff] }
 0x879   :  { %4577 = vmatpush.msrb.mxu2 %v4517_v16  ;;  %4646 = vmatpush.msrb.mxu1 %v4518_v17  ;;  %v4358_v38 = vld [vmem:[%s8721_s19 + $0xa8] sm:$0xff]  ;;  %v4483_v17 = vld [vmem:[%s8721_s19 + $0x490] sm:$0xff] }
 0x87a   :  { %6684 = vmatmul.msk.f32.vlgmr.msra.gmra.mxu3 %vm4056_vm13, %v8725_v36  ;;  %4636 = vmatpush.msra.mxu0 %v4402_v29  ;;  %v4523_v36 = vld [vmem:[%s8721_s19 + $0x5d0] sm:$0xff]  ;;  %v4470_v16 = vld [vmem:[%s8721_s19 + $0x428] sm:$0xff] }
 0x87b   :  { %4578 = vmatpush.msrb.mxu2 %v4513_v54  ;;  %6703 = vmatpush.msk.msrb.mxu3 %vm2770_vm8, %v3578_v33  ;;  %v4354_v54 = vld [vmem:[%s8721_s19 + $0x88] sm:$0xff]  ;;  %v4479_v29 = vld [vmem:[%s8721_s19 + $0x470] sm:$0xff] }
 0x87c   :  { %6695 = vmatmul.msk.f32.gmra.mxu1 %vm4056_vm13, %v8791_v30  ;;  %4713 = vmatpush.msrb.mxu0 %v4527_v21  ;;  %v4395_v33 = vld [vmem:[%s8721_s19 + $0x1d0] sm:$0xff] }
 0x87d   :  { %4579 = vmatpush.msrb.mxu2 %v4509_v49  ;;  %4647 = vmatpush.msrb.mxu1 %v4514_v24  ;;  %v4400_v49 = vld [vmem:[%s8721_s19 + $0x1f8] sm:$0xff]  ;;  %v4350_v24 = vld [vmem:[%s8721_s19 + $0x68] sm:$0xff]  ;;  %v4475_v21 = vld [vmem:[%s8721_s19 + $0x450] sm:$0xff] }
 0x87e   :  { %4323 = vmatpush.msrb.mxu3 %v3575_v12  ;;  %4714 = vmatpush.msrb.mxu0 %v4523_v36  ;;  %v4346_v12 = vld [vmem:[%s8721_s19 + $0x48] sm:$0xff]  ;;  %v4392_v36 = vld [vmem:[%s8721_s19 + $0x1b8] sm:$0xff] }
 0x87f   :  { %4580 = vmatpush.msrb.mxu2 %v4505_v28  ;;  %4648 = vmatpush.msrb.mxu1 %v4510_v41  ;;  %v4391_v28 = vld [vmem:[%s8721_s19 + $0x1b0] sm:$0xff] }
 0x880   :  { %4598 = vmatpush.msra.mxu3 %v4398_v9  ;;  %4715 = vmatpush.msrb.mxu0 %v4519_v56  ;;  %v4471_v9 = vld [vmem:[%s8721_s19 + $0x430] sm:$0xff]  ;;  %v4388_v56 = vld [vmem:[%s8721_s19 + $0x198] sm:$0xff] }
 0x881   :  { %4581 = vmatpush.msrb.mxu2 %v4501_v52  ;;  %4649 = vmatpush.msrb.mxu1 %v4506_v47  ;;  %v4387_v41 = vld [vmem:[%s8721_s19 + $0x190] sm:$0xff]  ;;  %v4342_v52 = vld [vmem:[%s8721_s19 + $0x28] sm:$0xff] }
 0x882   :  { %4599 = vmatpush.msra.mxu3 %v4394_v13  ;;  %6681 = vmatmul.msk.f32.gmra.mxu2 %vm4056_vm13, %v8745_v26  ;;  %v4467_v13 = vld [vmem:[%s8721_s19 + $0x410] sm:$0xff] }
 0x883   :  { %4582 = vmatpush.msrb.mxu2 %v4497_v51  ;;  %4650 = vmatpush.msrb.mxu1 %v4502_v50  ;;  %v4383_v47 = vld [vmem:[%s8721_s19 + $0x170] sm:$0xff]  ;;  %v4338_v51 = vld [vmem:[%s8721_s19 + $0x8] sm:$0xff] }
 0x884   :  { %4600 = vmatpush.msra.mxu3 %v4390_v48  ;;  %4716 = vmatpush.msrb.mxu0 %v4515_v35  ;;  %v4379_v48 = vld [vmem:[%s8721_s19 + $0x150] sm:$0xff]  ;;  %v4384_v35 = vld [vmem:[%s8721_s19 + $0x178] sm:$0xff] }
 0x885   :  { %6685 = vmatmul.msk.f32.gmra.mxu3 %vm4056_vm13, %v8736_v42  ;;  %4548 = vmatmul.f32.gmra.mxu0 %v8382_v20  ;;  %v4378_v42 = vld [vmem:[%s8721_s19 + $0x148] sm:$0xff]  ;;  %v4463_v50 = vld [vmem:[%s8721_s19 + $0x3f0] sm:$0xff] }
 0x886   :  { %6696 = vmatmul.msk.f32.gmra.mxu1 %vm4056_vm13, %v8806_v43  ;;  %4583 = vmatpush.msrb.mxu2 %v4493_v25  ;;  %v4375_v25 = vld [vmem:[%s8721_s19 + $0x130] sm:$0xff] }
 0x887   :  { %4601 = vmatpush.msra.mxu3 %v4386_v34  ;;  %4651 = vmatpush.msrb.mxu1 %v4498_v37  ;;  %v4459_v34 = vld [vmem:[%s8721_s19 + $0x3d0] sm:$0xff] }
 0x888   :  { %4717 = vmatpush.msrb.mxu0 %v4511_v44  ;;  %4584 = vmatpush.msrb.mxu2 %v4489_v22  ;;  %v4371_v37 = vld [vmem:[%s8721_s19 + $0x110] sm:$0xff]  ;;  %v4376_v22 = vld [vmem:[%s8721_s19 + $0x138] sm:$0xff] }
 0x889   :  { %4602 = vmatpush.msra.mxu3 %v4382_v63  ;;  %4652 = vmatpush.msrb.mxu1 %v4494_v5  ;;  %v4455_v44 = vld [vmem:[%s8721_s19 + $0x3b0] sm:$0xff] }
 0x88a   :  { %4718 = vmatpush.msrb.mxu0 %v4507_v0  ;;  %4585 = vmatpush.msrb.mxu2 %v4485_v3  ;;  %v4367_v63 = vld [vmem:[%s8721_s19 + $0xf0] sm:$0xff]  ;;  %v4372_v0 = vld [vmem:[%s8721_s19 + $0x118] sm:$0xff] }
 0x88b   :  { %4603 = vmatpush.msra.mxu3 %v4378_v42  ;;  %4653 = vmatpush.msrb.mxu1 %v4490_v57  ;;  %v4451_v5 = vld [vmem:[%s8721_s19 + $0x390] sm:$0xff]  ;;  %v4368_v57 = vld [vmem:[%s8721_s19 + $0xf8] sm:$0xff] }
 0x88c   :  { %4719 = vmatpush.msrb.mxu0 %v4503_v45  ;;  %6682 = vmatmul.msk.f32.gmra.mxu2 %vm4056_vm13, %v8754_v55  ;;  %v4363_v3 = vld [vmem:[%s8721_s19 + $0xd0] sm:$0xff] }
 0x88d   :  { %4586 = vmatpush.msrb.mxu2 %v4481_v53  ;;  %4604 = vmatpush.msra.mxu3 %v4374_v27  ;;  %v4447_v42 = vld [vmem:[%s8721_s19 + $0x370] sm:$0xff] }
 0x88e   :  { %4654 = vmatpush.msrb.mxu1 %v4486_v60  ;;  %4720 = vmatpush.msrb.mxu0 %v4499_v10  ;;  %v4359_v45 = vld [vmem:[%s8721_s19 + $0xb0] sm:$0xff]  ;;  %v4360_v10 = vld [vmem:[%s8721_s19 + $0xb8] sm:$0xff] }
 0x88f   :  { %6686 = vmatmul.msk.f32.gmra.mxu3 %vm4056_vm13, %v8745_v26  ;;  %4637 = vmatmul.f32.vlgmr.msra.gmra.mxu0 %v8361_v40  ;;  %v4362_v26 = vld [vmem:[%s8721_s19 + $0xc8] sm:$0xff]  ;;  %v4443_v53 = vld [vmem:[%s8721_s19 + $0x350] sm:$0xff] }
 0x890   :  { %6697 = vmatmul.msk.f32.gmra.mxu1 %vm4056_vm13, %v8821_v46  ;;  %4587 = vmatpush.msrb.mxu2 %v4477_v18  ;;  %v4355_v27 = vld [vmem:[%s8721_s19 + $0x90] sm:$0xff] }
 0x891   :  { %4605 = vmatpush.msra.mxu3 %v4370_v62  ;;  %4655 = vmatpush.msrb.mxu1 %v4482_v1  ;;  %v4439_v60 = vld [vmem:[%s8721_s19 + $0x330] sm:$0xff]  ;;  %v4356_v1 = vld [vmem:[%s8721_s19 + $0x98] sm:$0xff] }
 0x892   :  { %4721 = vmatpush.msrb.mxu0 %v4495_v31  ;;  %4588 = vmatpush.msrb.mxu2 %v4473_v32  ;;  %v4351_v18 = vld [vmem:[%s8721_s19 + $0x70] sm:$0xff] }
 0x893   :  { %4606 = vmatpush.msra.mxu3 %v4366_v4  ;;  %4656 = vmatpush.msrb.mxu1 %v4478_v6  ;;  %v4435_v62 = vld [vmem:[%s8721_s19 + $0x310] sm:$0xff]  ;;  %v4352_v4 = vld [vmem:[%s8721_s19 + $0x78] sm:$0xff] }
 0x894   :  { %4722 = vmatpush.msrb.mxu0 %v4491_v8  ;;  %4589 = vmatpush.msrb.mxu2 %v4469_v23  ;;  %v4347_v31 = vld [vmem:[%s8721_s19 + $0x50] sm:$0xff]  ;;  %v4348_v23 = vld [vmem:[%s8721_s19 + $0x58] sm:$0xff] }
 0x895   :  { %4607 = vmatpush.msra.mxu3 %v4362_v26  ;;  %4657 = vmatpush.msrb.mxu1 %v4474_v14  ;;  %v4431_v32 = vld [vmem:[%s8721_s19 + $0x2f0] sm:$0xff]  ;;  %v4344_v14 = vld [vmem:[%s8721_s19 + $0x38] sm:$0xff] }
 0x896   :  { %4723 = vmatpush.msrb.mxu0 %v4487_v2  ;;  %6699 = vmatmul.msk.f32.vlgmr.msra.gmra.mxu2 %vm4056_vm13, %v8776_v39  ;;  %v4343_v6 = vld [vmem:[%s8721_s19 + $0x30] sm:$0xff]  ;;  %v4464_v2 = vld [vmem:[%s8721_s19 + $0x3f8] sm:$0xff] }
 0x897   :  { %4590 = vmatpush.msrb.mxu2 %v4465_v15  ;;  %4608 = vmatpush.msra.mxu3 %v4358_v38  ;;  %v4427_v8 = vld [vmem:[%s8721_s19 + $0x2d0] sm:$0xff]  ;;  %v4340_v38 = vld [vmem:[%s8721_s19 + $0x18] sm:$0xff] }
 0x898   :  { %4658 = vmatpush.msrb.mxu1 %v4470_v16  ;;  %4724 = vmatpush.msrb.mxu0 %v4483_v17  ;;  %v4423_v26 = vld [vmem:[%s8721_s19 + $0x2b0] sm:$0xff]  ;;  %v4460_v16 = vld [vmem:[%s8721_s19 + $0x3d8] sm:$0xff] }
 0x899   :  { %6687 = vmatmul.msk.f32.gmra.mxu3 %vm4056_vm13, %v8754_v55  ;;  %4640 = vmatmul.f32.gmra.mxu0 %v8390_v11  ;;  %v4396_v55 = vld [vmem:[%s8721_s19 + $0x1d8] sm:$0xff]  ;;  %v4419_v15 = vld [vmem:[%s8721_s19 + $0x290] sm:$0xff] }
 0x89a   :  { %4667 = vmatpush.msra.mxu2 %v4399_v19  ;;  %4568 = vmatmul.f32.vlgmr.msra.gmra.mxu1 %v8361_v40  ;;  %v4415_v17 = vld [vmem:[%s8721_s19 + $0x270] sm:$0xff]  ;;  %v4456_v19 = vld [vmem:[%s8721_s19 + $0x3b8] sm:$0xff] }
 0x89b   :  { %4609 = vmatpush.msra.mxu3 %v4354_v54  ;;  %4659 = vmatpush.msrb.mxu1 %v4466_v61  ;;  %v4411_v54 = vld [vmem:[%s8721_s19 + $0x250] sm:$0xff]  ;;  %v4452_v61 = vld [vmem:[%s8721_s19 + $0x398] sm:$0xff] }
 0x89c   :  { %4725 = vmatpush.msrb.mxu0 %v4479_v29  ;;  %4668 = vmatpush.msra.mxu2 %v4395_v33  ;;  %v4407_v29 = vld [vmem:[%s8721_s19 + $0x230] sm:$0xff] }
 0x89d   :  { %4736 = vmatpush.msra.mxu1 %v4400_v49  ;;  %4610 = vmatpush.msra.mxu3 %v4350_v24  ;;  %v4403_v33 = vld [vmem:[%s8721_s19 + $0x210] sm:$0xff]  ;;  %v4444_v49 = vld [vmem:[%s8721_s19 + $0x358] sm:$0xff] }
 0x89e   :  { %4726 = vmatpush.msrb.mxu0 %v4475_v21  ;;  %4669 = vmatpush.msra.mxu2 %v4391_v28  ;;  %v4528_v24 = vld [vmem:[%s8721_s19 + $0x5f8] sm:$0xff] }
 0x89f   :  { %4737 = vmatpush.msra.mxu1 %v4396_v55  ;;  %4611 = vmatpush.msra.mxu3 %v4346_v12  ;;  %v4440_v21 = vld [vmem:[%s8721_s19 + $0x338] sm:$0xff] }
 0x8a0   :  { %4727 = vmatpush.msrb.mxu0 %v4471_v9  ;;  %6700 = vmatmul.msk.f32.gmra.mxu2 %vm4056_vm13, %v8791_v30  ;;  %v4524_v28 = vld [vmem:[%s8721_s19 + $0x5d8] sm:$0xff] }
 0x8a1   :  { %4670 = vmatpush.msra.mxu2 %v4387_v41  ;;  %4738 = vmatpush.msra.mxu1 %v4392_v36  ;;  %v4436_v55 = vld [vmem:[%s8721_s19 + $0x318] sm:$0xff] }
 0x8a2   :  { %4612 = vmatpush.msra.mxu3 %v4342_v52  ;;  %4728 = vmatpush.msrb.mxu0 %v4467_v13  ;;  %v4520_v12 = vld [vmem:[%s8721_s19 + $0x5b8] sm:$0xff] }
 0x8a3   :  { %6704 = vmatmul.msk.f32.vlgmr.msrb.gmra.mxu3 %vm4056_vm13, %v8776_v39  ;;  %4671 = vmatpush.msra.mxu2 %v4383_v47  ;;  %v4380_v39 = vld [vmem:[%s8721_s19 + $0x158] sm:$0xff] }
 0x8a4   :  { %4729 = vmatmul.f32.vlgmr.msrb.gmra.mxu0 %v8363_v58  ;;  %4739 = vmatpush.msra.mxu1 %v4388_v56  ;;  %v4432_v9 = vld [vmem:[%s8721_s19 + $0x2f8] sm:$0xff] }
 0x8a5   :  { %4571 = vmatmul.f32.gmra.mxu1 %v8390_v11  ;;  %4613 = vmatpush.msra.mxu3 %v4338_v51  ;;  %v4516_v41 = vld [vmem:[%s8721_s19 + $0x598] sm:$0xff] }
 0x8a6   :  { %4672 = vmatpush.msra.mxu2 %v4379_v48  ;;  %4740 = vmatpush.msra.mxu1 %v4384_v35  ;;  %v4428_v36 = vld [vmem:[%s8721_s19 + $0x2d8] sm:$0xff] }
 0x8a7   :  { %4690 = vmatpush.msrb.mxu3 %v4463_v50  ;;  %v4512_v52 = vld [vmem:[%s8721_s19 + $0x578] sm:$0xff] }
 0x8a8   :  { %4673 = vmatpush.msra.mxu2 %v4375_v25  ;;  %4741 = vmatpush.msra.mxu1 %v4380_v39  ;;  %v4424_v13 = vld [vmem:[%s8721_s19 + $0x2b8] sm:$0xff] }
 0x8a9   :  { %4691 = vmatpush.msrb.mxu3 %v4459_v34  ;;  %6701 = vmatmul.msk.f32.gmra.mxu2 %vm4056_vm13, %v8806_v43  ;;  %v4508_v47 = vld [vmem:[%s8721_s19 + $0x558] sm:$0xff] }
 0x8aa   :  { %4674 = vmatpush.msra.mxu2 %v4371_v37  ;;  %4742 = vmatpush.msra.mxu1 %v4376_v22  ;;  %v4504_v56 = vld [vmem:[%s8721_s19 + $0x538] sm:$0xff] }
 0x8ab   :  { %4692 = vmatpush.msrb.mxu3 %v4455_v44  ;;  %v4416_v51 = vld [vmem:[%s8721_s19 + $0x278] sm:$0xff] }
 0x8ac   :  { %6705 = vmatmul.msk.f32.gmra.mxu3 %vm4056_vm13, %v8791_v30  ;;  %4675 = vmatpush.msra.mxu2 %v4367_v63  ;;  %v4364_v30 = vld [vmem:[%s8721_s19 + $0xd8] sm:$0xff] }
 0x8ad   :  { %4693 = vmatpush.msrb.mxu3 %v4451_v5  ;;  %4732 = vmatmul.f32.gmra.mxu0 %v8392_v7  ;;  %v4500_v48 = vld [vmem:[%s8721_s19 + $0x518] sm:$0xff] }
 0x8ae   :  { %4743 = vmatpush.msra.mxu1 %v4372_v0  ;;  %4676 = vmatpush.msra.mxu2 %v4363_v3  ;;  %v4412_v50 = vld [vmem:[%s8721_s19 + $0x258] sm:$0xff] }
 0x8af   :  { %4660 = vmatmul.f32.vlgmr.msrb.gmra.mxu1 %v8363_v58  ;;  %4694 = vmatpush.msrb.mxu3 %v4447_v42  ;;  %v4496_v35 = vld [vmem:[%s8721_s19 + $0x4f8] sm:$0xff]  ;;  %v9055_v63 = vpop.f32.mrf.mxu0 }
 0x8b0   :  { %4744 = vmatpush.msra.mxu1 %v4368_v57  ;;  %4677 = vmatpush.msra.mxu2 %v4359_v45  ;;  %v4408_v25 = vld [vmem:[%s8721_s19 + $0x238] sm:$0xff] }
 0x8b1   :  { %4695 = vmatpush.msrb.mxu3 %v4443_v53  ;;  %6702 = vmatmul.msk.f32.gmra.mxu2 %vm4056_vm13, %v8821_v46  ;;  %v4492_v34 = vld [vmem:[%s8721_s19 + $0x4d8] sm:$0xff] }
 0x8b2   :  { %4745 = vmatpush.msra.mxu1 %v4364_v30  ;;  %4678 = vmatpush.msra.mxu2 %v4355_v27  ;;  %v4488_v39 = vld [vmem:[%s8721_s19 + $0x4b8] sm:$0xff] }
 0x8b3   :  { %4696 = vmatpush.msrb.mxu3 %v4439_v60  ;;  %v4484_v37 = vld [vmem:[%s8721_s19 + $0x498] sm:$0xff] }
 0x8b4   :  { %4746 = vmatpush.msra.mxu1 %v4360_v10  ;;  %6706 = vmatmul.msk.f32.gmra.mxu3 %vm4056_vm13, %v8806_v43  ;;  %v4339_v43 = vld [vmem:[%s8721_s19 + $0x10] sm:$0xff]  ;;  %v4480_v44 = vld [vmem:[%s8721_s19 + $0x478] sm:$0xff] }
 0x8b5   :  { %4679 = vmatpush.msra.mxu2 %v4351_v18  ;;  %4697 = vmatpush.msrb.mxu3 %v4435_v62  ;;  %v4476_v22 = vld [vmem:[%s8721_s19 + $0x458] sm:$0xff] }
 0x8b6   :  { %4747 = vmatpush.msra.mxu1 %v4356_v1  ;;  %v4472_v5 = vld [vmem:[%s8721_s19 + $0x438] sm:$0xff] }
 0x8b7   :  { %4663 = vmatmul.f32.gmra.mxu1 %v8392_v7  ;;  %4680 = vmatpush.msra.mxu2 %v4347_v31  ;;  %v4468_v0 = vld [vmem:[%s8721_s19 + $0x418] sm:$0xff] }
 0x8b8   :  { %4698 = vmatpush.msrb.mxu3 %v4431_v32  ;;  %4748 = vmatpush.msra.mxu1 %v4352_v4 }
 0x8b9   :  { %4681 = vmatpush.msra.mxu2 %v4343_v6 }
 0x8ba   :  { %4699 = vmatpush.msrb.mxu3 %v4427_v8  ;;  %4749 = vmatpush.msra.mxu1 %v4348_v23 }
 0x8bb   :  { %4591 = vmatmul.f32.vlgmr.msrb.gmra.mxu2 %v8363_v58 }
 0x8bc   :  { %4682 = vmatpush.msra.mxu2 %v4339_v43  ;;  %4700 = vmatpush.msrb.mxu3 %v4423_v26 }
 0x8bd   :  { %4750 = vmatpush.msra.mxu1 %v4344_v14  ;;  %6707 = vmatmul.msk.f32.gmra.mxu3 %vm4056_vm13, %v8821_v46  ;;  %v4448_v46 = vld [vmem:[%s8721_s19 + $0x378] sm:$0xff] }
 0x8be   :  { %4759 = vmatpush.msrb.mxu2 %v4464_v2  ;;  %4701 = vmatpush.msrb.mxu3 %v4419_v15 }
 0x8bf   :  { %4751 = vmatpush.msra.mxu1 %v4340_v38 }
 0x8c0   :  { %4752 = vmatmul.f32.vlgmr.msra.gmra.mxu1 %v8355_v59  ;;  %4760 = vmatpush.msrb.mxu2 %v4460_v16 }
 0x8c1   :  { %4702 = vmatpush.msrb.mxu3 %v4415_v17 }
 0x8c2   :  { %4761 = vmatpush.msrb.mxu2 %v4456_v19 }
 0x8c3   :  { %4703 = vmatpush.msrb.mxu3 %v4411_v54  ;;  %4594 = vmatmul.f32.gmra.mxu2 %v8392_v7 }
 0x8c4   :  { %4762 = vmatpush.msrb.mxu2 %v4452_v61 }
 0x8c5   :  { %4704 = vmatpush.msrb.mxu3 %v4407_v29 }
 0x8c6   :  { %4763 = vmatpush.msrb.mxu2 %v4448_v46  ;;  %4614 = vmatmul.f32.vlgmr.msra.gmra.mxu3 %v8355_v59 }
 0x8c7   :  { %4705 = vmatpush.msrb.mxu3 %v4403_v33 }
 0x8c8   :  { %4755 = vmatmul.f32.gmra.mxu1 %v8382_v20  ;;  %4764 = vmatpush.msrb.mxu2 %v4444_v49 }
 0x8c9   :  { %4782 = vmatpush.msra.mxu3 %v4528_v24 }
 0x8ca   :  { %4765 = vmatpush.msrb.mxu2 %v4440_v21 }
 0x8cb   :  { %4783 = vmatpush.msra.mxu3 %v4524_v28  ;;  %4683 = vmatmul.f32.vlgmr.msra.gmra.mxu2 %v8355_v59  ;;  %v4420_v59 = vld [vmem:[%s8721_s19 + $0x298] sm:$0xff] }
 0x8cc   :  { %4766 = vmatpush.msrb.mxu2 %v4436_v55 }
 0x8cd   :  { %4784 = vmatpush.msra.mxu3 %v4520_v12  ;;  %v9059_v3 = vpop.f32.mrf.mxu1 }
 0x8ce   :  { %4767 = vmatpush.msrb.mxu2 %v4432_v9  ;;  %4617 = vmatmul.f32.gmra.mxu3 %v8382_v20 }
 0x8cf   :  { %4785 = vmatpush.msra.mxu3 %v4516_v41 }
 0x8d0   :  { %4768 = vmatpush.msrb.mxu2 %v4428_v36  ;;  %v4805_v36 = vld [vmem:[%s9127_s27] sm:$0xff] }
 0x8d1   :  { %4786 = vmatpush.msra.mxu3 %v4512_v52 }
 0x8d2   :  { %4769 = vmatpush.msrb.mxu2 %v4424_v13 }
 0x8d3   :  { %4787 = vmatpush.msra.mxu3 %v4508_v47  ;;  %4686 = vmatmul.f32.gmra.mxu2 %v8382_v20  ;;  %v4404_v20 = vld [vmem:[%s8721_s19 + $0x218] sm:$0xff]  ;;  %s6587_s19 = sld [smem:[%s9970_s0 + %s6889_s16]]  }
 0x8d4   :  { %4770 = vmatpush.msrb.mxu2 %v4420_v59  ;;  %v4806_v59 = vld [vmem:[%s9127_s27 + $0x8] sm:$0xff] }
 0x8d5   :  { %4788 = vmatpush.msra.mxu3 %v4504_v56  ;;  %v9065_v42 = vpop.f32.mrf.mxu1 }
 0x8d6   :  { %4771 = vmatpush.msrb.mxu2 %v4416_v51  ;;  %4706 = vmatmul.f32.vlgmr.msrb.gmra.mxu3 %v8361_v40 }
 0x8d7   :  { %4789 = vmatpush.msra.mxu3 %v4500_v48 }
 0x8d8   :  { %4772 = vmatpush.msrb.mxu2 %v4412_v50 }
 0x8d9   :  { %4790 = vmatpush.msra.mxu3 %v4496_v35 }
 0x8da   :  { %4773 = vmatpush.msrb.mxu2 %v4408_v25 }
 0x8db   :  { %4791 = vmatpush.msra.mxu3 %v4492_v34 }
 0x8dc   :  { %4774 = vmatpush.msrb.mxu2 %v4404_v20  ;;  %v4807_v20 = vld [vmem:[%s9127_s27 + $0x10] sm:$0xff] }
 0x8dd   :  { %4792 = vmatpush.msra.mxu3 %v4488_v39  ;;  %4775 = vmatmul.f32.vlgmr.msrb.gmra.mxu2 %v8361_v40  ;;  %v9063_v40 = vpop.f32.mrf.mxu0  ;;  %v9072_v53 = vpop.f32.mrf.mxu1 }
 0x8de   :  { %4709 = vmatmul.f32.gmra.mxu3 %v8390_v11 }
 0x8df   :  { %4793 = vmatpush.msra.mxu3 %v4484_v37 }
 0x8e1   :  { %4794 = vmatpush.msra.mxu3 %v4480_v44  ;;  %v4808_v44 = vld [vmem:[%s9127_s27 + $0x18] sm:$0x3] }
 0x8e3   :  { %4795 = vmatpush.msra.mxu3 %v4476_v22 }
 0x8e5   :  { %4796 = vmatpush.msra.mxu3 %v4472_v5  ;;  %4778 = vmatmul.f32.gmra.mxu2 %v8390_v11  ;;  %v9070_v45 = vpop.f32.mrf.mxu0  ;;  %v9080_v60 = vpop.f32.mrf.mxu1 }
 0x8e7   :  { %4797 = vmatpush.msra.mxu3 %v4468_v0 }
 0x8e8   :  { %4798 = vmatmul.f32.vlgmr.msra.gmra.mxu3 %v8363_v58 }
 0x8ed   :  { %v9078_v11 = vpop.f32.mrf.mxu0 }
 0x8f0   :  { %4801 = vmatmul.f32.gmra.mxu3 %v8392_v7  ;;  %v9088_v7 = vpop.f32.mrf.mxu1 }
 0x8f2   :  { %v9068_v57 = vpop.f32.mrf.mxu2 }
 0x8f5   :  { %v9086_v18 = vpop.f32.mrf.mxu0 }
 0x8f9   :  { %v9096_v32 = vpop.f32.mrf.mxu1 }
 0x8fb   :  { %v9074_v30 = vpop.f32.mrf.mxu2 }
 0x8fd   :  { %v9076_v27 = vpop.f32.mrf.mxu3  ;;  %v9094_v31 = vpop.f32.mrf.mxu0 }
 0x903   :  { %v9104_v23 = vpop.f32.mrf.mxu1 }
 0x905   :  { %v9082_v58 = vpop.f32.mrf.mxu2  ;;  %v9102_v8 = vpop.f32.mrf.mxu0 }
 0x908   :  { %v9084_v10 = vpop.f32.mrf.mxu3 }
 0x90d   :  { %v9110_v14 = vpop.f32.mrf.mxu0  ;;  %v9112_v2 = vpop.f32.mrf.mxu1 }
 0x90f   :  { %v9090_v62 = vpop.f32.mrf.mxu2 }
 0x912   :  { %v9092_v1 = vpop.f32.mrf.mxu3 }
 0x915   :  { %v4546_v16 = vpop.f32.mrf.mxu0 }
 0x917   :  { %v4569_v17 = vpop.f32.mrf.mxu1 }
 0x918   :  { %v4570_v28 = vadd.f32 %v4569_v17, %v4546_v16 }
 0x919   :  { %v9098_v4 = vpop.f32.mrf.mxu2 }
 0x91c   :  { %v9100_v6 = vpop.f32.mrf.mxu3 }
 0x91d   :  { %v4549_v61 = vpop.f32.mrf.mxu0 }
 0x922   :  { %v4572_v46 = vpop.f32.mrf.mxu1 }
 0x923   :  { %v9106_v43 = vpop.f32.mrf.mxu2  ;;  %v4573_v24 = vadd.f32 %v4572_v46, %v4549_v61 }
 0x925   :  { %v4638_v49 = vpop.f32.mrf.mxu0 }
 0x926   :  { %v9108_v26 = vpop.f32.mrf.mxu3 }
 0x92c   :  { %v9114_v15 = vpop.f32.mrf.mxu2  ;;  %v4661_v12 = vpop.f32.mrf.mxu1 }
 0x92d   :  { %v4641_v52 = vpop.f32.mrf.mxu0 }
 0x92f   :  { %v9116_v38 = vpop.f32.mrf.mxu3 }
 0x934   :  { %v9118_v19 = vpop.f32.mrf.mxu2  ;;  %v4664_v48 = vpop.f32.mrf.mxu1 }
 0x935   :  { %v4730_v25 = vpop.f32.mrf.mxu0 }
 0x937   :  { %v9120_v54 = vpop.f32.mrf.mxu3 }
 0x93d   :  { %v4733_v0 = vpop.f32.mrf.mxu0 }
 0x93e   :  { %v4592_v29 = vpop.f32.mrf.mxu2 }
 0x93f   :  { %v4593_v9 = vadd.f32 %v4592_v29, %v4570_v28  ;;  %v4753_v29 = vpop.f32.mrf.mxu1  ;;  %v9155_v28 = vld [vmem:[%s9147_s1 + $0x70] sm:$0xff] }
 0x940   :  { %v9122_v33 = vpop.f32.mrf.mxu3 }
 0x946   :  { %v4595_v21 = vpop.f32.mrf.mxu2 }
 0x947   :  { %v4596_v55 = vadd.f32 %v4595_v21, %v4573_v24  ;;  %v4756_v24 = vpop.f32.mrf.mxu1  ;;  %v9152_v21 = vld [vmem:[%s9147_s1 + $0x78] sm:$0xff] }
 0x949   :  { %v4615_v41 = vpop.f32.mrf.mxu3  ;;  %6708 = vmatpush.msk.msra.mxu0 %vm2770_vm8, %v4596_v55 }
 0x94a   :  { %v4639_v56 = vadd.f32 %v4638_v49, %v4615_v41 }
 0x94b   :  { %4848 = vmatpush.msra.mxu0 %v4593_v9  ;;  %v9159_v9 = vld [vmem:[%s9147_s1 + $0x68] sm:$0xff] }
 0x94c   :  { %6709 = vmatmul.msk.f32.vlgmr.msra.gmra.mxu0 %vm4056_vm13, %v4805_v36  ;;  %v4662_v35 = vadd.f32 %v4661_v12, %v4639_v56  ;;  %v9168_v56 = vld [vmem:[%s9147_s1 + $0x58] sm:$0xff] }
 0x94d   :  { %5142 = vmatpush.msrb.mxu0 %v9152_v21 }
 0x94e   :  { %v4684_v13 = vpop.f32.mrf.mxu2 }
 0x94f   :  { %5143 = vmatpush.msrb.mxu0 %v9155_v28 }
 0x951   :  { %v4618_v47 = vpop.f32.mrf.mxu3  ;;  %5144 = vmatpush.msrb.mxu0 %v9159_v9 }
 0x952   :  { %v4642_v51 = vadd.f32 %v4641_v52, %v4618_v47 }
 0x954   :  { %v4665_v50 = vadd.f32 %v4664_v48, %v4642_v51  ;;  %6710 = vmatmul.msk.f32.gmra.mxu0 %vm4056_vm13, %v4806_v59  ;;  %v4975_v51 = vld [vmem:[%s9147_s1 + $0x50] sm:$0xff]  ;;  %v4974_v48 = vld [vmem:[%s9147_s1 + $0x48] sm:$0xff] }
 0x956   :  { %6713 = vmatpush.msk.msrb.mxu1 %vm2770_vm8, %v4665_v50  ;;  %v4687_v39 = vpop.f32.mrf.mxu2  ;;  %v4973_v50 = vld [vmem:[%s9147_s1 + $0x40] sm:$0xff] }
 0x958   :  { %4877 = vmatpush.msrb.mxu1 %v4662_v35  ;;  %v4995_v35 = vld [vmem:[%s9147_s1 + $0xf0] sm:$0xff] }
 0x959   :  { %v4707_v34 = vpop.f32.mrf.mxu3  ;;  %6714 = vmatmul.msk.f32.vlgmr.msrb.gmra.mxu1 %vm4056_vm13, %v4805_v36 }
 0x95a   :  { %v4708_v22 = vadd.f32 %v4707_v34, %v4684_v13  ;;  %v9163_v13 = vld [vmem:[%s9147_s1 + $0x60] sm:$0xff]  ;;  %v4994_v34 = vld [vmem:[%s9147_s1 + $0xe8] sm:$0xff] }
 0x95b   :  { %5145 = vmatpush.msrb.mxu0 %v9163_v13 }
 0x95c   :  { %6711 = vmatmul.msk.f32.gmra.mxu0 %vm4056_vm13, %v4807_v20  ;;  %v4731_v61 = vadd.f32 %v4730_v25, %v4708_v22  ;;  %v4972_v25 = vld [vmem:[%s9147_s1 + $0x38] sm:$0xff]  ;;  %v4991_v22 = vld [vmem:[%s9147_s1 + $0xd0] sm:$0xff] }
 0x95d   :  { %5146 = vmatpush.msrb.mxu0 %v9168_v56 }
 0x95f   :  { %5147 = vmatpush.msrb.mxu0 %v4975_v51 }
 0x960   :  { %v4776_v17 = vpop.f32.mrf.mxu2 }
 0x961   :  { %v4710_v37 = vpop.f32.mrf.mxu3  ;;  %6715 = vmatmul.msk.f32.gmra.mxu1 %vm4056_vm13, %v4806_v59  ;;  %v4777_v41 = vadd.f32 %v4776_v17, %v4753_v29  ;;  %5148 = vmatpush.msrb.mxu0 %v4974_v48  ;;  %v4989_v17 = vld [vmem:[%s9147_s1 + $0xc0] sm:$0xff]  ;;  %v4988_v29 = vld [vmem:[%s9147_s1 + $0xb8] sm:$0xff] }
 0x962   :  { %v4711_v5 = vadd.f32 %v4710_v37, %v4687_v39  ;;  %v4970_v39 = vld [vmem:[%s9147_s1 + $0x28] sm:$0xff]  ;;  %v4992_v37 = vld [vmem:[%s9147_s1 + $0xd8] sm:$0xff] }
 0x963   :  { %5149 = vmatpush.msrb.mxu0 %v4973_v50 }
 0x964   :  { %v4734_v16 = vadd.f32 %v4733_v0, %v4711_v5  ;;  %6712 = vmatmul.msk.f32.gmra.mxu0 %vm4056_vm13, %v4808_v44  ;;  %v4968_v5 = vld [vmem:[%s9147_s1 + $0x18] sm:$0xff]  ;;  %v4990_v0 = vld [vmem:[%s9147_s1 + $0xc8] sm:$0xff] }
 0x965   :  { %5150 = vmatpush.msrb.mxu0 %v4972_v25 }
 0x966   :  { %6718 = vmatpush.msk.msra.mxu2 %vm2770_vm8, %v4734_v16  ;;  %v4967_v16 = vld [vmem:[%s9147_s1 + $0x10] sm:$0xff] }
 0x968   :  { %4906 = vmatpush.msra.mxu2 %v4731_v61  ;;  %v4779_v49 = vpop.f32.mrf.mxu2  ;;  %v4966_v61 = vld [vmem:[%s9147_s1 + $0x8] sm:$0xff] }
 0x969   :  { %6716 = vmatmul.msk.f32.gmra.mxu1 %vm4056_vm13, %v4807_v20  ;;  %6719 = vmatmul.msk.f32.vlgmr.msra.gmra.mxu2 %vm4056_vm13, %v4805_v36  ;;  %v4780_v55 = vadd.f32 %v4779_v49, %v4756_v24  ;;  %v4987_v49 = vld [vmem:[%s9147_s1 + $0xb0] sm:$0xff]  ;;  %v4986_v24 = vld [vmem:[%s9147_s1 + $0xa8] sm:$0xff] }
 0x96b   :  { %v4799_v46 = vpop.f32.mrf.mxu3 }
 0x96c   :  { %v4800_v47 = vadd.f32 %v4799_v46, %v4777_v41  ;;  %v4965_v46 = vld [vmem:[%s9147_s1] sm:$0xff]  ;;  %v9213_v41 = vld [vmem:[%s9147_s1 + $0x90] sm:$0xff] }
 0x971   :  { %6717 = vmatmul.msk.f32.gmra.mxu1 %vm4056_vm13, %v4808_v44  ;;  %6720 = vmatmul.msk.f32.gmra.mxu2 %vm4056_vm13, %v4806_v59 }
 0x973   :  { %v4802_v12 = vpop.f32.mrf.mxu3 }
 0x974   :  { %v4803_v52 = vadd.f32 %v4802_v12, %v4780_v55  ;;  %v9203_v55 = vld [vmem:[%s9147_s1 + $0xa0] sm:$0xff]  ;;  %v9208_v12 = vld [vmem:[%s9147_s1 + $0x98] sm:$0xff] }
 0x976   :  { %6723 = vmatpush.msk.msrb.mxu3 %vm2770_vm8, %v4803_v52  ;;  %v9222_v52 = vld [vmem:[%s9147_s1 + $0x80] sm:$0xff] }
 0x978   :  { %4935 = vmatpush.msrb.mxu3 %v4800_v47  ;;  %v5012_v47 = vld [vmem:[%s9147_s1 + $0x178] sm:$0xff] }
 0x979   :  { %6724 = vmatmul.msk.f32.vlgmr.msrb.gmra.mxu3 %vm4056_vm13, %v4805_v36  ;;  %6721 = vmatmul.msk.f32.gmra.mxu2 %vm4056_vm13, %v4807_v20  ;;  %v4996_v36 = vld [vmem:[%s9147_s1 + $0xf8] sm:$0xff] }
 0x97a   :  { %5162 = vmatpush.msra.mxu1 %v4996_v36  ;;  %5182 = vmatpush.msra.mxu3 %v5012_v47 }
 0x97b   :  { %5265 = vmatpush.msrb.mxu2 %v5012_v47 }
 0x97c   :  { %5163 = vmatpush.msra.mxu1 %v4995_v35 }
 0x97e   :  { %5164 = vmatpush.msra.mxu1 %v4994_v34 }
 0x981   :  { %6725 = vmatmul.msk.f32.gmra.mxu3 %vm4056_vm13, %v4806_v59  ;;  %6722 = vmatmul.msk.f32.gmra.mxu2 %vm4056_vm13, %v4808_v44  ;;  %v4971_v59 = vld [vmem:[%s9147_s1 + $0x30] sm:$0xff] }
 0x982   :  { %5151 = vmatpush.msrb.mxu0 %v4971_v59 }
 0x984   :  { %5152 = vmatpush.msrb.mxu0 %v4970_v39 }
 0x989   :  { %6726 = vmatmul.msk.f32.gmra.mxu3 %vm4056_vm13, %v4807_v20  ;;  %v4993_v20 = vld [vmem:[%s9147_s1 + $0xe0] sm:$0xff] }
 0x98a   :  { %5165 = vmatpush.msra.mxu1 %v4993_v20 }
 0x98c   :  { %5166 = vmatpush.msra.mxu1 %v4992_v37 }
 0x98e   :  { %5167 = vmatpush.msra.mxu1 %v4991_v22 }
 0x990   :  { %5168 = vmatpush.msra.mxu1 %v4990_v0 }
 0x991   :  { %6727 = vmatmul.msk.f32.gmra.mxu3 %vm4056_vm13, %v4808_v44  ;;  %v4969_v44 = vld [vmem:[%s9147_s1 + $0x20] sm:$0xff] }
 0x992   :  { %5153 = vmatpush.msrb.mxu0 %v4969_v44  ;;  %5169 = vmatpush.msra.mxu1 %v4989_v17 }
 0x994   :  { %5154 = vmatpush.msrb.mxu0 %v4968_v5  ;;  %5170 = vmatpush.msra.mxu1 %v4988_v29 }
 0x996   :  { %5155 = vmatpush.msrb.mxu0 %v4967_v16  ;;  %5171 = vmatpush.msra.mxu1 %v4987_v49 }
 0x998   :  { %5156 = vmatpush.msrb.mxu0 %v4966_v61  ;;  %5172 = vmatpush.msra.mxu1 %v4986_v24 }
 0x99a   :  { %5157 = vmatpush.msrb.mxu0 %v4965_v46  ;;  %5173 = vmatpush.msra.mxu1 %v9203_v55 }
 0x99c   :  { %5225 = vmatpush.msra.mxu0 %v9152_v21  ;;  %5174 = vmatpush.msra.mxu1 %v9208_v12  ;;  %v9218_v21 = vld [vmem:[%s9147_s1 + $0x88] sm:$0xff] }
 0x99e   :  { %5226 = vmatpush.msra.mxu0 %v9155_v28  ;;  %5175 = vmatpush.msra.mxu1 %v9213_v41 }
 0x9a0   :  { %5227 = vmatpush.msra.mxu0 %v9159_v9  ;;  %5176 = vmatpush.msra.mxu1 %v9218_v21 }
 0x9a2   :  { %5228 = vmatpush.msra.mxu0 %v9163_v13  ;;  %5177 = vmatpush.msra.mxu1 %v9222_v52 }
 0x9a4   :  { %5229 = vmatpush.msra.mxu0 %v9168_v56  ;;  %5245 = vmatpush.msrb.mxu1 %v4996_v36  ;;  %v4242_v56 = vadd.f32 %v9094_v31, %v9063_v40  ;;  %v4239_v36 = vadd.f32 %v9086_v18, %v9055_v63  ;;  %v5010_v40 = vld [vmem:[%s9147_s1 + $0x168] sm:$0xff]  ;;  %v5009_v63 = vld [vmem:[%s9147_s1 + $0x160] sm:$0xff]  ;;  %v4248_v18 = vadd.f32 %v9110_v14, %v9078_v11 }
 0x9a6   :  { %5230 = vmatpush.msra.mxu0 %v4975_v51  ;;  %5246 = vmatpush.msrb.mxu1 %v4995_v35 }
 0x9a8   :  { %5231 = vmatpush.msra.mxu0 %v4974_v48  ;;  %5247 = vmatpush.msrb.mxu1 %v4994_v34  ;;  %v5011_v48 = vld [vmem:[%s9147_s1 + $0x170] sm:$0xff] }
 0x9a9   :  { %5183 = vmatpush.msra.mxu3 %v5011_v48  ;;  %5266 = vmatpush.msrb.mxu2 %v5011_v48  ;;  %v5002_v48 = vld [vmem:[%s9147_s1 + $0x128] sm:$0xff] }
 0x9aa   :  { %5232 = vmatpush.msra.mxu0 %v4973_v50  ;;  %5248 = vmatpush.msrb.mxu1 %v4993_v20  ;;  %v4245_v50 = vadd.f32 %v9102_v8, %v9070_v45  ;;  %v5008_v8 = vld [vmem:[%s9147_s1 + $0x158] sm:$0xff] }
 0x9ab   :  { %5184 = vmatpush.msra.mxu3 %v5010_v40  ;;  %5267 = vmatpush.msrb.mxu2 %v5010_v40 }
 0x9ac   :  { %5233 = vmatpush.msra.mxu0 %v4972_v25  ;;  %5249 = vmatpush.msrb.mxu1 %v4992_v37 }
 0x9ad   :  { %5185 = vmatpush.msra.mxu3 %v5009_v63  ;;  %5268 = vmatpush.msrb.mxu2 %v5009_v63 }
 0x9ae   :  { %5234 = vmatpush.msra.mxu0 %v4971_v59  ;;  %5250 = vmatpush.msrb.mxu1 %v4991_v22 }
 0x9af   :  { %5186 = vmatpush.msra.mxu3 %v5008_v8  ;;  %5269 = vmatpush.msrb.mxu2 %v5008_v8 }
 0x9b0   :  { %5235 = vmatpush.msra.mxu0 %v4970_v39  ;;  %5251 = vmatpush.msrb.mxu1 %v4990_v0 }
 0x9b2   :  { %5236 = vmatpush.msra.mxu0 %v4969_v44  ;;  %5252 = vmatpush.msrb.mxu1 %v4989_v17  ;;  %v5007_v44 = vld [vmem:[%s9147_s1 + $0x150] sm:$0xff] }
 0x9b3   :  { %5187 = vmatpush.msra.mxu3 %v5007_v44  ;;  %5270 = vmatpush.msrb.mxu2 %v5007_v44 }
 0x9b4   :  { %5237 = vmatpush.msra.mxu0 %v4968_v5  ;;  %5253 = vmatpush.msrb.mxu1 %v4988_v29  ;;  %v4271_v29 = vadd.f32 %v9096_v32, %v9065_v42  ;;  %v5004_v42 = vld [vmem:[%s9147_s1 + $0x138] sm:$0xff] }
 0x9b6   :  { %5238 = vmatpush.msra.mxu0 %v4967_v16  ;;  %5254 = vmatpush.msrb.mxu1 %v4987_v49  ;;  %v5006_v16 = vld [vmem:[%s9147_s1 + $0x148] sm:$0xff] }
 0x9b7   :  { %5188 = vmatpush.msra.mxu3 %v5006_v16  ;;  %5271 = vmatpush.msrb.mxu2 %v5006_v16 }
 0x9b8   :  { %5239 = vmatpush.msra.mxu0 %v4966_v61  ;;  %5255 = vmatpush.msrb.mxu1 %v4986_v24  ;;  %v5005_v24 = vld [vmem:[%s9147_s1 + $0x140] sm:$0xff] }
 0x9b9   :  { %5189 = vmatpush.msra.mxu3 %v5005_v24  ;;  %5272 = vmatpush.msrb.mxu2 %v5005_v24 }
 0x9ba   :  { %5240 = vmatpush.msra.mxu0 %v4965_v46  ;;  %5256 = vmatpush.msrb.mxu1 %v9203_v55 }
 0x9bb   :  { %5190 = vmatpush.msra.mxu3 %v5004_v42  ;;  %5273 = vmatpush.msrb.mxu2 %v5004_v42 }
 0x9bc   :  { %5257 = vmatpush.msrb.mxu1 %v9208_v12  ;;  %v4268_v12 = vadd.f32 %v9088_v7, %v9059_v3  ;;  %v5003_v3 = vld [vmem:[%s9147_s1 + $0x130] sm:$0xff] }
 0x9bd   :  { %5191 = vmatpush.msra.mxu3 %v5003_v3  ;;  %5274 = vmatpush.msrb.mxu2 %v5003_v3 }
 0x9be   :  { %5258 = vmatpush.msrb.mxu1 %v9213_v41 }
 0x9bf   :  { %5192 = vmatpush.msra.mxu3 %v5002_v48  ;;  %5275 = vmatpush.msrb.mxu2 %v5002_v48  ;;  %v4303_v48 = vadd.f32 %v9114_v15, %v9082_v58  ;;  %v4306_v15 = vadd.f32 %v9118_v19, %v9090_v62 }
 0x9c0   :  { %5259 = vmatpush.msrb.mxu1 %v9218_v21 }
 0x9c2   :  { %5260 = vmatpush.msrb.mxu1 %v9222_v52 }
 0x9c9   :  { %v4850_v28 = vpop.f32.mrf.mxu0 }
 0x9ca   :  { %v9238_v31 = vadd.f32 %v4850_v28, %v4239_v36 }
 0x9cc   :  { %v5080_v59 = vmul.f32 %v9238_v31, %v9238_v31 }
 0x9d1   :  { %v4853_v9 = vpop.f32.mrf.mxu0 }
 0x9d2   :  { %v9235_v35 = vadd.f32 %v4853_v9, %v4242_v56  ;;  %v4274_v9 = vadd.f32 %v9104_v23, %v9072_v53 }
 0x9d4   :  { %v5084_v45 = vmul.f32 %v9235_v35, %v9235_v35  ;;  %v5035_v20 = vadd.f32 %v9235_v35, %v9238_v31 }
 0x9d6   :  { %v9225_v13 = vpop.f32.mrf.mxu1  ;;  %v5096_v11 = vadd.f32 %v5084_v45, %v5080_v59  ;;  %v5001_v45 = vld [vmem:[%s9147_s1 + $0x120] sm:$0xff]  ;;  %v5000_v59 = vld [vmem:[%s9147_s1 + $0x118] sm:$0xff] }
 0x9d7   :  { %v9279_v56 = vadd.f32 %v9225_v13, %v4268_v12  ;;  %v4277_v13 = vadd.f32 %v9112_v2, %v9080_v60  ;;  %5193 = vmatpush.msra.mxu3 %v5001_v45  ;;  %5276 = vmatpush.msrb.mxu2 %v5001_v45 }
 0x9d9   :  { %v4856_v51 = vpop.f32.mrf.mxu0  ;;  %v5081_v52 = vmul.f32 %v9279_v56, %v9279_v56  ;;  %5194 = vmatpush.msra.mxu3 %v5000_v59  ;;  %5277 = vmatpush.msrb.mxu2 %v5000_v59 }
 0x9da   :  { %v9240_v25 = vadd.f32 %v4856_v51, %v4245_v50 }
 0x9dc   :  { %v5088_v39 = vmul.f32 %v9240_v25, %v9240_v25  ;;  %v5036_v14 = vadd.f32 %v5035_v20, %v9240_v25 }
 0x9de   :  { %v4882_v34 = vpop.f32.mrf.mxu1  ;;  %v5097_v17 = vadd.f32 %v5096_v11, %v5088_v39 }
 0x9df   :  { %v9274_v47 = vadd.f32 %v4882_v34, %v4271_v29  ;;  %v4998_v29 = vld [vmem:[%s9147_s1 + $0x108] sm:$0xff] }
 0x9e1   :  { %v4859_v37 = vpop.f32.mrf.mxu0  ;;  %v5085_v23 = vmul.f32 %v9274_v47, %v9274_v47  ;;  %v5045_v40 = vadd.f32 %v9274_v47, %v9279_v56 }
 0x9e2   :  { %v9255_v22 = vadd.f32 %v4859_v37, %v4248_v18 }
 0x9e3   :  { %v5106_v60 = vadd.f32 %v5085_v23, %v5081_v52  ;;  %v4297_v23 = vadd.f32 %v9098_v4, %v9068_v57  ;;  %v9318_v52 = vld [vmem:[%s9147_s1 + $0x198] sm:$0xff]  ;;  %v9332_v4 = vld [vmem:[%s9147_s1 + $0x188] sm:$0xff] }
 0x9e4   :  { %v5037_v5 = vsel %vm185_vm0, %v9255_v22, 0.0  ;;  %v5092_v0 = vmul.f32 %v9255_v22, %v9255_v22 }
 0x9e5   :  { %v5038_v61 = vadd.f32 %v5037_v5, %v5036_v14  ;;  %v4999_v5 = vld [vmem:[%s9147_s1 + $0x110] sm:$0xff] }
 0x9e6   :  { %v5098_v46 = vsel %vm185_vm0, %v5092_v0, 0.0  ;;  %v4885_v49 = vpop.f32.mrf.mxu1  ;;  %5195 = vmatpush.msra.mxu3 %v4999_v5  ;;  %5278 = vmatpush.msrb.mxu2 %v4999_v5 }
 0x9e7   :  { %v5039_v55 = vrot.slane %v5038_v61, 4  ;;  %v5099_v28 = vadd.f32 %v5098_v46, %v5097_v17  ;;  %v9281_v51 = vadd.f32 %v4885_v49, %v4274_v9 }
 0x9e8   :  { %5196 = vmatpush.msra.mxu3 %v4998_v29  ;;  %5279 = vmatpush.msrb.mxu2 %v4998_v29 }
 0x9e9   :  { %v5040_v32 = vadd.f32 %v5039_v55, %v5038_v61  ;;  %v5100_v41 = vrot.slane %v5099_v28, 4  ;;  %v5089_v34 = vmul.f32 %v9281_v51, %v9281_v51  ;;  %v5046_v2 = vadd.f32 %v5045_v40, %v9281_v51  ;;  %v4997_v55 = vld [vmem:[%s9147_s1 + $0x100] sm:$0xff]  ;;  %v9326_v40 = vld [vmem:[%s9147_s1 + $0x190] sm:$0xff] }
 0x9ea   :  { %5197 = vmatpush.msra.mxu3 %v4997_v55  ;;  %5280 = vmatpush.msrb.mxu2 %v4997_v55 }
 0x9eb   :  { %v5041_v53 = vrot.slane %v5040_v32, 2  ;;  %v5101_v7 = vadd.f32 %v5100_v41, %v5099_v28  ;;  %v5107_v11 = vadd.f32 %v5106_v60, %v5089_v34  ;;  %v4300_v41 = vadd.f32 %v9106_v43, %v9074_v30  ;;  %v5013_v60 = vld [vmem:[%s9147_s1 + $0x180] sm:$0xff] }
 0x9ec   :  { %v4908_v21 = vpop.f32.mrf.mxu2  ;;  %5214 = vmatpush.msrb.mxu3 %v9318_v52 }
 0x9ed   :  { %v5042_v36 = vadd.f32 %v5041_v53, %v5040_v32  ;;  %v5102_v50 = vrot.slane %v5101_v7, 2  ;;  %v9321_v30 = vadd.f32 %v4908_v21, %v4297_v23 }
 0x9ee   :  { %v4888_v63 = vpop.f32.mrf.mxu1  ;;  %5215 = vmatpush.msrb.mxu3 %v9326_v40 }
 0x9ef   :  { %v5043_v18 = vrot.slane %v5042_v36, 1  ;;  %v9297_v8 = vadd.f32 %v4888_v63, %v4277_v13  ;;  %v5103_v20 = vadd.f32 %v5102_v50, %v5101_v7  ;;  %v5082_v21 = vmul.f32 %v9321_v30, %v9321_v30 }
 0x9f0   :  { %5216 = vmatpush.msrb.mxu3 %v9332_v4 }
 0x9f1   :  { %v5047_v39 = vsel %vm185_vm0, %v9297_v8, 0.0  ;;  %v5093_v37 = vmul.f32 %v9297_v8, %v9297_v8  ;;  %v5044_v44 = vadd.f32 %v5043_v18, %v5042_v36  ;;  %v5104_v46 = vrot.slane %v5103_v20, 1 }
 0x9f2   :  { %v5048_v14 = vadd.f32 %v5047_v39, %v5046_v2  ;;  %5217 = vmatpush.msrb.mxu3 %v5013_v60 }
 0x9f3   :  { %v5108_v0 = vsel %vm185_vm0, %v5093_v37, 0.0  ;;  %5158 = vmatmul.f32.vlgmr.msrb.gmra.mxu0 %v5044_v44  ;;  %v5105_v9 = vadd.f32 %v5104_v46, %v5103_v20 }
 0x9f4   :  { %v5049_v16 = vrot.slane %v5048_v14, 4  ;;  %v5109_v17 = vadd.f32 %v5108_v0, %v5107_v11  ;;  %v4911_v61 = vpop.f32.mrf.mxu2  ;;  %v4329_v11 = vadd.f32 %v9116_v38, %v9084_v10 }
 0x9f5   :  { %v9315_v36 = vadd.f32 %v4911_v61, %v4300_v41 }
 0x9f6   :  { %v5050_v49 = vadd.f32 %v5049_v16, %v5048_v14  ;;  %v5110_v24 = vrot.slane %v5109_v17, 4  ;;  %v4326_v16 = vadd.f32 %v9108_v26, %v9076_v27 }
 0x9f7   :  { %v5086_v57 = vmul.f32 %v9315_v36, %v9315_v36  ;;  %v5055_v34 = vadd.f32 %v9315_v36, %v9321_v30 }
 0x9f8   :  { %v5051_v28 = vrot.slane %v5050_v49, 2  ;;  %v5111_v12 = vadd.f32 %v5110_v24, %v5109_v17  ;;  %v4332_v17 = vadd.f32 %v9120_v54, %v9092_v1 }
 0x9f9   :  { %v5116_v59 = vadd.f32 %v5086_v57, %v5082_v21 }
 0x9fa   :  { %v5052_v42 = vadd.f32 %v5051_v28, %v5050_v49  ;;  %v5112_v32 = vrot.slane %v5111_v12, 2 }
 0x9fb   :  { %5241 = vmatmul.f32.vlgmr.msra.gmra.mxu0 %v5105_v9 }
 0x9fc   :  { %v5053_v3 = vrot.slane %v5052_v42, 1  ;;  %v4937_v53 = vpop.f32.mrf.mxu3  ;;  %v4914_v7 = vpop.f32.mrf.mxu2  ;;  %v5113_v13 = vadd.f32 %v5112_v32, %v5111_v12  ;;  %v4335_v32 = vadd.f32 %v9122_v33, %v9100_v6 }
 0x9fd   :  { %v9323_v43 = vadd.f32 %v4914_v7, %v4303_v48  ;;  %v9360_v24 = vadd.f32 %v4937_v53, %v4326_v16 }
 0x9fe   :  { %v5054_v50 = vadd.f32 %v5053_v3, %v5052_v42  ;;  %v5114_v58 = vrot.slane %v5113_v13, 1 }
 0x9ff   :  { %v5090_v63 = vmul.f32 %v9323_v43, %v9323_v43  ;;  %v5056_v62 = vadd.f32 %v5055_v34, %v9323_v43  ;;  %v5083_v1 = vmul.f32 %v9360_v24, %v9360_v24  ;;  %v5066_v41 = vsel %vm5065_vm14, %v9360_v24, 0.0 }
 0xa00   :  { %5178 = vmatmul.f32.vlgmr.msra.gmra.mxu1 %v5054_v50  ;;  %v5115_v19 = vadd.f32 %v5114_v58, %v5113_v13 }
 0xa01   :  { %v5117_v37 = vadd.f32 %v5116_v59, %v5090_v63  ;;  %v5126_v50 = vsel %vm5065_vm14, %v5083_v1, 0.0  ;;  %v5017_v1 = vld [vmem:[%s9396_s5] sm:$0xff] }
 0xa04   :  { %v4940_v45 = vpop.f32.mrf.mxu3  ;;  %v4917_v18 = vpop.f32.mrf.mxu2 }
 0xa05   :  { %v9344_v2 = vadd.f32 %v4917_v18, %v4306_v15  ;;  %v9358_v61 = vadd.f32 %v4940_v45, %v4329_v11 }
 0xa07   :  { %v5057_v20 = vsel %vm185_vm0, %v9344_v2, 0.0  ;;  %v5094_v39 = vmul.f32 %v9344_v2, %v9344_v2  ;;  %v5087_v28 = vmul.f32 %v9358_v61, %v9358_v61  ;;  %v5067_v26 = vsel %vm5065_vm14, %v9358_v61, 0.0 }
 0xa08   :  { %v5058_v44 = vadd.f32 %v5057_v20, %v5056_v62  ;;  %5261 = vmatmul.f32.vlgmr.msrb.gmra.mxu1 %v5115_v19  ;;  %v5068_v7 = vadd.f32 %v5067_v26, %v5066_v41  ;;  %v5020_v26 = vld [vmem:[%s9396_s5 + $0x18] sm:$0xff] }
 0xa09   :  { %v5118_v14 = vsel %vm185_vm0, %v5094_v39, 0.0  ;;  %v5127_v3 = vsel %vm5065_vm14, %v5087_v28, 0.0  ;;  %v5030_v28 = vld [vmem:[%s9396_s5 + $0x68] sm:$0xff] }
 0xa0a   :  { %v5059_v5 = vrot.slane %v5058_v44, 4  ;;  %v5119_v0 = vadd.f32 %v5118_v14, %v5117_v37  ;;  %v5128_v6 = vadd.f32 %v5127_v3, %v5126_v50  ;;  %5439 = vmatpush.msra.mxu2 %v5030_v28 }
 0xa0c   :  { %v5060_v29 = vadd.f32 %v5059_v5, %v5058_v44  ;;  %v5120_v46 = vrot.slane %v5119_v0, 4  ;;  %v4943_v49 = vpop.f32.mrf.mxu3 }
 0xa0d   :  { %v9362_v55 = vadd.f32 %v4943_v49, %v4332_v17  ;;  %v5029_v17 = vld [vmem:[%s9396_s5 + $0x60] sm:$0xff]  ;;  %v5028_v49 = vld [vmem:[%s9396_s5 + $0x58] sm:$0xff] }
 0xa0e   :  { %v5061_v10 = vrot.slane %v5060_v29, 2  ;;  %v5121_v38 = vadd.f32 %v5120_v46, %v5119_v0  ;;  %v5025_v46 = vld [vmem:[%s9396_s5 + $0x40] sm:$0xff]  ;;  %5419 = vmatpush.msra.mxu1 %v5029_v17 }
 0xa0f   :  { %v5091_v54 = vmul.f32 %v9362_v55, %v9362_v55  ;;  %v5069_v53 = vsel %vm5065_vm14, %v9362_v55, 0.0 }
 0xa10   :  { %v5062_v12 = vadd.f32 %v5061_v10, %v5060_v29  ;;  %v5122_v27 = vrot.slane %v5121_v38, 2  ;;  %v5070_v33 = vadd.f32 %v5069_v53, %v5068_v7  ;;  %v5032_v29 = vld [vmem:[%s9396_s5 + $0x78] sm:$0xff]  ;;  %v5021_v10 = vld [vmem:[%s9396_s5 + $0x20] sm:$0xff]  ;;  %5420 = vmatpush.msra.mxu1 %v5025_v46  ;;  %v5018_v53 = vld [vmem:[%s9396_s5 + $0x8] sm:$0xff] }
 0xa11   :  { %v5129_v57 = vsel %vm5065_vm14, %v5091_v54, 0.0  ;;  %5396 = vmatpush.msrb.mxu0 %v5032_v29  ;;  %v5026_v54 = vld [vmem:[%s9396_s5 + $0x48] sm:$0xff] }
 0xa12   :  { %v5063_v9 = vrot.slane %v5062_v12, 1  ;;  %v5123_v42 = vadd.f32 %v5122_v27, %v5121_v38  ;;  %v5130_v63 = vadd.f32 %v5129_v57, %v5128_v6  ;;  %v5024_v38 = vld [vmem:[%s9396_s5 + $0x38] sm:$0xff]  ;;  %5421 = vmatpush.msra.mxu1 %v5021_v10  ;;  %5440 = vmatpush.msra.mxu2 %v5026_v54 }
 0xa13   :  { %5397 = vmatpush.msrb.mxu0 %v5028_v49 }
 0xa14   :  { %v4946_v23 = vpop.f32.mrf.mxu3  ;;  %v5064_v48 = vadd.f32 %v5063_v9, %v5062_v12  ;;  %v5124_v13 = vrot.slane %v5123_v42, 1  ;;  %5422 = vmatpush.msra.mxu1 %v5017_v1 }
 0xa15   :  { %v9381_v58 = vadd.f32 %v4946_v23, %v4335_v32  ;;  %5398 = vmatpush.msrb.mxu0 %v5024_v38  ;;  %v5022_v32 = vld [vmem:[%s9396_s5 + $0x28] sm:$0xff] }
 0xa16   :  { %5198 = vmatmul.f32.vlgmr.msra.gmra.mxu3 %v5064_v48  ;;  %v5125_v15 = vadd.f32 %v5124_v13, %v5123_v42  ;;  %5441 = vmatpush.msra.mxu2 %v5022_v32 }
 0xa17   :  { %v5072_v21 = vsel %vm5071_vm15, %v9381_v58, 0.0  ;;  %v5095_v34 = vmul.f32 %v9381_v58, %v9381_v58  ;;  %5297 = vmatpush.msra.mxu3 %v9318_v52  ;;  %5399 = vmatpush.msrb.mxu0 %v5020_v26 }
 0xa18   :  { %v5073_v45 = vadd.f32 %v5072_v21, %v5070_v33  ;;  %5281 = vmatmul.f32.vlgmr.msrb.gmra.mxu2 %v5125_v15 }
 0xa19   :  { %v5131_v18 = vsel %vm5071_vm15, %v5095_v34, 0.0  ;;  %5298 = vmatpush.msra.mxu3 %v9326_v40  ;;  %5479 = vmatpush.msra.mxu0 %v5032_v29 }
 0xa1a   :  { %v5074_v59 = vrot.slane %v5073_v45, 4  ;;  %v5132_v62 = vadd.f32 %v5131_v18, %v5130_v63  ;;  %5442 = vmatpush.msra.mxu2 %v5018_v53  ;;  %v5557_v18 = vld [vmem:[%s9413_s9 + $0x70] sm:$0xff] }
 0xa1b   :  { %5299 = vmatpush.msra.mxu3 %v9332_v4  ;;  %5480 = vmatpush.msra.mxu0 %v5028_v49  ;;  %v5552_v49 = vld [vmem:[%s9413_s9 + $0x48] sm:$0xff] }
 0xa1c   :  { %v5075_v19 = vadd.f32 %v5074_v59, %v5073_v45  ;;  %v5133_v20 = vrot.slane %v5132_v62, 4  ;;  %v5558_v45 = vld [vmem:[%s9413_s9 + $0x78] sm:$0xff] }
 0xa1d   :  { %5300 = vmatpush.msra.mxu3 %v5013_v60  ;;  %5481 = vmatpush.msra.mxu0 %v5024_v38  ;;  %v5551_v38 = vld [vmem:[%s9413_s9 + $0x40] sm:$0xff] }
 0xa1e   :  { %v5076_v39 = vrot.slane %v5075_v19, 2  ;;  %v5134_v37 = vadd.f32 %v5133_v20, %v5132_v62  ;;  %5607 = vmatpush.msrb.mxu1 %v5558_v45  ;;  %v5574_v62 = vld [vmem:[%s9413_s9 + $0xf8] sm:$0xff]  ;;  %v5573_v20 = vld [vmem:[%s9413_s9 + $0xf0] sm:$0xff]  ;;  %v5591_v45 = vld [vmem:[%s9413_s9 + $0x180] sm:$0xff] }
 0xa1f   :  { %5482 = vmatpush.msra.mxu0 %v5020_v26  ;;  %5636 = vmatpush.msrb.mxu2 %v5574_v62  ;;  %v5548_v26 = vld [vmem:[%s9413_s9 + $0x28] sm:$0xff]  ;;  %v5745_v62 = vld [vmem:[%s9460_s21 + $0x78] sm:$0xff] }
 0xa20   :  { %v5077_v44 = vadd.f32 %v5076_v39, %v5075_v19  ;;  %v5135_v11 = vrot.slane %v5134_v37, 2  ;;  %v5556_v19 = vld [vmem:[%s9413_s9 + $0x68] sm:$0xff]  ;;  %v5033_v39 = vld [vmem:[%s6578_s13] sm:$0x1]  ;;  %5608 = vmatpush.msrb.mxu1 %v5557_v18  ;;  %v5562_v18 = vld [vmem:[%s9413_s9 + $0x98] sm:$0xff] }
 0xa21   :  { %5637 = vmatpush.msrb.mxu2 %v5573_v20  ;;  %v5561_v20 = vld [vmem:[%s9413_s9 + $0x90] sm:$0xff] }
 0xa22   :  { %v5078_v14 = vrot.slane %v5077_v44, 1  ;;  %v5136_v5 = vadd.f32 %v5135_v11, %v5134_v37  ;;  %v5555_v11 = vld [vmem:[%s9413_s9 + $0x60] sm:$0xff]  ;;  %5609 = vmatpush.msrb.mxu1 %v5556_v19  ;;  %v5761_v19 = vld [vmem:[%s9460_s21 + $0xf8] sm:$0xff] }
 0xa24   :  { %v5079_v52 = vadd.f32 %v5078_v14, %v5077_v44  ;;  %v5137_v0 = vrot.slane %v5136_v5, 1  ;;  %v5572_v44 = vld [vmem:[%s9413_s9 + $0xe8] sm:$0xff]  ;;  %5610 = vmatpush.msrb.mxu1 %v5555_v11 }
 0xa25   :  { %5638 = vmatpush.msrb.mxu2 %v5572_v44  ;;  %v5760_v44 = vld [vmem:[%s9460_s21 + $0xf0] sm:$0xff]  ;;  %v5560_v11 = vld [vmem:[%s9413_s9 + $0x88] sm:$0xff] }
 0xa26   :  { %6728 = vmatmul.msk.f32.vlgmr.msrb.gmra.mxu3 %vm5065_vm14, %v5079_v52  ;;  %v5138_v16 = vadd.f32 %v5137_v0, %v5136_v5  ;;  %v5031_v5 = vld [vmem:[%s9396_s5 + $0x70] sm:$0xff]  ;;  %v5554_v0 = vld [vmem:[%s9413_s9 + $0x58] sm:$0xff] }
 0xa27   :  { %5336 = vmatpush.msrb.mxu3 %v5029_v17  ;;  %v5553_v17 = vld [vmem:[%s9413_s9 + $0x50] sm:$0xff]  ;;  %5611 = vmatpush.msrb.mxu1 %v5554_v0  ;;  %v5559_v0 = vld [vmem:[%s9413_s9 + $0x80] sm:$0xff] }
 0xa29   :  { %5337 = vmatpush.msrb.mxu3 %v5025_v46  ;;  %v5023_v46 = vld [vmem:[%s9396_s5 + $0x30] sm:$0xff]  ;;  %5612 = vmatpush.msrb.mxu1 %v5553_v17  ;;  %v5741_v17 = vld [vmem:[%s9460_s21 + $0x58] sm:$0xff] }
 0xa2b   :  { %5338 = vmatpush.msrb.mxu3 %v5021_v10  ;;  %v5019_v10 = vld [vmem:[%s9396_s5 + $0x10] sm:$0xff]  ;;  %5613 = vmatpush.msrb.mxu1 %v5552_v49  ;;  %v5580_v49 = vld [vmem:[%s9413_s9 + $0x128] sm:$0xff] }
 0xa2d   :  { %5339 = vmatpush.msrb.mxu3 %v5017_v1  ;;  %5614 = vmatpush.msrb.mxu1 %v5551_v38  ;;  %v5569_v1 = vld [vmem:[%s9413_s9 + $0xd0] sm:$0xff] }
 0xa2e   :  { %6729 = vmatmul.msk.f32.vlgmr.msra.gmra.mxu3 %vm5065_vm14, %v5138_v16  ;;  %v5034_v16 = vld [vmem:[%s6579_s17] sm:$0x1]  ;;  %v5756_v38 = vld [vmem:[%s9460_s21 + $0xd0] sm:$0xff] }
 0xa2f   :  { %5356 = vmatpush.msra.mxu3 %v5030_v28  ;;  %v5550_v28 = vld [vmem:[%s9413_s9 + $0x38] sm:$0xff] }
 0xa30   :  { %5615 = vmatpush.msrb.mxu1 %v5550_v28  ;;  %v5776_v28 = vld [vmem:[%s9460_s21 + $0x170] sm:$0xff] }
 0xa31   :  { %5357 = vmatpush.msra.mxu3 %v5026_v54  ;;  %v5568_v54 = vld [vmem:[%s9413_s9 + $0xc8] sm:$0xff] }
 0xa33   :  { %5358 = vmatpush.msra.mxu3 %v5022_v32  ;;  %v5590_v32 = vld [vmem:[%s9413_s9 + $0x178] sm:$0xff] }
 0xa35   :  { %5359 = vmatpush.msra.mxu3 %v5018_v53  ;;  %v5589_v53 = vld [vmem:[%s9413_s9 + $0x170] sm:$0xff] }
 0xa70   :  { %v5159_v60 = vpop.f32.mrf.mxu0 }
 0xa78   :  { %v5242_v41 = vpop.f32.mrf.mxu0 }
 0xa7d   :  { %v5179_v40 = vpop.f32.mrf.mxu1 }
 0xa7e   :  { %v5180_v27 = vadd.f32 %v5179_v40, %v5159_v60  ;;  %v5571_v40 = vld [vmem:[%s9413_s9 + $0xe0] sm:$0xff]  ;;  %v5027_v60 = vld [vmem:[%s9396_s5 + $0x50] sm:$0xff] }
 0xa7f   :  { %5639 = vmatpush.msrb.mxu2 %v5571_v40  ;;  %v5742_v40 = vld [vmem:[%s9460_s21 + $0x60] sm:$0xff] }
 0xa85   :  { %v5262_v9 = vpop.f32.mrf.mxu1 }
 0xa86   :  { %v5263_v7 = vadd.f32 %v5262_v9, %v5242_v41  ;;  %v5547_v9 = vld [vmem:[%s9413_s9 + $0x20] sm:$0xff]  ;;  %v5546_v41 = vld [vmem:[%s9413_s9 + $0x18] sm:$0xff] }
 0xa99   :  { %v5199_v4 = vpop.f32.mrf.mxu3 }
 0xa9a   :  { %v5200_v42 = vadd.f32 %v5199_v4, %v5180_v27  ;;  %v5549_v27 = vld [vmem:[%s9413_s9 + $0x30] sm:$0xff] }
 0xa9b   :  { %v5282_v3 = vpop.f32.mrf.mxu2  ;;  %5616 = vmatpush.msrb.mxu1 %v5549_v27  ;;  %v5739_v27 = vld [vmem:[%s9460_s21 + $0x48] sm:$0xff] }
 0xa9c   :  { %v5283_v48 = vadd.f32 %v5282_v3, %v5263_v7  ;;  %v5566_v3 = vld [vmem:[%s9413_s9 + $0xb8] sm:$0xff] }
 0xa9d   :  { %5617 = vmatpush.msrb.mxu1 %v5548_v26  ;;  %v5594_v7 = vld [vmem:[%s9413_s9 + $0x198] sm:$0xff]  ;;  %v5775_v26 = vld [vmem:[%s9460_s21 + $0x168] sm:$0xff] }
 0xa9f   :  { %5618 = vmatpush.msrb.mxu1 %v5547_v9  ;;  %v5738_v9 = vld [vmem:[%s9460_s21 + $0x40] sm:$0xff] }
 0xaa1   :  { %5619 = vmatpush.msrb.mxu1 %v5546_v41 }
 0xaa9   :  { %v5219_v12 = vpop.f32.mrf.mxu3 }
 0xaaa   :  { %v5220_v23 = vadd.f32 %v5219_v12, %v5200_v42  ;;  %v5570_v12 = vld [vmem:[%s9413_s9 + $0xd8] sm:$0xff]  ;;  %v5567_v42 = vld [vmem:[%s9413_s9 + $0xc0] sm:$0xff] }
 0xaab   :  { %5640 = vmatpush.msrb.mxu2 %v5570_v12  ;;  %v5579_v12 = vld [vmem:[%s9413_s9 + $0x120] sm:$0xff] }
 0xaac   :  { %v5305_v50 = vmul.f32 %v5220_v23, %v5220_v23 }
 0xaad   :  { %5641 = vmatpush.msrb.mxu2 %v5569_v1  ;;  %v5755_v1 = vld [vmem:[%s9460_s21 + $0xc8] sm:$0xff] }
 0xaaf   :  { %5642 = vmatpush.msrb.mxu2 %v5568_v54  ;;  %v5578_v54 = vld [vmem:[%s9413_s9 + $0x118] sm:$0xff] }
 0xab1   :  { %v5302_v13 = vpop.f32.mrf.mxu3  ;;  %5643 = vmatpush.msrb.mxu2 %v5567_v42  ;;  %v5754_v42 = vld [vmem:[%s9460_s21 + $0xc0] sm:$0xff] }
 0xab2   :  { %v5303_v57 = vadd.f32 %v5302_v13, %v5283_v48  ;;  %v5565_v48 = vld [vmem:[%s9413_s9 + $0xb0] sm:$0xff]  ;;  %v5588_v13 = vld [vmem:[%s9413_s9 + $0x168] sm:$0xff] }
 0xab3   :  { %5644 = vmatpush.msrb.mxu2 %v5566_v3  ;;  %v5577_v3 = vld [vmem:[%s9413_s9 + $0x110] sm:$0xff] }
 0xab4   :  { %v5306_v6 = vsub.f32 %v5303_v57, %v5305_v50  ;;  %v5593_v50 = vld [vmem:[%s9413_s9 + $0x190] sm:$0xff]  ;;  %v5544_v57 = vld [vmem:[%s9413_s9 + $0x8] sm:$0xff] }
 0xab5   :  { %5645 = vmatpush.msrb.mxu2 %v5565_v48  ;;  %v5576_v48 = vld [vmem:[%s9413_s9 + $0x108] sm:$0xff] }
 0xab6   :  { %v5307_v33 = vadd.f32 1e-05, %v5306_v6  ;;  %v5564_v6 = vld [vmem:[%s9413_s9 + $0xa8] sm:$0xff] }
 0xab7   :  { %5646 = vmatpush.msrb.mxu2 %v5564_v6  ;;  %v5575_v6 = vld [vmem:[%s9413_s9 + $0x100] sm:$0xff] }
 0xab8   :  { %6833 = vrsqrt.f32 %v5307_v33  ;;  %vm5314_vm2 = vweird.f32 %v5307_v33 }
 0xabe   :  { %v6834_v15 = vpop.eup %6833 }
 0xabf   :  { %v5309_v21 = vmul.f32 %v6834_v15, %v5307_v33  ;;  %vm5315_vm1 = vweird.f32 %v6834_v15  ;;  %v5587_v33 = vld [vmem:[%s9413_s9 + $0x160] sm:$0xff] }
 0xac0   :  { %vm5316_vm3 = vmor %vm5314_vm2, %vm5315_vm1 }
 0xac1   :  { %v5310_v34 = vmul.f32 %v6834_v15, %v5309_v21  ;;  %v5543_v21 = vld [vmem:[%s9413_s9] sm:$0xff] }
 0xac3   :  { %v5311_v63 = vmul.f32 0.5, %v5310_v34  ;;  %v5563_v34 = vld [vmem:[%s9413_s9 + $0xa0] sm:$0xff] }
 0xac4   :  { %5647 = vmatpush.msrb.mxu2 %v5563_v34  ;;  %v5734_v34 = vld [vmem:[%s9460_s21 + $0x20] sm:$0xff] }
 0xac5   :  { %v5312_v59 = vsub.f32 1.5, %v5311_v63  ;;  %v5586_v63 = vld [vmem:[%s9413_s9 + $0x158] sm:$0xff] }
 0xac6   :  { %5648 = vmatpush.msrb.mxu2 %v5562_v18 }
 0xac7   :  { %v5313_v37 = vmul.f32 %v6834_v15, %v5312_v59  ;;  %v5585_v59 = vld [vmem:[%s9413_s9 + $0x150] sm:$0xff] }
 0xac8   :  { %5649 = vmatpush.msrb.mxu2 %v5561_v20 }
 0xac9   :  { %v5317_v14 = vsel %vm5316_vm3, %v6834_v15, %v5313_v37  ;;  %v5592_v15 = vld [vmem:[%s9413_s9 + $0x188] sm:$0xff]  ;;  %v5744_v37 = vld [vmem:[%s9460_s21 + $0x70] sm:$0xff] }
 0xaca   :  { %v5318_v52 = vmul.f32 %v5317_v14, %v5033_v39  ;;  %v5584_v39 = vld [vmem:[%s9413_s9 + $0x148] sm:$0xff]  ;;  %v5583_v14 = vld [vmem:[%s9413_s9 + $0x140] sm:$0xff]  ;;  %5650 = vmatpush.msrb.mxu2 %v5560_v11 }
 0xacc   :  { %6730 = vmatmul.msk.f32.vlgmr.msrb.gmra.mxu3 %vm5065_vm14, %v5318_v52  ;;  %6733 = vmatmul.msk.f32.vlgmr.msrb.gmra.mxu0 %vm5065_vm14, %v5318_v52  ;;  %v5319_v4 = vmul.f32 %v5318_v52, %v5220_v23  ;;  %v5545_v23 = vld [vmem:[%s9413_s9 + $0x10] sm:$0xff] }
 0xacd   :  { %5376 = vmatpush.msrb.mxu3 %v5031_v5  ;;  %5706 = vmatpush.msrb.mxu0 %v5594_v7  ;;  %v5753_v7 = vld [vmem:[%s9460_s21 + $0xb8] sm:$0xff] }
 0xace   :  { %v5320_v29 = vsub.f32 %v5034_v16, %v5319_v4  ;;  %5620 = vmatpush.msrb.mxu1 %v5545_v23  ;;  %v5582_v16 = vld [vmem:[%s9413_s9 + $0x138] sm:$0xff]  ;;  %5651 = vmatpush.msrb.mxu2 %v5559_v0  ;;  %v5758_v4 = vld [vmem:[%s9460_s21 + $0xe0] sm:$0xff]  ;;  %v5732_v0 = vld [vmem:[%s9460_s21 + $0x10] sm:$0xff] }
 0xacf   :  { %5377 = vmatpush.msrb.mxu3 %v5027_v60  ;;  %5707 = vmatpush.msrb.mxu0 %v5593_v50  ;;  %v5773_v23 = vld [vmem:[%s9460_s21 + $0x158] sm:$0xff]  ;;  %v5752_v50 = vld [vmem:[%s9460_s21 + $0xb0] sm:$0xff] }
 0xad0   :  { %6734 = vmatmul.msk.f32.vlgmr.msra.gmra.mxu1 %vm5065_vm14, %v5320_v29  ;;  %6735 = vmatmul.msk.f32.vlgmr.msra.gmra.mxu2 %vm5065_vm14, %v5320_v29 }
 0xad1   :  { %5378 = vmatpush.msrb.mxu3 %v5023_v46  ;;  %5621 = vmatpush.msrb.mxu1 %v5544_v57  ;;  %v5772_v57 = vld [vmem:[%s9460_s21 + $0x150] sm:$0xff] }
 0xad2   :  { %5708 = vmatpush.msrb.mxu0 %v5592_v15  ;;  %v5751_v15 = vld [vmem:[%s9460_s21 + $0xa8] sm:$0xff] }
 0xad3   :  { %5379 = vmatpush.msrb.mxu3 %v5019_v10  ;;  %5622 = vmatpush.msrb.mxu1 %v5543_v21  ;;  %v5771_v21 = vld [vmem:[%s9460_s21 + $0x148] sm:$0xff] }
 0xad4   :  { %6731 = vmatmul.msk.f32.vlgmr.msra.gmra.mxu3 %vm5065_vm14, %v5318_v52  ;;  %6737 = vmatmul.msk.f32.vlgmr.msra.gmra.mxu0 %vm5065_vm14, %v5320_v29 }
 0xad5   :  { %5459 = vmatpush.msra.mxu3 %v5031_v5  ;;  %5709 = vmatpush.msrb.mxu0 %v5591_v45  ;;  %v5759_v5 = vld [vmem:[%s9460_s21 + $0xe8] sm:$0xff] }
 0xad6   :  { %5811 = vmatpush.msra.mxu1 %v5761_v19  ;;  %v5770_v19 = vld [vmem:[%s9460_s21 + $0x140] sm:$0xff] }
 0xad7   :  { %5460 = vmatpush.msra.mxu3 %v5027_v60  ;;  %5782 = vmatpush.msra.mxu0 %v5745_v62  ;;  %v5581_v60 = vld [vmem:[%s9413_s9 + $0x130] sm:$0xff] }
 0xad8   :  { %5812 = vmatpush.msra.mxu1 %v5760_v44 }
 0xad9   :  { %5461 = vmatpush.msra.mxu3 %v5023_v46  ;;  %5783 = vmatpush.msra.mxu0 %v5744_v37  ;;  %v5777_v46 = vld [vmem:[%s9460_s21 + $0x178] sm:$0xff] }
 0xada   :  { %5813 = vmatpush.msra.mxu1 %v5759_v5  ;;  %5840 = vmatpush.msra.mxu2 %v5777_v46  ;;  %v5749_v37 = vld [vmem:[%s9460_s21 + $0x98] sm:$0xff] }
 0xadb   :  { %5462 = vmatpush.msra.mxu3 %v5019_v10  ;;  %v5740_v10 = vld [vmem:[%s9460_s21 + $0x50] sm:$0xff] }
 0xadc   :  { %6732 = vmatmul.msk.f32.vlgmr.msrb.gmra.mxu3 %vm5065_vm14, %v5318_v52  ;;  %v5743_v52 = vld [vmem:[%s9460_s21 + $0x68] sm:$0xff]  ;;  %5814 = vmatpush.msra.mxu1 %v5758_v4  ;;  %v5768_v4 = vld [vmem:[%s9460_s21 + $0x130] sm:$0xff] }
 0xadd   :  { %5665 = vmatpush.msrb.mxu3 %v5590_v32  ;;  %5784 = vmatpush.msra.mxu0 %v5743_v52  ;;  %v5774_v32 = vld [vmem:[%s9460_s21 + $0x160] sm:$0xff] }
 0xade   :  { %5841 = vmatpush.msra.mxu2 %v5776_v28 }
 0xadf   :  { %5666 = vmatpush.msrb.mxu3 %v5589_v53  ;;  %5785 = vmatpush.msra.mxu0 %v5742_v40  ;;  %v5737_v53 = vld [vmem:[%s9460_s21 + $0x38] sm:$0xff] }
 0xae0   :  { %5842 = vmatpush.msra.mxu2 %v5775_v26 }
 0xae1   :  { %5667 = vmatpush.msrb.mxu3 %v5588_v13  ;;  %5786 = vmatpush.msra.mxu0 %v5741_v17  ;;  %v5736_v13 = vld [vmem:[%s9460_s21 + $0x30] sm:$0xff] }
 0xae2   :  { %5843 = vmatpush.msra.mxu2 %v5774_v32 }
 0xae3   :  { %5668 = vmatpush.msrb.mxu3 %v5587_v33  ;;  %5787 = vmatpush.msra.mxu0 %v5740_v10  ;;  %v5735_v33 = vld [vmem:[%s9460_s21 + $0x28] sm:$0xff] }
 0xae4   :  { %6736 = vmatmul.msk.f32.vlgmr.msra.gmra.mxu3 %vm5065_vm14, %v5320_v29  ;;  %v5757_v29 = vld [vmem:[%s9460_s21 + $0xd8] sm:$0xff]  ;;  %5844 = vmatpush.msra.mxu2 %v5773_v23 }
 0xae5   :  { %5669 = vmatpush.msrb.mxu3 %v5586_v63  ;;  %5815 = vmatpush.msra.mxu1 %v5757_v29  ;;  %v5747_v29 = vld [vmem:[%s9460_s21 + $0x88] sm:$0xff] }
 0xae6   :  { %5788 = vmatpush.msra.mxu0 %v5739_v27  ;;  %5845 = vmatpush.msra.mxu2 %v5772_v57  ;;  %v5762_v57 = vld [vmem:[%s9460_s21 + $0x100] sm:$0xff] }
 0xae7   :  { %5670 = vmatpush.msrb.mxu3 %v5585_v59  ;;  %5816 = vmatpush.msra.mxu1 %v5756_v38  ;;  %v5750_v59 = vld [vmem:[%s9460_s21 + $0xa0] sm:$0xff]  ;;  %v5767_v38 = vld [vmem:[%s9460_s21 + $0x128] sm:$0xff] }
 0xae8   :  { %5789 = vmatpush.msra.mxu0 %v5738_v9  ;;  %5846 = vmatpush.msra.mxu2 %v5771_v21 }
 0xae9   :  { %5671 = vmatpush.msrb.mxu3 %v5584_v39  ;;  %5817 = vmatpush.msra.mxu1 %v5755_v1  ;;  %v5733_v39 = vld [vmem:[%s9460_s21 + $0x18] sm:$0xff]  ;;  %v5766_v1 = vld [vmem:[%s9460_s21 + $0x120] sm:$0xff] }
 0xaea   :  { %5790 = vmatpush.msra.mxu0 %v5737_v53  ;;  %5847 = vmatpush.msra.mxu2 %v5770_v19 }
 0xaeb   :  { %5672 = vmatpush.msrb.mxu3 %v5583_v14  ;;  %5818 = vmatpush.msra.mxu1 %v5754_v42  ;;  %v5769_v14 = vld [vmem:[%s9460_s21 + $0x138] sm:$0xff] }
 0xaec   :  { %5791 = vmatpush.msra.mxu0 %v5736_v13  ;;  %5848 = vmatpush.msra.mxu2 %v5769_v14  ;;  %v5763_v13 = vld [vmem:[%s9460_s21 + $0x108] sm:$0xff] }
 0xaed   :  { %5673 = vmatpush.msrb.mxu3 %v5582_v16  ;;  %5819 = vmatpush.msra.mxu1 %v5753_v7  ;;  %v5748_v16 = vld [vmem:[%s9460_s21 + $0x90] sm:$0xff] }
 0xaee   :  { %5792 = vmatpush.msra.mxu0 %v5735_v33  ;;  %5849 = vmatpush.msra.mxu2 %v5768_v4  ;;  %v5764_v7 = vld [vmem:[%s9460_s21 + $0x110] sm:$0xff]  ;;  %v6045_v33 = vld [vmem:[%s9571_s25 + $0x78] sm:$0xff] }
 0xaef   :  { %5674 = vmatpush.msrb.mxu3 %v5581_v60  ;;  %5820 = vmatpush.msra.mxu1 %v5752_v50 }
 0xaf0   :  { %5793 = vmatpush.msra.mxu0 %v5734_v34  ;;  %5850 = vmatpush.msra.mxu2 %v5767_v38  ;;  %v6038_v38 = vld [vmem:[%s9571_s25 + $0x40] sm:$0xff] }
 0xaf1   :  { %5675 = vmatpush.msrb.mxu3 %v5580_v49  ;;  %5821 = vmatpush.msra.mxu1 %v5751_v15 }
 0xaf2   :  { %5794 = vmatpush.msra.mxu0 %v5733_v39  ;;  %5851 = vmatpush.msra.mxu2 %v5766_v1 }
 0xaf3   :  { %5676 = vmatpush.msrb.mxu3 %v5579_v12  ;;  %5822 = vmatpush.msra.mxu1 %v5750_v59  ;;  %v5730_v12 = vld [vmem:[%s9460_s21] sm:$0xff]  ;;  %v5781_v59 = vld [vmem:[%s9460_s21 + $0x198] sm:$0xff] }
 0xaf4   :  { %5795 = vmatpush.msra.mxu0 %v5732_v0  ;;  %v6042_v0 = vld [vmem:[%s9571_s25 + $0x60] sm:$0xff] }
 0xaf5   :  { %5677 = vmatpush.msrb.mxu3 %v5578_v54  ;;  %5823 = vmatpush.msra.mxu1 %v5749_v37  ;;  %v5780_v37 = vld [vmem:[%s9460_s21 + $0x190] sm:$0xff] }
 0xaf7   :  { %5678 = vmatpush.msrb.mxu3 %v5577_v3  ;;  %5824 = vmatpush.msra.mxu1 %v5748_v16 }
 0xaf9   :  { %5679 = vmatpush.msrb.mxu3 %v5576_v48  ;;  %5825 = vmatpush.msra.mxu1 %v5747_v29  ;;  %v6061_v29 = vld [vmem:[%s9571_s25 + $0xf8] sm:$0xff] }
 0xafb   :  { %5680 = vmatpush.msrb.mxu3 %v5575_v6 }
 0xafd   :  { %5881 = vmatpush.msra.mxu3 %v5781_v59  ;;  %v6050_v59 = vld [vmem:[%s9571_s25 + $0xa0] sm:$0xff] }
 0xaff   :  { %5882 = vmatpush.msra.mxu3 %v5780_v37  ;;  %v6072_v37 = vld [vmem:[%s9571_s25 + $0x150] sm:$0xff] }
 0xb49   :  { %v5401_v41 = vpop.f32.mrf.mxu0 }
 0xb4a   :  { %v9520_v63 = vperm.slane %v5401_v41, 0 }
 0xb4c   :  { %v5494_v52 = vmul.f32 %v9520_v63, %v9360_v24  ;;  %v5498_v27 = vmul.f32 %v9520_v63, %v9358_v61  ;;  %v5765_v61 = vld [vmem:[%s9460_s21 + $0x118] sm:$0xff]  ;;  %v5506_v39 = vmul.f32 %v9520_v63, %v9381_v58 }
 0xb4d   :  { %v5424_v45 = vpop.f32.mrf.mxu1  ;;  %5852 = vmatpush.msra.mxu2 %v5765_v61  ;;  %v6034_v61 = vld [vmem:[%s9571_s25 + $0x20] sm:$0xff] }
 0xb4e   :  { %v9528_v44 = vperm.slane %v5424_v45, 0 }
 0xb4f   :  { %v5341_v18 = vpop.f32.mrf.mxu3  ;;  %5853 = vmatpush.msra.mxu2 %v5764_v7 }
 0xb50   :  { %v9523_v62 = vperm.slane %v5341_v18, 0  ;;  %v6044_v18 = vld [vmem:[%s9571_s25 + $0x70] sm:$0xff] }
 0xb51   :  { %v5484_v20 = vpop.f32.mrf.mxu0  ;;  %5854 = vmatpush.msra.mxu2 %v5763_v13  ;;  %v6055_v13 = vld [vmem:[%s9571_s25 + $0xc8] sm:$0xff] }
 0xb52   :  { %v5491_v11 = vmul.f32 %v9523_v62, %v9238_v31  ;;  %v9535_v5 = vperm.slane %v5484_v20, 0  ;;  %v5731_v31 = vld [vmem:[%s9460_s21 + $0x8] sm:$0xff]  ;;  %v5495_v24 = vmul.f32 %v9523_v62, %v9235_v35  ;;  %v5746_v35 = vld [vmem:[%s9460_s21 + $0x80] sm:$0xff] }
 0xb53   :  { %v5444_v49 = vpop.f32.mrf.mxu2  ;;  %5796 = vmatpush.msra.mxu0 %v5731_v31  ;;  %5826 = vmatpush.msra.mxu1 %v5746_v35  ;;  %v6040_v31 = vld [vmem:[%s9571_s25 + $0x50] sm:$0xff]  ;;  %v6059_v35 = vld [vmem:[%s9571_s25 + $0xe8] sm:$0xff] }
 0xb54   :  { %v5511_v40 = vadd.f32 %v9528_v44, %v5491_v11  ;;  %v5514_v60 = vadd.f32 %v9535_v5, %v5494_v52  ;;  %v9561_v26 = vperm.slane %v5444_v49, 0  ;;  %v5515_v9 = vadd.f32 %v9528_v44, %v5495_v24  ;;  %5855 = vmatpush.msra.mxu2 %v5762_v57  ;;  %v5779_v11 = vld [vmem:[%s9460_s21 + $0x188] sm:$0xff]  ;;  %v6060_v49 = vld [vmem:[%s9571_s25 + $0xf0] sm:$0xff]  ;;  %v6077_v57 = vld [vmem:[%s9571_s25 + $0x178] sm:$0xff] }
 0xb55   :  { %v5518_v42 = vadd.f32 %v9535_v5, %v5498_v27  ;;  %5797 = vmatpush.msra.mxu0 %v5730_v12  ;;  %v5526_v16 = vadd.f32 %v9535_v5, %v5506_v39  ;;  %5883 = vmatpush.msra.mxu3 %v5779_v11  ;;  %v6037_v12 = vld [vmem:[%s9571_s25 + $0x38] sm:$0xff]  ;;  %v6047_v39 = vld [vmem:[%s9571_s25 + $0x88] sm:$0xff]  ;;  %v6046_v11 = vld [vmem:[%s9571_s25 + $0x80] sm:$0xff] }
 0xb56   :  { %v9545_v17 = vmax.f32 %v5511_v40, 0.0  ;;  %v9548_v46 = vmax.f32 %v5514_v60, 0.0  ;;  %v9580_v53 = vmax.f32 %v5515_v9, 0.0  ;;  %v5778_v40 = vld [vmem:[%s9460_s21 + $0x180] sm:$0xff] }
 0xb57   :  { %v5361_v10 = vpop.f32.mrf.mxu3  ;;  %v9583_v48 = vmax.f32 %v5518_v42, 0.0  ;;  %v9643_v24 = vmax.f32 %v5526_v16, 0.0  ;;  %5884 = vmatpush.msra.mxu3 %v5778_v40  ;;  %v6035_v42 = vld [vmem:[%s9571_s25 + $0x28] sm:$0xff]  ;;  %v6065_v40 = vld [vmem:[%s9571_s25 + $0x118] sm:$0xff] }
 0xb58   :  { %v9551_v28 = vperm.slane %v5361_v10, 0  ;;  %5623 = vmatmul.f32.vlgmr.msrb.gmra.mxu1 %v9545_v17  ;;  %6738 = vmatmul.msk.f32.vlgmr.msrb.gmra.mxu0 %vm5065_vm14, %v9548_v46  ;;  %v6067_v16 = vld [vmem:[%s9571_s25 + $0x128] sm:$0xff] }
 0xb5a   :  { %v5492_v54 = vmul.f32 %v9551_v28, %v9279_v56  ;;  %v5499_v56 = vmul.f32 %v9523_v62, %v9240_v25  ;;  %v5496_v41 = vmul.f32 %v9551_v28, %v9274_v47  ;;  %v5502_v25 = vmul.f32 %v9520_v63, %v9362_v55  ;;  %v6041_v63 = vld [vmem:[%s9571_s25 + $0x58] sm:$0xff] }
 0xb5b   :  { %v5503_v55 = vmul.f32 %v9523_v62, %v9255_v22  ;;  %v5500_v21 = vmul.f32 %v9551_v28, %v9281_v51  ;;  %v6043_v51 = vld [vmem:[%s9571_s25 + $0x68] sm:$0xff]  ;;  %v5504_v4 = vmul.f32 %v9551_v28, %v9297_v8 }
 0xb5c   :  { %v5512_v32 = vadd.f32 %v9561_v26, %v5492_v54  ;;  %v5519_v47 = vadd.f32 %v9528_v44, %v5499_v56  ;;  %v5516_v50 = vadd.f32 %v9561_v26, %v5496_v41  ;;  %v5522_v6 = vadd.f32 %v9535_v5, %v5502_v25  ;;  %v6058_v54 = vld [vmem:[%s9571_s25 + $0xe0] sm:$0xff]  ;;  %v6033_v56 = vld [vmem:[%s9571_s25 + $0x18] sm:$0xff]  ;;  %v6056_v41 = vld [vmem:[%s9571_s25 + $0xd0] sm:$0xff] }
 0xb5d   :  { %v5523_v14 = vadd.f32 %v9528_v44, %v5503_v55  ;;  %v5520_v52 = vadd.f32 %v9561_v26, %v5500_v21  ;;  %v5524_v10 = vadd.f32 %v9561_v26, %v5504_v4  ;;  %v6036_v26 = vld [vmem:[%s9571_s25 + $0x30] sm:$0xff]  ;;  %v6051_v21 = vld [vmem:[%s9571_s25 + $0xa8] sm:$0xff] }
 0xb5e   :  { %v9578_v3 = vmax.f32 %v5512_v32, 0.0  ;;  %v9603_v34 = vmax.f32 %v5519_v47, 0.0  ;;  %v9605_v45 = vmax.f32 %v5516_v50, 0.0  ;;  %v9609_v20 = vmax.f32 %v5522_v6, 0.0  ;;  %v6031_v47 = vld [vmem:[%s9571_s25 + $0x8] sm:$0xff]  ;;  %v6030_v50 = vld [vmem:[%s9571_s25] sm:$0xff] }
 0xb5f   :  { %v5381_v23 = vpop.f32.mrf.mxu3  ;;  %v9638_v5 = vmax.f32 %v5523_v14, 0.0  ;;  %v9640_v60 = vmax.f32 %v5520_v52, 0.0  ;;  %v9662_v1 = vmax.f32 %v5524_v10, 0.0  ;;  %v6076_v55 = vld [vmem:[%s9571_s25 + $0x170] sm:$0xff]  ;;  %v6070_v14 = vld [vmem:[%s9571_s25 + $0x140] sm:$0xff]  ;;  %v6069_v52 = vld [vmem:[%s9571_s25 + $0x138] sm:$0xff] }
 0xb60   :  { %5626 = vmatmul.f32.gmra.mxu1 %v9580_v53  ;;  %5652 = vmatmul.f32.vlgmr.msrb.gmra.mxu2 %v9578_v3  ;;  %v9597_v15 = vperm.slane %v5381_v23, 0  ;;  %v6032_v23 = vld [vmem:[%s9571_s25 + $0x10] sm:$0xff] }
 0xb61   :  { %6739 = vmatmul.msk.f32.gmra.mxu0 %vm5065_vm14, %v9583_v48  ;;  %6082 = vmatpush.msrb.mxu2 %v6045_v33  ;;  %v6053_v33 = vld [vmem:[%s9571_s25 + $0xb8] sm:$0xff]  ;;  %v6064_v4 = vld [vmem:[%s9571_s25 + $0x110] sm:$0xff] }
 0xb62   :  { %v5493_v22 = vmul.f32 %v9597_v15, %v9321_v30  ;;  %v5497_v44 = vmul.f32 %v9597_v15, %v9315_v36  ;;  %v6039_v36 = vld [vmem:[%s9571_s25 + $0x48] sm:$0xff]  ;;  %v5501_v27 = vmul.f32 %v9597_v15, %v9323_v43  ;;  %v6057_v43 = vld [vmem:[%s9571_s25 + $0xd8] sm:$0xff]  ;;  %v5505_v7 = vmul.f32 %v9597_v15, %v9344_v2  ;;  %v6054_v2 = vld [vmem:[%s9571_s25 + $0xc0] sm:$0xff] }
 0xb63   :  { %6083 = vmatpush.msrb.mxu2 %v6044_v18  ;;  %v6052_v15 = vld [vmem:[%s9571_s25 + $0xb0] sm:$0xff]  ;;  %v6075_v18 = vld [vmem:[%s9571_s25 + $0x168] sm:$0xff] }
 0xb64   :  { %v6304_v10 = vld [vmem:[%s9728_s29 + $0xf0] sm:$0xff] }
 0xb65   :  { %6084 = vmatpush.msrb.mxu2 %v6043_v51  ;;  %v6073_v51 = vld [vmem:[%s9571_s25 + $0x158] sm:$0xff] }
 0xb67   :  { %v5464_v19 = vpop.f32.mrf.mxu3  ;;  %6085 = vmatpush.msrb.mxu2 %v6042_v0  ;;  %v6068_v0 = vld [vmem:[%s9571_s25 + $0x130] sm:$0xff] }
 0xb68   :  { %v9613_v62 = vperm.slane %v5464_v19, 0  ;;  %5629 = vmatmul.f32.gmra.mxu1 %v9603_v34  ;;  %5655 = vmatmul.f32.gmra.mxu2 %v9605_v45  ;;  %v6074_v19 = vld [vmem:[%s9571_s25 + $0x160] sm:$0xff] }
 0xb69   :  { %6740 = vmatmul.msk.f32.gmra.mxu0 %vm5065_vm14, %v9609_v20  ;;  %6086 = vmatpush.msrb.mxu2 %v6041_v63  ;;  %v6066_v63 = vld [vmem:[%s9571_s25 + $0x120] sm:$0xff] }
 0xb6a   :  { %v5513_v30 = vadd.f32 %v9613_v62, %v5493_v22  ;;  %v5517_v8 = vadd.f32 %v9613_v62, %v5497_v44  ;;  %v5521_v9 = vadd.f32 %v9613_v62, %v5501_v27  ;;  %v5525_v25 = vadd.f32 %v9613_v62, %v5505_v7  ;;  %v6049_v22 = vld [vmem:[%s9571_s25 + $0x98] sm:$0xff]  ;;  %v6048_v62 = vld [vmem:[%s9571_s25 + $0x90] sm:$0xff]  ;;  %v6063_v44 = vld [vmem:[%s9571_s25 + $0x108] sm:$0xff] }
 0xb6b   :  { %6087 = vmatpush.msrb.mxu2 %v6040_v31  ;;  %v6062_v31 = vld [vmem:[%s9571_s25 + $0x100] sm:$0xff]  ;;  %v6321_v27 = vld [vmem:[%s9728_s29 + $0x178] sm:$0xff] }
 0xb6c   :  { %v9629_v58 = vmax.f32 %v5513_v30, 0.0  ;;  %v9655_v28 = vmax.f32 %v5517_v8, 0.0  ;;  %v9673_v32 = vmax.f32 %v5521_v9, 0.0  ;;  %v9690_v6 = vmax.f32 %v5525_v25, 0.0  ;;  %v6071_v30 = vld [vmem:[%s9571_s25 + $0x148] sm:$0xff]  ;;  %v6305_v8 = vld [vmem:[%s9728_s29 + $0xf8] sm:$0xff] }
 0xb6d   :  { %6088 = vmatpush.msrb.mxu2 %v6039_v36  ;;  %v6080_v36 = vld [vmem:[%s9571_s25 + $0x190] sm:$0xff]  ;;  %v6319_v9 = vld [vmem:[%s9728_s29 + $0x168] sm:$0xff]  ;;  %v6297_v7 = vld [vmem:[%s9728_s29 + $0xb8] sm:$0xff] }
 0xb6e   :  { %5681 = vmatmul.f32.vlgmr.msrb.gmra.mxu3 %v9629_v58  ;;  %v6315_v25 = vld [vmem:[%s9728_s29 + $0x148] sm:$0xff] }
 0xb6f   :  { %6111 = vmatpush.msrb.mxu3 %v6061_v29  ;;  %6089 = vmatpush.msrb.mxu2 %v6038_v38  ;;  %v6081_v29 = vld [vmem:[%s9571_s25 + $0x198] sm:$0xff]  ;;  %v6078_v38 = vld [vmem:[%s9571_s25 + $0x180] sm:$0xff] }
 0xb70   :  { %5632 = vmatmul.f32.gmra.mxu1 %v9638_v5  ;;  %5658 = vmatmul.f32.gmra.mxu2 %v9640_v60 }
 0xb71   :  { %6741 = vmatmul.msk.f32.gmra.mxu0 %vm5065_vm14, %v9643_v24  ;;  %6112 = vmatpush.msrb.mxu3 %v6060_v49  ;;  %v6079_v49 = vld [vmem:[%s9571_s25 + $0x188] sm:$0xff] }
 0xb72   :  { %6090 = vmatpush.msrb.mxu2 %v6037_v12  ;;  %v6303_v12 = vld [vmem:[%s9728_s29 + $0xe8] sm:$0xff] }
 0xb73   :  { %6113 = vmatpush.msrb.mxu3 %v6059_v35  ;;  %v6302_v35 = vld [vmem:[%s9728_s29 + $0xe0] sm:$0xff] }
 0xb74   :  { %6091 = vmatpush.msrb.mxu2 %v6036_v26  ;;  %v6301_v26 = vld [vmem:[%s9728_s29 + $0xd8] sm:$0xff] }
 0xb75   :  { %6114 = vmatpush.msrb.mxu3 %v6058_v54  ;;  %v6320_v54 = vld [vmem:[%s9728_s29 + $0x170] sm:$0xff] }
 0xb76   :  { %5684 = vmatmul.f32.gmra.mxu3 %v9655_v28  ;;  %6092 = vmatpush.msrb.mxu2 %v6035_v42  ;;  %v6300_v42 = vld [vmem:[%s9728_s29 + $0xd0] sm:$0xff] }
 0xb77   :  { %6115 = vmatpush.msrb.mxu3 %v6057_v43  ;;  %v6299_v43 = vld [vmem:[%s9728_s29 + $0xc8] sm:$0xff] }
 0xb78   :  { %5661 = vmatmul.f32.gmra.mxu2 %v9662_v1  ;;  %5827 = vmatmul.f32.vlgmr.msra.gmra.mxu1 %v9578_v3 }
 0xb79   :  { %5798 = vmatmul.f32.vlgmr.msra.gmra.mxu0 %v9545_v17  ;;  %6093 = vmatpush.msrb.mxu2 %v6034_v61  ;;  %v6298_v61 = vld [vmem:[%s9728_s29 + $0xc0] sm:$0xff] }
 0xb7a   :  { %6116 = vmatpush.msrb.mxu3 %v6056_v41  ;;  %v6317_v41 = vld [vmem:[%s9728_s29 + $0x158] sm:$0xff] }
 0xb7b   :  { %6094 = vmatpush.msrb.mxu2 %v6033_v56  ;;  %v6318_v56 = vld [vmem:[%s9728_s29 + $0x160] sm:$0xff] }
 0xb7c   :  { %6117 = vmatpush.msrb.mxu3 %v6055_v13  ;;  %v6296_v13 = vld [vmem:[%s9728_s29 + $0xb0] sm:$0xff] }
 0xb7d   :  { %6095 = vmatpush.msrb.mxu2 %v6032_v23  ;;  %v6316_v23 = vld [vmem:[%s9728_s29 + $0x150] sm:$0xff] }
 0xb7e   :  { %5687 = vmatmul.f32.gmra.mxu3 %v9673_v32 }
 0xb7f   :  { %6096 = vmatpush.msrb.mxu2 %v6031_v47  ;;  %6118 = vmatpush.msrb.mxu3 %v6054_v2  ;;  %v6295_v47 = vld [vmem:[%s9728_s29 + $0xa8] sm:$0xff]  ;;  %v6294_v2 = vld [vmem:[%s9728_s29 + $0xa0] sm:$0xff] }
 0xb80   :  { %5830 = vmatmul.f32.gmra.mxu1 %v9605_v45  ;;  %5856 = vmatmul.f32.vlgmr.msra.gmra.mxu2 %v9629_v58 }
 0xb81   :  { %5801 = vmatmul.f32.gmra.mxu0 %v9580_v53  ;;  %6097 = vmatpush.msrb.mxu2 %v6030_v50  ;;  %v6314_v50 = vld [vmem:[%s9728_s29 + $0x140] sm:$0xff] }
 0xb82   :  { %6119 = vmatpush.msrb.mxu3 %v6053_v33  ;;  %v6293_v33 = vld [vmem:[%s9728_s29 + $0x98] sm:$0xff] }
 0xb83   :  { %6140 = vmatpush.msra.mxu2 %v6077_v57  ;;  %v6313_v57 = vld [vmem:[%s9728_s29 + $0x138] sm:$0xff] }
 0xb84   :  { %6120 = vmatpush.msrb.mxu3 %v6052_v15  ;;  %v6312_v15 = vld [vmem:[%s9728_s29 + $0x130] sm:$0xff] }
 0xb85   :  { %6141 = vmatpush.msra.mxu2 %v6076_v55  ;;  %v6292_v55 = vld [vmem:[%s9728_s29 + $0x90] sm:$0xff] }
 0xb86   :  { %5690 = vmatmul.f32.gmra.mxu3 %v9690_v6 }
 0xb87   :  { %6121 = vmatpush.msrb.mxu3 %v6051_v21  ;;  %6142 = vmatpush.msra.mxu2 %v6075_v18  ;;  %v6291_v21 = vld [vmem:[%s9728_s29 + $0x88] sm:$0xff] }
 0xb88   :  { %5833 = vmatmul.f32.gmra.mxu1 %v9640_v60  ;;  %5859 = vmatmul.f32.gmra.mxu2 %v9655_v28  ;;  %v6311_v18 = vld [vmem:[%s9728_s29 + $0x128] sm:$0xff] }
 0xb89   :  { %5804 = vmatmul.f32.gmra.mxu0 %v9603_v34  ;;  %6122 = vmatpush.msrb.mxu3 %v6050_v59  ;;  %v6290_v59 = vld [vmem:[%s9728_s29 + $0x80] sm:$0xff] }
 0xb8a   :  { %6143 = vmatpush.msra.mxu2 %v6074_v19  ;;  %v6310_v19 = vld [vmem:[%s9728_s29 + $0x120] sm:$0xff] }
 0xb8b   :  { %6123 = vmatpush.msrb.mxu3 %v6049_v22  ;;  %v6309_v22 = vld [vmem:[%s9728_s29 + $0x118] sm:$0xff] }
 0xb8c   :  { %6144 = vmatpush.msra.mxu2 %v6073_v51  ;;  %v6307_v51 = vld [vmem:[%s9728_s29 + $0x108] sm:$0xff] }
 0xb8d   :  { %6124 = vmatpush.msrb.mxu3 %v6048_v62  ;;  %v6308_v62 = vld [vmem:[%s9728_s29 + $0x110] sm:$0xff] }
 0xb8e   :  { %6742 = vmatmul.msk.f32.vlgmr.msra.gmra.mxu3 %vm5065_vm14, %v9548_v46  ;;  %6145 = vmatpush.msra.mxu2 %v6072_v37 }
 0xb8f   :  { %6125 = vmatpush.msrb.mxu3 %v6047_v39  ;;  %v6306_v39 = vld [vmem:[%s9728_s29 + $0x100] sm:$0xff] }
 0xb90   :  { %5836 = vmatmul.f32.gmra.mxu1 %v9662_v1  ;;  %5862 = vmatmul.f32.gmra.mxu2 %v9673_v32 }
 0xb91   :  { %5807 = vmatmul.f32.gmra.mxu0 %v9638_v5  ;;  %6126 = vmatpush.msrb.mxu3 %v6046_v11 }
 0xb92   :  { %6146 = vmatpush.msra.mxu2 %v6071_v30 }
 0xb93   :  { %6181 = vmatpush.msra.mxu3 %v6081_v29 }
 0xb94   :  { %6147 = vmatpush.msra.mxu2 %v6070_v14 }
 0xb95   :  { %6182 = vmatpush.msra.mxu3 %v6080_v36 }
 0xb96   :  { %6743 = vmatmul.msk.f32.gmra.mxu3 %vm5065_vm14, %v9583_v48  ;;  %6148 = vmatpush.msra.mxu2 %v6069_v52 }
 0xb97   :  { %6183 = vmatpush.msra.mxu3 %v6079_v49 }
 0xb98   :  { %5865 = vmatmul.f32.gmra.mxu2 %v9690_v6 }
 0xb99   :  { %6149 = vmatpush.msra.mxu2 %v6068_v0  ;;  %6184 = vmatpush.msra.mxu3 %v6078_v38 }
 0xb9b   :  { %6150 = vmatpush.msra.mxu2 %v6067_v16 }
 0xb9d   :  { %6151 = vmatpush.msra.mxu2 %v6066_v63 }
 0xb9e   :  { %6744 = vmatmul.msk.f32.gmra.mxu3 %vm5065_vm14, %v9609_v20 }
 0xb9f   :  { %6152 = vmatpush.msra.mxu2 %v6065_v40 }
 0xba0   :  { %6098 = vmatmul.f32.vlgmr.msrb.gmra.mxu2 %v9545_v17 }
 0xba1   :  { %6153 = vmatpush.msra.mxu2 %v6064_v4 }
 0xba3   :  { %6154 = vmatpush.msra.mxu2 %v6063_v44 }
 0xba5   :  { %6155 = vmatpush.msra.mxu2 %v6062_v31 }
 0xba6   :  { %6745 = vmatmul.msk.f32.gmra.mxu3 %vm5065_vm14, %v9643_v24 }
 0xba7   :  { %6355 = vmatpush.msrb.mxu2 %v6305_v8 }
 0xba8   :  { %6101 = vmatmul.f32.gmra.mxu2 %v9580_v53 }
 0xba9   :  { %6356 = vmatpush.msrb.mxu2 %v6304_v10 }
 0xbab   :  { %6357 = vmatpush.msrb.mxu2 %v6303_v12 }
 0xbad   :  { %6358 = vmatpush.msrb.mxu2 %v6302_v35 }
 0xbae   :  { %6127 = vmatmul.f32.vlgmr.msrb.gmra.mxu3 %v9578_v3 }
 0xbaf   :  { %6384 = vmatpush.msrb.mxu3 %v6321_v27  ;;  %6359 = vmatpush.msrb.mxu2 %v6301_v26 }
 0xbb0   :  { %6104 = vmatmul.f32.gmra.mxu2 %v9603_v34 }
 0xbb1   :  { %6385 = vmatpush.msrb.mxu3 %v6320_v54  ;;  %6360 = vmatpush.msrb.mxu2 %v6300_v42 }
 0xbb3   :  { %6386 = vmatpush.msrb.mxu3 %v6319_v9  ;;  %6361 = vmatpush.msrb.mxu2 %v6299_v43 }
 0xbb5   :  { %6387 = vmatpush.msrb.mxu3 %v6318_v56  ;;  %6362 = vmatpush.msrb.mxu2 %v6298_v61  ;;  %v5723_v56 = vld [vmem:[%s9809_s3] sm:$0xff] }
 0xbb6   :  { %6130 = vmatmul.f32.gmra.mxu3 %v9605_v45 }
 0xbb7   :  { %6388 = vmatpush.msrb.mxu3 %v6317_v41  ;;  %6363 = vmatpush.msrb.mxu2 %v6297_v7  ;;  %v6289_v7 = vld [vmem:[%s9728_s29 + $0x78] sm:$0xff] }
 0xbb8   :  { %6107 = vmatmul.f32.gmra.mxu2 %v9638_v5 }
 0xbb9   :  { %6389 = vmatpush.msrb.mxu3 %v6316_v23  ;;  %6364 = vmatpush.msrb.mxu2 %v6296_v13  ;;  %v6288_v23 = vld [vmem:[%s9728_s29 + $0x70] sm:$0xff]  ;;  %v6287_v13 = vld [vmem:[%s9728_s29 + $0x68] sm:$0xff] }
 0xbbb   :  { %6390 = vmatpush.msrb.mxu3 %v6315_v25  ;;  %6365 = vmatpush.msrb.mxu2 %v6295_v47 }
 0xbbd   :  { %6391 = vmatpush.msrb.mxu3 %v6314_v50  ;;  %6366 = vmatpush.msrb.mxu2 %v6294_v2  ;;  %v6286_v50 = vld [vmem:[%s9728_s29 + $0x60] sm:$0xff] }
 0xbbe   :  { %6133 = vmatmul.f32.gmra.mxu3 %v9640_v60 }
 0xbbf   :  { %6392 = vmatpush.msrb.mxu3 %v6313_v57  ;;  %6367 = vmatpush.msrb.mxu2 %v6293_v33  ;;  %v5724_v57 = vld [vmem:[%s9809_s3 + $0x8] sm:$0xff] }
 0xbc0   :  { %6156 = vmatmul.f32.vlgmr.msra.gmra.mxu2 %v9629_v58 }
 0xbc1   :  { %6393 = vmatpush.msrb.mxu3 %v6312_v15  ;;  %6368 = vmatpush.msrb.mxu2 %v6292_v55  ;;  %v6285_v15 = vld [vmem:[%s9728_s29 + $0x58] sm:$0xff]  ;;  %v6284_v55 = vld [vmem:[%s9728_s29 + $0x50] sm:$0xff] }
 0xbc3   :  { %6394 = vmatpush.msrb.mxu3 %v6311_v18  ;;  %6369 = vmatpush.msrb.mxu2 %v6291_v21  ;;  %v6283_v21 = vld [vmem:[%s9728_s29 + $0x48] sm:$0xff] }
 0xbc5   :  { %6395 = vmatpush.msrb.mxu3 %v6310_v19  ;;  %6370 = vmatpush.msrb.mxu2 %v6290_v59  ;;  %v6282_v59 = vld [vmem:[%s9728_s29 + $0x40] sm:$0xff] }
 0xbc6   :  { %6136 = vmatmul.f32.gmra.mxu3 %v9662_v1 }
 0xbc7   :  { %6396 = vmatpush.msrb.mxu3 %v6309_v22  ;;  %v5725_v22 = vld [vmem:[%s9809_s3 + $0x10] sm:$0xff] }
 0xbc8   :  { %6159 = vmatmul.f32.gmra.mxu2 %v9655_v28 }
 0xbc9   :  { %6397 = vmatpush.msrb.mxu3 %v6308_v62 }
 0xbcb   :  { %6398 = vmatpush.msrb.mxu3 %v6307_v51 }
 0xbcd   :  { %6399 = vmatpush.msrb.mxu3 %v6306_v39  ;;  %v6281_v39 = vld [vmem:[%s9728_s29 + $0x38] sm:$0xff] }
 0xbce   :  { %6762 = vmatmul.msk.f32.vlgmr.msra.gmra.mxu3 %vm5065_vm14, %v9548_v46 }
 0xbd0   :  { %6162 = vmatmul.f32.gmra.mxu2 %v9673_v32 }
 0xbd5   :  { %v5624_v37 = vpop.f32.mrf.mxu1  ;;  %v5711_v11 = vpop.f32.mrf.mxu0 }
 0xbd6   :  { %6763 = vmatmul.msk.f32.gmra.mxu3 %vm5065_vm14, %v9583_v48 }
 0xbd8   :  { %6165 = vmatmul.f32.gmra.mxu2 %v9690_v6 }
 0xbdd   :  { %v5627_v14 = vpop.f32.mrf.mxu1 }
 0xbde   :  { %6764 = vmatmul.msk.f32.gmra.mxu3 %vm5065_vm14, %v9609_v20  ;;  %v5714_v52 = vpop.f32.mrf.mxu0 }
 0xbe0   :  { %6371 = vmatmul.f32.vlgmr.msrb.gmra.mxu2 %v9578_v3 }
 0xbe3   :  { %v5653_v30 = vpop.f32.mrf.mxu2 }
 0xbe4   :  { %v5654_v12 = vadd.f32 %v5653_v30, %v5624_v37  ;;  %v6280_v37 = vld [vmem:[%s9728_s29 + $0x30] sm:$0xff]  ;;  %v6279_v30 = vld [vmem:[%s9728_s29 + $0x28] sm:$0xff] }
 0xbe5   :  { %v5630_v16 = vpop.f32.mrf.mxu1 }
 0xbe6   :  { %6765 = vmatmul.msk.f32.gmra.mxu3 %vm5065_vm14, %v9643_v24  ;;  %v5717_v63 = vpop.f32.mrf.mxu0 }
 0xbe8   :  { %6374 = vmatmul.f32.gmra.mxu2 %v9605_v45 }
 0xbeb   :  { %v5656_v0 = vpop.f32.mrf.mxu2 }
 0xbec   :  { %v5657_v10 = vadd.f32 %v5656_v0, %v5627_v14 }
 0xbed   :  { %v5633_v44 = vpop.f32.mrf.mxu1 }
 0xbee   :  { %6400 = vmatmul.f32.vlgmr.msrb.gmra.mxu3 %v9629_v58  ;;  %v5720_v31 = vpop.f32.mrf.mxu0 }
 0xbf0   :  { %6377 = vmatmul.f32.gmra.mxu2 %v9640_v60 }
 0xbf1   :  { %v5682_v40 = vpop.f32.mrf.mxu3 }
 0xbf3   :  { %v5659_v4 = vpop.f32.mrf.mxu2 }
 0xbf4   :  { %v5660_v60 = vadd.f32 %v5659_v4, %v5630_v16  ;;  %v6278_v16 = vld [vmem:[%s9728_s29 + $0x20] sm:$0xff] }
 0xbf5   :  { %v9801_v58 = vpop.f32.mrf.mxu1 }
 0xbf6   :  { %6403 = vmatmul.f32.gmra.mxu3 %v9655_v28  ;;  %v9803_v36 = vpop.f32.mrf.mxu0 }
 0xbf8   :  { %6380 = vmatmul.f32.gmra.mxu2 %v9662_v1 }
 0xbf9   :  { %v5685_v3 = vpop.f32.mrf.mxu3 }
 0xbfa   :  { %v5686_v35 = vadd.f32 %v5685_v3, %v5657_v10  ;;  %v5726_v3 = vld [vmem:[%s9809_s3 + $0x18] sm:$0xff] }
 0xbfb   :  { %v5662_v29 = vpop.f32.mrf.mxu2 }
 0xbfc   :  { %v5663_v49 = vadd.f32 %v5662_v29, %v5633_v44  ;;  %v5715_v42 = vadd.f32 %v5714_v52, %v5686_v35  ;;  %v5829_v29 = vadd.f32 %v9801_v58, %v9803_v36  ;;  %v5898_v36 = vld [vmem:[%s9838_s7] sm:$0xff]  ;;  %v5899_v35 = vld [vmem:[%s9838_s7 + $0x8] sm:$0xff] }
 0xbfd   :  { %v5831_v26 = vpop.f32.mrf.mxu1 }
 0xbfe   :  { %6406 = vmatmul.f32.gmra.mxu3 %v9673_v32  ;;  %v5802_v9 = vpop.f32.mrf.mxu0 }
 0xc01   :  { %v5688_v45 = vpop.f32.mrf.mxu3 }
 0xc02   :  { %v5689_v1 = vadd.f32 %v5688_v45, %v5660_v60 }
 0xc03   :  { %v9799_v8 = vpop.f32.mrf.mxu2 }
 0xc04   :  { %v5718_v54 = vadd.f32 %v5717_v63, %v5689_v1  ;;  %v5832_v63 = vadd.f32 %v5831_v26, %v5802_v9  ;;  %v6275_v1 = vld [vmem:[%s9728_s29 + $0x8] sm:$0xff] }
 0xc05   :  { %v5834_v25 = vpop.f32.mrf.mxu1 }
 0xc06   :  { %6409 = vmatmul.f32.gmra.mxu3 %v9690_v6  ;;  %v5683_v6 = vadd.f32 %v5682_v40, %v5654_v12  ;;  %v5805_v47 = vpop.f32.mrf.mxu0  ;;  %v5727_v12 = vld [vmem:[%s9809_s3 + $0x20] sm:$0xff] }
 0xc07   :  { %v5835_v14 = vadd.f32 %v5834_v25, %v5805_v47  ;;  %v5902_v25 = vld [vmem:[%s9838_s7 + $0x20] sm:$0xff] }
 0xc08   :  { %v5712_v61 = vadd.f32 %v5711_v11, %v5683_v6  ;;  %v5728_v6 = vld [vmem:[%s9809_s3 + $0x28] sm:$0xff] }
 0xc09   :  { %v5691_v28 = vpop.f32.mrf.mxu3 }
 0xc0a   :  { %v5692_v38 = vadd.f32 %v5691_v28, %v5663_v49  ;;  %v6276_v49 = vld [vmem:[%s9728_s29 + $0x10] sm:$0xff]  ;;  %v5858_v28 = vadd.f32 %v9799_v8, %v5829_v29 }
 0xc0b   :  { %v9811_v32 = vpop.f32.mrf.mxu2 }
 0xc0c   :  { %v5721_v27 = vadd.f32 %v5720_v31, %v5692_v38  ;;  %v6277_v31 = vld [vmem:[%s9728_s29 + $0x18] sm:$0xff]  ;;  %v5861_v45 = vadd.f32 %v9811_v32, %v5832_v63  ;;  %v6274_v32 = vld [vmem:[%s9728_s29] sm:$0xff] }
 0xc0d   :  { %v5837_v19 = vpop.f32.mrf.mxu1 }
 0xc0e   :  { %6754 = vmatpush.msk.msrb.mxu1 %vm185_vm0, %v5721_v27  ;;  %v5808_v62 = vpop.f32.mrf.mxu0 }
 0xc0f   :  { %v5838_v11 = vadd.f32 %v5837_v19, %v5808_v62 }
 0xc10   :  { %6005 = vmatpush.msrb.mxu1 %v5718_v54  ;;  %v5900_v54 = vld [vmem:[%s9838_s7 + $0x10] sm:$0xff] }
 0xc11   :  { %v9814_v43 = vpop.f32.mrf.mxu3 }
 0xc12   :  { %6006 = vmatpush.msrb.mxu1 %v5715_v42  ;;  %v5887_v58 = vadd.f32 %v9814_v43, %v5858_v28  ;;  %v5729_v42 = vld [vmem:[%s9809_s3 + $0x30] sm:$0xff]  ;;  %v6325_v43 = vld [vmem:[%s9728_s29 + $0x198] sm:$0xff] }
 0xc13   :  { %v5863_v41 = vpop.f32.mrf.mxu2 }
 0xc14   :  { %6007 = vmatpush.msrb.mxu1 %v5712_v61  ;;  %v5864_v40 = vadd.f32 %v5863_v41, %v5835_v14  ;;  %v6324_v61 = vld [vmem:[%s9728_s29 + $0x190] sm:$0xff]  ;;  %v5901_v41 = vld [vmem:[%s9838_s7 + $0x18] sm:$0xff]  ;;  %v6198_v14 = vld [vmem:[%s9886_s11] sm:$0xff] }
 0xc15   :  { %6755 = vmatmul.msk.f32.vlgmr.msrb.gmra.mxu1 %vm5905_vm4, %v5723_v56 }
 0xc16   :  { %6326 = vmatpush.msra.mxu1 %v6289_v7 }
 0xc18   :  { %6327 = vmatpush.msra.mxu1 %v6288_v23  ;;  %v6323_v23 = vld [vmem:[%s9728_s29 + $0x188] sm:$0xff] }
 0xc19   :  { %v5889_v2 = vpop.f32.mrf.mxu3 }
 0xc1a   :  { %6328 = vmatpush.msra.mxu1 %v6287_v13  ;;  %v5890_v10 = vadd.f32 %v5889_v2, %v5861_v45  ;;  %v6322_v13 = vld [vmem:[%s9728_s29 + $0x180] sm:$0xff] }
 0xc1b   :  { %v5866_v33 = vpop.f32.mrf.mxu2 }
 0xc1c   :  { %6329 = vmatpush.msra.mxu1 %v6286_v50  ;;  %v5867_v52 = vadd.f32 %v5866_v33, %v5838_v11  ;;  %v5903_v50 = vld [vmem:[%s9838_s7 + $0x28] sm:$0xff] }
 0xc1d   :  { %6756 = vmatmul.msk.f32.gmra.mxu1 %vm5905_vm4, %v5724_v57 }
 0xc1e   :  { %6330 = vmatpush.msra.mxu1 %v6285_v15  ;;  %v5904_v15 = vld [vmem:[%s9838_s7 + $0x30] sm:$0xff] }
 0xc20   :  { %6331 = vmatpush.msra.mxu1 %v6284_v55 }
 0xc21   :  { %v5892_v18 = vpop.f32.mrf.mxu3 }
 0xc22   :  { %6332 = vmatpush.msra.mxu1 %v6283_v21  ;;  %v5893_v60 = vadd.f32 %v5892_v18, %v5864_v40  ;;  %v6204_v40 = vld [vmem:[%s9886_s11 + $0x30] sm:$0xff] }
 0xc23   :  { %v9829_v51 = vpop.f32.mrf.mxu2 }
 0xc24   :  { %6333 = vmatpush.msra.mxu1 %v6282_v59 }
 0xc25   :  { %6757 = vmatmul.msk.f32.gmra.mxu1 %vm5905_vm4, %v5725_v22 }
 0xc26   :  { %6334 = vmatpush.msra.mxu1 %v6281_v39 }
 0xc28   :  { %6335 = vmatpush.msra.mxu1 %v6280_v37 }
 0xc29   :  { %v5895_v0 = vpop.f32.mrf.mxu3 }
 0xc2a   :  { %v5896_v4 = vadd.f32 %v5895_v0, %v5867_v52  ;;  %6336 = vmatpush.msra.mxu1 %v6279_v30  ;;  %v6201_v52 = vld [vmem:[%s9886_s11 + $0x18] sm:$0xff]  ;;  %v6202_v0 = vld [vmem:[%s9886_s11 + $0x20] sm:$0xff] }
 0xc2b   :  { %v9842_v44 = vpop.f32.mrf.mxu2 }
 0xc2c   :  { %6746 = vmatpush.msk.msrb.mxu0 %vm185_vm0, %v5896_v4  ;;  %6337 = vmatpush.msra.mxu1 %v6278_v16 }
 0xc2d   :  { %6758 = vmatmul.msk.f32.gmra.mxu1 %vm5905_vm4, %v5726_v3 }
 0xc2e   :  { %5943 = vmatpush.msrb.mxu0 %v5893_v60  ;;  %6338 = vmatpush.msra.mxu1 %v6277_v31 }
 0xc30   :  { %5944 = vmatpush.msrb.mxu0 %v5890_v10  ;;  %6339 = vmatpush.msra.mxu1 %v6276_v49 }
 0xc31   :  { %v6128_v38 = vpop.f32.mrf.mxu3 }
 0xc32   :  { %5945 = vmatpush.msrb.mxu0 %v5887_v58  ;;  %6340 = vmatpush.msra.mxu1 %v6275_v1  ;;  %v6129_v62 = vadd.f32 %v6128_v38, %v9829_v51  ;;  %v6199_v51 = vld [vmem:[%s9886_s11 + $0x8] sm:$0xff] }
 0xc33   :  { %6747 = vmatmul.msk.f32.vlgmr.msrb.gmra.mxu0 %vm5905_vm4, %v5898_v36  ;;  %v6105_v8 = vpop.f32.mrf.mxu2 }
 0xc34   :  { %6341 = vmatpush.msra.mxu1 %v6274_v32 }
 0xc35   :  { %6759 = vmatmul.msk.f32.gmra.mxu1 %vm5905_vm4, %v5727_v12 }
 0xc36   :  { %6425 = vmatpush.msrb.mxu1 %v6325_v43 }
 0xc38   :  { %6426 = vmatpush.msrb.mxu1 %v6324_v61 }
 0xc39   :  { %v6131_v27 = vpop.f32.mrf.mxu3 }
 0xc3a   :  { %6427 = vmatpush.msrb.mxu1 %v6323_v23 }
 0xc3b   :  { %6748 = vmatmul.msk.f32.gmra.mxu0 %vm5905_vm4, %v5899_v35  ;;  %v6108_v26 = vpop.f32.mrf.mxu2 }
 0xc3c   :  { %6428 = vmatpush.msrb.mxu1 %v6322_v13 }
 0xc3d   :  { %6760 = vmatmul.msk.f32.gmra.mxu1 %vm5905_vm4, %v5728_v6 }
 0xc41   :  { %v6134_v9 = vpop.f32.mrf.mxu3 }
 0xc42   :  { %v6135_v18 = vadd.f32 %v6134_v9, %v6105_v8 }
 0xc43   :  { %6749 = vmatmul.msk.f32.gmra.mxu0 %vm5905_vm4, %v5900_v54  ;;  %v6157_v56 = vpop.f32.mrf.mxu2 }
 0xc44   :  { %v6158_v37 = vadd.f32 %v6157_v56, %v6129_v62  ;;  %v6444_v62 = vld [vmem:[%s6587_s19 + $0x10] sm:$0xff] }
 0xc45   :  { %6761 = vmatmul.msk.f32.gmra.mxu1 %vm5905_vm4, %v5729_v42 }
 0xc49   :  { %v6137_v7 = vpop.f32.mrf.mxu3 }
 0xc4a   :  { %v6138_v21 = vadd.f32 %v6137_v7, %v6108_v26 }
 0xc4b   :  { %6750 = vmatmul.msk.f32.gmra.mxu0 %vm5905_vm4, %v5901_v41  ;;  %v6160_v47 = vpop.f32.mrf.mxu2 }
 0xc4d   :  { %6342 = vmatmul.f32.vlgmr.msra.gmra.mxu1 %v9545_v17 }
 0xc51   :  { %v6186_v2 = vpop.f32.mrf.mxu3 }
 0xc52   :  { %v6187_v30 = vadd.f32 %v6186_v2, %v6158_v37  ;;  %v6447_v37 = vld [vmem:[%s6587_s19 + $0x28] sm:$0xff] }
 0xc53   :  { %6751 = vmatmul.msk.f32.gmra.mxu0 %vm5905_vm4, %v5902_v25  ;;  %v6163_v33 = vpop.f32.mrf.mxu2 }
 0xc54   :  { %v6164_v19 = vadd.f32 %v6163_v33, %v6135_v18 }
 0xc55   :  { %6345 = vmatmul.f32.gmra.mxu1 %v9580_v53 }
 0xc59   :  { %v6189_v57 = vpop.f32.mrf.mxu3 }
 0xc5b   :  { %6752 = vmatmul.msk.f32.gmra.mxu0 %vm5905_vm4, %v5903_v50  ;;  %v6166_v17 = vpop.f32.mrf.mxu2 }
 0xc5c   :  { %v6167_v59 = vadd.f32 %v6166_v17, %v6138_v21 }
 0xc5d   :  { %6348 = vmatmul.f32.gmra.mxu1 %v9603_v34  ;;  %v6132_v34 = vadd.f32 %v6131_v27, %v9842_v44 }
 0xc5f   :  { %v6161_v39 = vadd.f32 %v6160_v47, %v6132_v34 }
 0xc61   :  { %v6192_v55 = vpop.f32.mrf.mxu3  ;;  %v6190_v11 = vadd.f32 %v6189_v57, %v6161_v39  ;;  %v6445_v39 = vld [vmem:[%s6587_s19 + $0x18] sm:$0xff] }
 0xc63   :  { %6753 = vmatmul.msk.f32.gmra.mxu0 %vm5905_vm4, %v5904_v15  ;;  %v6372_v27 = vpop.f32.mrf.mxu2 }
 0xc65   :  { %6351 = vmatmul.f32.gmra.mxu1 %v9638_v5  ;;  %v6193_v5 = vadd.f32 %v6192_v55, %v6164_v19  ;;  %v6442_v19 = vld [vmem:[%s6587_s19] sm:$0xff] }
 0xc69   :  { %v6195_v53 = vpop.f32.mrf.mxu3 }
 0xc6a   :  { %v6196_v22 = vadd.f32 %v6195_v53, %v6167_v59 }
 0xc6b   :  { %v6375_v42 = vpop.f32.mrf.mxu2 }
 0xc6c   :  { %6766 = vmatpush.msk.msra.mxu0 %vm185_vm0, %v6196_v22  ;;  %v6443_v22 = vld [vmem:[%s6587_s19 + $0x8] sm:$0xff] }
 0xc6d   :  { %6774 = vmatmul.msk.f32.vlgmr.msrb.gmra.mxu1 %vm5065_vm14, %v9548_v46  ;;  %v6200_v46 = vld [vmem:[%s9886_s11 + $0x10] sm:$0xff] }
 0xc6e   :  { %6242 = vmatpush.msra.mxu0 %v6193_v5  ;;  %v6446_v5 = vld [vmem:[%s6587_s19 + $0x20] sm:$0xff] }
 0xc70   :  { %6243 = vmatpush.msra.mxu0 %v6190_v11  ;;  %v6448_v11 = vld [vmem:[%s6587_s19 + $0x30] sm:$0xff] }
 0xc71   :  { %v6401_v54 = vpop.f32.mrf.mxu3 }
 0xc72   :  { %6244 = vmatpush.msra.mxu0 %v6187_v30 }
 0xc73   :  { %6767 = vmatmul.msk.f32.vlgmr.msra.gmra.mxu0 %vm5905_vm4, %v6198_v14  ;;  %v6378_v56 = vpop.f32.mrf.mxu2 }
 0xc75   :  { %6775 = vmatmul.msk.f32.gmra.mxu1 %vm5065_vm14, %v9583_v48  ;;  %v6203_v48 = vld [vmem:[%s9886_s11 + $0x28] sm:$0xff] }
 0xc79   :  { %v6404_v61 = vpop.f32.mrf.mxu3 }
 0xc7b   :  { %6768 = vmatmul.msk.f32.gmra.mxu0 %vm5905_vm4, %v6199_v51  ;;  %v6381_v13 = vpop.f32.mrf.mxu2 }
 0xc7d   :  { %6776 = vmatmul.msk.f32.gmra.mxu1 %vm5065_vm14, %v9609_v20 }
 0xc81   :  { %v6407_v7 = vpop.f32.mrf.mxu3 }
 0xc83   :  { %6769 = vmatmul.msk.f32.gmra.mxu0 %vm5905_vm4, %v6200_v46 }
 0xc85   :  { %6777 = vmatmul.msk.f32.gmra.mxu1 %vm5065_vm14, %v9643_v24 }
 0xc89   :  { %v6410_v2 = vpop.f32.mrf.mxu3 }
 0xc8b   :  { %6770 = vmatmul.msk.f32.gmra.mxu0 %vm5905_vm4, %v6201_v52 }
 0xc92   :  { %v6009_v16 = vpop.f32.mrf.mxu1 }
 0xc93   :  { %6771 = vmatmul.msk.f32.gmra.mxu0 %vm5905_vm4, %v6202_v0 }
 0xc9a   :  { %v6012_v63 = vpop.f32.mrf.mxu1 }
 0xc9b   :  { %6772 = vmatmul.msk.f32.gmra.mxu0 %vm5905_vm4, %v6203_v48 }
 0xca2   :  { %v6015_v4 = vpop.f32.mrf.mxu1 }
 0xca3   :  { %6773 = vmatmul.msk.f32.gmra.mxu0 %vm5905_vm4, %v6204_v40 }
 0xcaa   :  { %v6018_v20 = vpop.f32.mrf.mxu1 }
 0xcb0   :  { %v5947_v3 = vpop.f32.mrf.mxu0 }
 0xcb1   :  { %v9913_v44 = vadd.f32 %v6009_v16, %v5947_v3 }
 0xcb2   :  { %v6021_v24 = vpop.f32.mrf.mxu1 }
 0xcb8   :  { %v5950_v31 = vpop.f32.mrf.mxu0 }
 0xcb9   :  { %v9915_v29 = vadd.f32 %v6012_v63, %v5950_v31  ;;  %v6828_v63 = vld [vmem:[%s9920_s15] ss:$0 sm:$0xff] }
 0xcba   :  { %v6024_v45 = vpop.f32.mrf.mxu1 }
 0xcc0   :  { %v5953_v60 = vpop.f32.mrf.mxu0 }
 0xcc1   :  { %v9922_v49 = vadd.f32 %v6015_v4, %v5953_v60 }
 0xcc2   :  { %v6027_v28 = vpop.f32.mrf.mxu1 }
 0xcc8   :  { %v5956_v10 = vpop.f32.mrf.mxu0 }
 0xcc9   :  { %v9924_v1 = vadd.f32 %v6018_v20, %v5956_v10 }
 0xcca   :  { %v6343_v58 = vpop.f32.mrf.mxu1 }
 0xccb   :  { %v6373_v15 = vadd.f32 %v6372_v27, %v6343_v58 }
 0xccd   :  { %v6402_v59 = vadd.f32 %v6401_v54, %v6373_v15 }
 0xcd0   :  { %v5959_v36 = vpop.f32.mrf.mxu0 }
 0xcd1   :  { %v9926_v38 = vadd.f32 %v6021_v24, %v5959_v36 }
 0xcd2   :  { %v6346_v32 = vpop.f32.mrf.mxu1 }
 0xcd3   :  { %v6376_v50 = vadd.f32 %v6375_v42, %v6346_v32 }
 0xcd5   :  { %v6405_v21 = vadd.f32 %v6404_v61, %v6376_v50 }
 0xcd8   :  { %v5962_v12 = vpop.f32.mrf.mxu0 }
 0xcd9   :  { %v9928_v8 = vadd.f32 %v6024_v45, %v5962_v12 }
 0xcda   :  { %v6349_v35 = vpop.f32.mrf.mxu1 }
 0xcdb   :  { %v6379_v47 = vadd.f32 %v6378_v56, %v6349_v35 }
 0xcdd   :  { %v6408_v55 = vadd.f32 %v6407_v7, %v6379_v47 }
 0xce0   :  { %v5965_v6 = vpop.f32.mrf.mxu0 }
 0xce1   :  { %v9930_v26 = vadd.f32 %v6027_v28, %v5965_v6 }
 0xce2   :  { %v6352_v9 = vpop.f32.mrf.mxu1 }
 0xce3   :  { %v6382_v25 = vadd.f32 %v6381_v13, %v6352_v9 }
 0xce5   :  { %v6411_v57 = vadd.f32 %v6410_v2, %v6382_v25 }
 0xcea   :  { %v6430_v43 = vpop.f32.mrf.mxu1 }
 0xceb   :  { %v6431_v34 = vadd.f32 %v6430_v43, %v6402_v59 }
 0xcf0   :  { %v6246_v30 = vpop.f32.mrf.mxu0 }
 0xcf1   :  { %v6267_v48 = vadd.f32 %v6246_v30, %v9913_v44 }
 0xcf2   :  { %v6433_v41 = vpop.f32.mrf.mxu1 }
 0xcf3   :  { %v6434_v53 = vadd.f32 %v6433_v41, %v6405_v21 }
 0xcf8   :  { %v6249_v14 = vpop.f32.mrf.mxu0 }
 0xcf9   :  { %v6268_v3 = vadd.f32 %v6249_v14, %v9915_v29 }
 0xcfa   :  { %v6436_v23 = vpop.f32.mrf.mxu1 }
 0xcfb   :  { %v6437_v18 = vadd.f32 %v6436_v23, %v6408_v55 }
 0xd00   :  { %v6252_v51 = vpop.f32.mrf.mxu0 }
 0xd01   :  { %v6269_v60 = vadd.f32 %v6252_v51, %v9922_v49 }
 0xd02   :  { %v6439_v33 = vpop.f32.mrf.mxu1 }
 0xd03   :  { %v6440_v17 = vadd.f32 %v6439_v33, %v6411_v57 }
 0xd05   :  { %6778 = vmatpush.msk.msrb.mxu0 %vm185_vm0, %v6440_v17  ;;  %vm6536_vm0 = vcmask 228352  }
 0xd07   :  { %6486 = vmatpush.msrb.mxu0 %v6437_v18 }
 0xd08   :  { %v6255_v46 = vpop.f32.mrf.mxu0 }
 0xd09   :  { %6487 = vmatpush.msrb.mxu0 %v6434_v53  ;;  %v6270_v29 = vadd.f32 %v6255_v46, %v9924_v1 }
 0xd0b   :  { %6488 = vmatpush.msrb.mxu0 %v6431_v34 }
 0xd0c   :  { %6779 = vmatmul.msk.f32.vlgmr.msrb.gmra.mxu0 %vm5905_vm4, %v6442_v19 }
 0xd10   :  { %v6258_v52 = vpop.f32.mrf.mxu0 }
 0xd11   :  { %v6271_v49 = vadd.f32 %v6258_v52, %v9926_v38 }
 0xd14   :  { %6780 = vmatmul.msk.f32.gmra.mxu0 %vm5905_vm4, %v6443_v22 }
 0xd18   :  { %v6261_v0 = vpop.f32.mrf.mxu0 }
 0xd19   :  { %v6272_v1 = vadd.f32 %v6261_v0, %v9928_v8 }
 0xd1c   :  { %6781 = vmatmul.msk.f32.gmra.mxu0 %vm5905_vm4, %v6444_v62 }
 0xd20   :  { %v6264_v16 = vpop.f32.mrf.mxu0 }
 0xd21   :  { %v6273_v38 = vadd.f32 %v6264_v16, %v9930_v26 }
 0xd24   :  { %6782 = vmatmul.msk.f32.gmra.mxu0 %vm5905_vm4, %v6445_v39 }
 0xd2c   :  { %6783 = vmatmul.msk.f32.gmra.mxu0 %vm5905_vm4, %v6446_v5 }
 0xd34   :  { %6784 = vmatmul.msk.f32.gmra.mxu0 %vm5905_vm4, %v6447_v37 }
 0xd3c   :  { %6785 = vmatmul.msk.f32.gmra.mxu0 %vm5905_vm4, %v6448_v11 }
 0xd89   :  { %v6490_v40 = vpop.f32.mrf.mxu0 }
 0xd8a   :  { %v6511_v4 = vadd.f32 %v6490_v40, %v6267_v48 }
 0xd8c   :  { %v6522_v20 = vadd.f32 %v6828_v63, %v6511_v4 }
 0xd8e   :  { %6835 = vtanh.f32 %v6522_v20 }
 0xd91   :  { %v6493_v24 = vpop.f32.mrf.mxu0 }
 0xd92   :  { %v6512_v31 = vadd.f32 %v6493_v24, %v6268_v3 }
 0xd94   :  { %v6836_v45 = vpop.eup %6835  ;;  %v6523_v44 = vadd.f32 %v6828_v63, %v6512_v31 }
 0xd95   :  { %6537 = vst.msk [vmem:[%s9948_s23] sm:$0xff] %vm6536_vm0, %v6836_v45 }
 0xd96   :  { %6837 = vtanh.f32 %v6523_v44 }
 0xd99   :  { %v6496_v28 = vpop.f32.mrf.mxu0 }
 0xd9a   :  { %v6513_v10 = vadd.f32 %v6496_v28, %v6269_v60 }
 0xd9c   :  { %v6838_v58 = vpop.eup %6837  ;;  %v6524_v36 = vadd.f32 %v6828_v63, %v6513_v10 }
 0xd9d   :  { %6538 = vst.msk [vmem:[%s9948_s23 + $0x8] sm:$0xff] %vm6536_vm0, %v6838_v58 }
 0xd9e   :  { %6839 = vtanh.f32 %v6524_v36 }
 0xda1   :  { %v6499_v32 = vpop.f32.mrf.mxu0 }
 0xda2   :  { %v6514_v12 = vadd.f32 %v6499_v32, %v6270_v29 }
 0xda4   :  { %v6840_v35 = vpop.eup %6839  ;;  %v6525_v27 = vadd.f32 %v6828_v63, %v6514_v12 }
 0xda5   :  { %6539 = vst.msk [vmem:[%s9948_s23 + $0x10] sm:$0xff] %vm6536_vm0, %v6840_v35 }
 0xda6   :  { %6841 = vtanh.f32 %v6525_v27 }
 0xda9   :  { %v6502_v6 = vpop.f32.mrf.mxu0 }
 0xdaa   :  { %v6515_v54 = vadd.f32 %v6502_v6, %v6271_v49 }
 0xdac   :  { %v6842_v9 = vpop.eup %6841  ;;  %v6526_v42 = vadd.f32 %v6828_v63, %v6515_v54 }
 0xdad   :  { %6540 = vst.msk [vmem:[%s9948_s23 + $0x18] sm:$0xff] %vm6536_vm0, %v6842_v9 }
 0xdae   :  { %6843 = vtanh.f32 %v6526_v42 }
 0xdb1   :  { %v6505_v43 = vpop.f32.mrf.mxu0 }
 0xdb2   :  { %v6516_v61 = vadd.f32 %v6505_v43, %v6272_v1 }
 0xdb4   :  { %v6844_v56 = vpop.eup %6843  ;;  %v6527_v41 = vadd.f32 %v6828_v63, %v6516_v61 }
 0xdb5   :  { %6541 = vst.msk [vmem:[%s9948_s23 + $0x20] sm:$0xff] %vm6536_vm0, %v6844_v56 }
 0xdb6   :  { %6845 = vtanh.f32 %v6527_v41 }
 0xdb9   :  { %v6508_v7 = vpop.f32.mrf.mxu0 }
 0xdba   :  { %v6517_v23 = vadd.f32 %v6508_v7, %v6273_v38 }
 0xdbc   :  { %v6846_v13 = vpop.eup %6845  ;;  %v6528_v25 = vadd.f32 %v6828_v63, %v6517_v23 }
 0xdbd   :  { %6542 = vst.msk [vmem:[%s9948_s23 + $0x28] sm:$0xff] %vm6536_vm0, %v6846_v13 }
 0xdbe   :  { %6847 = vtanh.f32 %v6528_v25 }
 0xdc4   :  { %v6848_v47 = vpop.eup %6847 }
 0xdc5   :  { %6543 = vst.msk [vmem:[%s9948_s23 + $0x30] sm:$0xff] %vm6536_vm0, %v6848_v47 }

</bundles_post_ra>
